<compile_context>
chip_gen: v7x
topology: tpu7x:2x2x1
jax: 0.10.0
libtpu: 0.0.40
codegen_flags: <defaults>
</compile_context>

<pallas_src>
import numpy as np
import jax
import jax.numpy as jnp
from jax import lax
from jax.experimental import pallas as pl
from jax.experimental.pallas import tpu as pltpu

# ----------------------------- hyper-parameters ------------------------------
B = 2            # batch size
N = 16           # number of nodes (dim with kernel size 1 in every conv)
K = 4            # args.top_k_neighbors
TX = 8           # args.seq_length_x (input sequence length)
TY = 8           # args.seq_length_y (== TX so all branches end at T == 1)
INC = 32         # increase_dimension_hidden_size
F1N_MID = 48     # hidden of the 1n branch
FOUT = 64        # inception_out_feature_size
OUT_CH = 12      # final Conv3d(64, 12, ...)
OUT_PAD = 128    # lane-dense output width (OUT_CH padded with zero channels)
WPAD = 128       # lane width of the packed weight slab
VROWS = 16       # rows of the packed bias / vector table

POOL_NEIGHBORS = [2, 2]   # args.pooling_neighbors_list (prod == K)
POOL_SEQ = [2, 4]         # args.pooling_seq_list      (prod == TX)

# TODO(synk): Caculate_parameters_conv solves a cvxpy/CPLEX integer program and
# shuffles the result; replaced by a fixed feasible bag list satisfying
# sum(dila1*(ker1-1)) == K-1 and sum(dila2*(ker2-1)) == TX-1
# (max kernel 3, max dilation 2) -- hyperparameter selection, not forward math.
CONV_BAGS = [
    (2, 3, 1, 2),   # reduces (K, T) by (1, 4)
    (2, 3, 1, 1),   # reduces (K, T) by (1, 2)
    (2, 2, 1, 1),   # reduces (K, T) by (1, 1)
]

BN_EPS = 1e-5


# ------------------------------ parameter init -------------------------------
def init_raw_params(key):
    ki = iter(jax.random.split(key, 64))

    def nrm(shape, scale=0.1):
        return scale * jax.random.normal(next(ki), shape, dtype=jnp.float32)

    def bn(c):
        gamma = 1.0 + 0.1 * jax.random.normal(next(ki), (c,), dtype=jnp.float32)
        beta = 0.1 * jax.random.normal(next(ki), (c,), dtype=jnp.float32)
        mean = 0.1 * jax.random.normal(next(ki), (c,), dtype=jnp.float32)
        var = 0.5 + jax.random.uniform(next(ki), (c,), dtype=jnp.float32)
        return (gamma, beta, mean, var)

    raw = {}
    # increase_dimension_net : Conv3d(1, 32, (1,1,1))
    raw["w_inc"] = nrm((INC, 1, 1, 1, 1))
    raw["b_inc"] = nrm((INC,))
    # spatial_temporal_net_1n
    raw["bn_1n"] = bn(INC)
    raw["w1_1n"] = nrm((F1N_MID, INC, 1, K, 1))
    raw["b1_1n"] = nrm((F1N_MID,))
    raw["w2_1n"] = nrm((FOUT, F1N_MID, 1, 1, TY))
    raw["b2_1n"] = nrm((FOUT,))
    # spatial_temporal_net_pooling
    raw["bn_p"], raw["w_p"], raw["b_p"] = [], [], []
    for idx in range(len(POOL_NEIGHBORS)):
        cin = INC if idx == 0 else FOUT
        raw["bn_p"].append(bn(cin))
        raw["w_p"].append(nrm((FOUT, cin, 1, 1, 1)))
        raw["b_p"].append(nrm((FOUT,)))
    # spatial_temporal_net_nn
    raw["bn_n"], raw["w_n"], raw["b_n"] = [], [], []
    for idx, (k1, k2, _d1, _d2) in enumerate(CONV_BAGS):
        cin = INC if idx == 0 else FOUT
        raw["bn_n"].append(bn(cin))
        raw["w_n"].append(nrm((FOUT, cin, 1, k1, k2)))
        raw["b_n"].append(nrm((FOUT,)))
    # final_conv
    raw["w_f1"] = nrm((FOUT, FOUT * 3, 1, 1, 1))
    raw["b_f1"] = nrm((FOUT,))
    raw["bn_f"] = bn(FOUT)
    raw["w_f2"] = nrm((OUT_CH, FOUT, 1, 1, 1))
    raw["b_f2"] = nrm((OUT_CH,))
    return raw


# ------------------------- host-side packing / folding ------------------------
def bn_scale_shift(bn_tuple, eps=BN_EPS):
    # TODO(synk): BatchNorm3d is realized in eval mode (running stats folded);
    # training-mode batch statistics are not modeled.
    g, be, m, v = bn_tuple
    s = g / jnp.sqrt(v + eps)
    t = be - m * s
    return s, t


def conv_w_mat(w):
    # torch (Cout, Cin, 1, kh, kw) -> (kh*kw*Cin, Cout), row order = (i, j, ci)
    cout, cin, _, kh, kw = w.shape
    return jnp.transpose(w[:, :, 0, :, :], (2, 3, 1, 0)).reshape(kh * kw * cin, cout)


def fold_bn_into_conv(wmat, bvec, s, t, taps):
    """Fold a per-cin BatchNorm (x*s+t) applied before (an optional AvgPool and)
    an im2col conv whose weight-matrix rows are ordered (tap, cin)."""
    s_full = jnp.tile(s, taps)[:, None]
    t_full = jnp.tile(t, taps)
    return wmat * s_full, bvec + t_full @ wmat


def pack_params(raw):
    """Fold all BNs and pack everything into one (rows,128) weight slab plus a
    (16,128) vector table (w_inc, b_inc, all biases)."""
    ents = []   # (name, Wmat (rows, cout), bias (cout,))

    # 1n branch: BN(32) -> conv(1,K,1) -> ReLU -> conv(1,1,TY) -> ReLU
    s, t = bn_scale_shift(raw["bn_1n"])
    w1, b1 = fold_bn_into_conv(conv_w_mat(raw["w1_1n"]), raw["b1_1n"], s, t, K)
    ents.append(("1n_a", w1, b1))
    ents.append(("1n_b", conv_w_mat(raw["w2_1n"]), raw["b2_1n"]))

    # pooling branch: BN -> AvgPool -> 1x1 conv (BN commutes with AvgPool)
    for i in range(len(POOL_NEIGHBORS)):
        s, t = bn_scale_shift(raw["bn_p"][i])
        w, b = fold_bn_into_conv(conv_w_mat(raw["w_p"][i]), raw["b_p"][i], s, t, 1)
        ents.append((f"p{i}", w, b))

    # nn branch: BN -> dilated conv -> ReLU
    for i, (k1, k2, _d1, _d2) in enumerate(CONV_BAGS):
        s, t = bn_scale_shift(raw["bn_n"][i])
        w, b = fold_bn_into_conv(conv_w_mat(raw["w_n"][i]), raw["b_n"][i], s, t, k1 * k2)
        ents.append((f"n{i}", w, b))

    # final conv: conv -> BN -> ReLU  (BN folds onto the conv's output channels)
    s, t = bn_scale_shift(raw["bn_f"])
    wf1 = conv_w_mat(raw["w_f1"]) * s[None, :]
    bf1 = raw["b_f1"] * s + t
    ents.append(("f1", wf1, bf1))

    # last conv, zero-padded to a lane-dense 128-wide output
    wf2 = jnp.pad(conv_w_mat(raw["w_f2"]), ((0, 0), (0, OUT_PAD - OUT_CH)))
    bf2 = jnp.pad(raw["b_f2"], (0, OUT_PAD - OUT_CH))
    ents.append(("f2", wf2, bf2))

    layout = {}
    blocks = []
    off = 0
    vec_rows = [conv_w_mat(raw["w_inc"]).reshape(-1),   # row 0: w_inc (32 lanes)
                raw["b_inc"]]                           # row 1: b_inc
    for bidx, (name, w, b) in enumerate(ents, start=2):
        rows, cout = int(w.shape[0]), int(w.shape[1])
        assert rows % 8 == 0 and cout <= WPAD
        blocks.append(jnp.pad(w, ((0, 0), (0, WPAD - cout))))
        layout[name] = (off, rows, cout, bidx)
        off += rows
        vec_rows.append(b)
    w_slab = jnp.concatenate(blocks, axis=0).astype(jnp.float32)   # (off, 128)

    v_slab = jnp.zeros((VROWS, WPAD), jnp.float32)
    for i, b in enumerate(vec_rows):
        v_slab = v_slab.at[i, : b.shape[0]].set(b)

    return w_slab, v_slab, layout


# --------------------------------- kernel ------------------------------------
def make_kernel(bn_blk, layout):
    M = bn_blk

    def conv_relu(act, w, b, k1, k2, d1, d2):
        """act: (Kc, Tc, M, C).  One matmul per layer: output positions stacked
        on sublanes, im2col taps lane-concatenated to match the weight rows."""
        Kc, Tc, _, C = act.shape
        kout = Kc - d1 * (k1 - 1)
        tout = Tc - d2 * (k2 - 1)
        row_blocks = []
        for ko in range(kout):
            for to in range(tout):
                taps = [act[ko + i * d1, to + j * d2]
                        for i in range(k1) for j in range(k2)]
                row_blocks.append(taps[0] if len(taps) == 1
                                  else jnp.concatenate(taps, axis=-1))
        lhs = (row_blocks[0] if len(row_blocks) == 1
               else jnp.concatenate(row_blocks, axis=0))        # (kout*tout*M, k1*k2*C)
        y = jnp.dot(lhs, w, preferred_element_type=jnp.float32) + b
        y = jnp.maximum(y, 0.0)
        cout = w.shape[1]
        tiles = [y[p * M:(p + 1) * M] for p in range(kout * tout)]
        return jnp.stack(tiles, axis=0).reshape(kout, tout, M, cout)

    def avg_pool(act, ph, pw):
        Kc, Tc, _, C = act.shape
        kout, tout = Kc // ph, Tc // pw
        inv = 1.0 / float(ph * pw)
        tiles = []
        for ko in range(kout):
            for to in range(tout):
                s = None
                for i in range(ph):
                    for j in range(pw):
                        piece = act[ko * ph + i, to * pw + j]
                        s = piece if s is None else s + piece
                tiles.append(s * inv)
        return jnp.stack(tiles, axis=0).reshape(kout, tout, M, C)

    def crop_add(prev, new):
        Kp, Tp = prev.shape[0], prev.shape[1]
        Kn, Tn = new.shape[0], new.shape[1]
        return prev[Kp - Kn:, Tp - Tn:, :, :] + new

    def kernel(x_ref, w_ref, v_ref, out_ref, hid_ref):
        vtab = v_ref[...]                                        # (16, 128)

        def weight(name):
            off, rows, cout, bidx = layout[name]
            return w_ref[off:off + rows, 0:cout], vtab[bidx:bidx + 1, 0:cout]

        # --- increase_dimension_net: Conv3d(1, 32, 1x1x1) + ReLU ---
        x4 = x_ref[...]                                          # (K, TX, M, 1)
        w_inc = vtab[0:1, 0:INC]                                 # (1, 32)
        b_inc = vtab[1:2, 0:INC]
        hid_ref[...] = jnp.maximum(x4 * w_inc + b_inc, 0.0)      # (K, TX, M, 32)

        # --- spatial_temporal_net_nn (BN folded, dilated conv, crop residual) ---
        cur = hid_ref[...]
        for idx, (k1, k2, d1, d2) in enumerate(CONV_BAGS):
            w, b = weight(f"n{idx}")
            y = conv_relu(cur, w, b, k1, k2, d1, d2)
            cur = y if idx == 0 else crop_add(cur, y)
        out_nn = cur[0, 0]                                       # (M, 64)

        # --- spatial_temporal_net_pooling (BN folded through AvgPool) ---
        cur = hid_ref[...]
        for idx, (ph, pw) in enumerate(zip(POOL_NEIGHBORS, POOL_SEQ)):
            w, b = weight(f"p{idx}")
            y = conv_relu(avg_pool(cur, ph, pw), w, b, 1, 1, 1, 1)
            cur = y if idx == 0 else crop_add(cur, y)
        out_pool = cur[0, 0]                                     # (M, 64)

        # --- spatial_temporal_net_1n ---
        cur = hid_ref[...]
        w, b = weight("1n_a")
        cur = conv_relu(cur, w, b, K, 1, 1, 1)                   # collapse neighbors
        w, b = weight("1n_b")
        cur = conv_relu(cur, w, b, 1, TY, 1, 1)                  # collapse time
        out_1n = cur[0, 0]                                       # (M, 64)

        # --- concat [pooling, nn, 1n] + final_conv (BN folded, lane-padded out) ---
        cat = jnp.concatenate([out_pool, out_nn, out_1n], axis=-1)   # (M, 192)
        w, b = weight("f1")
        z = jnp.maximum(jnp.dot(cat, w, preferred_element_type=jnp.float32) + b, 0.0)
        w, b = weight("f2")
        z = jnp.dot(z, w, preferred_element_type=jnp.float32) + b    # (M, 128)
        out_ref[...] = z

    return kernel


# ------------------------------ pallas wrapper --------------------------------
def _rows_per_step():
    """v7x has two TensorCores per chip -> use a 2-step parallel grid there;
    single-core chips (v5e/v6e) use one grid step (no per-step overhead)."""
    kind = ""
    try:
        kind = jax.devices()[0].device_kind.lower()
    except Exception:
        pass
    rows = B * N
    if "v7" in kind or "7x" in kind:
        return rows // 2
    return rows


def forward_pallas(x5, w_slab, v_slab, layout):
    """x5: (B, N, K, 1, TX) float32 -> (B, 12, N, 1) (matches torch output)."""
    rows_total = B * N
    bn_blk = _rows_per_step()
    assert rows_total % bn_blk == 0 and bn_blk % 8 == 0
    grid = (rows_total // bn_blk,)

    # (B, N, K, 1, TX) -> (K, TX, B*N, 1): per-(k,t) the kernel sees an (M,1) tile
    x4 = jnp.transpose(x5[:, :, :, 0, :].reshape(rows_total, K, TX),
                       (1, 2, 0))[..., None]

    out = pl.pallas_call(
        make_kernel(bn_blk, layout),
        out_shape=jax.ShapeDtypeStruct((rows_total, OUT_PAD), jnp.float32),
        grid_spec=pltpu.PrefetchScalarGridSpec(
            num_scalar_prefetch=0,
            grid=grid,
            in_specs=[
                pl.BlockSpec((K, TX, bn_blk, 1), lambda i: (0, 0, i, 0)),
                pl.BlockSpec(w_slab.shape, lambda i: (0, 0)),
                pl.BlockSpec(v_slab.shape, lambda i: (0, 0)),
            ],
            out_specs=pl.BlockSpec((bn_blk, OUT_PAD), lambda i: (i, 0)),
            scratch_shapes=[pltpu.VMEM((K, TX, bn_blk, INC), jnp.float32)],
        ),
        compiler_params=pltpu.CompilerParams(dimension_semantics=("parallel",)),
    )(x4, w_slab, v_slab)

    out = out[:, :OUT_CH]                                # drop zero-padded lanes
    return out.reshape(B, N, OUT_CH).transpose(0, 2, 1)[..., None]


# --------------------------- pure-JAX reference -------------------------------
def _conv3d(x, w, b, dilation=(1, 1, 1)):
    y = lax.conv_general_dilated(
        x, w, window_strides=(1, 1, 1), padding="VALID",
        rhs_dilation=dilation,
        dimension_numbers=("NCDHW", "OIDHW", "NCDHW"),
        precision=lax.Precision.HIGHEST)
    return y + b[None, :, None, None, None]


def _bn3d(x, bn_tuple, eps=BN_EPS):
    g, be, m, v = bn_tuple
    scale = g / jnp.sqrt(v + eps)
    shift = be - m * scale
    return x * scale[None, :, None, None, None] + shift[None, :, None, None, None]


def _avgpool3d(x, ph, pw):
    bb, c, nn_, kk, tt = x.shape
    return x.reshape(bb, c, nn_, kk // ph, ph, tt // pw, pw).mean(axis=(4, 6))


def forward_reference(x5, raw):
    x = jnp.transpose(x5, (0, 3, 1, 2, 4))                    # permute(0,3,1,2,4)
    h = jax.nn.relu(_conv3d(x, raw["w_inc"], raw["b_inc"]))
    out_nn = h
    for idx, (k1, k2, d1, d2) in enumerate(CONV_BAGS):
        y = jax.nn.relu(_conv3d(_bn3d(out_nn, raw["bn_n"][idx]),
                                raw["w_n"][idx], raw["b_n"][idx],
                                dilation=(1, d1, d2)))
        if idx == 0:
            out_nn = y
        else:
            kk, tt = y.shape[3], y.shape[4]
            out_nn = out_nn[:, :, :, -kk:, -tt:] + y
    out_p = h
    for idx, (ph, pw) in enumerate(zip(POOL_NEIGHBORS, POOL_SEQ)):
        y = jax.nn.relu(_conv3d(_avgpool3d(_bn3d(out_p, raw["bn_p"][idx]), ph, pw),
                                raw["w_p"][idx], raw["b_p"][idx]))
        if idx == 0:
            out_p = y
        else:
            kk, tt = y.shape[3], y.shape[4]
            out_p = out_p[:, :, :, -kk:, -tt:] + y
    h1 = _bn3d(h, raw["bn_1n"])
    h1 = jax.nn.relu(_conv3d(h1, raw["w1_1n"], raw["b1_1n"]))
    h1 = jax.nn.relu(_conv3d(h1, raw["w2_1n"], raw["b2_1n"]))
    cat = jnp.concatenate([out_p, out_nn, h1], axis=1)
    z = _conv3d(cat, raw["w_f1"], raw["b_f1"])
    z = jax.nn.relu(_bn3d(z, raw["bn_f"]))
    z = _conv3d(z, raw["w_f2"], raw["b_f2"])
    return z[..., 0]                                          # squeeze(-1): (B, 12, N, 1)


# ----------------------------------- main -------------------------------------
if __name__ == "__main__":
    key = jax.random.PRNGKey(0)
    k_x, k_p = jax.random.split(key)
    # torch module's input (before permute): (B, N, K, 1, TX)
    x = jax.random.normal(k_x, (B, N, K, 1, TX), dtype=jnp.float32)

    raw = init_raw_params(k_p)
    w_slab, v_slab, layout = pack_params(raw)

    out = forward_pallas(x, w_slab, v_slab, layout)
    out = jax.block_until_ready(out)

    assert out.shape == (B, OUT_CH, N, 1), out.shape
    assert bool(jnp.all(jnp.isfinite(out)))

    ref = jax.block_until_ready(forward_reference(x, raw))
    np.testing.assert_allclose(np.asarray(out), np.asarray(ref), rtol=3e-2, atol=3e-2)

    print("KERNEL_OK")
</pallas_src>

<mosaic_0001>
module attributes {stable_mosaic.version = 11 : i64} {
  func.func @kernel(%arg0: i32, %arg1: memref<4x8x32x1xf32, #tpu.memory_space<vmem>>, %arg2: memref<1696x128xf32, #tpu.memory_space<vmem>>, %arg3: memref<16x128xf32, #tpu.memory_space<vmem>>, %arg4: memref<32x128xf32, #tpu.memory_space<vmem>>, %arg5: memref<4x8x32x32xf32, #tpu.memory_space<vmem>>) attributes {dimension_semantics = [#tpu.dimension_semantics<parallel>], iteration_bounds = array<i64: 1>, scalar_prefetch = 0 : i64, scratch_operands = 1 : i64, tpu.core_type = #tpu.core_type<tc>, window_params = [{transform_indices = @transform_0, window_bounds = array<i64: 4, 8, 32, 1>}, {pipeline_mode = #tpu.pipeline_mode<synchronous>, transform_indices = @transform_1, window_bounds = array<i64: 1696, 128>}, {pipeline_mode = #tpu.pipeline_mode<synchronous>, transform_indices = @transform_2, window_bounds = array<i64: 16, 128>}, {transform_indices = @transform_3, window_bounds = array<i64: 32, 128>}]} {
    %c0 = arith.constant 0 : index
    %c0_0 = arith.constant 0 : index
    %0 = vector.load %arg3[%c0, %c0_0] : memref<16x128xf32, #tpu.memory_space<vmem>>, vector<16x128xf32>
    %c0_1 = arith.constant 0 : index
    %c0_2 = arith.constant 0 : index
    %c0_3 = arith.constant 0 : index
    %c0_4 = arith.constant 0 : index
    %1 = vector.load %arg1[%c0_1, %c0_2, %c0_3, %c0_4] : memref<4x8x32x1xf32, #tpu.memory_space<vmem>>, vector<4x8x32x1xf32>
    %2 = vector.extract_strided_slice %0 {offsets = [0, 0], sizes = [1, 32], strides = [1, 1]} : vector<16x128xf32> to vector<1x32xf32>
    %3 = vector.extract_strided_slice %0 {offsets = [1, 0], sizes = [1, 32], strides = [1, 1]} : vector<16x128xf32> to vector<1x32xf32>
    %4 = vector.shape_cast %2 : vector<1x32xf32> to vector<1x1x1x32xf32>
    %5 = vector.broadcast %1 : vector<4x8x32x1xf32> to vector<4x8x32x32xf32>
    %6 = vector.broadcast %4 : vector<1x1x1x32xf32> to vector<4x8x32x32xf32>
    %7 = arith.mulf %5, %6 : vector<4x8x32x32xf32>
    %8 = vector.shape_cast %3 : vector<1x32xf32> to vector<1x1x1x32xf32>
    %9 = vector.broadcast %8 : vector<1x1x1x32xf32> to vector<4x8x32x32xf32>
    %10 = arith.addf %7, %9 : vector<4x8x32x32xf32>
    %cst = arith.constant 0.000000e+00 : f32
    %11 = vector.broadcast %cst : f32 to vector<4x8x32x32xf32>
    %12 = arith.maximumf %10, %11 : vector<4x8x32x32xf32>
    %c0_5 = arith.constant 0 : index
    %c0_6 = arith.constant 0 : index
    %c0_7 = arith.constant 0 : index
    %c0_8 = arith.constant 0 : index
    %13 = vector.load %arg5[%c0_5, %c0_6, %c0_7, %c0_8] : memref<4x8x32x32xf32, #tpu.memory_space<vmem>>, vector<4x8x32x32xf32>
    tpu.vector_store %arg5[%c0_5, %c0_6, %c0_7, %c0_8], %12 {strides = array<i32>} : memref<4x8x32x32xf32, #tpu.memory_space<vmem>>, vector<4x8x32x32xf32>,
    %c0_9 = arith.constant 0 : index
    %c0_10 = arith.constant 0 : index
    %c0_11 = arith.constant 0 : index
    %c0_12 = arith.constant 0 : index
    %14 = vector.load %arg5[%c0_9, %c0_10, %c0_11, %c0_12] : memref<4x8x32x32xf32, #tpu.memory_space<vmem>>, vector<4x8x32x32xf32>
    %c608 = arith.constant 608 : index
    %c0_13 = arith.constant 0 : index
    %15 = vector.load %arg2[%c608, %c0_13] : memref<1696x128xf32, #tpu.memory_space<vmem>>, vector<192x64xf32>
    %16 = vector.extract_strided_slice %0 {offsets = [6, 0], sizes = [1, 64], strides = [1, 1]} : vector<16x128xf32> to vector<1x64xf32>
    %17 = vector.extract_strided_slice %14 {offsets = [0, 0, 0, 0], sizes = [1, 1, 32, 32], strides = [1, 1, 1, 1]} : vector<4x8x32x32xf32> to vector<1x1x32x32xf32>
    %18 = vector.shape_cast %17 : vector<1x1x32x32xf32> to vector<32x32xf32>
    %19 = vector.extract_strided_slice %14 {offsets = [0, 2, 0, 0], sizes = [1, 1, 32, 32], strides = [1, 1, 1, 1]} : vector<4x8x32x32xf32> to vector<1x1x32x32xf32>
    %20 = vector.shape_cast %19 : vector<1x1x32x32xf32> to vector<32x32xf32>
    %21 = vector.extract_strided_slice %14 {offsets = [0, 4, 0, 0], sizes = [1, 1, 32, 32], strides = [1, 1, 1, 1]} : vector<4x8x32x32xf32> to vector<1x1x32x32xf32>
    %22 = vector.shape_cast %21 : vector<1x1x32x32xf32> to vector<32x32xf32>
    %23 = vector.extract_strided_slice %14 {offsets = [1, 0, 0, 0], sizes = [1, 1, 32, 32], strides = [1, 1, 1, 1]} : vector<4x8x32x32xf32> to vector<1x1x32x32xf32>
    %24 = vector.shape_cast %23 : vector<1x1x32x32xf32> to vector<32x32xf32>
    %25 = vector.extract_strided_slice %14 {offsets = [1, 2, 0, 0], sizes = [1, 1, 32, 32], strides = [1, 1, 1, 1]} : vector<4x8x32x32xf32> to vector<1x1x32x32xf32>
    %26 = vector.shape_cast %25 : vector<1x1x32x32xf32> to vector<32x32xf32>
    %27 = vector.extract_strided_slice %14 {offsets = [1, 4, 0, 0], sizes = [1, 1, 32, 32], strides = [1, 1, 1, 1]} : vector<4x8x32x32xf32> to vector<1x1x32x32xf32>
    %28 = vector.shape_cast %27 : vector<1x1x32x32xf32> to vector<32x32xf32>
    %29 = tpu.concatenate %18, %20, %22, %24, %26, %28 in 1 : vector<32x32xf32>, vector<32x32xf32>, vector<32x32xf32>, vector<32x32xf32>, vector<32x32xf32>, vector<32x32xf32> -> vector<32x192xf32>
    %30 = vector.extract_strided_slice %14 {offsets = [0, 1, 0, 0], sizes = [1, 1, 32, 32], strides = [1, 1, 1, 1]} : vector<4x8x32x32xf32> to vector<1x1x32x32xf32>
    %31 = vector.shape_cast %30 : vector<1x1x32x32xf32> to vector<32x32xf32>
    %32 = vector.extract_strided_slice %14 {offsets = [0, 3, 0, 0], sizes = [1, 1, 32, 32], strides = [1, 1, 1, 1]} : vector<4x8x32x32xf32> to vector<1x1x32x32xf32>
    %33 = vector.shape_cast %32 : vector<1x1x32x32xf32> to vector<32x32xf32>
    %34 = vector.extract_strided_slice %14 {offsets = [0, 5, 0, 0], sizes = [1, 1, 32, 32], strides = [1, 1, 1, 1]} : vector<4x8x32x32xf32> to vector<1x1x32x32xf32>
    %35 = vector.shape_cast %34 : vector<1x1x32x32xf32> to vector<32x32xf32>
    %36 = vector.extract_strided_slice %14 {offsets = [1, 1, 0, 0], sizes = [1, 1, 32, 32], strides = [1, 1, 1, 1]} : vector<4x8x32x32xf32> to vector<1x1x32x32xf32>
    %37 = vector.shape_cast %36 : vector<1x1x32x32xf32> to vector<32x32xf32>
    %38 = vector.extract_strided_slice %14 {offsets = [1, 3, 0, 0], sizes = [1, 1, 32, 32], strides = [1, 1, 1, 1]} : vector<4x8x32x32xf32> to vector<1x1x32x32xf32>
    %39 = vector.shape_cast %38 : vector<1x1x32x32xf32> to vector<32x32xf32>
    %40 = vector.extract_strided_slice %14 {offsets = [1, 5, 0, 0], sizes = [1, 1, 32, 32], strides = [1, 1, 1, 1]} : vector<4x8x32x32xf32> to vector<1x1x32x32xf32>
    %41 = vector.shape_cast %40 : vector<1x1x32x32xf32> to vector<32x32xf32>
    %42 = tpu.concatenate %31, %33, %35, %37, %39, %41 in 1 : vector<32x32xf32>, vector<32x32xf32>, vector<32x32xf32>, vector<32x32xf32>, vector<32x32xf32>, vector<32x32xf32> -> vector<32x192xf32>
    %43 = vector.extract_strided_slice %14 {offsets = [0, 2, 0, 0], sizes = [1, 1, 32, 32], strides = [1, 1, 1, 1]} : vector<4x8x32x32xf32> to vector<1x1x32x32xf32>
    %44 = vector.shape_cast %43 : vector<1x1x32x32xf32> to vector<32x32xf32>
    %45 = vector.extract_strided_slice %14 {offsets = [0, 4, 0, 0], sizes = [1, 1, 32, 32], strides = [1, 1, 1, 1]} : vector<4x8x32x32xf32> to vector<1x1x32x32xf32>
    %46 = vector.shape_cast %45 : vector<1x1x32x32xf32> to vector<32x32xf32>
    %47 = vector.extract_strided_slice %14 {offsets = [0, 6, 0, 0], sizes = [1, 1, 32, 32], strides = [1, 1, 1, 1]} : vector<4x8x32x32xf32> to vector<1x1x32x32xf32>
    %48 = vector.shape_cast %47 : vector<1x1x32x32xf32> to vector<32x32xf32>
    %49 = vector.extract_strided_slice %14 {offsets = [1, 2, 0, 0], sizes = [1, 1, 32, 32], strides = [1, 1, 1, 1]} : vector<4x8x32x32xf32> to vector<1x1x32x32xf32>
    %50 = vector.shape_cast %49 : vector<1x1x32x32xf32> to vector<32x32xf32>
    %51 = vector.extract_strided_slice %14 {offsets = [1, 4, 0, 0], sizes = [1, 1, 32, 32], strides = [1, 1, 1, 1]} : vector<4x8x32x32xf32> to vector<1x1x32x32xf32>
    %52 = vector.shape_cast %51 : vector<1x1x32x32xf32> to vector<32x32xf32>
    %53 = vector.extract_strided_slice %14 {offsets = [1, 6, 0, 0], sizes = [1, 1, 32, 32], strides = [1, 1, 1, 1]} : vector<4x8x32x32xf32> to vector<1x1x32x32xf32>
    %54 = vector.shape_cast %53 : vector<1x1x32x32xf32> to vector<32x32xf32>
    %55 = tpu.concatenate %44, %46, %48, %50, %52, %54 in 1 : vector<32x32xf32>, vector<32x32xf32>, vector<32x32xf32>, vector<32x32xf32>, vector<32x32xf32>, vector<32x32xf32> -> vector<32x192xf32>
    %56 = vector.extract_strided_slice %14 {offsets = [0, 3, 0, 0], sizes = [1, 1, 32, 32], strides = [1, 1, 1, 1]} : vector<4x8x32x32xf32> to vector<1x1x32x32xf32>
    %57 = vector.shape_cast %56 : vector<1x1x32x32xf32> to vector<32x32xf32>
    %58 = vector.extract_strided_slice %14 {offsets = [0, 5, 0, 0], sizes = [1, 1, 32, 32], strides = [1, 1, 1, 1]} : vector<4x8x32x32xf32> to vector<1x1x32x32xf32>
    %59 = vector.shape_cast %58 : vector<1x1x32x32xf32> to vector<32x32xf32>
    %60 = vector.extract_strided_slice %14 {offsets = [0, 7, 0, 0], sizes = [1, 1, 32, 32], strides = [1, 1, 1, 1]} : vector<4x8x32x32xf32> to vector<1x1x32x32xf32>
    %61 = vector.shape_cast %60 : vector<1x1x32x32xf32> to vector<32x32xf32>
    %62 = vector.extract_strided_slice %14 {offsets = [1, 3, 0, 0], sizes = [1, 1, 32, 32], strides = [1, 1, 1, 1]} : vector<4x8x32x32xf32> to vector<1x1x32x32xf32>
    %63 = vector.shape_cast %62 : vector<1x1x32x32xf32> to vector<32x32xf32>
    %64 = vector.extract_strided_slice %14 {offsets = [1, 5, 0, 0], sizes = [1, 1, 32, 32], strides = [1, 1, 1, 1]} : vector<4x8x32x32xf32> to vector<1x1x32x32xf32>
    %65 = vector.shape_cast %64 : vector<1x1x32x32xf32> to vector<32x32xf32>
    %66 = vector.extract_strided_slice %14 {offsets = [1, 7, 0, 0], sizes = [1, 1, 32, 32], strides = [1, 1, 1, 1]} : vector<4x8x32x32xf32> to vector<1x1x32x32xf32>
    %67 = vector.shape_cast %66 : vector<1x1x32x32xf32> to vector<32x32xf32>
    %68 = tpu.concatenate %57, %59, %61, %63, %65, %67 in 1 : vector<32x32xf32>, vector<32x32xf32>, vector<32x32xf32>, vector<32x32xf32>, vector<32x32xf32>, vector<32x32xf32> -> vector<32x192xf32>
    %69 = vector.extract_strided_slice %14 {offsets = [1, 0, 0, 0], sizes = [1, 1, 32, 32], strides = [1, 1, 1, 1]} : vector<4x8x32x32xf32> to vector<1x1x32x32xf32>
    %70 = vector.shape_cast %69 : vector<1x1x32x32xf32> to vector<32x32xf32>
    %71 = vector.extract_strided_slice %14 {offsets = [1, 2, 0, 0], sizes = [1, 1, 32, 32], strides = [1, 1, 1, 1]} : vector<4x8x32x32xf32> to vector<1x1x32x32xf32>
    %72 = vector.shape_cast %71 : vector<1x1x32x32xf32> to vector<32x32xf32>
    %73 = vector.extract_strided_slice %14 {offsets = [1, 4, 0, 0], sizes = [1, 1, 32, 32], strides = [1, 1, 1, 1]} : vector<4x8x32x32xf32> to vector<1x1x32x32xf32>
    %74 = vector.shape_cast %73 : vector<1x1x32x32xf32> to vector<32x32xf32>
    %75 = vector.extract_strided_slice %14 {offsets = [2, 0, 0, 0], sizes = [1, 1, 32, 32], strides = [1, 1, 1, 1]} : vector<4x8x32x32xf32> to vector<1x1x32x32xf32>
    %76 = vector.shape_cast %75 : vector<1x1x32x32xf32> to vector<32x32xf32>
    %77 = vector.extract_strided_slice %14 {offsets = [2, 2, 0, 0], sizes = [1, 1, 32, 32], strides = [1, 1, 1, 1]} : vector<4x8x32x32xf32> to vector<1x1x32x32xf32>
    %78 = vector.shape_cast %77 : vector<1x1x32x32xf32> to vector<32x32xf32>
    %79 = vector.extract_strided_slice %14 {offsets = [2, 4, 0, 0], sizes = [1, 1, 32, 32], strides = [1, 1, 1, 1]} : vector<4x8x32x32xf32> to vector<1x1x32x32xf32>
    %80 = vector.shape_cast %79 : vector<1x1x32x32xf32> to vector<32x32xf32>
    %81 = tpu.concatenate %70, %72, %74, %76, %78, %80 in 1 : vector<32x32xf32>, vector<32x32xf32>, vector<32x32xf32>, vector<32x32xf32>, vector<32x32xf32>, vector<32x32xf32> -> vector<32x192xf32>
    %82 = vector.extract_strided_slice %14 {offsets = [1, 1, 0, 0], sizes = [1, 1, 32, 32], strides = [1, 1, 1, 1]} : vector<4x8x32x32xf32> to vector<1x1x32x32xf32>
    %83 = vector.shape_cast %82 : vector<1x1x32x32xf32> to vector<32x32xf32>
    %84 = vector.extract_strided_slice %14 {offsets = [1, 3, 0, 0], sizes = [1, 1, 32, 32], strides = [1, 1, 1, 1]} : vector<4x8x32x32xf32> to vector<1x1x32x32xf32>
    %85 = vector.shape_cast %84 : vector<1x1x32x32xf32> to vector<32x32xf32>
    %86 = vector.extract_strided_slice %14 {offsets = [1, 5, 0, 0], sizes = [1, 1, 32, 32], strides = [1, 1, 1, 1]} : vector<4x8x32x32xf32> to vector<1x1x32x32xf32>
    %87 = vector.shape_cast %86 : vector<1x1x32x32xf32> to vector<32x32xf32>
    %88 = vector.extract_strided_slice %14 {offsets = [2, 1, 0, 0], sizes = [1, 1, 32, 32], strides = [1, 1, 1, 1]} : vector<4x8x32x32xf32> to vector<1x1x32x32xf32>
    %89 = vector.shape_cast %88 : vector<1x1x32x32xf32> to vector<32x32xf32>
    %90 = vector.extract_strided_slice %14 {offsets = [2, 3, 0, 0], sizes = [1, 1, 32, 32], strides = [1, 1, 1, 1]} : vector<4x8x32x32xf32> to vector<1x1x32x32xf32>
    %91 = vector.shape_cast %90 : vector<1x1x32x32xf32> to vector<32x32xf32>
    %92 = vector.extract_strided_slice %14 {offsets = [2, 5, 0, 0], sizes = [1, 1, 32, 32], strides = [1, 1, 1, 1]} : vector<4x8x32x32xf32> to vector<1x1x32x32xf32>
    %93 = vector.shape_cast %92 : vector<1x1x32x32xf32> to vector<32x32xf32>
    %94 = tpu.concatenate %83, %85, %87, %89, %91, %93 in 1 : vector<32x32xf32>, vector<32x32xf32>, vector<32x32xf32>, vector<32x32xf32>, vector<32x32xf32>, vector<32x32xf32> -> vector<32x192xf32>
    %95 = vector.extract_strided_slice %14 {offsets = [1, 2, 0, 0], sizes = [1, 1, 32, 32], strides = [1, 1, 1, 1]} : vector<4x8x32x32xf32> to vector<1x1x32x32xf32>
    %96 = vector.shape_cast %95 : vector<1x1x32x32xf32> to vector<32x32xf32>
    %97 = vector.extract_strided_slice %14 {offsets = [1, 4, 0, 0], sizes = [1, 1, 32, 32], strides = [1, 1, 1, 1]} : vector<4x8x32x32xf32> to vector<1x1x32x32xf32>
    %98 = vector.shape_cast %97 : vector<1x1x32x32xf32> to vector<32x32xf32>
    %99 = vector.extract_strided_slice %14 {offsets = [1, 6, 0, 0], sizes = [1, 1, 32, 32], strides = [1, 1, 1, 1]} : vector<4x8x32x32xf32> to vector<1x1x32x32xf32>
    %100 = vector.shape_cast %99 : vector<1x1x32x32xf32> to vector<32x32xf32>
    %101 = vector.extract_strided_slice %14 {offsets = [2, 2, 0, 0], sizes = [1, 1, 32, 32], strides = [1, 1, 1, 1]} : vector<4x8x32x32xf32> to vector<1x1x32x32xf32>
    %102 = vector.shape_cast %101 : vector<1x1x32x32xf32> to vector<32x32xf32>
    %103 = vector.extract_strided_slice %14 {offsets = [2, 4, 0, 0], sizes = [1, 1, 32, 32], strides = [1, 1, 1, 1]} : vector<4x8x32x32xf32> to vector<1x1x32x32xf32>
    %104 = vector.shape_cast %103 : vector<1x1x32x32xf32> to vector<32x32xf32>
    %105 = vector.extract_strided_slice %14 {offsets = [2, 6, 0, 0], sizes = [1, 1, 32, 32], strides = [1, 1, 1, 1]} : vector<4x8x32x32xf32> to vector<1x1x32x32xf32>
    %106 = vector.shape_cast %105 : vector<1x1x32x32xf32> to vector<32x32xf32>
    %107 = tpu.concatenate %96, %98, %100, %102, %104, %106 in 1 : vector<32x32xf32>, vector<32x32xf32>, vector<32x32xf32>, vector<32x32xf32>, vector<32x32xf32>, vector<32x32xf32> -> vector<32x192xf32>
    %108 = vector.extract_strided_slice %14 {offsets = [1, 3, 0, 0], sizes = [1, 1, 32, 32], strides = [1, 1, 1, 1]} : vector<4x8x32x32xf32> to vector<1x1x32x32xf32>
    %109 = vector.shape_cast %108 : vector<1x1x32x32xf32> to vector<32x32xf32>
    %110 = vector.extract_strided_slice %14 {offsets = [1, 5, 0, 0], sizes = [1, 1, 32, 32], strides = [1, 1, 1, 1]} : vector<4x8x32x32xf32> to vector<1x1x32x32xf32>
    %111 = vector.shape_cast %110 : vector<1x1x32x32xf32> to vector<32x32xf32>
    %112 = vector.extract_strided_slice %14 {offsets = [1, 7, 0, 0], sizes = [1, 1, 32, 32], strides = [1, 1, 1, 1]} : vector<4x8x32x32xf32> to vector<1x1x32x32xf32>
    %113 = vector.shape_cast %112 : vector<1x1x32x32xf32> to vector<32x32xf32>
    %114 = vector.extract_strided_slice %14 {offsets = [2, 3, 0, 0], sizes = [1, 1, 32, 32], strides = [1, 1, 1, 1]} : vector<4x8x32x32xf32> to vector<1x1x32x32xf32>
    %115 = vector.shape_cast %114 : vector<1x1x32x32xf32> to vector<32x32xf32>
    %116 = vector.extract_strided_slice %14 {offsets = [2, 5, 0, 0], sizes = [1, 1, 32, 32], strides = [1, 1, 1, 1]} : vector<4x8x32x32xf32> to vector<1x1x32x32xf32>
    %117 = vector.shape_cast %116 : vector<1x1x32x32xf32> to vector<32x32xf32>
    %118 = vector.extract_strided_slice %14 {offsets = [2, 7, 0, 0], sizes = [1, 1, 32, 32], strides = [1, 1, 1, 1]} : vector<4x8x32x32xf32> to vector<1x1x32x32xf32>
    %119 = vector.shape_cast %118 : vector<1x1x32x32xf32> to vector<32x32xf32>
    %120 = tpu.concatenate %109, %111, %113, %115, %117, %119 in 1 : vector<32x32xf32>, vector<32x32xf32>, vector<32x32xf32>, vector<32x32xf32>, vector<32x32xf32>, vector<32x32xf32> -> vector<32x192xf32>
    %121 = vector.extract_strided_slice %14 {offsets = [2, 0, 0, 0], sizes = [1, 1, 32, 32], strides = [1, 1, 1, 1]} : vector<4x8x32x32xf32> to vector<1x1x32x32xf32>
    %122 = vector.shape_cast %121 : vector<1x1x32x32xf32> to vector<32x32xf32>
    %123 = vector.extract_strided_slice %14 {offsets = [2, 2, 0, 0], sizes = [1, 1, 32, 32], strides = [1, 1, 1, 1]} : vector<4x8x32x32xf32> to vector<1x1x32x32xf32>
    %124 = vector.shape_cast %123 : vector<1x1x32x32xf32> to vector<32x32xf32>
    %125 = vector.extract_strided_slice %14 {offsets = [2, 4, 0, 0], sizes = [1, 1, 32, 32], strides = [1, 1, 1, 1]} : vector<4x8x32x32xf32> to vector<1x1x32x32xf32>
    %126 = vector.shape_cast %125 : vector<1x1x32x32xf32> to vector<32x32xf32>
    %127 = vector.extract_strided_slice %14 {offsets = [3, 0, 0, 0], sizes = [1, 1, 32, 32], strides = [1, 1, 1, 1]} : vector<4x8x32x32xf32> to vector<1x1x32x32xf32>
    %128 = vector.shape_cast %127 : vector<1x1x32x32xf32> to vector<32x32xf32>
    %129 = vector.extract_strided_slice %14 {offsets = [3, 2, 0, 0], sizes = [1, 1, 32, 32], strides = [1, 1, 1, 1]} : vector<4x8x32x32xf32> to vector<1x1x32x32xf32>
    %130 = vector.shape_cast %129 : vector<1x1x32x32xf32> to vector<32x32xf32>
    %131 = vector.extract_strided_slice %14 {offsets = [3, 4, 0, 0], sizes = [1, 1, 32, 32], strides = [1, 1, 1, 1]} : vector<4x8x32x32xf32> to vector<1x1x32x32xf32>
    %132 = vector.shape_cast %131 : vector<1x1x32x32xf32> to vector<32x32xf32>
    %133 = tpu.concatenate %122, %124, %126, %128, %130, %132 in 1 : vector<32x32xf32>, vector<32x32xf32>, vector<32x32xf32>, vector<32x32xf32>, vector<32x32xf32>, vector<32x32xf32> -> vector<32x192xf32>
    %134 = vector.extract_strided_slice %14 {offsets = [2, 1, 0, 0], sizes = [1, 1, 32, 32], strides = [1, 1, 1, 1]} : vector<4x8x32x32xf32> to vector<1x1x32x32xf32>
    %135 = vector.shape_cast %134 : vector<1x1x32x32xf32> to vector<32x32xf32>
    %136 = vector.extract_strided_slice %14 {offsets = [2, 3, 0, 0], sizes = [1, 1, 32, 32], strides = [1, 1, 1, 1]} : vector<4x8x32x32xf32> to vector<1x1x32x32xf32>
    %137 = vector.shape_cast %136 : vector<1x1x32x32xf32> to vector<32x32xf32>
    %138 = vector.extract_strided_slice %14 {offsets = [2, 5, 0, 0], sizes = [1, 1, 32, 32], strides = [1, 1, 1, 1]} : vector<4x8x32x32xf32> to vector<1x1x32x32xf32>
    %139 = vector.shape_cast %138 : vector<1x1x32x32xf32> to vector<32x32xf32>
    %140 = vector.extract_strided_slice %14 {offsets = [3, 1, 0, 0], sizes = [1, 1, 32, 32], strides = [1, 1, 1, 1]} : vector<4x8x32x32xf32> to vector<1x1x32x32xf32>
    %141 = vector.shape_cast %140 : vector<1x1x32x32xf32> to vector<32x32xf32>
    %142 = vector.extract_strided_slice %14 {offsets = [3, 3, 0, 0], sizes = [1, 1, 32, 32], strides = [1, 1, 1, 1]} : vector<4x8x32x32xf32> to vector<1x1x32x32xf32>
    %143 = vector.shape_cast %142 : vector<1x1x32x32xf32> to vector<32x32xf32>
    %144 = vector.extract_strided_slice %14 {offsets = [3, 5, 0, 0], sizes = [1, 1, 32, 32], strides = [1, 1, 1, 1]} : vector<4x8x32x32xf32> to vector<1x1x32x32xf32>
    %145 = vector.shape_cast %144 : vector<1x1x32x32xf32> to vector<32x32xf32>
    %146 = tpu.concatenate %135, %137, %139, %141, %143, %145 in 1 : vector<32x32xf32>, vector<32x32xf32>, vector<32x32xf32>, vector<32x32xf32>, vector<32x32xf32>, vector<32x32xf32> -> vector<32x192xf32>
    %147 = vector.extract_strided_slice %14 {offsets = [2, 2, 0, 0], sizes = [1, 1, 32, 32], strides = [1, 1, 1, 1]} : vector<4x8x32x32xf32> to vector<1x1x32x32xf32>
    %148 = vector.shape_cast %147 : vector<1x1x32x32xf32> to vector<32x32xf32>
    %149 = vector.extract_strided_slice %14 {offsets = [2, 4, 0, 0], sizes = [1, 1, 32, 32], strides = [1, 1, 1, 1]} : vector<4x8x32x32xf32> to vector<1x1x32x32xf32>
    %150 = vector.shape_cast %149 : vector<1x1x32x32xf32> to vector<32x32xf32>
    %151 = vector.extract_strided_slice %14 {offsets = [2, 6, 0, 0], sizes = [1, 1, 32, 32], strides = [1, 1, 1, 1]} : vector<4x8x32x32xf32> to vector<1x1x32x32xf32>
    %152 = vector.shape_cast %151 : vector<1x1x32x32xf32> to vector<32x32xf32>
    %153 = vector.extract_strided_slice %14 {offsets = [3, 2, 0, 0], sizes = [1, 1, 32, 32], strides = [1, 1, 1, 1]} : vector<4x8x32x32xf32> to vector<1x1x32x32xf32>
    %154 = vector.shape_cast %153 : vector<1x1x32x32xf32> to vector<32x32xf32>
    %155 = vector.extract_strided_slice %14 {offsets = [3, 4, 0, 0], sizes = [1, 1, 32, 32], strides = [1, 1, 1, 1]} : vector<4x8x32x32xf32> to vector<1x1x32x32xf32>
    %156 = vector.shape_cast %155 : vector<1x1x32x32xf32> to vector<32x32xf32>
    %157 = vector.extract_strided_slice %14 {offsets = [3, 6, 0, 0], sizes = [1, 1, 32, 32], strides = [1, 1, 1, 1]} : vector<4x8x32x32xf32> to vector<1x1x32x32xf32>
    %158 = vector.shape_cast %157 : vector<1x1x32x32xf32> to vector<32x32xf32>
    %159 = tpu.concatenate %148, %150, %152, %154, %156, %158 in 1 : vector<32x32xf32>, vector<32x32xf32>, vector<32x32xf32>, vector<32x32xf32>, vector<32x32xf32>, vector<32x32xf32> -> vector<32x192xf32>
    %160 = vector.extract_strided_slice %14 {offsets = [2, 3, 0, 0], sizes = [1, 1, 32, 32], strides = [1, 1, 1, 1]} : vector<4x8x32x32xf32> to vector<1x1x32x32xf32>
    %161 = vector.shape_cast %160 : vector<1x1x32x32xf32> to vector<32x32xf32>
    %162 = vector.extract_strided_slice %14 {offsets = [2, 5, 0, 0], sizes = [1, 1, 32, 32], strides = [1, 1, 1, 1]} : vector<4x8x32x32xf32> to vector<1x1x32x32xf32>
    %163 = vector.shape_cast %162 : vector<1x1x32x32xf32> to vector<32x32xf32>
    %164 = vector.extract_strided_slice %14 {offsets = [2, 7, 0, 0], sizes = [1, 1, 32, 32], strides = [1, 1, 1, 1]} : vector<4x8x32x32xf32> to vector<1x1x32x32xf32>
    %165 = vector.shape_cast %164 : vector<1x1x32x32xf32> to vector<32x32xf32>
    %166 = vector.extract_strided_slice %14 {offsets = [3, 3, 0, 0], sizes = [1, 1, 32, 32], strides = [1, 1, 1, 1]} : vector<4x8x32x32xf32> to vector<1x1x32x32xf32>
    %167 = vector.shape_cast %166 : vector<1x1x32x32xf32> to vector<32x32xf32>
    %168 = vector.extract_strided_slice %14 {offsets = [3, 5, 0, 0], sizes = [1, 1, 32, 32], strides = [1, 1, 1, 1]} : vector<4x8x32x32xf32> to vector<1x1x32x32xf32>
    %169 = vector.shape_cast %168 : vector<1x1x32x32xf32> to vector<32x32xf32>
    %170 = vector.extract_strided_slice %14 {offsets = [3, 7, 0, 0], sizes = [1, 1, 32, 32], strides = [1, 1, 1, 1]} : vector<4x8x32x32xf32> to vector<1x1x32x32xf32>
    %171 = vector.shape_cast %170 : vector<1x1x32x32xf32> to vector<32x32xf32>
    %172 = tpu.concatenate %161, %163, %165, %167, %169, %171 in 1 : vector<32x32xf32>, vector<32x32xf32>, vector<32x32xf32>, vector<32x32xf32>, vector<32x32xf32>, vector<32x32xf32> -> vector<32x192xf32>
    %173 = tpu.concatenate %29, %42, %55, %68, %81, %94, %107, %120, %133, %146, %159, %172 in 0 : vector<32x192xf32>, vector<32x192xf32>, vector<32x192xf32>, vector<32x192xf32>, vector<32x192xf32>, vector<32x192xf32>, vector<32x192xf32>, vector<32x192xf32>, vector<32x192xf32>, vector<32x192xf32>, vector<32x192xf32>, vector<32x192xf32> -> vector<384x192xf32>
    %cst_14 = arith.constant dense<0.000000e+00> : vector<384x64xf32>
    %174 = tpu.matmul %173, %15, %cst_14 {dimension_numbers = #tpu.dot_dimension_numbers<[1], [0], [0], [1], [0, 0, 1, 1], [], []>} : vector<384x192xf32>, vector<192x64xf32>, vector<384x64xf32> -> vector<384x64xf32>
    %175 = vector.broadcast %16 : vector<1x64xf32> to vector<384x64xf32>
    %176 = arith.addf %174, %175 : vector<384x64xf32>
    %cst_15 = arith.constant 0.000000e+00 : f32
    %177 = vector.broadcast %cst_15 : f32 to vector<384x64xf32>
    %178 = arith.maximumf %176, %177 : vector<384x64xf32>
    %179 = vector.extract_strided_slice %178 {offsets = [0, 0], sizes = [32, 64], strides = [1, 1]} : vector<384x64xf32> to vector<32x64xf32>
    %180 = vector.extract_strided_slice %178 {offsets = [32, 0], sizes = [32, 64], strides = [1, 1]} : vector<384x64xf32> to vector<32x64xf32>
    %181 = vector.extract_strided_slice %178 {offsets = [64, 0], sizes = [32, 64], strides = [1, 1]} : vector<384x64xf32> to vector<32x64xf32>
    %182 = vector.extract_strided_slice %178 {offsets = [96, 0], sizes = [32, 64], strides = [1, 1]} : vector<384x64xf32> to vector<32x64xf32>
    %183 = vector.extract_strided_slice %178 {offsets = [128, 0], sizes = [32, 64], strides = [1, 1]} : vector<384x64xf32> to vector<32x64xf32>
    %184 = vector.extract_strided_slice %178 {offsets = [160, 0], sizes = [32, 64], strides = [1, 1]} : vector<384x64xf32> to vector<32x64xf32>
    %185 = vector.extract_strided_slice %178 {offsets = [192, 0], sizes = [32, 64], strides = [1, 1]} : vector<384x64xf32> to vector<32x64xf32>
    %186 = vector.extract_strided_slice %178 {offsets = [224, 0], sizes = [32, 64], strides = [1, 1]} : vector<384x64xf32> to vector<32x64xf32>
    %187 = vector.extract_strided_slice %178 {offsets = [256, 0], sizes = [32, 64], strides = [1, 1]} : vector<384x64xf32> to vector<32x64xf32>
    %188 = vector.extract_strided_slice %178 {offsets = [288, 0], sizes = [32, 64], strides = [1, 1]} : vector<384x64xf32> to vector<32x64xf32>
    %189 = vector.extract_strided_slice %178 {offsets = [320, 0], sizes = [32, 64], strides = [1, 1]} : vector<384x64xf32> to vector<32x64xf32>
    %190 = vector.extract_strided_slice %178 {offsets = [352, 0], sizes = [32, 64], strides = [1, 1]} : vector<384x64xf32> to vector<32x64xf32>
    %191 = vector.shape_cast %179 : vector<32x64xf32> to vector<1x32x64xf32>
    %192 = vector.shape_cast %180 : vector<32x64xf32> to vector<1x32x64xf32>
    %193 = vector.shape_cast %181 : vector<32x64xf32> to vector<1x32x64xf32>
    %194 = vector.shape_cast %182 : vector<32x64xf32> to vector<1x32x64xf32>
    %195 = vector.shape_cast %183 : vector<32x64xf32> to vector<1x32x64xf32>
    %196 = vector.shape_cast %184 : vector<32x64xf32> to vector<1x32x64xf32>
    %197 = vector.shape_cast %185 : vector<32x64xf32> to vector<1x32x64xf32>
    %198 = vector.shape_cast %186 : vector<32x64xf32> to vector<1x32x64xf32>
    %199 = vector.shape_cast %187 : vector<32x64xf32> to vector<1x32x64xf32>
    %200 = vector.shape_cast %188 : vector<32x64xf32> to vector<1x32x64xf32>
    %201 = vector.shape_cast %189 : vector<32x64xf32> to vector<1x32x64xf32>
    %202 = vector.shape_cast %190 : vector<32x64xf32> to vector<1x32x64xf32>
    %203 = tpu.concatenate %191, %192, %193, %194, %195, %196, %197, %198, %199, %200, %201, %202 in 0 : vector<1x32x64xf32>, vector<1x32x64xf32>, vector<1x32x64xf32>, vector<1x32x64xf32>, vector<1x32x64xf32>, vector<1x32x64xf32>, vector<1x32x64xf32>, vector<1x32x64xf32>, vector<1x32x64xf32>, vector<1x32x64xf32>, vector<1x32x64xf32>, vector<1x32x64xf32> -> vector<12x32x64xf32>
    %204 = vector.shape_cast %203 : vector<12x32x64xf32> to vector<3x4x32x64xf32>
    %c800 = arith.constant 800 : index
    %c0_16 = arith.constant 0 : index
    %205 = vector.load %arg2[%c800, %c0_16] : memref<1696x128xf32, #tpu.memory_space<vmem>>, vector<384x64xf32>
    %206 = vector.extract_strided_slice %0 {offsets = [7, 0], sizes = [1, 64], strides = [1, 1]} : vector<16x128xf32> to vector<1x64xf32>
    %207 = vector.extract_strided_slice %204 {offsets = [0, 0, 0, 0], sizes = [1, 1, 32, 64], strides = [1, 1, 1, 1]} : vector<3x4x32x64xf32> to vector<1x1x32x64xf32>
    %208 = vector.shape_cast %207 : vector<1x1x32x64xf32> to vector<32x64xf32>
    %209 = vector.extract_strided_slice %204 {offsets = [0, 1, 0, 0], sizes = [1, 1, 32, 64], strides = [1, 1, 1, 1]} : vector<3x4x32x64xf32> to vector<1x1x32x64xf32>
    %210 = vector.shape_cast %209 : vector<1x1x32x64xf32> to vector<32x64xf32>
    %211 = vector.extract_strided_slice %204 {offsets = [0, 2, 0, 0], sizes = [1, 1, 32, 64], strides = [1, 1, 1, 1]} : vector<3x4x32x64xf32> to vector<1x1x32x64xf32>
    %212 = vector.shape_cast %211 : vector<1x1x32x64xf32> to vector<32x64xf32>
    %213 = vector.extract_strided_slice %204 {offsets = [1, 0, 0, 0], sizes = [1, 1, 32, 64], strides = [1, 1, 1, 1]} : vector<3x4x32x64xf32> to vector<1x1x32x64xf32>
    %214 = vector.shape_cast %213 : vector<1x1x32x64xf32> to vector<32x64xf32>
    %215 = vector.extract_strided_slice %204 {offsets = [1, 1, 0, 0], sizes = [1, 1, 32, 64], strides = [1, 1, 1, 1]} : vector<3x4x32x64xf32> to vector<1x1x32x64xf32>
    %216 = vector.shape_cast %215 : vector<1x1x32x64xf32> to vector<32x64xf32>
    %217 = vector.extract_strided_slice %204 {offsets = [1, 2, 0, 0], sizes = [1, 1, 32, 64], strides = [1, 1, 1, 1]} : vector<3x4x32x64xf32> to vector<1x1x32x64xf32>
    %218 = vector.shape_cast %217 : vector<1x1x32x64xf32> to vector<32x64xf32>
    %219 = tpu.concatenate %208, %210, %212, %214, %216, %218 in 1 : vector<32x64xf32>, vector<32x64xf32>, vector<32x64xf32>, vector<32x64xf32>, vector<32x64xf32>, vector<32x64xf32> -> vector<32x384xf32>
    %220 = vector.extract_strided_slice %204 {offsets = [0, 1, 0, 0], sizes = [1, 1, 32, 64], strides = [1, 1, 1, 1]} : vector<3x4x32x64xf32> to vector<1x1x32x64xf32>
    %221 = vector.shape_cast %220 : vector<1x1x32x64xf32> to vector<32x64xf32>
    %222 = vector.extract_strided_slice %204 {offsets = [0, 2, 0, 0], sizes = [1, 1, 32, 64], strides = [1, 1, 1, 1]} : vector<3x4x32x64xf32> to vector<1x1x32x64xf32>
    %223 = vector.shape_cast %222 : vector<1x1x32x64xf32> to vector<32x64xf32>
    %224 = vector.extract_strided_slice %204 {offsets = [0, 3, 0, 0], sizes = [1, 1, 32, 64], strides = [1, 1, 1, 1]} : vector<3x4x32x64xf32> to vector<1x1x32x64xf32>
    %225 = vector.shape_cast %224 : vector<1x1x32x64xf32> to vector<32x64xf32>
    %226 = vector.extract_strided_slice %204 {offsets = [1, 1, 0, 0], sizes = [1, 1, 32, 64], strides = [1, 1, 1, 1]} : vector<3x4x32x64xf32> to vector<1x1x32x64xf32>
    %227 = vector.shape_cast %226 : vector<1x1x32x64xf32> to vector<32x64xf32>
    %228 = vector.extract_strided_slice %204 {offsets = [1, 2, 0, 0], sizes = [1, 1, 32, 64], strides = [1, 1, 1, 1]} : vector<3x4x32x64xf32> to vector<1x1x32x64xf32>
    %229 = vector.shape_cast %228 : vector<1x1x32x64xf32> to vector<32x64xf32>
    %230 = vector.extract_strided_slice %204 {offsets = [1, 3, 0, 0], sizes = [1, 1, 32, 64], strides = [1, 1, 1, 1]} : vector<3x4x32x64xf32> to vector<1x1x32x64xf32>
    %231 = vector.shape_cast %230 : vector<1x1x32x64xf32> to vector<32x64xf32>
    %232 = tpu.concatenate %221, %223, %225, %227, %229, %231 in 1 : vector<32x64xf32>, vector<32x64xf32>, vector<32x64xf32>, vector<32x64xf32>, vector<32x64xf32>, vector<32x64xf32> -> vector<32x384xf32>
    %233 = vector.extract_strided_slice %204 {offsets = [1, 0, 0, 0], sizes = [1, 1, 32, 64], strides = [1, 1, 1, 1]} : vector<3x4x32x64xf32> to vector<1x1x32x64xf32>
    %234 = vector.shape_cast %233 : vector<1x1x32x64xf32> to vector<32x64xf32>
    %235 = vector.extract_strided_slice %204 {offsets = [1, 1, 0, 0], sizes = [1, 1, 32, 64], strides = [1, 1, 1, 1]} : vector<3x4x32x64xf32> to vector<1x1x32x64xf32>
    %236 = vector.shape_cast %235 : vector<1x1x32x64xf32> to vector<32x64xf32>
    %237 = vector.extract_strided_slice %204 {offsets = [1, 2, 0, 0], sizes = [1, 1, 32, 64], strides = [1, 1, 1, 1]} : vector<3x4x32x64xf32> to vector<1x1x32x64xf32>
    %238 = vector.shape_cast %237 : vector<1x1x32x64xf32> to vector<32x64xf32>
    %239 = vector.extract_strided_slice %204 {offsets = [2, 0, 0, 0], sizes = [1, 1, 32, 64], strides = [1, 1, 1, 1]} : vector<3x4x32x64xf32> to vector<1x1x32x64xf32>
    %240 = vector.shape_cast %239 : vector<1x1x32x64xf32> to vector<32x64xf32>
    %241 = vector.extract_strided_slice %204 {offsets = [2, 1, 0, 0], sizes = [1, 1, 32, 64], strides = [1, 1, 1, 1]} : vector<3x4x32x64xf32> to vector<1x1x32x64xf32>
    %242 = vector.shape_cast %241 : vector<1x1x32x64xf32> to vector<32x64xf32>
    %243 = vector.extract_strided_slice %204 {offsets = [2, 2, 0, 0], sizes = [1, 1, 32, 64], strides = [1, 1, 1, 1]} : vector<3x4x32x64xf32> to vector<1x1x32x64xf32>
    %244 = vector.shape_cast %243 : vector<1x1x32x64xf32> to vector<32x64xf32>
    %245 = tpu.concatenate %234, %236, %238, %240, %242, %244 in 1 : vector<32x64xf32>, vector<32x64xf32>, vector<32x64xf32>, vector<32x64xf32>, vector<32x64xf32>, vector<32x64xf32> -> vector<32x384xf32>
    %246 = vector.extract_strided_slice %204 {offsets = [1, 1, 0, 0], sizes = [1, 1, 32, 64], strides = [1, 1, 1, 1]} : vector<3x4x32x64xf32> to vector<1x1x32x64xf32>
    %247 = vector.shape_cast %246 : vector<1x1x32x64xf32> to vector<32x64xf32>
    %248 = vector.extract_strided_slice %204 {offsets = [1, 2, 0, 0], sizes = [1, 1, 32, 64], strides = [1, 1, 1, 1]} : vector<3x4x32x64xf32> to vector<1x1x32x64xf32>
    %249 = vector.shape_cast %248 : vector<1x1x32x64xf32> to vector<32x64xf32>
    %250 = vector.extract_strided_slice %204 {offsets = [1, 3, 0, 0], sizes = [1, 1, 32, 64], strides = [1, 1, 1, 1]} : vector<3x4x32x64xf32> to vector<1x1x32x64xf32>
    %251 = vector.shape_cast %250 : vector<1x1x32x64xf32> to vector<32x64xf32>
    %252 = vector.extract_strided_slice %204 {offsets = [2, 1, 0, 0], sizes = [1, 1, 32, 64], strides = [1, 1, 1, 1]} : vector<3x4x32x64xf32> to vector<1x1x32x64xf32>
    %253 = vector.shape_cast %252 : vector<1x1x32x64xf32> to vector<32x64xf32>
    %254 = vector.extract_strided_slice %204 {offsets = [2, 2, 0, 0], sizes = [1, 1, 32, 64], strides = [1, 1, 1, 1]} : vector<3x4x32x64xf32> to vector<1x1x32x64xf32>
    %255 = vector.shape_cast %254 : vector<1x1x32x64xf32> to vector<32x64xf32>
    %256 = vector.extract_strided_slice %204 {offsets = [2, 3, 0, 0], sizes = [1, 1, 32, 64], strides = [1, 1, 1, 1]} : vector<3x4x32x64xf32> to vector<1x1x32x64xf32>
    %257 = vector.shape_cast %256 : vector<1x1x32x64xf32> to vector<32x64xf32>
    %258 = tpu.concatenate %247, %249, %251, %253, %255, %257 in 1 : vector<32x64xf32>, vector<32x64xf32>, vector<32x64xf32>, vector<32x64xf32>, vector<32x64xf32>, vector<32x64xf32> -> vector<32x384xf32>
    %259 = tpu.concatenate %219, %232, %245, %258 in 0 : vector<32x384xf32>, vector<32x384xf32>, vector<32x384xf32>, vector<32x384xf32> -> vector<128x384xf32>
    %cst_17 = arith.constant dense<0.000000e+00> : vector<128x64xf32>
    %260 = tpu.matmul %259, %205, %cst_17 {dimension_numbers = #tpu.dot_dimension_numbers<[1], [0], [0], [1], [0, 0, 1, 1], [], []>} : vector<128x384xf32>, vector<384x64xf32>, vector<128x64xf32> -> vector<128x64xf32>
    %261 = vector.broadcast %206 : vector<1x64xf32> to vector<128x64xf32>
    %262 = arith.addf %260, %261 : vector<128x64xf32>
    %cst_18 = arith.constant 0.000000e+00 : f32
    %263 = vector.broadcast %cst_18 : f32 to vector<128x64xf32>
    %264 = arith.maximumf %262, %263 : vector<128x64xf32>
    %265 = vector.extract_strided_slice %264 {offsets = [0, 0], sizes = [32, 64], strides = [1, 1]} : vector<128x64xf32> to vector<32x64xf32>
    %266 = vector.extract_strided_slice %264 {offsets = [32, 0], sizes = [32, 64], strides = [1, 1]} : vector<128x64xf32> to vector<32x64xf32>
    %267 = vector.extract_strided_slice %264 {offsets = [64, 0], sizes = [32, 64], strides = [1, 1]} : vector<128x64xf32> to vector<32x64xf32>
    %268 = vector.extract_strided_slice %264 {offsets = [96, 0], sizes = [32, 64], strides = [1, 1]} : vector<128x64xf32> to vector<32x64xf32>
    %269 = vector.shape_cast %265 : vector<32x64xf32> to vector<1x32x64xf32>
    %270 = vector.shape_cast %266 : vector<32x64xf32> to vector<1x32x64xf32>
    %271 = vector.shape_cast %267 : vector<32x64xf32> to vector<1x32x64xf32>
    %272 = vector.shape_cast %268 : vector<32x64xf32> to vector<1x32x64xf32>
    %273 = tpu.concatenate %269, %270, %271, %272 in 0 : vector<1x32x64xf32>, vector<1x32x64xf32>, vector<1x32x64xf32>, vector<1x32x64xf32> -> vector<4x32x64xf32>
    %274 = vector.shape_cast %273 : vector<4x32x64xf32> to vector<2x2x32x64xf32>
    %275 = vector.extract_strided_slice %204 {offsets = [1, 2, 0, 0], sizes = [2, 2, 32, 64], strides = [1, 1, 1, 1]} : vector<3x4x32x64xf32> to vector<2x2x32x64xf32>
    %276 = arith.addf %275, %274 : vector<2x2x32x64xf32>
    %c1184 = arith.constant 1184 : index
    %c0_19 = arith.constant 0 : index
    %277 = vector.load %arg2[%c1184, %c0_19] : memref<1696x128xf32, #tpu.memory_space<vmem>>, vector<256x64xf32>
    %278 = vector.extract_strided_slice %0 {offsets = [8, 0], sizes = [1, 64], strides = [1, 1]} : vector<16x128xf32> to vector<1x64xf32>
    %279 = vector.extract_strided_slice %276 {offsets = [0, 0, 0, 0], sizes = [1, 1, 32, 64], strides = [1, 1, 1, 1]} : vector<2x2x32x64xf32> to vector<1x1x32x64xf32>
    %280 = vector.shape_cast %279 : vector<1x1x32x64xf32> to vector<32x64xf32>
    %281 = vector.extract_strided_slice %276 {offsets = [0, 1, 0, 0], sizes = [1, 1, 32, 64], strides = [1, 1, 1, 1]} : vector<2x2x32x64xf32> to vector<1x1x32x64xf32>
    %282 = vector.shape_cast %281 : vector<1x1x32x64xf32> to vector<32x64xf32>
    %283 = vector.extract_strided_slice %276 {offsets = [1, 0, 0, 0], sizes = [1, 1, 32, 64], strides = [1, 1, 1, 1]} : vector<2x2x32x64xf32> to vector<1x1x32x64xf32>
    %284 = vector.shape_cast %283 : vector<1x1x32x64xf32> to vector<32x64xf32>
    %285 = vector.extract_strided_slice %276 {offsets = [1, 1, 0, 0], sizes = [1, 1, 32, 64], strides = [1, 1, 1, 1]} : vector<2x2x32x64xf32> to vector<1x1x32x64xf32>
    %286 = vector.shape_cast %285 : vector<1x1x32x64xf32> to vector<32x64xf32>
    %287 = tpu.concatenate %280, %282, %284, %286 in 1 : vector<32x64xf32>, vector<32x64xf32>, vector<32x64xf32>, vector<32x64xf32> -> vector<32x256xf32>
    %cst_20 = arith.constant dense<0.000000e+00> : vector<32x64xf32>
    %288 = tpu.matmul %287, %277, %cst_20 {dimension_numbers = #tpu.dot_dimension_numbers<[1], [0], [0], [1], [0, 0, 1, 1], [], []>} : vector<32x256xf32>, vector<256x64xf32>, vector<32x64xf32> -> vector<32x64xf32>
    %289 = vector.broadcast %278 : vector<1x64xf32> to vector<32x64xf32>
    %290 = arith.addf %288, %289 : vector<32x64xf32>
    %cst_21 = arith.constant 0.000000e+00 : f32
    %291 = vector.broadcast %cst_21 : f32 to vector<32x64xf32>
    %292 = arith.maximumf %290, %291 : vector<32x64xf32>
    %293 = vector.shape_cast %292 : vector<32x64xf32> to vector<1x32x64xf32>
    %294 = vector.shape_cast %293 : vector<1x32x64xf32> to vector<1x1x32x64xf32>
    %295 = vector.extract_strided_slice %276 {offsets = [1, 1, 0, 0], sizes = [1, 1, 32, 64], strides = [1, 1, 1, 1]} : vector<2x2x32x64xf32> to vector<1x1x32x64xf32>
    %296 = arith.addf %295, %294 : vector<1x1x32x64xf32>
    %297 = vector.shape_cast %296 : vector<1x1x32x64xf32> to vector<32x64xf32>
    %c0_22 = arith.constant 0 : index
    %c0_23 = arith.constant 0 : index
    %c0_24 = arith.constant 0 : index
    %c0_25 = arith.constant 0 : index
    %298 = vector.load %arg5[%c0_22, %c0_23, %c0_24, %c0_25] : memref<4x8x32x32xf32, #tpu.memory_space<vmem>>, vector<4x8x32x32xf32>
    %c512 = arith.constant 512 : index
    %c0_26 = arith.constant 0 : index
    %299 = vector.load %arg2[%c512, %c0_26] : memref<1696x128xf32, #tpu.memory_space<vmem>>, vector<32x64xf32>
    %300 = vector.extract_strided_slice %0 {offsets = [4, 0], sizes = [1, 64], strides = [1, 1]} : vector<16x128xf32> to vector<1x64xf32>
    %301 = vector.extract_strided_slice %298 {offsets = [0, 0, 0, 0], sizes = [1, 1, 32, 32], strides = [1, 1, 1, 1]} : vector<4x8x32x32xf32> to vector<1x1x32x32xf32>
    %302 = vector.shape_cast %301 : vector<1x1x32x32xf32> to vector<32x32xf32>
    %303 = vector.extract_strided_slice %298 {offsets = [0, 1, 0, 0], sizes = [1, 1, 32, 32], strides = [1, 1, 1, 1]} : vector<4x8x32x32xf32> to vector<1x1x32x32xf32>
    %304 = vector.shape_cast %303 : vector<1x1x32x32xf32> to vector<32x32xf32>
    %305 = arith.addf %302, %304 : vector<32x32xf32>
    %306 = vector.extract_strided_slice %298 {offsets = [1, 0, 0, 0], sizes = [1, 1, 32, 32], strides = [1, 1, 1, 1]} : vector<4x8x32x32xf32> to vector<1x1x32x32xf32>
    %307 = vector.shape_cast %306 : vector<1x1x32x32xf32> to vector<32x32xf32>
    %308 = arith.addf %305, %307 : vector<32x32xf32>
    %309 = vector.extract_strided_slice %298 {offsets = [1, 1, 0, 0], sizes = [1, 1, 32, 32], strides = [1, 1, 1, 1]} : vector<4x8x32x32xf32> to vector<1x1x32x32xf32>
    %310 = vector.shape_cast %309 : vector<1x1x32x32xf32> to vector<32x32xf32>
    %311 = arith.addf %308, %310 : vector<32x32xf32>
    %cst_27 = arith.constant 2.500000e-01 : f32
    %312 = vector.broadcast %cst_27 : f32 to vector<32x32xf32>
    %313 = arith.mulf %311, %312 : vector<32x32xf32>
    %314 = vector.extract_strided_slice %298 {offsets = [0, 2, 0, 0], sizes = [1, 1, 32, 32], strides = [1, 1, 1, 1]} : vector<4x8x32x32xf32> to vector<1x1x32x32xf32>
    %315 = vector.shape_cast %314 : vector<1x1x32x32xf32> to vector<32x32xf32>
    %316 = vector.extract_strided_slice %298 {offsets = [0, 3, 0, 0], sizes = [1, 1, 32, 32], strides = [1, 1, 1, 1]} : vector<4x8x32x32xf32> to vector<1x1x32x32xf32>
    %317 = vector.shape_cast %316 : vector<1x1x32x32xf32> to vector<32x32xf32>
    %318 = arith.addf %315, %317 : vector<32x32xf32>
    %319 = vector.extract_strided_slice %298 {offsets = [1, 2, 0, 0], sizes = [1, 1, 32, 32], strides = [1, 1, 1, 1]} : vector<4x8x32x32xf32> to vector<1x1x32x32xf32>
    %320 = vector.shape_cast %319 : vector<1x1x32x32xf32> to vector<32x32xf32>
    %321 = arith.addf %318, %320 : vector<32x32xf32>
    %322 = vector.extract_strided_slice %298 {offsets = [1, 3, 0, 0], sizes = [1, 1, 32, 32], strides = [1, 1, 1, 1]} : vector<4x8x32x32xf32> to vector<1x1x32x32xf32>
    %323 = vector.shape_cast %322 : vector<1x1x32x32xf32> to vector<32x32xf32>
    %324 = arith.addf %321, %323 : vector<32x32xf32>
    %cst_28 = arith.constant 2.500000e-01 : f32
    %325 = vector.broadcast %cst_28 : f32 to vector<32x32xf32>
    %326 = arith.mulf %324, %325 : vector<32x32xf32>
    %327 = vector.extract_strided_slice %298 {offsets = [0, 4, 0, 0], sizes = [1, 1, 32, 32], strides = [1, 1, 1, 1]} : vector<4x8x32x32xf32> to vector<1x1x32x32xf32>
    %328 = vector.shape_cast %327 : vector<1x1x32x32xf32> to vector<32x32xf32>
    %329 = vector.extract_strided_slice %298 {offsets = [0, 5, 0, 0], sizes = [1, 1, 32, 32], strides = [1, 1, 1, 1]} : vector<4x8x32x32xf32> to vector<1x1x32x32xf32>
    %330 = vector.shape_cast %329 : vector<1x1x32x32xf32> to vector<32x32xf32>
    %331 = arith.addf %328, %330 : vector<32x32xf32>
    %332 = vector.extract_strided_slice %298 {offsets = [1, 4, 0, 0], sizes = [1, 1, 32, 32], strides = [1, 1, 1, 1]} : vector<4x8x32x32xf32> to vector<1x1x32x32xf32>
    %333 = vector.shape_cast %332 : vector<1x1x32x32xf32> to vector<32x32xf32>
    %334 = arith.addf %331, %333 : vector<32x32xf32>
    %335 = vector.extract_strided_slice %298 {offsets = [1, 5, 0, 0], sizes = [1, 1, 32, 32], strides = [1, 1, 1, 1]} : vector<4x8x32x32xf32> to vector<1x1x32x32xf32>
    %336 = vector.shape_cast %335 : vector<1x1x32x32xf32> to vector<32x32xf32>
    %337 = arith.addf %334, %336 : vector<32x32xf32>
    %cst_29 = arith.constant 2.500000e-01 : f32
    %338 = vector.broadcast %cst_29 : f32 to vector<32x32xf32>
    %339 = arith.mulf %337, %338 : vector<32x32xf32>
    %340 = vector.extract_strided_slice %298 {offsets = [0, 6, 0, 0], sizes = [1, 1, 32, 32], strides = [1, 1, 1, 1]} : vector<4x8x32x32xf32> to vector<1x1x32x32xf32>
    %341 = vector.shape_cast %340 : vector<1x1x32x32xf32> to vector<32x32xf32>
    %342 = vector.extract_strided_slice %298 {offsets = [0, 7, 0, 0], sizes = [1, 1, 32, 32], strides = [1, 1, 1, 1]} : vector<4x8x32x32xf32> to vector<1x1x32x32xf32>
    %343 = vector.shape_cast %342 : vector<1x1x32x32xf32> to vector<32x32xf32>
    %344 = arith.addf %341, %343 : vector<32x32xf32>
    %345 = vector.extract_strided_slice %298 {offsets = [1, 6, 0, 0], sizes = [1, 1, 32, 32], strides = [1, 1, 1, 1]} : vector<4x8x32x32xf32> to vector<1x1x32x32xf32>
    %346 = vector.shape_cast %345 : vector<1x1x32x32xf32> to vector<32x32xf32>
    %347 = arith.addf %344, %346 : vector<32x32xf32>
    %348 = vector.extract_strided_slice %298 {offsets = [1, 7, 0, 0], sizes = [1, 1, 32, 32], strides = [1, 1, 1, 1]} : vector<4x8x32x32xf32> to vector<1x1x32x32xf32>
    %349 = vector.shape_cast %348 : vector<1x1x32x32xf32> to vector<32x32xf32>
    %350 = arith.addf %347, %349 : vector<32x32xf32>
    %cst_30 = arith.constant 2.500000e-01 : f32
    %351 = vector.broadcast %cst_30 : f32 to vector<32x32xf32>
    %352 = arith.mulf %350, %351 : vector<32x32xf32>
    %353 = vector.extract_strided_slice %298 {offsets = [2, 0, 0, 0], sizes = [1, 1, 32, 32], strides = [1, 1, 1, 1]} : vector<4x8x32x32xf32> to vector<1x1x32x32xf32>
    %354 = vector.shape_cast %353 : vector<1x1x32x32xf32> to vector<32x32xf32>
    %355 = vector.extract_strided_slice %298 {offsets = [2, 1, 0, 0], sizes = [1, 1, 32, 32], strides = [1, 1, 1, 1]} : vector<4x8x32x32xf32> to vector<1x1x32x32xf32>
    %356 = vector.shape_cast %355 : vector<1x1x32x32xf32> to vector<32x32xf32>
    %357 = arith.addf %354, %356 : vector<32x32xf32>
    %358 = vector.extract_strided_slice %298 {offsets = [3, 0, 0, 0], sizes = [1, 1, 32, 32], strides = [1, 1, 1, 1]} : vector<4x8x32x32xf32> to vector<1x1x32x32xf32>
    %359 = vector.shape_cast %358 : vector<1x1x32x32xf32> to vector<32x32xf32>
    %360 = arith.addf %357, %359 : vector<32x32xf32>
    %361 = vector.extract_strided_slice %298 {offsets = [3, 1, 0, 0], sizes = [1, 1, 32, 32], strides = [1, 1, 1, 1]} : vector<4x8x32x32xf32> to vector<1x1x32x32xf32>
    %362 = vector.shape_cast %361 : vector<1x1x32x32xf32> to vector<32x32xf32>
    %363 = arith.addf %360, %362 : vector<32x32xf32>
    %cst_31 = arith.constant 2.500000e-01 : f32
    %364 = vector.broadcast %cst_31 : f32 to vector<32x32xf32>
    %365 = arith.mulf %363, %364 : vector<32x32xf32>
    %366 = vector.extract_strided_slice %298 {offsets = [2, 2, 0, 0], sizes = [1, 1, 32, 32], strides = [1, 1, 1, 1]} : vector<4x8x32x32xf32> to vector<1x1x32x32xf32>
    %367 = vector.shape_cast %366 : vector<1x1x32x32xf32> to vector<32x32xf32>
    %368 = vector.extract_strided_slice %298 {offsets = [2, 3, 0, 0], sizes = [1, 1, 32, 32], strides = [1, 1, 1, 1]} : vector<4x8x32x32xf32> to vector<1x1x32x32xf32>
    %369 = vector.shape_cast %368 : vector<1x1x32x32xf32> to vector<32x32xf32>
    %370 = arith.addf %367, %369 : vector<32x32xf32>
    %371 = vector.extract_strided_slice %298 {offsets = [3, 2, 0, 0], sizes = [1, 1, 32, 32], strides = [1, 1, 1, 1]} : vector<4x8x32x32xf32> to vector<1x1x32x32xf32>
    %372 = vector.shape_cast %371 : vector<1x1x32x32xf32> to vector<32x32xf32>
    %373 = arith.addf %370, %372 : vector<32x32xf32>
    %374 = vector.extract_strided_slice %298 {offsets = [3, 3, 0, 0], sizes = [1, 1, 32, 32], strides = [1, 1, 1, 1]} : vector<4x8x32x32xf32> to vector<1x1x32x32xf32>
    %375 = vector.shape_cast %374 : vector<1x1x32x32xf32> to vector<32x32xf32>
    %376 = arith.addf %373, %375 : vector<32x32xf32>
    %cst_32 = arith.constant 2.500000e-01 : f32
    %377 = vector.broadcast %cst_32 : f32 to vector<32x32xf32>
    %378 = arith.mulf %376, %377 : vector<32x32xf32>
    %379 = vector.extract_strided_slice %298 {offsets = [2, 4, 0, 0], sizes = [1, 1, 32, 32], strides = [1, 1, 1, 1]} : vector<4x8x32x32xf32> to vector<1x1x32x32xf32>
    %380 = vector.shape_cast %379 : vector<1x1x32x32xf32> to vector<32x32xf32>
    %381 = vector.extract_strided_slice %298 {offsets = [2, 5, 0, 0], sizes = [1, 1, 32, 32], strides = [1, 1, 1, 1]} : vector<4x8x32x32xf32> to vector<1x1x32x32xf32>
    %382 = vector.shape_cast %381 : vector<1x1x32x32xf32> to vector<32x32xf32>
    %383 = arith.addf %380, %382 : vector<32x32xf32>
    %384 = vector.extract_strided_slice %298 {offsets = [3, 4, 0, 0], sizes = [1, 1, 32, 32], strides = [1, 1, 1, 1]} : vector<4x8x32x32xf32> to vector<1x1x32x32xf32>
    %385 = vector.shape_cast %384 : vector<1x1x32x32xf32> to vector<32x32xf32>
    %386 = arith.addf %383, %385 : vector<32x32xf32>
    %387 = vector.extract_strided_slice %298 {offsets = [3, 5, 0, 0], sizes = [1, 1, 32, 32], strides = [1, 1, 1, 1]} : vector<4x8x32x32xf32> to vector<1x1x32x32xf32>
    %388 = vector.shape_cast %387 : vector<1x1x32x32xf32> to vector<32x32xf32>
    %389 = arith.addf %386, %388 : vector<32x32xf32>
    %cst_33 = arith.constant 2.500000e-01 : f32
    %390 = vector.broadcast %cst_33 : f32 to vector<32x32xf32>
    %391 = arith.mulf %389, %390 : vector<32x32xf32>
    %392 = vector.extract_strided_slice %298 {offsets = [2, 6, 0, 0], sizes = [1, 1, 32, 32], strides = [1, 1, 1, 1]} : vector<4x8x32x32xf32> to vector<1x1x32x32xf32>
    %393 = vector.shape_cast %392 : vector<1x1x32x32xf32> to vector<32x32xf32>
    %394 = vector.extract_strided_slice %298 {offsets = [2, 7, 0, 0], sizes = [1, 1, 32, 32], strides = [1, 1, 1, 1]} : vector<4x8x32x32xf32> to vector<1x1x32x32xf32>
    %395 = vector.shape_cast %394 : vector<1x1x32x32xf32> to vector<32x32xf32>
    %396 = arith.addf %393, %395 : vector<32x32xf32>
    %397 = vector.extract_strided_slice %298 {offsets = [3, 6, 0, 0], sizes = [1, 1, 32, 32], strides = [1, 1, 1, 1]} : vector<4x8x32x32xf32> to vector<1x1x32x32xf32>
    %398 = vector.shape_cast %397 : vector<1x1x32x32xf32> to vector<32x32xf32>
    %399 = arith.addf %396, %398 : vector<32x32xf32>
    %400 = vector.extract_strided_slice %298 {offsets = [3, 7, 0, 0], sizes = [1, 1, 32, 32], strides = [1, 1, 1, 1]} : vector<4x8x32x32xf32> to vector<1x1x32x32xf32>
    %401 = vector.shape_cast %400 : vector<1x1x32x32xf32> to vector<32x32xf32>
    %402 = arith.addf %399, %401 : vector<32x32xf32>
    %cst_34 = arith.constant 2.500000e-01 : f32
    %403 = vector.broadcast %cst_34 : f32 to vector<32x32xf32>
    %404 = arith.mulf %402, %403 : vector<32x32xf32>
    %405 = vector.shape_cast %313 : vector<32x32xf32> to vector<1x32x32xf32>
    %406 = vector.shape_cast %326 : vector<32x32xf32> to vector<1x32x32xf32>
    %407 = vector.shape_cast %339 : vector<32x32xf32> to vector<1x32x32xf32>
    %408 = vector.shape_cast %352 : vector<32x32xf32> to vector<1x32x32xf32>
    %409 = vector.shape_cast %365 : vector<32x32xf32> to vector<1x32x32xf32>
    %410 = vector.shape_cast %378 : vector<32x32xf32> to vector<1x32x32xf32>
    %411 = vector.shape_cast %391 : vector<32x32xf32> to vector<1x32x32xf32>
    %412 = vector.shape_cast %404 : vector<32x32xf32> to vector<1x32x32xf32>
    %413 = tpu.concatenate %405, %406, %407, %408, %409, %410, %411, %412 in 0 : vector<1x32x32xf32>, vector<1x32x32xf32>, vector<1x32x32xf32>, vector<1x32x32xf32>, vector<1x32x32xf32>, vector<1x32x32xf32>, vector<1x32x32xf32>, vector<1x32x32xf32> -> vector<8x32x32xf32>
    %414 = vector.shape_cast %413 : vector<8x32x32xf32> to vector<2x4x32x32xf32>
    %415 = vector.extract_strided_slice %414 {offsets = [0, 0, 0, 0], sizes = [1, 1, 32, 32], strides = [1, 1, 1, 1]} : vector<2x4x32x32xf32> to vector<1x1x32x32xf32>
    %416 = vector.shape_cast %415 : vector<1x1x32x32xf32> to vector<32x32xf32>
    %417 = vector.extract_strided_slice %414 {offsets = [0, 1, 0, 0], sizes = [1, 1, 32, 32], strides = [1, 1, 1, 1]} : vector<2x4x32x32xf32> to vector<1x1x32x32xf32>
    %418 = vector.shape_cast %417 : vector<1x1x32x32xf32> to vector<32x32xf32>
    %419 = vector.extract_strided_slice %414 {offsets = [0, 2, 0, 0], sizes = [1, 1, 32, 32], strides = [1, 1, 1, 1]} : vector<2x4x32x32xf32> to vector<1x1x32x32xf32>
    %420 = vector.shape_cast %419 : vector<1x1x32x32xf32> to vector<32x32xf32>
    %421 = vector.extract_strided_slice %414 {offsets = [0, 3, 0, 0], sizes = [1, 1, 32, 32], strides = [1, 1, 1, 1]} : vector<2x4x32x32xf32> to vector<1x1x32x32xf32>
    %422 = vector.shape_cast %421 : vector<1x1x32x32xf32> to vector<32x32xf32>
    %423 = vector.extract_strided_slice %414 {offsets = [1, 0, 0, 0], sizes = [1, 1, 32, 32], strides = [1, 1, 1, 1]} : vector<2x4x32x32xf32> to vector<1x1x32x32xf32>
    %424 = vector.shape_cast %423 : vector<1x1x32x32xf32> to vector<32x32xf32>
    %425 = vector.extract_strided_slice %414 {offsets = [1, 1, 0, 0], sizes = [1, 1, 32, 32], strides = [1, 1, 1, 1]} : vector<2x4x32x32xf32> to vector<1x1x32x32xf32>
    %426 = vector.shape_cast %425 : vector<1x1x32x32xf32> to vector<32x32xf32>
    %427 = vector.extract_strided_slice %414 {offsets = [1, 2, 0, 0], sizes = [1, 1, 32, 32], strides = [1, 1, 1, 1]} : vector<2x4x32x32xf32> to vector<1x1x32x32xf32>
    %428 = vector.shape_cast %427 : vector<1x1x32x32xf32> to vector<32x32xf32>
    %429 = vector.extract_strided_slice %414 {offsets = [1, 3, 0, 0], sizes = [1, 1, 32, 32], strides = [1, 1, 1, 1]} : vector<2x4x32x32xf32> to vector<1x1x32x32xf32>
    %430 = vector.shape_cast %429 : vector<1x1x32x32xf32> to vector<32x32xf32>
    %431 = tpu.concatenate %416, %418, %420, %422, %424, %426, %428, %430 in 0 : vector<32x32xf32>, vector<32x32xf32>, vector<32x32xf32>, vector<32x32xf32>, vector<32x32xf32>, vector<32x32xf32>, vector<32x32xf32>, vector<32x32xf32> -> vector<256x32xf32>
    %cst_35 = arith.constant dense<0.000000e+00> : vector<256x64xf32>
    %432 = tpu.matmul %431, %299, %cst_35 {dimension_numbers = #tpu.dot_dimension_numbers<[1], [0], [0], [1], [0, 0, 1, 1], [], []>} : vector<256x32xf32>, vector<32x64xf32>, vector<256x64xf32> -> vector<256x64xf32>
    %433 = vector.broadcast %300 : vector<1x64xf32> to vector<256x64xf32>
    %434 = arith.addf %432, %433 : vector<256x64xf32>
    %cst_36 = arith.constant 0.000000e+00 : f32
    %435 = vector.broadcast %cst_36 : f32 to vector<256x64xf32>
    %436 = arith.maximumf %434, %435 : vector<256x64xf32>
    %437 = vector.extract_strided_slice %436 {offsets = [0, 0], sizes = [32, 64], strides = [1, 1]} : vector<256x64xf32> to vector<32x64xf32>
    %438 = vector.extract_strided_slice %436 {offsets = [32, 0], sizes = [32, 64], strides = [1, 1]} : vector<256x64xf32> to vector<32x64xf32>
    %439 = vector.extract_strided_slice %436 {offsets = [64, 0], sizes = [32, 64], strides = [1, 1]} : vector<256x64xf32> to vector<32x64xf32>
    %440 = vector.extract_strided_slice %436 {offsets = [96, 0], sizes = [32, 64], strides = [1, 1]} : vector<256x64xf32> to vector<32x64xf32>
    %441 = vector.extract_strided_slice %436 {offsets = [128, 0], sizes = [32, 64], strides = [1, 1]} : vector<256x64xf32> to vector<32x64xf32>
    %442 = vector.extract_strided_slice %436 {offsets = [160, 0], sizes = [32, 64], strides = [1, 1]} : vector<256x64xf32> to vector<32x64xf32>
    %443 = vector.extract_strided_slice %436 {offsets = [192, 0], sizes = [32, 64], strides = [1, 1]} : vector<256x64xf32> to vector<32x64xf32>
    %444 = vector.extract_strided_slice %436 {offsets = [224, 0], sizes = [32, 64], strides = [1, 1]} : vector<256x64xf32> to vector<32x64xf32>
    %445 = vector.shape_cast %437 : vector<32x64xf32> to vector<1x32x64xf32>
    %446 = vector.shape_cast %438 : vector<32x64xf32> to vector<1x32x64xf32>
    %447 = vector.shape_cast %439 : vector<32x64xf32> to vector<1x32x64xf32>
    %448 = vector.shape_cast %440 : vector<32x64xf32> to vector<1x32x64xf32>
    %449 = vector.shape_cast %441 : vector<32x64xf32> to vector<1x32x64xf32>
    %450 = vector.shape_cast %442 : vector<32x64xf32> to vector<1x32x64xf32>
    %451 = vector.shape_cast %443 : vector<32x64xf32> to vector<1x32x64xf32>
    %452 = vector.shape_cast %444 : vector<32x64xf32> to vector<1x32x64xf32>
    %453 = tpu.concatenate %445, %446, %447, %448, %449, %450, %451, %452 in 0 : vector<1x32x64xf32>, vector<1x32x64xf32>, vector<1x32x64xf32>, vector<1x32x64xf32>, vector<1x32x64xf32>, vector<1x32x64xf32>, vector<1x32x64xf32>, vector<1x32x64xf32> -> vector<8x32x64xf32>
    %454 = vector.shape_cast %453 : vector<8x32x64xf32> to vector<2x4x32x64xf32>
    %c544 = arith.constant 544 : index
    %c0_37 = arith.constant 0 : index
    %455 = vector.load %arg2[%c544, %c0_37] : memref<1696x128xf32, #tpu.memory_space<vmem>>, vector<64x64xf32>
    %456 = vector.extract_strided_slice %0 {offsets = [5, 0], sizes = [1, 64], strides = [1, 1]} : vector<16x128xf32> to vector<1x64xf32>
    %457 = vector.extract_strided_slice %454 {offsets = [0, 0, 0, 0], sizes = [1, 1, 32, 64], strides = [1, 1, 1, 1]} : vector<2x4x32x64xf32> to vector<1x1x32x64xf32>
    %458 = vector.shape_cast %457 : vector<1x1x32x64xf32> to vector<32x64xf32>
    %459 = vector.extract_strided_slice %454 {offsets = [0, 1, 0, 0], sizes = [1, 1, 32, 64], strides = [1, 1, 1, 1]} : vector<2x4x32x64xf32> to vector<1x1x32x64xf32>
    %460 = vector.shape_cast %459 : vector<1x1x32x64xf32> to vector<32x64xf32>
    %461 = arith.addf %458, %460 : vector<32x64xf32>
    %462 = vector.extract_strided_slice %454 {offsets = [0, 2, 0, 0], sizes = [1, 1, 32, 64], strides = [1, 1, 1, 1]} : vector<2x4x32x64xf32> to vector<1x1x32x64xf32>
    %463 = vector.shape_cast %462 : vector<1x1x32x64xf32> to vector<32x64xf32>
    %464 = arith.addf %461, %463 : vector<32x64xf32>
    %465 = vector.extract_strided_slice %454 {offsets = [0, 3, 0, 0], sizes = [1, 1, 32, 64], strides = [1, 1, 1, 1]} : vector<2x4x32x64xf32> to vector<1x1x32x64xf32>
    %466 = vector.shape_cast %465 : vector<1x1x32x64xf32> to vector<32x64xf32>
    %467 = arith.addf %464, %466 : vector<32x64xf32>
    %468 = vector.extract_strided_slice %454 {offsets = [1, 0, 0, 0], sizes = [1, 1, 32, 64], strides = [1, 1, 1, 1]} : vector<2x4x32x64xf32> to vector<1x1x32x64xf32>
    %469 = vector.shape_cast %468 : vector<1x1x32x64xf32> to vector<32x64xf32>
    %470 = arith.addf %467, %469 : vector<32x64xf32>
    %471 = vector.extract_strided_slice %454 {offsets = [1, 1, 0, 0], sizes = [1, 1, 32, 64], strides = [1, 1, 1, 1]} : vector<2x4x32x64xf32> to vector<1x1x32x64xf32>
    %472 = vector.shape_cast %471 : vector<1x1x32x64xf32> to vector<32x64xf32>
    %473 = arith.addf %470, %472 : vector<32x64xf32>
    %474 = vector.extract_strided_slice %454 {offsets = [1, 2, 0, 0], sizes = [1, 1, 32, 64], strides = [1, 1, 1, 1]} : vector<2x4x32x64xf32> to vector<1x1x32x64xf32>
    %475 = vector.shape_cast %474 : vector<1x1x32x64xf32> to vector<32x64xf32>
    %476 = arith.addf %473, %475 : vector<32x64xf32>
    %477 = vector.extract_strided_slice %454 {offsets = [1, 3, 0, 0], sizes = [1, 1, 32, 64], strides = [1, 1, 1, 1]} : vector<2x4x32x64xf32> to vector<1x1x32x64xf32>
    %478 = vector.shape_cast %477 : vector<1x1x32x64xf32> to vector<32x64xf32>
    %479 = arith.addf %476, %478 : vector<32x64xf32>
    %cst_38 = arith.constant 1.250000e-01 : f32
    %480 = vector.broadcast %cst_38 : f32 to vector<32x64xf32>
    %481 = arith.mulf %479, %480 : vector<32x64xf32>
    %482 = vector.shape_cast %481 : vector<32x64xf32> to vector<1x32x64xf32>
    %483 = vector.shape_cast %482 : vector<1x32x64xf32> to vector<1x1x32x64xf32>
    %484 = vector.shape_cast %483 : vector<1x1x32x64xf32> to vector<32x64xf32>
    %cst_39 = arith.constant dense<0.000000e+00> : vector<32x64xf32>
    %485 = tpu.matmul %484, %455, %cst_39 {dimension_numbers = #tpu.dot_dimension_numbers<[1], [0], [0], [1], [0, 0, 1, 1], [], []>} : vector<32x64xf32>, vector<64x64xf32>, vector<32x64xf32> -> vector<32x64xf32>
    %486 = vector.broadcast %456 : vector<1x64xf32> to vector<32x64xf32>
    %487 = arith.addf %485, %486 : vector<32x64xf32>
    %cst_40 = arith.constant 0.000000e+00 : f32
    %488 = vector.broadcast %cst_40 : f32 to vector<32x64xf32>
    %489 = arith.maximumf %487, %488 : vector<32x64xf32>
    %490 = vector.shape_cast %489 : vector<32x64xf32> to vector<1x32x64xf32>
    %491 = vector.shape_cast %490 : vector<1x32x64xf32> to vector<1x1x32x64xf32>
    %492 = vector.extract_strided_slice %454 {offsets = [1, 3, 0, 0], sizes = [1, 1, 32, 64], strides = [1, 1, 1, 1]} : vector<2x4x32x64xf32> to vector<1x1x32x64xf32>
    %493 = arith.addf %492, %491 : vector<1x1x32x64xf32>
    %494 = vector.shape_cast %493 : vector<1x1x32x64xf32> to vector<32x64xf32>
    %c0_41 = arith.constant 0 : index
    %c0_42 = arith.constant 0 : index
    %c0_43 = arith.constant 0 : index
    %c0_44 = arith.constant 0 : index
    %495 = vector.load %arg5[%c0_41, %c0_42, %c0_43, %c0_44] : memref<4x8x32x32xf32, #tpu.memory_space<vmem>>, vector<4x8x32x32xf32>
    %c0_45 = arith.constant 0 : index
    %c0_46 = arith.constant 0 : index
    %496 = vector.load %arg2[%c0_45, %c0_46] : memref<1696x128xf32, #tpu.memory_space<vmem>>, vector<128x48xf32>
    %497 = vector.extract_strided_slice %0 {offsets = [2, 0], sizes = [1, 48], strides = [1, 1]} : vector<16x128xf32> to vector<1x48xf32>
    %498 = vector.extract_strided_slice %495 {offsets = [0, 0, 0, 0], sizes = [1, 1, 32, 32], strides = [1, 1, 1, 1]} : vector<4x8x32x32xf32> to vector<1x1x32x32xf32>
    %499 = vector.shape_cast %498 : vector<1x1x32x32xf32> to vector<32x32xf32>
    %500 = vector.extract_strided_slice %495 {offsets = [1, 0, 0, 0], sizes = [1, 1, 32, 32], strides = [1, 1, 1, 1]} : vector<4x8x32x32xf32> to vector<1x1x32x32xf32>
    %501 = vector.shape_cast %500 : vector<1x1x32x32xf32> to vector<32x32xf32>
    %502 = vector.extract_strided_slice %495 {offsets = [2, 0, 0, 0], sizes = [1, 1, 32, 32], strides = [1, 1, 1, 1]} : vector<4x8x32x32xf32> to vector<1x1x32x32xf32>
    %503 = vector.shape_cast %502 : vector<1x1x32x32xf32> to vector<32x32xf32>
    %504 = vector.extract_strided_slice %495 {offsets = [3, 0, 0, 0], sizes = [1, 1, 32, 32], strides = [1, 1, 1, 1]} : vector<4x8x32x32xf32> to vector<1x1x32x32xf32>
    %505 = vector.shape_cast %504 : vector<1x1x32x32xf32> to vector<32x32xf32>
    %506 = tpu.concatenate %499, %501, %503, %505 in 1 : vector<32x32xf32>, vector<32x32xf32>, vector<32x32xf32>, vector<32x32xf32> -> vector<32x128xf32>
    %507 = vector.extract_strided_slice %495 {offsets = [0, 1, 0, 0], sizes = [1, 1, 32, 32], strides = [1, 1, 1, 1]} : vector<4x8x32x32xf32> to vector<1x1x32x32xf32>
    %508 = vector.shape_cast %507 : vector<1x1x32x32xf32> to vector<32x32xf32>
    %509 = vector.extract_strided_slice %495 {offsets = [1, 1, 0, 0], sizes = [1, 1, 32, 32], strides = [1, 1, 1, 1]} : vector<4x8x32x32xf32> to vector<1x1x32x32xf32>
    %510 = vector.shape_cast %509 : vector<1x1x32x32xf32> to vector<32x32xf32>
    %511 = vector.extract_strided_slice %495 {offsets = [2, 1, 0, 0], sizes = [1, 1, 32, 32], strides = [1, 1, 1, 1]} : vector<4x8x32x32xf32> to vector<1x1x32x32xf32>
    %512 = vector.shape_cast %511 : vector<1x1x32x32xf32> to vector<32x32xf32>
    %513 = vector.extract_strided_slice %495 {offsets = [3, 1, 0, 0], sizes = [1, 1, 32, 32], strides = [1, 1, 1, 1]} : vector<4x8x32x32xf32> to vector<1x1x32x32xf32>
    %514 = vector.shape_cast %513 : vector<1x1x32x32xf32> to vector<32x32xf32>
    %515 = tpu.concatenate %508, %510, %512, %514 in 1 : vector<32x32xf32>, vector<32x32xf32>, vector<32x32xf32>, vector<32x32xf32> -> vector<32x128xf32>
    %516 = vector.extract_strided_slice %495 {offsets = [0, 2, 0, 0], sizes = [1, 1, 32, 32], strides = [1, 1, 1, 1]} : vector<4x8x32x32xf32> to vector<1x1x32x32xf32>
    %517 = vector.shape_cast %516 : vector<1x1x32x32xf32> to vector<32x32xf32>
    %518 = vector.extract_strided_slice %495 {offsets = [1, 2, 0, 0], sizes = [1, 1, 32, 32], strides = [1, 1, 1, 1]} : vector<4x8x32x32xf32> to vector<1x1x32x32xf32>
    %519 = vector.shape_cast %518 : vector<1x1x32x32xf32> to vector<32x32xf32>
    %520 = vector.extract_strided_slice %495 {offsets = [2, 2, 0, 0], sizes = [1, 1, 32, 32], strides = [1, 1, 1, 1]} : vector<4x8x32x32xf32> to vector<1x1x32x32xf32>
    %521 = vector.shape_cast %520 : vector<1x1x32x32xf32> to vector<32x32xf32>
    %522 = vector.extract_strided_slice %495 {offsets = [3, 2, 0, 0], sizes = [1, 1, 32, 32], strides = [1, 1, 1, 1]} : vector<4x8x32x32xf32> to vector<1x1x32x32xf32>
    %523 = vector.shape_cast %522 : vector<1x1x32x32xf32> to vector<32x32xf32>
    %524 = tpu.concatenate %517, %519, %521, %523 in 1 : vector<32x32xf32>, vector<32x32xf32>, vector<32x32xf32>, vector<32x32xf32> -> vector<32x128xf32>
    %525 = vector.extract_strided_slice %495 {offsets = [0, 3, 0, 0], sizes = [1, 1, 32, 32], strides = [1, 1, 1, 1]} : vector<4x8x32x32xf32> to vector<1x1x32x32xf32>
    %526 = vector.shape_cast %525 : vector<1x1x32x32xf32> to vector<32x32xf32>
    %527 = vector.extract_strided_slice %495 {offsets = [1, 3, 0, 0], sizes = [1, 1, 32, 32], strides = [1, 1, 1, 1]} : vector<4x8x32x32xf32> to vector<1x1x32x32xf32>
    %528 = vector.shape_cast %527 : vector<1x1x32x32xf32> to vector<32x32xf32>
    %529 = vector.extract_strided_slice %495 {offsets = [2, 3, 0, 0], sizes = [1, 1, 32, 32], strides = [1, 1, 1, 1]} : vector<4x8x32x32xf32> to vector<1x1x32x32xf32>
    %530 = vector.shape_cast %529 : vector<1x1x32x32xf32> to vector<32x32xf32>
    %531 = vector.extract_strided_slice %495 {offsets = [3, 3, 0, 0], sizes = [1, 1, 32, 32], strides = [1, 1, 1, 1]} : vector<4x8x32x32xf32> to vector<1x1x32x32xf32>
    %532 = vector.shape_cast %531 : vector<1x1x32x32xf32> to vector<32x32xf32>
    %533 = tpu.concatenate %526, %528, %530, %532 in 1 : vector<32x32xf32>, vector<32x32xf32>, vector<32x32xf32>, vector<32x32xf32> -> vector<32x128xf32>
    %534 = vector.extract_strided_slice %495 {offsets = [0, 4, 0, 0], sizes = [1, 1, 32, 32], strides = [1, 1, 1, 1]} : vector<4x8x32x32xf32> to vector<1x1x32x32xf32>
    %535 = vector.shape_cast %534 : vector<1x1x32x32xf32> to vector<32x32xf32>
    %536 = vector.extract_strided_slice %495 {offsets = [1, 4, 0, 0], sizes = [1, 1, 32, 32], strides = [1, 1, 1, 1]} : vector<4x8x32x32xf32> to vector<1x1x32x32xf32>
    %537 = vector.shape_cast %536 : vector<1x1x32x32xf32> to vector<32x32xf32>
    %538 = vector.extract_strided_slice %495 {offsets = [2, 4, 0, 0], sizes = [1, 1, 32, 32], strides = [1, 1, 1, 1]} : vector<4x8x32x32xf32> to vector<1x1x32x32xf32>
    %539 = vector.shape_cast %538 : vector<1x1x32x32xf32> to vector<32x32xf32>
    %540 = vector.extract_strided_slice %495 {offsets = [3, 4, 0, 0], sizes = [1, 1, 32, 32], strides = [1, 1, 1, 1]} : vector<4x8x32x32xf32> to vector<1x1x32x32xf32>
    %541 = vector.shape_cast %540 : vector<1x1x32x32xf32> to vector<32x32xf32>
    %542 = tpu.concatenate %535, %537, %539, %541 in 1 : vector<32x32xf32>, vector<32x32xf32>, vector<32x32xf32>, vector<32x32xf32> -> vector<32x128xf32>
    %543 = vector.extract_strided_slice %495 {offsets = [0, 5, 0, 0], sizes = [1, 1, 32, 32], strides = [1, 1, 1, 1]} : vector<4x8x32x32xf32> to vector<1x1x32x32xf32>
    %544 = vector.shape_cast %543 : vector<1x1x32x32xf32> to vector<32x32xf32>
    %545 = vector.extract_strided_slice %495 {offsets = [1, 5, 0, 0], sizes = [1, 1, 32, 32], strides = [1, 1, 1, 1]} : vector<4x8x32x32xf32> to vector<1x1x32x32xf32>
    %546 = vector.shape_cast %545 : vector<1x1x32x32xf32> to vector<32x32xf32>
    %547 = vector.extract_strided_slice %495 {offsets = [2, 5, 0, 0], sizes = [1, 1, 32, 32], strides = [1, 1, 1, 1]} : vector<4x8x32x32xf32> to vector<1x1x32x32xf32>
    %548 = vector.shape_cast %547 : vector<1x1x32x32xf32> to vector<32x32xf32>
    %549 = vector.extract_strided_slice %495 {offsets = [3, 5, 0, 0], sizes = [1, 1, 32, 32], strides = [1, 1, 1, 1]} : vector<4x8x32x32xf32> to vector<1x1x32x32xf32>
    %550 = vector.shape_cast %549 : vector<1x1x32x32xf32> to vector<32x32xf32>
    %551 = tpu.concatenate %544, %546, %548, %550 in 1 : vector<32x32xf32>, vector<32x32xf32>, vector<32x32xf32>, vector<32x32xf32> -> vector<32x128xf32>
    %552 = vector.extract_strided_slice %495 {offsets = [0, 6, 0, 0], sizes = [1, 1, 32, 32], strides = [1, 1, 1, 1]} : vector<4x8x32x32xf32> to vector<1x1x32x32xf32>
    %553 = vector.shape_cast %552 : vector<1x1x32x32xf32> to vector<32x32xf32>
    %554 = vector.extract_strided_slice %495 {offsets = [1, 6, 0, 0], sizes = [1, 1, 32, 32], strides = [1, 1, 1, 1]} : vector<4x8x32x32xf32> to vector<1x1x32x32xf32>
    %555 = vector.shape_cast %554 : vector<1x1x32x32xf32> to vector<32x32xf32>
    %556 = vector.extract_strided_slice %495 {offsets = [2, 6, 0, 0], sizes = [1, 1, 32, 32], strides = [1, 1, 1, 1]} : vector<4x8x32x32xf32> to vector<1x1x32x32xf32>
    %557 = vector.shape_cast %556 : vector<1x1x32x32xf32> to vector<32x32xf32>
    %558 = vector.extract_strided_slice %495 {offsets = [3, 6, 0, 0], sizes = [1, 1, 32, 32], strides = [1, 1, 1, 1]} : vector<4x8x32x32xf32> to vector<1x1x32x32xf32>
    %559 = vector.shape_cast %558 : vector<1x1x32x32xf32> to vector<32x32xf32>
    %560 = tpu.concatenate %553, %555, %557, %559 in 1 : vector<32x32xf32>, vector<32x32xf32>, vector<32x32xf32>, vector<32x32xf32> -> vector<32x128xf32>
    %561 = vector.extract_strided_slice %495 {offsets = [0, 7, 0, 0], sizes = [1, 1, 32, 32], strides = [1, 1, 1, 1]} : vector<4x8x32x32xf32> to vector<1x1x32x32xf32>
    %562 = vector.shape_cast %561 : vector<1x1x32x32xf32> to vector<32x32xf32>
    %563 = vector.extract_strided_slice %495 {offsets = [1, 7, 0, 0], sizes = [1, 1, 32, 32], strides = [1, 1, 1, 1]} : vector<4x8x32x32xf32> to vector<1x1x32x32xf32>
    %564 = vector.shape_cast %563 : vector<1x1x32x32xf32> to vector<32x32xf32>
    %565 = vector.extract_strided_slice %495 {offsets = [2, 7, 0, 0], sizes = [1, 1, 32, 32], strides = [1, 1, 1, 1]} : vector<4x8x32x32xf32> to vector<1x1x32x32xf32>
    %566 = vector.shape_cast %565 : vector<1x1x32x32xf32> to vector<32x32xf32>
    %567 = vector.extract_strided_slice %495 {offsets = [3, 7, 0, 0], sizes = [1, 1, 32, 32], strides = [1, 1, 1, 1]} : vector<4x8x32x32xf32> to vector<1x1x32x32xf32>
    %568 = vector.shape_cast %567 : vector<1x1x32x32xf32> to vector<32x32xf32>
    %569 = tpu.concatenate %562, %564, %566, %568 in 1 : vector<32x32xf32>, vector<32x32xf32>, vector<32x32xf32>, vector<32x32xf32> -> vector<32x128xf32>
    %570 = tpu.concatenate %506, %515, %524, %533, %542, %551, %560, %569 in 0 : vector<32x128xf32>, vector<32x128xf32>, vector<32x128xf32>, vector<32x128xf32>, vector<32x128xf32>, vector<32x128xf32>, vector<32x128xf32>, vector<32x128xf32> -> vector<256x128xf32>
    %cst_47 = arith.constant dense<0.000000e+00> : vector<256x48xf32>
    %571 = tpu.matmul %570, %496, %cst_47 {dimension_numbers = #tpu.dot_dimension_numbers<[1], [0], [0], [1], [0, 0, 1, 1], [], []>} : vector<256x128xf32>, vector<128x48xf32>, vector<256x48xf32> -> vector<256x48xf32>
    %572 = vector.broadcast %497 : vector<1x48xf32> to vector<256x48xf32>
    %573 = arith.addf %571, %572 : vector<256x48xf32>
    %cst_48 = arith.constant 0.000000e+00 : f32
    %574 = vector.broadcast %cst_48 : f32 to vector<256x48xf32>
    %575 = arith.maximumf %573, %574 : vector<256x48xf32>
    %576 = vector.extract_strided_slice %575 {offsets = [0, 0], sizes = [32, 48], strides = [1, 1]} : vector<256x48xf32> to vector<32x48xf32>
    %577 = vector.extract_strided_slice %575 {offsets = [32, 0], sizes = [32, 48], strides = [1, 1]} : vector<256x48xf32> to vector<32x48xf32>
    %578 = vector.extract_strided_slice %575 {offsets = [64, 0], sizes = [32, 48], strides = [1, 1]} : vector<256x48xf32> to vector<32x48xf32>
    %579 = vector.extract_strided_slice %575 {offsets = [96, 0], sizes = [32, 48], strides = [1, 1]} : vector<256x48xf32> to vector<32x48xf32>
    %580 = vector.extract_strided_slice %575 {offsets = [128, 0], sizes = [32, 48], strides = [1, 1]} : vector<256x48xf32> to vector<32x48xf32>
    %581 = vector.extract_strided_slice %575 {offsets = [160, 0], sizes = [32, 48], strides = [1, 1]} : vector<256x48xf32> to vector<32x48xf32>
    %582 = vector.extract_strided_slice %575 {offsets = [192, 0], sizes = [32, 48], strides = [1, 1]} : vector<256x48xf32> to vector<32x48xf32>
    %583 = vector.extract_strided_slice %575 {offsets = [224, 0], sizes = [32, 48], strides = [1, 1]} : vector<256x48xf32> to vector<32x48xf32>
    %584 = vector.shape_cast %576 : vector<32x48xf32> to vector<1x32x48xf32>
    %585 = vector.shape_cast %577 : vector<32x48xf32> to vector<1x32x48xf32>
    %586 = vector.shape_cast %578 : vector<32x48xf32> to vector<1x32x48xf32>
    %587 = vector.shape_cast %579 : vector<32x48xf32> to vector<1x32x48xf32>
    %588 = vector.shape_cast %580 : vector<32x48xf32> to vector<1x32x48xf32>
    %589 = vector.shape_cast %581 : vector<32x48xf32> to vector<1x32x48xf32>
    %590 = vector.shape_cast %582 : vector<32x48xf32> to vector<1x32x48xf32>
    %591 = vector.shape_cast %583 : vector<32x48xf32> to vector<1x32x48xf32>
    %592 = tpu.concatenate %584, %585, %586, %587, %588, %589, %590, %591 in 0 : vector<1x32x48xf32>, vector<1x32x48xf32>, vector<1x32x48xf32>, vector<1x32x48xf32>, vector<1x32x48xf32>, vector<1x32x48xf32>, vector<1x32x48xf32>, vector<1x32x48xf32> -> vector<8x32x48xf32>
    %593 = vector.shape_cast %592 : vector<8x32x48xf32> to vector<1x8x32x48xf32>
    %c128 = arith.constant 128 : index
    %c0_49 = arith.constant 0 : index
    %594 = vector.load %arg2[%c128, %c0_49] : memref<1696x128xf32, #tpu.memory_space<vmem>>, vector<384x64xf32>
    %595 = vector.extract_strided_slice %0 {offsets = [3, 0], sizes = [1, 64], strides = [1, 1]} : vector<16x128xf32> to vector<1x64xf32>
    %596 = vector.extract_strided_slice %593 {offsets = [0, 0, 0, 0], sizes = [1, 1, 32, 48], strides = [1, 1, 1, 1]} : vector<1x8x32x48xf32> to vector<1x1x32x48xf32>
    %597 = vector.shape_cast %596 : vector<1x1x32x48xf32> to vector<32x48xf32>
    %598 = vector.extract_strided_slice %593 {offsets = [0, 1, 0, 0], sizes = [1, 1, 32, 48], strides = [1, 1, 1, 1]} : vector<1x8x32x48xf32> to vector<1x1x32x48xf32>
    %599 = vector.shape_cast %598 : vector<1x1x32x48xf32> to vector<32x48xf32>
    %600 = vector.extract_strided_slice %593 {offsets = [0, 2, 0, 0], sizes = [1, 1, 32, 48], strides = [1, 1, 1, 1]} : vector<1x8x32x48xf32> to vector<1x1x32x48xf32>
    %601 = vector.shape_cast %600 : vector<1x1x32x48xf32> to vector<32x48xf32>
    %602 = vector.extract_strided_slice %593 {offsets = [0, 3, 0, 0], sizes = [1, 1, 32, 48], strides = [1, 1, 1, 1]} : vector<1x8x32x48xf32> to vector<1x1x32x48xf32>
    %603 = vector.shape_cast %602 : vector<1x1x32x48xf32> to vector<32x48xf32>
    %604 = vector.extract_strided_slice %593 {offsets = [0, 4, 0, 0], sizes = [1, 1, 32, 48], strides = [1, 1, 1, 1]} : vector<1x8x32x48xf32> to vector<1x1x32x48xf32>
    %605 = vector.shape_cast %604 : vector<1x1x32x48xf32> to vector<32x48xf32>
    %606 = vector.extract_strided_slice %593 {offsets = [0, 5, 0, 0], sizes = [1, 1, 32, 48], strides = [1, 1, 1, 1]} : vector<1x8x32x48xf32> to vector<1x1x32x48xf32>
    %607 = vector.shape_cast %606 : vector<1x1x32x48xf32> to vector<32x48xf32>
    %608 = vector.extract_strided_slice %593 {offsets = [0, 6, 0, 0], sizes = [1, 1, 32, 48], strides = [1, 1, 1, 1]} : vector<1x8x32x48xf32> to vector<1x1x32x48xf32>
    %609 = vector.shape_cast %608 : vector<1x1x32x48xf32> to vector<32x48xf32>
    %610 = vector.extract_strided_slice %593 {offsets = [0, 7, 0, 0], sizes = [1, 1, 32, 48], strides = [1, 1, 1, 1]} : vector<1x8x32x48xf32> to vector<1x1x32x48xf32>
    %611 = vector.shape_cast %610 : vector<1x1x32x48xf32> to vector<32x48xf32>
    %612 = tpu.concatenate %597, %599, %601, %603, %605, %607, %609, %611 in 1 : vector<32x48xf32>, vector<32x48xf32>, vector<32x48xf32>, vector<32x48xf32>, vector<32x48xf32>, vector<32x48xf32>, vector<32x48xf32>, vector<32x48xf32> -> vector<32x384xf32>
    %cst_50 = arith.constant dense<0.000000e+00> : vector<32x64xf32>
    %613 = tpu.matmul %612, %594, %cst_50 {dimension_numbers = #tpu.dot_dimension_numbers<[1], [0], [0], [1], [0, 0, 1, 1], [], []>} : vector<32x384xf32>, vector<384x64xf32>, vector<32x64xf32> -> vector<32x64xf32>
    %614 = vector.broadcast %595 : vector<1x64xf32> to vector<32x64xf32>
    %615 = arith.addf %613, %614 : vector<32x64xf32>
    %cst_51 = arith.constant 0.000000e+00 : f32
    %616 = vector.broadcast %cst_51 : f32 to vector<32x64xf32>
    %617 = arith.maximumf %615, %616 : vector<32x64xf32>
    %618 = vector.shape_cast %617 : vector<32x64xf32> to vector<1x32x64xf32>
    %619 = vector.shape_cast %618 : vector<1x32x64xf32> to vector<1x1x32x64xf32>
    %620 = vector.shape_cast %619 : vector<1x1x32x64xf32> to vector<32x64xf32>
    %621 = tpu.concatenate %494, %297, %620 in 1 : vector<32x64xf32>, vector<32x64xf32>, vector<32x64xf32> -> vector<32x192xf32>
    %c1440 = arith.constant 1440 : index
    %c0_52 = arith.constant 0 : index
    %622 = vector.load %arg2[%c1440, %c0_52] : memref<1696x128xf32, #tpu.memory_space<vmem>>, vector<192x64xf32>
    %623 = vector.extract_strided_slice %0 {offsets = [9, 0], sizes = [1, 64], strides = [1, 1]} : vector<16x128xf32> to vector<1x64xf32>
    %cst_53 = arith.constant dense<0.000000e+00> : vector<32x64xf32>
    %624 = tpu.matmul %621, %622, %cst_53 {dimension_numbers = #tpu.dot_dimension_numbers<[1], [0], [0], [1], [0, 0, 1, 1], [], []>} : vector<32x192xf32>, vector<192x64xf32>, vector<32x64xf32> -> vector<32x64xf32>
    %625 = vector.broadcast %623 : vector<1x64xf32> to vector<32x64xf32>
    %626 = arith.addf %624, %625 : vector<32x64xf32>
    %cst_54 = arith.constant 0.000000e+00 : f32
    %627 = vector.broadcast %cst_54 : f32 to vector<32x64xf32>
    %628 = arith.maximumf %626, %627 : vector<32x64xf32>
    %c1632 = arith.constant 1632 : index
    %c0_55 = arith.constant 0 : index
    %629 = vector.load %arg2[%c1632, %c0_55] : memref<1696x128xf32, #tpu.memory_space<vmem>>, vector<64x128xf32>
    %630 = vector.extract_strided_slice %0 {offsets = [10, 0], sizes = [1, 128], strides = [1, 1]} : vector<16x128xf32> to vector<1x128xf32>
    %cst_56 = arith.constant dense<0.000000e+00> : vector<32x128xf32>
    %631 = tpu.matmul %628, %629, %cst_56 {dimension_numbers = #tpu.dot_dimension_numbers<[1], [0], [0], [1], [0, 0, 1, 1], [], []>} : vector<32x64xf32>, vector<64x128xf32>, vector<32x128xf32> -> vector<32x128xf32>
    %632 = vector.broadcast %630 : vector<1x128xf32> to vector<32x128xf32>
    %633 = arith.addf %631, %632 : vector<32x128xf32>
    %c0_57 = arith.constant 0 : index
    %c0_58 = arith.constant 0 : index
    %634 = vector.load %arg4[%c0_57, %c0_58] : memref<32x128xf32, #tpu.memory_space<vmem>>, vector<32x128xf32>
    tpu.vector_store %arg4[%c0_57, %c0_58], %633 {strides = array<i32>} : memref<32x128xf32, #tpu.memory_space<vmem>>, vector<32x128xf32>,
    return
  }
  func.func @transform_0(%arg0: i32) -> (i32, i32, i32, i32) {
    %c0_i32 = arith.constant 0 : i32
    %c0_i32_0 = arith.constant 0 : i32
    %c0_i32_1 = arith.constant 0 : i32
    %c0_i32_2 = arith.constant 0 : i32
    return %c0_i32, %c0_i32_0, %arg0, %c0_i32_1 : i32, i32, i32, i32
  }
  func.func @transform_1(%arg0: i32) -> (i32, i32) {
    %c0_i32 = arith.constant 0 : i32
    %c0_i32_0 = arith.constant 0 : i32
    %c0_i32_1 = arith.constant 0 : i32
    return %c0_i32, %c0_i32_0 : i32, i32
  }
  func.func @transform_2(%arg0: i32) -> (i32, i32) {
    %c0_i32 = arith.constant 0 : i32
    %c0_i32_0 = arith.constant 0 : i32
    %c0_i32_1 = arith.constant 0 : i32
    return %c0_i32, %c0_i32_0 : i32, i32
  }
  func.func @transform_3(%arg0: i32) -> (i32, i32) {
    %c0_i32 = arith.constant 0 : i32
    %c0_i32_0 = arith.constant 0 : i32
    return %arg0, %c0_i32 : i32, i32
  }
}

</mosaic_0001>

<bundles_post_ra>
// kernel: tpu_custom_call.1
= control target key start
LH: loop header
LB: loop body
LE: loop exit
PB: predicated region body
PF: predicated region fallthrough
CT: control target
= control target key end

     0   :  { %8 = vsyncpa [#allocation4], 0  ;;  %s10373_s0 = inlined_call_operand.vmem [shape: f32[4,8,32,1], index: 0, kind: input, shape index: {}]   ;;  %s10374_s1 = inlined_call_operand.hbm [shape: f32[1696,128], index: 1, kind: input, shape index: {}]   ;;  %s10375_s2 = inlined_call_operand.vmem [shape: f32[16,128], index: 2, kind: input, shape index: {}]   ;;  %s10376_s3 = inlined_call_operand.hbm [shape: f32[32,128], index: 3, kind: output, shape index: {}]  }
   0x1   :  { %9 = vsyncpa [#allocation5], 0  ;;  %s7113_s12 = smov [#allocation3]   ;;  %s7065_s16 = scalar_lea.hbm %s10374_s1, 27136 }
   0x2   :  { %s17_s13 = sshll.u32 %s7113_s12, 4  ;;  %p7066_p0 = scmp.ne.s32.totalorder %s10374_s1, %s7065_s16  ;;  %s18_s13 = int_to_ptr.vmem [resolvable:$true] %s17_s13 }
   0x3   :  { %p7069_p1 = scmp.lt.u32.totalorder %s7065_s16, %s10374_s1 }
   0x5   :  { %p7071_p2 = pnand %p7069_p1, %p7066_p0 }
   0x7   :  { %7074 = shalt.err (!%p7071_p2)
}
   0x8   :  { %s7075_s21 = scalar_lea.vmem %s18_s13, 27136  ;;  %p7080_p4 = scmp.lt.s32.totalorder %s18_s13, %s18_s13 }
   0x9   :  { %p7076_p3 = scmp.ne.s32.totalorder %s18_s13, %s7075_s21  ;;  %p7081_p5 = scmp.lt.s32.totalorder %s7075_s21, %s7075_s21 }
   0xb   :  { %p7082_p6 = por %p7081_p5, %p7080_p4 }
   0xd   :  { %p7083_p7 = pnand %p7082_p6, %p7076_p3 }
   0xf   :  { %7086 = shalt.err (!%p7083_p7)
}
  0x10   :  { %s7114_s22 = smov 128   ;;  %s7115_s23 = smov 8  }
  0x11   :  { %23 = dma.hbm_to_vmem [thread:$0]  %s10374_s1, 27136, %s18_s13, [#allocation4], %s7114_s22, %s7114_s22, %s7115_s23  }
  0x12   :  { %7109 = dma.done.wait [#allocation4], 27136  }
  0x13   :  { %7110 = vsyncadd [#allocation4], 4294940160  ;;  %v7116_v0 = vmov 0   ;;  %v79_v1 = vld [vmem:[%s10373_s0 + $0x180] sm:$0xff]  ;;  %v48_v5 = vld [vmem:[%s10373_s0 + $0x88] sm:$0xff]  ;;  %v10379_v60 = vmov 0.0|0.0  }
  0x14   :  { %6338 = vset.pattern.permute.xlu1 %v7116_v0  ;;  %6337 = vset.pattern.permute.xlu0 %v7116_v0  ;;  %v39_v2 = vld [vmem:[%s10373_s0 + $0x40] sm:$0xff]  ;;  %v40_v6 = vld [vmem:[%s10373_s0 + $0x48] sm:$0xff]  ;;  %v49_v9 = vld [vmem:[%s10373_s0 + $0x90] sm:$0xff]  ;;  %vm1191_vm0 = vcmask 261120   ;;  %s7118_s14 = smov 64   ;;  %s7119_s15 = smov 32  }
  0x15   :  { %401 = vperm.xlu1 %6338, %v79_v1   ;;  %201 = vperm.xlu0 %6337, %v39_v2   ;;  %v63_v3 = vld [vmem:[%s10373_s0 + $0x100] sm:$0xff]  ;;  %v64_v7 = vld [vmem:[%s10373_s0 + $0x108] sm:$0xff]  ;;  %v41_v10 = vld [vmem:[%s10373_s0 + $0x50] sm:$0xff]  ;;  %s7120_s18 = smov 96   ;;  %vm1540_vm1 = vcmask 523264   ;;  %vm1545_vm2 = vcmask 785408  }
  0x16   :  { %v47_v4 = vld [vmem:[%s10373_s0 + $0x80] sm:$0xff]  ;;  %v80_v8 = vld [vmem:[%s10373_s0 + $0x188] sm:$0xff]  ;;  %v65_v11 = vld [vmem:[%s10373_s0 + $0x110] sm:$0xff]  ;;  %6020 = vmatprep.subr.bf16.mxu0 %v10379_v60  ;;  %s7121_s19 = smov 16   ;;  %s7122_s20 = smov 48   ;;  %vm4837_vm3 = vcmask 392192  }
  0x17   :  { %v81_v12 = vld [vmem:[%s10373_s0 + $0x190] sm:$0xff]  ;;  %v50_v13 = vld [vmem:[%s10373_s0 + $0x98] sm:$0xff]  ;;  %v51_v17 = vld [vmem:[%s10373_s0 + $0xa0] sm:$0xff]  ;;  %s7123_s21 = smov 112   ;;  %s7124_s25 = smov 80   ;;  %vm4846_vm4 = vcmask 130048  }
  0x18   :  { %v42_v14 = vld [vmem:[%s10373_s0 + $0x58] sm:$0xff]  ;;  %v43_v18 = vld [vmem:[%s10373_s0 + $0x60] sm:$0xff]  ;;  %v52_v21 = vld [vmem:[%s10373_s0 + $0xa8] sm:$0xff]  ;;  %vm4855_vm5 = vcmask 916480   ;;  %vm4864_vm6 = vcmask 654336  }
  0x19   :  { %321 = vperm.xlu1 %6338, %v63_v3   ;;  %241 = vperm.xlu0 %6337, %v47_v4   ;;  %v66_v15 = vld [vmem:[%s10373_s0 + $0x118] sm:$0xff]  ;;  %v67_v19 = vld [vmem:[%s10373_s0 + $0x120] sm:$0xff]  ;;  %v44_v22 = vld [vmem:[%s10373_s0 + $0x68] sm:$0xff]  ;;  %v799_v4 = vlaneseq }
  0x1a   :  { %v82_v16 = vld [vmem:[%s10373_s0 + $0x198] sm:$0xff]  ;;  %v83_v20 = vld [vmem:[%s10373_s0 + $0x1a0] sm:$0xff]  ;;  %v68_v23 = vld [vmem:[%s10373_s0 + $0x128] sm:$0xff] }
  0x1b   :  { %v84_v24 = vld [vmem:[%s10373_s0 + $0x1a8] sm:$0xff]  ;;  %v53_v25 = vld [vmem:[%s10373_s0 + $0xb0] sm:$0xff]  ;;  %v54_v29 = vld [vmem:[%s10373_s0 + $0xb8] sm:$0xff] }
  0x1c   :  { %v45_v26 = vld [vmem:[%s10373_s0 + $0x70] sm:$0xff]  ;;  %v46_v30 = vld [vmem:[%s10373_s0 + $0x78] sm:$0xff]  ;;  %v87_v33 = vld [vmem:[%s10373_s0 + $0x1c0] sm:$0xff] }
  0x1d   :  { %246 = vperm.xlu1 %6338, %v48_v5   ;;  %206 = vperm.xlu0 %6337, %v40_v6   ;;  %v69_v27 = vld [vmem:[%s10373_s0 + $0x130] sm:$0xff]  ;;  %v70_v31 = vld [vmem:[%s10373_s0 + $0x138] sm:$0xff]  ;;  %v55_v34 = vld [vmem:[%s10373_s0 + $0xc0] sm:$0xff] }
  0x1e   :  { %v85_v28 = vld [vmem:[%s10373_s0 + $0x1b0] sm:$0xff]  ;;  %v86_v32 = vld [vmem:[%s10373_s0 + $0x1b8] sm:$0xff]  ;;  %v56_v35 = vld [vmem:[%s10373_s0 + $0xc8] sm:$0xff] }
  0x1f   :  { %v71_v36 = vld [vmem:[%s10373_s0 + $0x140] sm:$0xff]  ;;  %v72_v37 = vld [vmem:[%s10373_s0 + $0x148] sm:$0xff]  ;;  %v89_v39 = vld [vmem:[%s10373_s0 + $0x1d0] sm:$0xff] }
  0x20   :  { %v88_v38 = vld [vmem:[%s10373_s0 + $0x1c8] sm:$0xff]  ;;  %v57_v40 = vld [vmem:[%s10373_s0 + $0xd0] sm:$0xff]  ;;  %v58_v41 = vld [vmem:[%s10373_s0 + $0xd8] sm:$0xff] }
  0x21   :  { %326 = vperm.xlu1 %6338, %v64_v7   ;;  %406 = vperm.xlu0 %6337, %v80_v8   ;;  %v73_v42 = vld [vmem:[%s10373_s0 + $0x150] sm:$0xff]  ;;  %v74_v43 = vld [vmem:[%s10373_s0 + $0x158] sm:$0xff]  ;;  %v91_v45 = vld [vmem:[%s10373_s0 + $0x1e0] sm:$0xff] }
  0x22   :  { %v90_v44 = vld [vmem:[%s10373_s0 + $0x1d8] sm:$0xff]  ;;  %v59_v46 = vld [vmem:[%s10373_s0 + $0xe0] sm:$0xff]  ;;  %v60_v47 = vld [vmem:[%s10373_s0 + $0xe8] sm:$0xff] }
  0x23   :  { %v75_v48 = vld [vmem:[%s10373_s0 + $0x160] sm:$0xff]  ;;  %v76_v49 = vld [vmem:[%s10373_s0 + $0x168] sm:$0xff]  ;;  %v93_v51 = vld [vmem:[%s10373_s0 + $0x1f0] sm:$0xff] }
  0x24   :  { %v92_v50 = vld [vmem:[%s10373_s0 + $0x1e8] sm:$0xff]  ;;  %v61_v52 = vld [vmem:[%s10373_s0 + $0xf0] sm:$0xff]  ;;  %v31_v54 = vld [vmem:[%s10373_s0] sm:$0xff] }
  0x25   :  { %251 = vperm.xlu1 %6338, %v49_v9   ;;  %211 = vperm.xlu0 %6337, %v41_v10   ;;  %v77_v53 = vld [vmem:[%s10373_s0 + $0x170] sm:$0xff]  ;;  %v1448_v55 = vld [vmem:[#allocation3 + $0x260] sm:$0xff]  ;;  %v1449_v56 = vld [vmem:[#allocation3 + $0x268] sm:$0xff]  ;;  %v7345_v10 = vshrl.u32 %v799_v4, 7 }
  0x26   :  { %v6021_v57 = vpack.c.bf16 %v1449_v56, %v1448_v55  ;;  %v94_v58 = vld [vmem:[%s10373_s0 + $0x1f8] sm:$0xff]  ;;  %v1450_v61 = vld [vmem:[#allocation3 + $0x270] sm:$0xff]  ;;  %v32_v1 = vld [vmem:[%s10373_s0 + $0x8] sm:$0xff] }
  0x27   :  { %v62_v59 = vld [vmem:[%s10373_s0 + $0xf8] sm:$0xff]  ;;  %v1452_v2 = vld [vmem:[#allocation3 + $0x280] sm:$0xff]  ;;  %v1453_v3 = vld [vmem:[#allocation3 + $0x288] sm:$0xff]  ;;  %10496 = vst [vmem:[#allocation9_spill] sm:$0xff] %v7345_v10 }
  0x28   :  { %6022 = vmatpush1.bf16.msra.mxu0 %v6021_v57  ;;  %v1451_v62 = vld [vmem:[#allocation3 + $0x278] sm:$0xff]  ;;  %v6027_v5 = vpack.c.bf16 %v1453_v3, %v1452_v2  ;;  %v33_v6 = vld [vmem:[%s10373_s0 + $0x10] sm:$0xff]  ;;  %v111_v7 = vld [vmem:[%s10373_s0 + $0x280] sm:$0xff] }
  0x29   :  { %331 = vperm.xlu1 %6338, %v65_v11   ;;  %411 = vperm.xlu0 %6337, %v81_v12   ;;  %v6024_v63 = vpack.c.bf16 %v1451_v62, %v1450_v61  ;;  %v78_v0 = vld [vmem:[%s10373_s0 + $0x178] sm:$0xff]  ;;  %v1454_v8 = vld [vmem:[#allocation3 + $0x290] sm:$0xff]  ;;  %v112_v12 = vld [vmem:[%s10373_s0 + $0x288] sm:$0xff] }
  0x2a   :  { %6023 = vmatprep.subr.bf16.mxu0 %v10379_v60  ;;  %v1455_v9 = vld [vmem:[#allocation3 + $0x298] sm:$0xff]  ;;  %v1464_v55 = vld [vmem:[#allocation3 + $0x2e0] sm:$0xff]  ;;  %v1465_v56 = vld [vmem:[#allocation3 + $0x2e8] sm:$0xff] }
  0x2b   :  { %v6030_v11 = vpack.c.bf16 %v1455_v9, %v1454_v8  ;;  %v115_v62 = vld [vmem:[%s10373_s0 + $0x2a0] sm:$0xff]  ;;  %v1466_v4 = vld [vmem:[#allocation3 + $0x2f0] sm:$0xff] }
  0x2c   :  { %6025 = vmatpush1.bf16.msra.mxu0 %v6024_v63  ;;  %v6045_v63 = vpack.c.bf16 %v1465_v56, %v1464_v55 }
  0x2d   :  { %256 = vperm.xlu1 %6338, %v50_v13   ;;  %216 = vperm.xlu0 %6337, %v42_v14   ;;  %v95_v13 = vld [vmem:[%s10373_s0 + $0x200] sm:$0xff] }
  0x2e   :  { %6026 = vmatprep.subr.bf16.mxu0 %v10379_v60  ;;  %v1456_v14 = vld [vmem:[#allocation3 + $0x2a0] sm:$0xff] }
  0x30   :  { %6028 = vmatpush1.bf16.msra.mxu0 %v6027_v5  ;;  %v1467_v5 = vld [vmem:[#allocation3 + $0x2f8] sm:$0xff] }
  0x31   :  { %336 = vperm.xlu1 %6338, %v66_v15   ;;  %416 = vperm.xlu0 %6337, %v82_v16   ;;  %v1457_v15 = vld [vmem:[#allocation3 + $0x2a8] sm:$0xff]  ;;  %v10378_v16 = vsub.s32 0, %v7345_v10 }
  0x32   :  { %6029 = vmatprep.subr.bf16.mxu0 %v10379_v60 }
  0x34   :  { %6031 = vmatpush1.bf16.msra.mxu0 %v6030_v11  ;;  %v37_v11 = vld [vmem:[%s10373_s0 + $0x30] sm:$0xff] }
  0x35   :  { %261 = vperm.xlu1 %6338, %v51_v17   ;;  %221 = vperm.xlu0 %6337, %v43_v18   ;;  %v6033_v17 = vpack.c.bf16 %v1457_v15, %v1456_v14  ;;  %v96_v18 = vld [vmem:[%s10373_s0 + $0x208] sm:$0xff] }
  0x36   :  { %6032 = vmatprep.subr.bf16.mxu0 %v10379_v60 }
  0x38   :  { %6034 = vmatpush1.bf16.msra.mxu0 %v6033_v17 }
  0x39   :  { %341 = vperm.xlu1 %6338, %v67_v19   ;;  %421 = vperm.xlu0 %6337, %v83_v20   ;;  %v34_v19 = vld [vmem:[%s10373_s0 + $0x18] sm:$0xff]  ;;  %v29_v20 = vld [vmem:[%s10375_s2] sm:$0xff] }
  0x3a   :  { %6035 = vmatprep.subr.bf16.mxu0 %v10379_v60 }
  0x3d   :  { %266 = vperm.xlu1 %6338, %v52_v21   ;;  %226 = vperm.xlu0 %6337, %v44_v22   ;;  %v10377_v21 = vsub.s32 1, %v7345_v10  ;;  %v1458_v22 = vld [vmem:[#allocation3 + $0x2b0] sm:$0xff] }
  0x41   :  { %346 = vperm.xlu1 %6338, %v68_v23   ;;  %426 = vperm.xlu0 %6337, %v84_v24   ;;  %v1459_v23 = vld [vmem:[#allocation3 + $0x2b8] sm:$0xff]  ;;  %v7368_v24 = vrot.slane %v29_v20, %v10378_v16 }
  0x45   :  { %271 = vperm.xlu1 %6338, %v53_v25   ;;  %231 = vperm.xlu0 %6337, %v45_v26   ;;  %v6036_v25 = vpack.c.bf16 %v1459_v23, %v1458_v22  ;;  %v35_v26 = vld [vmem:[%s10373_s0 + $0x20] sm:$0xff] }
  0x47   :  { %6037 = vmatpush1.bf16.msra.mxu0 %v6036_v25 }
  0x48   :  { %6038 = vmatprep.subr.bf16.mxu0 %v10379_v60 }
  0x49   :  { %351 = vperm.xlu1 %6338, %v69_v27   ;;  %431 = vperm.xlu0 %6337, %v85_v28   ;;  %v113_v27 = vld [vmem:[%s10373_s0 + $0x290] sm:$0xff]  ;;  %v7378_v28 = vrot.slane %v29_v20, %v10377_v21 }
  0x4d   :  { %276 = vperm.xlu1 %6338, %v54_v29   ;;  %236 = vperm.xlu0 %6337, %v46_v30  }
  0x51   :  { %356 = vperm.xlu1 %6338, %v70_v31   ;;  %436 = vperm.xlu0 %6337, %v86_v32   ;;  %v1460_v31 = vld [vmem:[#allocation3 + $0x2c0] sm:$0xff]  ;;  %v1461_v32 = vld [vmem:[#allocation3 + $0x2c8] sm:$0xff] }
  0x55   :  { %441 = vperm.xlu1 %6338, %v87_v33   ;;  %281 = vperm.xlu0 %6337, %v55_v34  }
  0x59   :  { %286 = vperm.xlu1 %6338, %v56_v35   ;;  %361 = vperm.xlu0 %6337, %v71_v36   ;;  %v6039_v35 = vpack.c.bf16 %v1461_v32, %v1460_v31  ;;  %v114_v36 = vld [vmem:[%s10373_s0 + $0x298] sm:$0xff]  ;;  %v1470_v32 = vld [vmem:[#allocation3 + $0x310] sm:$0xff] }
  0x5b   :  { %6040 = vmatpush1.bf16.msra.mxu0 %v6039_v35 }
  0x5c   :  { %6041 = vmatprep.subr.bf16.mxu0 %v10379_v60 }
  0x5d   :  { %366 = vperm.xlu1 %6338, %v72_v37   ;;  %446 = vperm.xlu0 %6337, %v88_v38   ;;  %v97_v37 = vld [vmem:[%s10373_s0 + $0x210] sm:$0xff] }
  0x61   :  { %451 = vperm.xlu1 %6338, %v89_v39   ;;  %291 = vperm.xlu0 %6337, %v57_v40  }
  0x65   :  { %296 = vperm.xlu1 %6338, %v58_v41   ;;  %371 = vperm.xlu0 %6337, %v73_v42   ;;  %v1462_v42 = vld [vmem:[#allocation3 + $0x2d0] sm:$0xff] }
  0x69   :  { %376 = vperm.xlu1 %6338, %v74_v43   ;;  %456 = vperm.xlu0 %6337, %v90_v44   ;;  %v1463_v43 = vld [vmem:[#allocation3 + $0x2d8] sm:$0xff] }
  0x6d   :  { %461 = vperm.xlu1 %6338, %v91_v45   ;;  %301 = vperm.xlu0 %6337, %v59_v46  }
  0x71   :  { %306 = vperm.xlu1 %6338, %v60_v47   ;;  %381 = vperm.xlu0 %6337, %v75_v48   ;;  %v98_v48 = vld [vmem:[%s10373_s0 + $0x218] sm:$0xff] }
  0x75   :  { %386 = vperm.xlu1 %6338, %v76_v49   ;;  %466 = vperm.xlu0 %6337, %v92_v50   ;;  %v36_v49 = vld [vmem:[%s10373_s0 + $0x28] sm:$0xff]  ;;  %v6042_v50 = vpack.c.bf16 %v1463_v43, %v1462_v42 }
  0x77   :  { %6043 = vmatpush1.bf16.msra.mxu0 %v6042_v50 }
  0x78   :  { %6044 = vmatprep.subr.bf16.mxu0 %v10379_v60 }
  0x79   :  { %471 = vperm.xlu1 %6338, %v93_v51   ;;  %311 = vperm.xlu0 %6337, %v61_v52  }
  0x7b   :  { %6046 = vmatpush1.bf16.msra.mxu0 %v6045_v63 }
  0x7c   :  { %6047 = vmatprep.subr.bf16.mxu0 %v10379_v60 }
  0x7d   :  { %391 = vperm.xlu1 %6338, %v77_v53   ;;  %161 = vperm.xlu0 %6337, %v31_v54  }
  0x81   :  { %476 = vperm.xlu1 %6338, %v94_v58   ;;  %316 = vperm.xlu0 %6337, %v62_v59  }
  0x85   :  { %396 = vperm.xlu1 %6338, %v78_v0   ;;  %166 = vperm.xlu0 %6337, %v32_v1  }
  0x89   :  { %171 = vperm.xlu1 %6338, %v33_v6   ;;  %561 = vperm.xlu0 %6337, %v111_v7  }
  0x8d   :  { %566 = vperm.xlu1 %6338, %v112_v12   ;;  %481 = vperm.xlu0 %6337, %v95_v13   ;;  %v6048_v12 = vpack.c.bf16 %v1467_v5, %v1466_v4 }
  0x8f   :  { %6049 = vmatpush1.bf16.msra.mxu0 %v6048_v12 }
  0x90   :  { %6050 = vmatprep.subr.bf16.mxu0 %v10379_v60 }
  0x91   :  { %486 = vperm.xlu1 %6338, %v96_v18   ;;  %176 = vperm.xlu0 %6337, %v34_v19   ;;  %v1468_v18 = vld [vmem:[#allocation3 + $0x300] sm:$0xff]  ;;  %v1469_v19 = vld [vmem:[#allocation3 + $0x308] sm:$0xff] }
  0x94   :  { %v402_v29 = vpop.permute.xlu1 %401  ;;  %v202_v30 = vpop.permute.xlu0 %201 }
  0x95   :  { %v851_v33 = vmul.f32 %v7368_v24, %v402_v29  ;;  %v811_v34 = vmul.f32 %v7368_v24, %v202_v30  ;;  %181 = vperm.xlu1 %6338, %v35_v26   ;;  %571 = vperm.xlu0 %6337, %v113_v27   ;;  %v6051_v26 = vpack.c.bf16 %v1469_v19, %v1468_v18 }
  0x97   :  { %v983_v38 = vadd.f32 %v7378_v28, %v851_v33  ;;  %v943_v39 = vadd.f32 %v7378_v28, %v811_v34  ;;  %6052 = vmatpush1.bf16.msra.mxu0 %v6051_v26  ;;  %v1471_v33 = vld [vmem:[#allocation3 + $0x318] sm:$0xff] }
  0x98   :  { %v322_v40 = vpop.permute.xlu1 %321  ;;  %v242_v41 = vpop.permute.xlu0 %241  ;;  %6053 = vmatprep.subr.bf16.mxu0 %v10379_v60  ;;  %v6054_v42 = vpack.c.bf16 %v1471_v33, %v1470_v32 }
  0x99   :  { %v1111_v44 = vmax.f32 %v983_v38, 0.0  ;;  %v1071_v45 = vmax.f32 %v943_v39, 0.0  ;;  %v835_v46 = vmul.f32 %v7368_v24, %v322_v40  ;;  %v819_v47 = vmul.f32 %v7368_v24, %v242_v41  ;;  %576 = vperm.xlu1 %6338, %v114_v36   ;;  %491 = vperm.xlu0 %6337, %v97_v37  }
  0x9b   :  { %1240 = vst.msk [vmem:[#allocation2 + $0x180] sm:$0xff] %vm1191_vm0, %v1111_v44  ;;  %1200 = vst.msk [vmem:[#allocation2 + $0x40] sm:$0xff] %vm1191_vm0, %v1071_v45  ;;  %v967_v51 = vadd.f32 %v7378_v28, %v835_v46  ;;  %v951_v52 = vadd.f32 %v7378_v28, %v819_v47  ;;  %6055 = vmatpush1.bf16.msra.mxu0 %v6054_v42 }
  0x9c   :  { %v247_v53 = vpop.permute.xlu1 %246  ;;  %v207_v54 = vpop.permute.xlu0 %206 }
  0x9d   :  { %v1095_v57 = vmax.f32 %v967_v51, 0.0  ;;  %v1079_v58 = vmax.f32 %v951_v52, 0.0  ;;  %v820_v59 = vmul.f32 %v7368_v24, %v247_v53  ;;  %v812_v61 = vmul.f32 %v7368_v24, %v207_v54  ;;  %496 = vperm.xlu1 %6338, %v98_v48   ;;  %186 = vperm.xlu0 %6337, %v36_v49  }
  0x9f   :  { %1224 = vst.msk [vmem:[#allocation2 + $0x100] sm:$0xff] %vm1191_vm0, %v1095_v57  ;;  %1208 = vst.msk [vmem:[#allocation2 + $0x80] sm:$0xff] %vm1191_vm0, %v1079_v58  ;;  %v952_v0 = vadd.f32 %v7378_v28, %v820_v59  ;;  %v944_v1 = vadd.f32 %v7378_v28, %v812_v61 }
  0xa0   :  { %v327_v2 = vpop.permute.xlu1 %326  ;;  %v407_v3 = vpop.permute.xlu0 %406 }
  0xa1   :  { %v1080_v6 = vmax.f32 %v952_v0, 0.0  ;;  %v1072_v7 = vmax.f32 %v944_v1, 0.0  ;;  %v836_v8 = vmul.f32 %v7368_v24, %v327_v2  ;;  %v852_v9 = vmul.f32 %v7368_v24, %v407_v3  ;;  %581 = vperm.xlu1 %6338, %v115_v62   ;;  %v38_v1 = vld [vmem:[%s10373_s0 + $0x38] sm:$0xff] }
  0xa2   :  { %v1328_v38 = vld [vmem:[#allocation2 + $0x40] sm:$0xff] }
  0xa3   :  { %1209 = vst.msk [vmem:[#allocation2 + $0x88] sm:$0xff] %vm1191_vm0, %v1080_v6  ;;  %1201 = vst.msk [vmem:[#allocation2 + $0x48] sm:$0xff] %vm1191_vm0, %v1072_v7  ;;  %v968_v13 = vadd.f32 %v7378_v28, %v836_v8  ;;  %v984_v14 = vadd.f32 %v7378_v28, %v852_v9  ;;  %v1368_v58 = vld [vmem:[#allocation2 + $0x180] sm:$0xff] }
  0xa4   :  { %v252_v15 = vpop.permute.xlu1 %251  ;;  %v212_v17 = vpop.permute.xlu0 %211 }
  0xa5   :  { %v1096_v20 = vmax.f32 %v968_v13, 0.0  ;;  %v1112_v22 = vmax.f32 %v984_v14, 0.0  ;;  %v821_v23 = vmul.f32 %v7368_v24, %v252_v15  ;;  %v813_v25 = vmul.f32 %v7368_v24, %v212_v17  ;;  %191 = vperm.xlu1 %6338, %v37_v11   ;;  %v99_v13 = vld [vmem:[%s10373_s0 + $0x220] sm:$0xff] }
  0xa6   :  { %v1336_v39 = vld [vmem:[#allocation2 + $0x80] sm:$0xff] }
  0xa7   :  { %1225 = vst.msk [vmem:[#allocation2 + $0x108] sm:$0xff] %vm1191_vm0, %v1096_v20  ;;  %1241 = vst.msk [vmem:[#allocation2 + $0x188] sm:$0xff] %vm1191_vm0, %v1112_v22  ;;  %v953_v27 = vadd.f32 %v7378_v28, %v821_v23  ;;  %v945_v29 = vadd.f32 %v7378_v28, %v813_v25  ;;  %v1352_v2 = vld [vmem:[#allocation2 + $0x100] sm:$0xff] }
  0xa8   :  { %v332_v30 = vpop.permute.xlu1 %331  ;;  %v412_v31 = vpop.permute.xlu0 %411 }
  0xa9   :  { %v1081_v34 = vmax.f32 %v953_v27, 0.0  ;;  %v1073_v35 = vmax.f32 %v945_v29, 0.0  ;;  %v837_v36 = vmul.f32 %v7368_v24, %v332_v30  ;;  %v853_v37 = vmul.f32 %v7368_v24, %v412_v31  ;;  %v116_v27 = vld [vmem:[%s10373_s0 + $0x2a8] sm:$0xff] }
  0xaa   :  { %v1337_v40 = vld [vmem:[#allocation2 + $0x88] sm:$0xff] }
  0xab   :  { %v1329_v41 = vld [vmem:[#allocation2 + $0x48] sm:$0xff]  ;;  %1210 = vst.msk [vmem:[#allocation2 + $0x90] sm:$0xff] %vm1191_vm0, %v1081_v34  ;;  %1202 = vst.msk [vmem:[#allocation2 + $0x50] sm:$0xff] %vm1191_vm0, %v1073_v35  ;;  %v969_v43 = vadd.f32 %v7378_v28, %v837_v36  ;;  %v985_v44 = vadd.f32 %v7378_v28, %v853_v37  ;;  %v7438_v45 = vpack.i.bf16 %v1337_v40, %v1336_v39 }
  0xac   :  { %v6339_v46 = vpack.i.bf16 %v1329_v41, %v1328_v38  ;;  %v257_v47 = vpop.permute.xlu1 %256  ;;  %v217_v48 = vpop.permute.xlu0 %216  ;;  %v100_v38 = vld [vmem:[%s10373_s0 + $0x228] sm:$0xff] }
  0xad   :  { %v1097_v49 = vmax.f32 %v969_v43, 0.0  ;;  %v1113_v50 = vmax.f32 %v985_v44, 0.0  ;;  %v822_v51 = vmul.f32 %v7368_v24, %v257_v47  ;;  %v814_v52 = vmul.f32 %v7368_v24, %v217_v48  ;;  %6345 = vrot.lane.b32.xlu1 %v7438_v45, %s7118_s14 }
  0xae   :  { %6340 = vrot.lane.b32.xlu0 %v6339_v46, %s7119_s15  ;;  %v1369_v57 = vld [vmem:[#allocation2 + $0x188] sm:$0xff] }
  0xaf   :  { %1226 = vst.msk [vmem:[#allocation2 + $0x110] sm:$0xff] %vm1191_vm0, %v1097_v49  ;;  %1242 = vst.msk [vmem:[#allocation2 + $0x190] sm:$0xff] %vm1191_vm0, %v1113_v50  ;;  %v954_v53 = vadd.f32 %v7378_v28, %v822_v51  ;;  %v946_v54 = vadd.f32 %v7378_v28, %v814_v52  ;;  %v1353_v59 = vld [vmem:[#allocation2 + $0x108] sm:$0xff] }
  0xb0   :  { %v337_v55 = vpop.permute.xlu1 %336  ;;  %v417_v56 = vpop.permute.xlu0 %416  ;;  %v6349_v5 = vpack.i.bf16 %v1353_v59, %v1352_v2 }
  0xb1   :  { %v1082_v61 = vmax.f32 %v954_v53, 0.0  ;;  %v1074_v62 = vmax.f32 %v946_v54, 0.0  ;;  %v838_v63 = vmul.f32 %v7368_v24, %v337_v55  ;;  %v854_v0 = vmul.f32 %v7368_v24, %v417_v56  ;;  %1526 = vrot.lane.b32.xlu1 %v1369_v57, %s7119_s15 }
  0xb2   :  { %1524 = vrot.lane.b32.xlu0 %v1368_v58, %s7119_s15  ;;  %v1330_v25 = vld [vmem:[#allocation2 + $0x50] sm:$0xff] }
  0xb3   :  { %1211 = vst.msk [vmem:[#allocation2 + $0x98] sm:$0xff] %vm1191_vm0, %v1082_v61  ;;  %1203 = vst.msk [vmem:[#allocation2 + $0x58] sm:$0xff] %vm1191_vm0, %v1074_v62  ;;  %v970_v3 = vadd.f32 %v7378_v28, %v838_v63  ;;  %v986_v4 = vadd.f32 %v7378_v28, %v854_v0  ;;  %v1338_v52 = vld [vmem:[#allocation2 + $0x90] sm:$0xff] }
  0xb4   :  { %v262_v6 = vpop.permute.xlu1 %261  ;;  %v222_v7 = vpop.permute.xlu0 %221  ;;  %v117_v0 = vld [vmem:[%s10373_s0 + $0x2b0] sm:$0xff] }
  0xb5   :  { %v1098_v8 = vmax.f32 %v970_v3, 0.0  ;;  %v1114_v9 = vmax.f32 %v986_v4, 0.0  ;;  %v823_v11 = vmul.f32 %v7368_v24, %v262_v6  ;;  %v815_v12 = vmul.f32 %v7368_v24, %v222_v7  ;;  %196 = vperm.xlu1 %6338, %v38_v1  }
  0xb6   :  { %6350 = vrot.lane.b32.xlu0 %v6349_v5, %s7120_s18  ;;  %v1370_v43 = vld [vmem:[#allocation2 + $0x190] sm:$0xff] }
  0xb7   :  { %1227 = vst.msk [vmem:[#allocation2 + $0x118] sm:$0xff] %vm1191_vm0, %v1098_v8  ;;  %1243 = vst.msk [vmem:[#allocation2 + $0x198] sm:$0xff] %vm1191_vm0, %v1114_v9  ;;  %v955_v14 = vadd.f32 %v7378_v28, %v823_v11  ;;  %v947_v15 = vadd.f32 %v7378_v28, %v815_v12  ;;  %v1354_v51 = vld [vmem:[#allocation2 + $0x110] sm:$0xff]  ;;  %v102_v11 = vld [vmem:[%s10373_s0 + $0x238] sm:$0xff] }
  0xb8   :  { %v342_v17 = vpop.permute.xlu1 %341  ;;  %v422_v18 = vpop.permute.xlu0 %421  ;;  %v101_v12 = vld [vmem:[%s10373_s0 + $0x230] sm:$0xff] }
  0xb9   :  { %v1083_v19 = vmax.f32 %v955_v14, 0.0  ;;  %v1075_v20 = vmax.f32 %v947_v15, 0.0  ;;  %v839_v22 = vmul.f32 %v7368_v24, %v342_v17  ;;  %v855_v23 = vmul.f32 %v7368_v24, %v422_v18 }
  0xba   :  { %501 = vperm.xlu0 %6337, %v99_v13   ;;  %v1331_v26 = vld [vmem:[#allocation2 + $0x58] sm:$0xff] }
  0xbb   :  { %1212 = vst.msk [vmem:[#allocation2 + $0xa0] sm:$0xff] %vm1191_vm0, %v1083_v19  ;;  %1204 = vst.msk [vmem:[#allocation2 + $0x60] sm:$0xff] %vm1191_vm0, %v1075_v20  ;;  %v971_v29 = vadd.f32 %v7378_v28, %v839_v22  ;;  %v987_v30 = vadd.f32 %v7378_v28, %v855_v23  ;;  %v6354_v31 = vpack.i.bf16 %v1331_v26, %v1330_v25  ;;  %v1339_v46 = vld [vmem:[#allocation2 + $0x98] sm:$0xff] }
  0xbc   :  { %v267_v32 = vpop.permute.xlu1 %266  ;;  %v227_v33 = vpop.permute.xlu0 %226  ;;  %v7496_v56 = vpack.i.bf16 %v1339_v46, %v1338_v52  ;;  %v118_v26 = vld [vmem:[%s10373_s0 + $0x2b8] sm:$0xff] }
  0xbd   :  { %v1099_v34 = vmax.f32 %v971_v29, 0.0  ;;  %v1115_v35 = vmax.f32 %v987_v30, 0.0  ;;  %v824_v36 = vmul.f32 %v7368_v24, %v267_v32  ;;  %v816_v37 = vmul.f32 %v7368_v24, %v227_v33  ;;  %6355 = vrot.lane.b32.xlu1 %v6354_v31, %s7119_s15 }
  0xbe   :  { %586 = vperm.xlu0 %6337, %v116_v27   ;;  %v1355_v44 = vld [vmem:[#allocation2 + $0x118] sm:$0xff] }
  0xbf   :  { %1228 = vst.msk [vmem:[#allocation2 + $0x120] sm:$0xff] %vm1191_vm0, %v1099_v34  ;;  %1244 = vst.msk [vmem:[#allocation2 + $0x1a0] sm:$0xff] %vm1191_vm0, %v1115_v35  ;;  %v956_v39 = vadd.f32 %v7378_v28, %v824_v36  ;;  %v948_v40 = vadd.f32 %v7378_v28, %v816_v37  ;;  %v6364_v55 = vpack.i.bf16 %v1355_v44, %v1354_v51  ;;  %v7510_v5 = vld [vmem:[#allocation2 + $0x198] sm:$0xff] }
  0xc0   :  { %v347_v41 = vpop.permute.xlu1 %346  ;;  %v427_v42 = vpop.permute.xlu0 %426 }
  0xc1   :  { %v1084_v47 = vmax.f32 %v956_v39, 0.0  ;;  %v1076_v48 = vmax.f32 %v948_v40, 0.0  ;;  %v840_v49 = vmul.f32 %v7368_v24, %v347_v41  ;;  %v856_v50 = vmul.f32 %v7368_v24, %v427_v42  ;;  %1528 = vrot.lane.b32.xlu1 %v1370_v43, %s7119_s15 }
  0xc2   :  { %506 = vperm.xlu0 %6337, %v100_v38   ;;  %v1340_v25 = vld [vmem:[#allocation2 + $0xa0] sm:$0xff] }
  0xc3   :  { %1213 = vst.msk [vmem:[#allocation2 + $0xa8] sm:$0xff] %vm1191_vm0, %v1084_v47  ;;  %1205 = vst.msk [vmem:[#allocation2 + $0x68] sm:$0xff] %vm1191_vm0, %v1076_v48  ;;  %v972_v53 = vadd.f32 %v7378_v28, %v840_v49  ;;  %v988_v54 = vadd.f32 %v7378_v28, %v856_v50  ;;  %v119_v38 = vld [vmem:[%s10373_s0 + $0x2c0] sm:$0xff] }
  0xc4   :  { %v272_v57 = vpop.permute.xlu1 %271  ;;  %v232_v58 = vpop.permute.xlu0 %231  ;;  %v1332_v39 = vld [vmem:[#allocation2 + $0x60] sm:$0xff] }
  0xc5   :  { %v1100_v59 = vmax.f32 %v972_v53, 0.0  ;;  %v1116_v61 = vmax.f32 %v988_v54, 0.0  ;;  %v825_v62 = vmul.f32 %v7368_v24, %v272_v57  ;;  %v817_v63 = vmul.f32 %v7368_v24, %v232_v58  ;;  %6365 = vrot.lane.b32.xlu1 %v6364_v55, %s7120_s18  ;;  %v103_v50 = vld [vmem:[%s10373_s0 + $0x240] sm:$0xff] }
  0xc6   :  { %6360 = vrot.lane.b32.xlu0 %v7496_v56, %s7118_s14  ;;  %v7558_v55 = vld [vmem:[#allocation2 + $0x1a0] sm:$0xff] }
  0xc7   :  { %1229 = vst.msk [vmem:[#allocation2 + $0x128] sm:$0xff] %vm1191_vm0, %v1100_v59  ;;  %1245 = vst.msk [vmem:[#allocation2 + $0x1a8] sm:$0xff] %vm1191_vm0, %v1116_v61  ;;  %v957_v1 = vadd.f32 %v7378_v28, %v825_v62  ;;  %v949_v2 = vadd.f32 %v7378_v28, %v817_v63  ;;  %v120_v63 = vld [vmem:[%s10373_s0 + $0x2c8] sm:$0xff] }
  0xc8   :  { %v352_v3 = vpop.permute.xlu1 %351  ;;  %v432_v4 = vpop.permute.xlu0 %431 }
  0xc9   :  { %v1085_v6 = vmax.f32 %v957_v1, 0.0  ;;  %v1077_v7 = vmax.f32 %v949_v2, 0.0  ;;  %v841_v8 = vmul.f32 %v7368_v24, %v352_v3  ;;  %v857_v9 = vmul.f32 %v7368_v24, %v432_v4  ;;  %1530 = vrot.lane.b32.xlu1 %v7510_v5, %s7119_s15 }
  0xca   :  { %591 = vperm.xlu0 %6337, %v117_v0   ;;  %v1341_v18 = vld [vmem:[#allocation2 + $0xa8] sm:$0xff]  ;;  %v1356_v0 = vld [vmem:[#allocation2 + $0x120] sm:$0xff] }
  0xcb   :  { %1214 = vst.msk [vmem:[#allocation2 + $0xb0] sm:$0xff] %vm1191_vm0, %v1085_v6  ;;  %1206 = vst.msk [vmem:[#allocation2 + $0x70] sm:$0xff] %vm1191_vm0, %v1077_v7  ;;  %v973_v13 = vadd.f32 %v7378_v28, %v841_v8  ;;  %v989_v14 = vadd.f32 %v7378_v28, %v857_v9  ;;  %v7535_v30 = vpack.i.bf16 %v1341_v18, %v1340_v25  ;;  %v1333_v33 = vld [vmem:[#allocation2 + $0x68] sm:$0xff] }
  0xcc   :  { %v277_v15 = vpop.permute.xlu1 %276  ;;  %v237_v17 = vpop.permute.xlu0 %236  ;;  %v6369_v42 = vpack.i.bf16 %v1333_v33, %v1332_v39 }
  0xcd   :  { %v1101_v19 = vmax.f32 %v973_v13, 0.0  ;;  %v1117_v20 = vmax.f32 %v989_v14, 0.0  ;;  %v826_v22 = vmul.f32 %v7368_v24, %v277_v15  ;;  %v818_v23 = vmul.f32 %v7368_v24, %v237_v17  ;;  %516 = vperm.xlu1 %6338, %v102_v11  }
  0xce   :  { %511 = vperm.xlu0 %6337, %v101_v12   ;;  %v1357_v57 = vld [vmem:[#allocation2 + $0x128] sm:$0xff] }
  0xcf   :  { %1230 = vst.msk [vmem:[#allocation2 + $0x130] sm:$0xff] %vm1191_vm0, %v1101_v19  ;;  %1246 = vst.msk [vmem:[#allocation2 + $0x1b0] sm:$0xff] %vm1191_vm0, %v1117_v20  ;;  %v958_v27 = vadd.f32 %v7378_v28, %v826_v22  ;;  %v950_v29 = vadd.f32 %v7378_v28, %v818_v23  ;;  %v6379_v3 = vpack.i.bf16 %v1357_v57, %v1356_v0  ;;  %v7578_v20 = vld [vmem:[#allocation2 + $0x1a8] sm:$0xff] }
  0xd0   :  { %v357_v31 = vpop.permute.xlu1 %356  ;;  %v437_v32 = vpop.permute.xlu0 %436 }
  0xd1   :  { %v1086_v34 = vmax.f32 %v958_v27, 0.0  ;;  %v1078_v35 = vmax.f32 %v950_v29, 0.0  ;;  %v842_v36 = vmul.f32 %v7368_v24, %v357_v31  ;;  %v858_v37 = vmul.f32 %v7368_v24, %v437_v32  ;;  %6375 = vrot.lane.b32.xlu1 %v7535_v30, %s7118_s14  ;;  %v104_v27 = vld [vmem:[%s10373_s0 + $0x248] sm:$0xff] }
  0xd2   :  { %596 = vperm.xlu0 %6337, %v118_v26   ;;  %v1334_v13 = vld [vmem:[#allocation2 + $0x70] sm:$0xff] }
  0xd3   :  { %1215 = vst.msk [vmem:[#allocation2 + $0xb8] sm:$0xff] %vm1191_vm0, %v1086_v34  ;;  %1207 = vst.msk [vmem:[#allocation2 + $0x78] sm:$0xff] %vm1191_vm0, %v1078_v35  ;;  %v974_v40 = vadd.f32 %v7378_v28, %v842_v36  ;;  %v990_v41 = vadd.f32 %v7378_v28, %v858_v37 }
  0xd4   :  { %v442_v43 = vpop.permute.xlu1 %441  ;;  %v282_v44 = vpop.permute.xlu0 %281 }
  0xd5   :  { %v1102_v46 = vmax.f32 %v974_v40, 0.0  ;;  %v1118_v47 = vmax.f32 %v990_v41, 0.0  ;;  %v859_v48 = vmul.f32 %v7368_v24, %v442_v43  ;;  %v827_v49 = vmul.f32 %v7368_v24, %v282_v44  ;;  %601 = vperm.xlu1 %6338, %v119_v38   ;;  %v1342_v41 = vld [vmem:[#allocation2 + $0xb0] sm:$0xff] }
  0xd6   :  { %6370 = vrot.lane.b32.xlu0 %v6369_v42, %s7119_s15  ;;  %v1374_v34 = vld [vmem:[#allocation2 + $0x1b0] sm:$0xff] }
  0xd7   :  { %1231 = vst.msk [vmem:[#allocation2 + $0x138] sm:$0xff] %vm1191_vm0, %v1102_v46  ;;  %1247 = vst.msk [vmem:[#allocation2 + $0x1b8] sm:$0xff] %vm1191_vm0, %v1118_v47  ;;  %v991_v51 = vadd.f32 %v7378_v28, %v859_v48  ;;  %v959_v52 = vadd.f32 %v7378_v28, %v827_v49  ;;  %v1358_v42 = vld [vmem:[#allocation2 + $0x130] sm:$0xff] }
  0xd8   :  { %v287_v53 = vpop.permute.xlu1 %286  ;;  %v362_v54 = vpop.permute.xlu0 %361 }
  0xd9   :  { %v1119_v58 = vmax.f32 %v991_v51, 0.0  ;;  %v1087_v59 = vmax.f32 %v959_v52, 0.0  ;;  %v828_v61 = vmul.f32 %v7368_v24, %v287_v53  ;;  %v843_v62 = vmul.f32 %v7368_v24, %v362_v54  ;;  %521 = vperm.xlu1 %6338, %v103_v50   ;;  %v121_v54 = vld [vmem:[%s10373_s0 + $0x2d0] sm:$0xff] }
  0xda   :  { %1606 = vrot.lane.b32.xlu0 %v7558_v55, %s7119_s15  ;;  %v1335_v7 = vld [vmem:[#allocation2 + $0x78] sm:$0xff] }
  0xdb   :  { %1248 = vst.msk [vmem:[#allocation2 + $0x1c0] sm:$0xff] %vm1191_vm0, %v1119_v58  ;;  %1216 = vst.msk [vmem:[#allocation2 + $0xc0] sm:$0xff] %vm1191_vm0, %v1087_v59  ;;  %v960_v1 = vadd.f32 %v7378_v28, %v828_v61  ;;  %v975_v2 = vadd.f32 %v7378_v28, %v843_v62  ;;  %v6384_v17 = vpack.i.bf16 %v1335_v7, %v1334_v13  ;;  %v1343_v36 = vld [vmem:[#allocation2 + $0xb8] sm:$0xff] }
  0xdc   :  { %v367_v4 = vpop.permute.xlu1 %366  ;;  %v447_v6 = vpop.permute.xlu0 %446  ;;  %v7599_v47 = vpack.i.bf16 %v1343_v36, %v1342_v41  ;;  %v106_v7 = vld [vmem:[%s10373_s0 + $0x258] sm:$0xff]  ;;  %v123_v36 = vld [vmem:[%s10373_s0 + $0x2e0] sm:$0xff] }
  0xdd   :  { %v1088_v8 = vmax.f32 %v960_v1, 0.0  ;;  %v1103_v9 = vmax.f32 %v975_v2, 0.0  ;;  %v844_v11 = vmul.f32 %v7368_v24, %v367_v4  ;;  %v860_v12 = vmul.f32 %v7368_v24, %v447_v6  ;;  %606 = vperm.xlu1 %6338, %v120_v63  }
  0xde   :  { %6380 = vrot.lane.b32.xlu0 %v6379_v3, %s7120_s18  ;;  %v1359_v35 = vld [vmem:[#allocation2 + $0x138] sm:$0xff] }
  0xdf   :  { %1217 = vst.msk [vmem:[#allocation2 + $0xc8] sm:$0xff] %vm1191_vm0, %v1088_v8  ;;  %1232 = vst.msk [vmem:[#allocation2 + $0x140] sm:$0xff] %vm1191_vm0, %v1103_v9  ;;  %v976_v14 = vadd.f32 %v7378_v28, %v844_v11  ;;  %v992_v15 = vadd.f32 %v7378_v28, %v860_v12  ;;  %v6394_v46 = vpack.i.bf16 %v1359_v35, %v1358_v42  ;;  %v7619_v1 = vld [vmem:[#allocation2 + $0x1b8] sm:$0xff]  ;;  %v105_v8 = vld [vmem:[%s10373_s0 + $0x250] sm:$0xff] }
  0xe0   :  { %v452_v18 = vpop.permute.xlu1 %451  ;;  %v292_v19 = vpop.permute.xlu0 %291 }
  0xe1   :  { %v1104_v22 = vmax.f32 %v976_v14, 0.0  ;;  %v1120_v23 = vmax.f32 %v992_v15, 0.0  ;;  %v861_v25 = vmul.f32 %v7368_v24, %v452_v18  ;;  %v829_v26 = vmul.f32 %v7368_v24, %v292_v19  ;;  %6385 = vrot.lane.b32.xlu1 %v6384_v17, %s7119_s15 }
  0xe2   :  { %1608 = vrot.lane.b32.xlu0 %v7578_v20, %s7119_s15  ;;  %v7609_v57 = vld [vmem:[#allocation2 + $0x1c0] sm:$0xff] }
  0xe3   :  { %1233 = vst.msk [vmem:[#allocation2 + $0x148] sm:$0xff] %vm1191_vm0, %v1104_v22  ;;  %1249 = vst.msk [vmem:[#allocation2 + $0x1c8] sm:$0xff] %vm1191_vm0, %v1120_v23  ;;  %v993_v29 = vadd.f32 %v7378_v28, %v861_v25  ;;  %v961_v31 = vadd.f32 %v7378_v28, %v829_v26  ;;  %v1344_v22 = vld [vmem:[#allocation2 + $0xc0] sm:$0xff]  ;;  %v122_v23 = vld [vmem:[%s10373_s0 + $0x2d8] sm:$0xff] }
  0xe4   :  { %v297_v32 = vpop.permute.xlu1 %296  ;;  %v372_v33 = vpop.permute.xlu0 %371 }
  0xe5   :  { %v1121_v37 = vmax.f32 %v993_v29, 0.0  ;;  %v1089_v38 = vmax.f32 %v961_v31, 0.0  ;;  %v830_v39 = vmul.f32 %v7368_v24, %v297_v32  ;;  %v845_v40 = vmul.f32 %v7368_v24, %v372_v33  ;;  %1610 = vrot.lane.b32.xlu1 %v1374_v34, %s7119_s15 }
  0xe6   :  { %526 = vperm.xlu0 %6337, %v104_v27   ;;  %v7635_v14 = vld [vmem:[#allocation2 + $0xc8] sm:$0xff] }
  0xe7   :  { %1250 = vst.msk [vmem:[#allocation2 + $0x1d0] sm:$0xff] %vm1191_vm0, %v1121_v37  ;;  %1218 = vst.msk [vmem:[#allocation2 + $0xd0] sm:$0xff] %vm1191_vm0, %v1089_v38  ;;  %v962_v43 = vadd.f32 %v7378_v28, %v830_v39  ;;  %v977_v44 = vadd.f32 %v7378_v28, %v845_v40  ;;  %v6404_v27 = vpack.i.bf16 %v7635_v14, %v1344_v22 }
  0xe8   :  { %v377_v48 = vpop.permute.xlu1 %376  ;;  %v457_v49 = vpop.permute.xlu0 %456 }
  0xe9   :  { %v1090_v50 = vmax.f32 %v962_v43, 0.0  ;;  %v1105_v51 = vmax.f32 %v977_v44, 0.0  ;;  %v846_v52 = vmul.f32 %v7368_v24, %v377_v48  ;;  %v862_v53 = vmul.f32 %v7368_v24, %v457_v49  ;;  %6395 = vrot.lane.b32.xlu1 %v6394_v46, %s7120_s18 }
  0xea   :  { %6390 = vrot.lane.b32.xlu0 %v7599_v47, %s7118_s14  ;;  %v7611_v58 = vld [vmem:[#allocation2 + $0x1c8] sm:$0xff] }
  0xeb   :  { %1219 = vst.msk [vmem:[#allocation2 + $0xd8] sm:$0xff] %vm1191_vm0, %v1090_v50  ;;  %1234 = vst.msk [vmem:[#allocation2 + $0x150] sm:$0xff] %vm1191_vm0, %v1105_v51  ;;  %v978_v59 = vadd.f32 %v7378_v28, %v846_v52  ;;  %v994_v61 = vadd.f32 %v7378_v28, %v862_v53  ;;  %v107_v50 = vld [vmem:[%s10373_s0 + $0x260] sm:$0xff] }
  0xec   :  { %v462_v63 = vpop.permute.xlu1 %461  ;;  %v302_v0 = vpop.permute.xlu0 %301 }
  0xed   :  { %v1106_v2 = vmax.f32 %v978_v59, 0.0  ;;  %v1122_v3 = vmax.f32 %v994_v61, 0.0  ;;  %v863_v4 = vmul.f32 %v7368_v24, %v462_v63  ;;  %v831_v6 = vmul.f32 %v7368_v24, %v302_v0  ;;  %1612 = vrot.lane.b32.xlu1 %v7619_v1, %s7119_s15  ;;  %v7677_v63 = vld [vmem:[#allocation2 + $0x148] sm:$0xff] }
  0xee   :  { %611 = vperm.xlu0 %6337, %v121_v54   ;;  %v7653_v37 = vld [vmem:[#allocation2 + $0x1d0] sm:$0xff] }
  0xef   :  { %1235 = vst.msk [vmem:[#allocation2 + $0x158] sm:$0xff] %vm1191_vm0, %v1106_v2  ;;  %1251 = vst.msk [vmem:[#allocation2 + $0x1d8] sm:$0xff] %vm1191_vm0, %v1122_v3  ;;  %v995_v9 = vadd.f32 %v7378_v28, %v863_v4  ;;  %v963_v11 = vadd.f32 %v7378_v28, %v831_v6  ;;  %v124_v6 = vld [vmem:[%s10373_s0 + $0x2e8] sm:$0xff] }
  0xf0   :  { %v307_v12 = vpop.permute.xlu1 %306  ;;  %v382_v13 = vpop.permute.xlu0 %381 }
  0xf1   :  { %v1123_v15 = vmax.f32 %v995_v9, 0.0  ;;  %v1091_v17 = vmax.f32 %v963_v11, 0.0  ;;  %v832_v18 = vmul.f32 %v7368_v24, %v307_v12  ;;  %v847_v19 = vmul.f32 %v7368_v24, %v382_v13  ;;  %536 = vperm.xlu1 %6338, %v106_v7   ;;  %v7687_v7 = vld [vmem:[#allocation2 + $0x140] sm:$0xff] }
  0xf2   :  { %531 = vperm.xlu0 %6337, %v105_v8   ;;  %v7697_v12 = vpack.i.bf16 %v7677_v63, %v7687_v7 }
  0xf3   :  { %1252 = vst.msk [vmem:[#allocation2 + $0x1e0] sm:$0xff] %vm1191_vm0, %v1123_v15  ;;  %1220 = vst.msk [vmem:[#allocation2 + $0xe0] sm:$0xff] %vm1191_vm0, %v1091_v17  ;;  %v964_v25 = vadd.f32 %v7378_v28, %v832_v18  ;;  %v979_v26 = vadd.f32 %v7378_v28, %v847_v19 }
  0xf4   :  { %v387_v29 = vpop.permute.xlu1 %386  ;;  %v467_v31 = vpop.permute.xlu0 %466 }
  0xf5   :  { %v1092_v32 = vmax.f32 %v964_v25, 0.0  ;;  %v1107_v33 = vmax.f32 %v979_v26, 0.0  ;;  %v848_v34 = vmul.f32 %v7368_v24, %v387_v29  ;;  %v864_v35 = vmul.f32 %v7368_v24, %v467_v31  ;;  %6405 = vrot.lane.b32.xlu1 %v6404_v27, %s7118_s14 }
  0xf6   :  { %616 = vperm.xlu0 %6337, %v122_v23   ;;  %v7655_v38 = vld [vmem:[#allocation2 + $0x1d8] sm:$0xff] }
  0xf7   :  { %1221 = vst.msk [vmem:[#allocation2 + $0xe8] sm:$0xff] %vm1191_vm0, %v1092_v32  ;;  %1236 = vst.msk [vmem:[#allocation2 + $0x160] sm:$0xff] %vm1191_vm0, %v1107_v33  ;;  %v980_v39 = vadd.f32 %v7378_v28, %v848_v34  ;;  %v996_v40 = vadd.f32 %v7378_v28, %v864_v35 }
  0xf8   :  { %v472_v42 = vpop.permute.xlu1 %471  ;;  %v312_v43 = vpop.permute.xlu0 %311 }
  0xf9   :  { %v1108_v44 = vmax.f32 %v980_v39, 0.0  ;;  %v1124_v46 = vmax.f32 %v996_v40, 0.0  ;;  %v865_v48 = vmul.f32 %v7368_v24, %v472_v42  ;;  %v833_v49 = vmul.f32 %v7368_v24, %v312_v43  ;;  %621 = vperm.xlu1 %6338, %v123_v36   ;;  %v1346_v43 = vld [vmem:[#allocation2 + $0xd0] sm:$0xff] }
  0xfa   :  { %6400 = vrot.lane.b32.xlu0 %v7438_v45, %s7119_s15  ;;  %v7670_v51 = vld [vmem:[#allocation2 + $0xe0] sm:$0xff] }
  0xfb   :  { %1237 = vst.msk [vmem:[#allocation2 + $0x168] sm:$0xff] %vm1191_vm0, %v1108_v44  ;;  %1253 = vst.msk [vmem:[#allocation2 + $0x1e8] sm:$0xff] %vm1191_vm0, %v1124_v46  ;;  %v997_v52 = vadd.f32 %v7378_v28, %v865_v48  ;;  %v965_v53 = vadd.f32 %v7378_v28, %v833_v49  ;;  %v3598_v54 = vadd.f32 %v7670_v51, %v1344_v22  ;;  %v7701_v15 = vld [vmem:[#allocation2 + $0x1e0] sm:$0xff]  ;;  %v108_v46 = vld [vmem:[%s10373_s0 + $0x268] sm:$0xff] }
  0xfc   :  { %v392_v59 = vpop.permute.xlu1 %391  ;;  %v162_v61 = vpop.permute.xlu0 %161 }
  0xfd   :  { %v1125_v45 = vmax.f32 %v997_v52, 0.0  ;;  %v1093_v0 = vmax.f32 %v965_v53, 0.0  ;;  %v849_v2 = vmul.f32 %v7368_v24, %v392_v59  ;;  %v803_v3 = vmul.f32 %v7368_v24, %v162_v61  ;;  %541 = vperm.xlu1 %6338, %v107_v50   ;;  %v7738_v53 = vld [vmem:[#allocation2 + $0x158] sm:$0xff] }
  0xfe   :  { %1682 = vrot.lane.b32.xlu0 %v7609_v57, %s7119_s15  ;;  %v3602_v4 = vadd.f32 %v3598_v54, %v7609_v57  ;;  %v7689_v8 = vld [vmem:[#allocation2 + $0xe8] sm:$0xff]  ;;  %v1347_v54 = vld [vmem:[#allocation2 + $0xd8] sm:$0xff] }
  0xff   :  { %1254 = vst.msk [vmem:[#allocation2 + $0x1f0] sm:$0xff] %vm1191_vm0, %v1125_v45  ;;  %1222 = vst.msk [vmem:[#allocation2 + $0xf0] sm:$0xff] %vm1191_vm0, %v1093_v0  ;;  %v981_v9 = vadd.f32 %v7378_v28, %v849_v2  ;;  %v935_v11 = vadd.f32 %v7378_v28, %v803_v3  ;;  %v3599_v13 = vadd.f32 %v7689_v8, %v7635_v14  ;;  %v7745_v3 = vld [vmem:[#allocation2 + $0x150] sm:$0xff] }
 0x100   :  { %v477_v17 = vpop.permute.xlu1 %476  ;;  %v317_v18 = vpop.permute.xlu0 %316  ;;  %v7704_v19 = vadd.f32 %v3602_v4, %v7701_v15 }
 0x101   :  { %v1109_v22 = vmax.f32 %v981_v9, 0.0  ;;  %v1063_v23 = vmax.f32 %v935_v11, 0.0  ;;  %v866_v25 = vmul.f32 %v7368_v24, %v477_v17  ;;  %v834_v26 = vmul.f32 %v7368_v24, %v317_v18  ;;  %626 = vperm.xlu1 %6338, %v124_v6  }
 0x102   :  { %10497 = vst [vmem:[#allocation10_spill] sm:$0xff] %v7704_v19  ;;  %6410 = vrot.lane.b32.xlu0 %v7697_v12, %s7120_s18  ;;  %v3603_v27 = vadd.f32 %v3599_v13, %v7611_v58  ;;  %v7711_v14 = vld [vmem:[#allocation2 + $0x1e8] sm:$0xff]  ;;  %v7753_v9 = vpack.i.bf16 %v7738_v53, %v7745_v3  ;;  %v6419_v11 = vpack.i.bf16 %v1347_v54, %v1346_v43  ;;  %v6938_v19 = vld [vmem:[#allocation2 + $0x78] sm:$0xff] }
 0x103   :  { %1238 = vst.msk [vmem:[#allocation2 + $0x170] sm:$0xff] %vm1191_vm0, %v1109_v22  ;;  %1192 = vst.msk [vmem:[#allocation2] sm:$0xff] %vm1191_vm0, %v1063_v23  ;;  %v998_v29 = vadd.f32 %v7378_v28, %v866_v25  ;;  %v966_v31 = vadd.f32 %v7378_v28, %v834_v26 }
 0x104   :  { %v397_v33 = vpop.permute.xlu1 %396  ;;  %v167_v34 = vpop.permute.xlu0 %166  ;;  %v7720_v35 = vadd.f32 %v3603_v27, %v7711_v14 }
 0x105   :  { %v1126_v36 = vmax.f32 %v998_v29, 0.0  ;;  %v1094_v39 = vmax.f32 %v966_v31, 0.0  ;;  %v850_v40 = vmul.f32 %v7368_v24, %v397_v33  ;;  %v804_v42 = vmul.f32 %v7368_v24, %v167_v34  ;;  %6415 = vrot.lane.b32.xlu1 %v7496_v56, %s7119_s15  ;;  %v125_v31 = vld [vmem:[%s10373_s0 + $0x2f0] sm:$0xff] }
 0x106   :  { %10498 = vst [vmem:[#allocation11_spill] sm:$0xff] %v7720_v35  ;;  %1684 = vrot.lane.b32.xlu0 %v7611_v58, %s7119_s15  ;;  %v7728_v44 = vld [vmem:[#allocation2 + $0xf0] sm:$0xff] }
 0x107   :  { %1255 = vst.msk [vmem:[#allocation2 + $0x1f8] sm:$0xff] %vm1191_vm0, %v1126_v36  ;;  %1223 = vst.msk [vmem:[#allocation2 + $0xf8] sm:$0xff] %vm1191_vm0, %v1094_v39  ;;  %v982_v48 = vadd.f32 %v7378_v28, %v850_v40  ;;  %v936_v49 = vadd.f32 %v7378_v28, %v804_v42  ;;  %v3600_v56 = vadd.f32 %v7728_v44, %v1346_v43  ;;  %v7755_v13 = vld [vmem:[#allocation2 + $0x1f0] sm:$0xff] }
 0x108   :  { %v172_v50 = vpop.permute.xlu1 %171  ;;  %v562_v52 = vpop.permute.xlu0 %561 }
 0x109   :  { %v1110_v59 = vmax.f32 %v982_v48, 0.0  ;;  %v1064_v61 = vmax.f32 %v936_v49, 0.0  ;;  %v805_v45 = vmul.f32 %v7368_v24, %v172_v50  ;;  %v883_v0 = vmul.f32 %v7368_v24, %v562_v52  ;;  %1686 = vrot.lane.b32.xlu1 %v7653_v37, %s7119_s15  ;;  %v110_v52 = vld [vmem:[%s10373_s0 + $0x278] sm:$0xff] }
 0x10a   :  { %546 = vperm.xlu0 %6337, %v108_v46   ;;  %v3604_v2 = vadd.f32 %v3600_v56, %v7653_v37 }
 0x10b   :  { %1239 = vst.msk [vmem:[#allocation2 + $0x178] sm:$0xff] %vm1191_vm0, %v1110_v59  ;;  %1193 = vst.msk [vmem:[#allocation2 + $0x8] sm:$0xff] %vm1191_vm0, %v1064_v61  ;;  %v937_v4 = vadd.f32 %v7378_v28, %v805_v45  ;;  %v1015_v6 = vadd.f32 %v7378_v28, %v883_v0 }
 0x10c   :  { %v567_v17 = vpop.permute.xlu1 %566  ;;  %v482_v18 = vpop.permute.xlu0 %481  ;;  %v7758_v22 = vadd.f32 %v3604_v2, %v7755_v13 }
 0x10d   :  { %v1065_v23 = vmax.f32 %v937_v4, 0.0  ;;  %v1143_v25 = vmax.f32 %v1015_v6, 0.0  ;;  %v884_v26 = vmul.f32 %v7368_v24, %v567_v17  ;;  %v867_v27 = vmul.f32 %v7368_v24, %v482_v18  ;;  %6425 = vrot.lane.b32.xlu1 %v7753_v9, %s7120_s18  ;;  %v126_v18 = vld [vmem:[%s10373_s0 + $0x2f8] sm:$0xff] }
 0x10e   :  { %10499 = vst [vmem:[#allocation12_spill] sm:$0xff] %v7758_v22  ;;  %6420 = vrot.lane.b32.xlu0 %v6419_v11, %s7118_s14  ;;  %v7765_v29 = vld [vmem:[#allocation2 + $0xf8] sm:$0xff] }
 0x10f   :  { %v7770_v33 = vld [vmem:[#allocation2 + $0x1f8] sm:$0xff]  ;;  %1194 = vst.msk [vmem:[#allocation2 + $0x10] sm:$0xff] %vm1191_vm0, %v1065_v23  ;;  %1272 = vst.msk [vmem:[#allocation2 + $0x280] sm:$0xff] %vm1191_vm0, %v1143_v25  ;;  %v1016_v34 = vadd.f32 %v7378_v28, %v884_v26  ;;  %v999_v36 = vadd.f32 %v7378_v28, %v867_v27  ;;  %v3601_v39 = vadd.f32 %v7765_v29, %v1347_v54  ;;  %v109_v54 = vld [vmem:[%s10373_s0 + $0x270] sm:$0xff] }
 0x110   :  { %v487_v40 = vpop.permute.xlu1 %486  ;;  %v177_v42 = vpop.permute.xlu0 %176  ;;  %v6434_v26 = vpack.i.bf16 %v7689_v8, %v7670_v51 }
 0x111   :  { %v1144_v46 = vmax.f32 %v1016_v34, 0.0  ;;  %v1127_v48 = vmax.f32 %v999_v36, 0.0  ;;  %v868_v49 = vmul.f32 %v7368_v24, %v487_v40  ;;  %v806_v56 = vmul.f32 %v7368_v24, %v177_v42  ;;  %1688 = vrot.lane.b32.xlu1 %v7655_v38, %s7119_s15  ;;  %v143_v42 = vld [vmem:[%s10373_s0 + $0x380] sm:$0xff] }
 0x112   :  { %631 = vperm.xlu0 %6337, %v125_v31   ;;  %v3605_v50 = vadd.f32 %v3601_v39, %v7655_v38 }
 0x113   :  { %1273 = vst.msk [vmem:[#allocation2 + $0x288] sm:$0xff] %vm1191_vm0, %v1144_v46  ;;  %1256 = vst.msk [vmem:[#allocation2 + $0x200] sm:$0xff] %vm1191_vm0, %v1127_v48  ;;  %v1000_v59 = vadd.f32 %v7378_v28, %v868_v49  ;;  %v938_v61 = vadd.f32 %v7378_v28, %v806_v56 }
 0x114   :  { %v182_v45 = vpop.permute.xlu1 %181  ;;  %v572_v0 = vpop.permute.xlu0 %571  ;;  %v7795_v2 = vadd.f32 %v3605_v50, %v7770_v33 }
 0x115   :  { %v1128_v4 = vmax.f32 %v1000_v59, 0.0  ;;  %v1066_v6 = vmax.f32 %v938_v61, 0.0  ;;  %v807_v11 = vmul.f32 %v7368_v24, %v182_v45  ;;  %v885_v17 = vmul.f32 %v7368_v24, %v572_v0  ;;  %556 = vperm.xlu1 %6338, %v110_v52  }
 0x116   :  { %10500 = vst [vmem:[#allocation13_spill] sm:$0xff] %v7795_v2  ;;  %551 = vperm.xlu0 %6337, %v109_v54   ;;  %v127_v54 = vld [vmem:[%s10373_s0 + $0x300] sm:$0xff] }
 0x117   :  { %1257 = vst.msk [vmem:[#allocation2 + $0x208] sm:$0xff] %vm1191_vm0, %v1128_v4  ;;  %1195 = vst.msk [vmem:[#allocation2 + $0x18] sm:$0xff] %vm1191_vm0, %v1066_v6  ;;  %v939_v23 = vadd.f32 %v7378_v28, %v807_v11  ;;  %v1017_v25 = vadd.f32 %v7378_v28, %v885_v17  ;;  %v7829_v4 = vld [vmem:[#allocation2 + $0x168] sm:$0xff] }
 0x118   :  { %v577_v27 = vpop.permute.xlu1 %576  ;;  %v492_v31 = vpop.permute.xlu0 %491  ;;  %v144_v17 = vld [vmem:[%s10373_s0 + $0x388] sm:$0xff] }
 0x119   :  { %v1067_v34 = vmax.f32 %v939_v23, 0.0  ;;  %v1145_v36 = vmax.f32 %v1017_v25, 0.0  ;;  %v886_v39 = vmul.f32 %v7368_v24, %v577_v27  ;;  %v869_v40 = vmul.f32 %v7368_v24, %v492_v31  ;;  %6435 = vrot.lane.b32.xlu1 %v6434_v26, %s7118_s14 }
 0x11a   :  { %636 = vperm.xlu0 %6337, %v126_v18   ;;  %v7837_v18 = vld [vmem:[#allocation2 + $0x160] sm:$0xff] }
 0x11b   :  { %1196 = vst.msk [vmem:[#allocation2 + $0x20] sm:$0xff] %vm1191_vm0, %v1067_v34  ;;  %1274 = vst.msk [vmem:[#allocation2 + $0x290] sm:$0xff] %vm1191_vm0, %v1145_v36  ;;  %v1018_v51 = vadd.f32 %v7378_v28, %v886_v39  ;;  %v1001_v8 = vadd.f32 %v7378_v28, %v869_v40  ;;  %v7844_v25 = vpack.i.bf16 %v7829_v4, %v7837_v18 }
 0x11c   :  { %v497_v46 = vpop.permute.xlu1 %496  ;;  %v187_v48 = vpop.permute.xlu0 %186 }
 0x11d   :  { %v1146_v49 = vmax.f32 %v1018_v51, 0.0  ;;  %v1129_v56 = vmax.f32 %v1001_v8, 0.0  ;;  %v870_v50 = vmul.f32 %v7368_v24, %v497_v46  ;;  %v808_v52 = vmul.f32 %v7368_v24, %v187_v48  ;;  %721 = vperm.xlu1 %6338, %v143_v42  }
 0x11e   :  { %6430 = vrot.lane.b32.xlu0 %v7535_v30, %s7119_s15 }
 0x11f   :  { %1275 = vst.msk [vmem:[#allocation2 + $0x298] sm:$0xff] %vm1191_vm0, %v1146_v49  ;;  %1258 = vst.msk [vmem:[#allocation2 + $0x210] sm:$0xff] %vm1191_vm0, %v1129_v56  ;;  %v1002_v59 = vadd.f32 %v7378_v28, %v870_v50  ;;  %v940_v61 = vadd.f32 %v7378_v28, %v808_v52  ;;  %v128_v50 = vld [vmem:[%s10373_s0 + $0x308] sm:$0xff] }
 0x120   :  { %v582_v45 = vpop.permute.xlu1 %581  ;;  %v6341_v0 = vpop.permute.xlu0 %6340 }
 0x121   :  { %v1130_v6 = vmax.f32 %v1002_v59, 0.0  ;;  %v1068_v11 = vmax.f32 %v940_v61, 0.0  ;;  %v887_v30 = vmul.f32 %v7368_v24, %v582_v45  ;;  %641 = vperm.xlu1 %6338, %v127_v54   ;;  %v6342_v39 = vunpack.i.l.bf16 %v6341_v0  ;;  %v7873_v61 = vld [vmem:[#allocation2 + $0x178] sm:$0xff]  ;;  %v1321_v45 = vld [vmem:[#allocation2 + $0x8] sm:$0xff] }
 0x122   :  { %1758 = vrot.lane.b32.xlu0 %v7701_v15, %s7119_s15  ;;  %v6343_v8 = vunpack.i.h.bf16 %v6341_v0 }
 0x123   :  { %1259 = vst.msk [vmem:[#allocation2 + $0x218] sm:$0xff] %vm1191_vm0, %v1130_v6  ;;  %1197 = vst.msk [vmem:[#allocation2 + $0x28] sm:$0xff] %vm1191_vm0, %v1068_v11  ;;  %v1019_v23 = vadd.f32 %v7378_v28, %v887_v30  ;;  %v7883_v30 = vld [vmem:[#allocation2 + $0x170] sm:$0xff] }
 0x124   :  { %v192_v26 = vpop.permute.xlu1 %191  ;;  %v7846_v27 = vpop.permute.xlu0 %1524  ;;  %v1537_v11 = vsel %vm1191_vm0, %v1321_v45, %v6343_v8 }
 0x125   :  { %10501 = vst [vmem:[#allocation14_spill] sm:$0xff] %v7846_v27  ;;  %v1147_v31 = vmax.f32 %v1019_v23, 0.0  ;;  %v809_v34 = vmul.f32 %v7368_v24, %v192_v26  ;;  %726 = vperm.xlu1 %6338, %v144_v17   ;;  %v7854_v36 = vsel %vm1191_vm0, %v7687_v7, %v7846_v27  ;;  %v1320_v7 = vld [vmem:[#allocation2] sm:$0xff]  ;;  %v7890_v23 = vpack.i.bf16 %v7873_v61, %v7883_v30  ;;  %v6935_v27 = vld [vmem:[#allocation2 + $0x68] sm:$0xff] }
 0x126   :  { %6440 = vrot.lane.b32.xlu0 %v7844_v25, %s7120_s18  ;;  %5326 = vmatprep.mubr.msk.f32.mxu0 %vm1540_vm1, %v7854_v36  ;;  %v1536_v52 = vsel %vm1191_vm0, %v1320_v7, %v6342_v39  ;;  %v6449_v26 = vpack.i.bf16 %v7765_v29, %v7728_v44  ;;  %v130_v44 = vld [vmem:[%s10373_s0 + $0x318] sm:$0xff]  ;;  %v129_v29 = vld [vmem:[%s10373_s0 + $0x310] sm:$0xff] }
 0x127   :  { %1276 = vst.msk [vmem:[#allocation2 + $0x2a0] sm:$0xff] %vm1191_vm0, %v1147_v31  ;;  %v941_v40 = vadd.f32 %v7378_v28, %v809_v34  ;;  %v145_v31 = vld [vmem:[%s10373_s0 + $0x390] sm:$0xff] }
 0x128   :  { %v6346_v42 = vpop.permute.xlu1 %6345  ;;  %v6351_v51 = vpop.permute.xlu0 %6350 }
 0x129   :  { %v1069_v46 = vmax.f32 %v941_v40, 0.0  ;;  %v6347_v48 = vunpack.i.l.bf16 %v6346_v42  ;;  %6445 = vrot.lane.b32.xlu1 %v7599_v47, %s7119_s15  ;;  %v6348_v49 = vunpack.i.h.bf16 %v6346_v42  ;;  %v6352_v56 = vunpack.i.l.bf16 %v6351_v51 }
 0x12a   :  { %1760 = vrot.lane.b32.xlu0 %v7711_v14, %s7119_s15  ;;  %v6353_v0 = vunpack.i.h.bf16 %v6351_v51 }
 0x12b   :  { %1198 = vst.msk [vmem:[#allocation2 + $0x30] sm:$0xff] %vm1191_vm0, %v1069_v46  ;;  %v1541_v54 = vsel %vm1540_vm1, %v1536_v52, %v6347_v48  ;;  %v1542_v17 = vsel %vm1540_vm1, %v1537_v11, %v6348_v49  ;;  %v146_v48 = vld [vmem:[%s10373_s0 + $0x398] sm:$0xff]  ;;  %v7917_v49 = vld [vmem:[#allocation2 + $0x188] sm:$0xff]  ;;  %v147_v11 = vld [vmem:[%s10373_s0 + $0x3a0] sm:$0xff] }
 0x12c   :  { %v7870_v59 = vpop.permute.xlu1 %1526  ;;  %v1546_v47 = vsel %vm1545_vm2, %v1541_v54, %v6352_v56  ;;  %v7919_v56 = vld [vmem:[#allocation2 + $0x180] sm:$0xff] }
 0x12d   :  { %10502 = vst [vmem:[#allocation15_spill] sm:$0xff] %v7870_v59  ;;  %1762 = vrot.lane.b32.xlu1 %v7755_v13, %s7119_s15  ;;  %v7880_v6 = vsel %vm1191_vm0, %v7677_v63, %v7870_v59  ;;  %2511 = vmatmul.mubr.f32.vlgmr.msra.gmra.mrb[0].mxu0 %v1546_v47  ;;  %v1547_v63 = vsel %vm1545_vm2, %v1542_v17, %v6353_v0 }
 0x12e   :  { %646 = vperm.xlu0 %6337, %v128_v50   ;;  %5327 = vmatprep.mubr.msk.f32.mxu0 %vm1540_vm1, %v7880_v6  ;;  %v6464_v50 = vpack.i.bf16 %v7917_v49, %v7919_v56 }
 0x131   :  { %6455 = vrot.lane.b32.xlu1 %v7890_v23, %s7120_s18  ;;  %2516 = vmatmul.mubr.f32.gmra.mrb[2].mxu0 %v1547_v63 }
 0x132   :  { %6450 = vrot.lane.b32.xlu0 %v6449_v26, %s7118_s14 }
 0x134   :  { %v197_v34 = vpop.permute.xlu1 %196 }
 0x135   :  { %v810_v39 = vmul.f32 %v7368_v24, %v197_v34  ;;  %1764 = vrot.lane.b32.xlu1 %v7770_v33, %s7119_s15 }
 0x136   :  { %731 = vperm.xlu0 %6337, %v145_v31  }
 0x137   :  { %v942_v40 = vadd.f32 %v7378_v28, %v810_v39  ;;  %v131_v39 = vld [vmem:[%s10373_s0 + $0x320] sm:$0xff] }
 0x138   :  { %v6356_v42 = vpop.permute.xlu1 %6355 }
 0x139   :  { %v502_v51 = vpop.permute.xlu0 %501  ;;  %v1070_v8 = vmax.f32 %v942_v40, 0.0  ;;  %656 = vperm.xlu1 %6338, %v130_v44   ;;  %v7947_v40 = vld [vmem:[#allocation2 + $0x280] sm:$0xff] }
 0x13a   :  { %v871_v46 = vmul.f32 %v7368_v24, %v502_v51  ;;  %651 = vperm.xlu0 %6337, %v129_v29   ;;  %v1385_v51 = vld [vmem:[#allocation2 + $0x208] sm:$0xff] }
 0x13b   :  { %1199 = vst.msk [vmem:[#allocation2 + $0x38] sm:$0xff] %vm1191_vm0, %v1070_v8  ;;  %v6358_v8 = vunpack.i.h.bf16 %v6356_v42 }
 0x13c   :  { %v1003_v7 = vadd.f32 %v7378_v28, %v871_v46  ;;  %v7923_v52 = vpop.permute.xlu1 %1528 }
 0x13d   :  { %10503 = vst [vmem:[#allocation16_spill] sm:$0xff] %v7923_v52  ;;  %v587_v54 = vpop.permute.xlu0 %586  ;;  %6465 = vrot.lane.b32.xlu1 %v6464_v50, %s7118_s14  ;;  %v7930_v0 = vsel %vm1191_vm0, %v7745_v3, %v7923_v52  ;;  %v6357_v3 = vunpack.i.l.bf16 %v6356_v42 }
 0x13e   :  { %v1131_v47 = vmax.f32 %v1003_v7, 0.0  ;;  %v888_v45 = vmul.f32 %v7368_v24, %v587_v54  ;;  %736 = vperm.xlu0 %6337, %v146_v48   ;;  %5328 = vmatprep.mubr.msk.f32.mxu0 %vm1540_vm1, %v7930_v0  ;;  %v148_v54 = vld [vmem:[%s10373_s0 + $0x3a8] sm:$0xff] }
 0x140   :  { %1260 = vst.msk [vmem:[#allocation2 + $0x220] sm:$0xff] %vm1191_vm0, %v1131_v47  ;;  %v1020_v17 = vadd.f32 %v7378_v28, %v888_v45  ;;  %v6366_v31 = vpop.permute.xlu1 %6365  ;;  %v7954_v47 = vld [vmem:[#allocation2 + $0x200] sm:$0xff] }
 0x141   :  { %v507_v26 = vpop.permute.xlu0 %506  ;;  %741 = vperm.xlu1 %6338, %v147_v11   ;;  %v6367_v7 = vunpack.i.l.bf16 %v6366_v31  ;;  %v6469_v11 = vpack.i.bf16 %v1385_v51, %v7954_v47  ;;  %v6368_v51 = vunpack.i.h.bf16 %v6366_v31  ;;  %v132_v31 = vld [vmem:[%s10373_s0 + $0x328] sm:$0xff] }
 0x142   :  { %v1148_v63 = vmax.f32 %v1020_v17, 0.0  ;;  %v872_v34 = vmul.f32 %v7368_v24, %v507_v26  ;;  %6460 = vrot.lane.b32.xlu0 %v7697_v12, %s7119_s15  ;;  %v1322_v12 = vld [vmem:[#allocation2 + $0x10] sm:$0xff] }
 0x143   :  { %v1538_v45 = vsel %vm1191_vm0, %v1322_v12, %v6357_v3 }
 0x144   :  { %1277 = vst.msk [vmem:[#allocation2 + $0x2a8] sm:$0xff] %vm1191_vm0, %v1148_v63  ;;  %v1004_v44 = vadd.f32 %v7378_v28, %v872_v34  ;;  %v7958_v42 = vpop.permute.xlu1 %1530  ;;  %v1323_v34 = vld [vmem:[#allocation2 + $0x18] sm:$0xff] }
 0x145   :  { %v6361_v29 = vpop.permute.xlu0 %6360  ;;  %661 = vperm.xlu1 %6338, %v131_v39   ;;  %10504 = vst [vmem:[#allocation17_spill] sm:$0xff] %v7958_v42  ;;  %v7969_v3 = vsel %vm1191_vm0, %v7738_v53, %v7958_v42 }
 0x146   :  { %v1132_v46 = vmax.f32 %v1004_v44, 0.0  ;;  %v6362_v48 = vunpack.i.l.bf16 %v6361_v29  ;;  %1830 = vrot.lane.b32.xlu0 %v7947_v40, %s7119_s15  ;;  %v6363_v50 = vunpack.i.h.bf16 %v6361_v29  ;;  %v1539_v44 = vsel %vm1191_vm0, %v1323_v34, %v6358_v8 }
 0x148   :  { %1261 = vst.msk [vmem:[#allocation2 + $0x228] sm:$0xff] %vm1191_vm0, %v1132_v46  ;;  %v1543_v17 = vsel %vm1540_vm1, %v1538_v45, %v6362_v48  ;;  %v1544_v29 = vsel %vm1540_vm1, %v1539_v44, %v6363_v50 }
 0x149   :  { %v592_v26 = vpop.permute.xlu0 %591  ;;  %v1548_v63 = vsel %vm1545_vm2, %v1543_v17, %v6367_v7  ;;  %746 = vperm.xlu1 %6338, %v148_v54   ;;  %v7975_v7 = vld [vmem:[#allocation2 + $0x288] sm:$0xff]  ;;  %v1549_v53 = vsel %vm1545_vm2, %v1544_v29, %v6368_v51  ;;  %v1386_v29 = vld [vmem:[#allocation2 + $0x210] sm:$0xff] }
 0x14a   :  { %v889_v39 = vmul.f32 %v7368_v24, %v592_v26  ;;  %6470 = vrot.lane.b32.xlu0 %v6469_v11, %s7120_s18  ;;  %2521 = vmatmul.mubr.f32.gmra.mrb[4].mxu0 %v1548_v63  ;;  %v1387_v63 = vld [vmem:[#allocation2 + $0x218] sm:$0xff] }
 0x14b   :  { %5329 = vmatprep.mubr.msk.f32.mxu0 %vm1540_vm1, %v7969_v3  ;;  %v6484_v51 = vpack.i.bf16 %v1387_v63, %v1386_v29  ;;  %v8014_v63 = vld [vmem:[#allocation2 + $0x298] sm:$0xff]  ;;  %v8098_v60 = vld [vmem:[#allocation2 + $0x2a8] sm:$0xff] }
 0x14c   :  { %v1021_v46 = vadd.f32 %v7378_v28, %v889_v39  ;;  %v517_v48 = vpop.permute.xlu1 %516  ;;  %v134_v29 = vld [vmem:[%s10373_s0 + $0x338] sm:$0xff] }
 0x14d   :  { %v512_v12 = vpop.permute.xlu0 %511  ;;  %v874_v8 = vmul.f32 %v7368_v24, %v517_v48  ;;  %6475 = vrot.lane.b32.xlu1 %v7753_v9, %s7119_s15  ;;  %v7992_v9 = vld [vmem:[#allocation2 + $0x290] sm:$0xff] }
 0x14e   :  { %v1149_v54 = vmax.f32 %v1021_v46, 0.0  ;;  %v873_v45 = vmul.f32 %v7368_v24, %v512_v12  ;;  %1832 = vrot.lane.b32.xlu0 %v7975_v7, %s7119_s15  ;;  %2526 = vmatmul.mubr.f32.gmra.mrb[6].mxu0 %v1549_v53  ;;  %v7999_v46 = vld [vmem:[#allocation2 + $0x190] sm:$0xff] }
 0x14f   :  { %v1006_v50 = vadd.f32 %v7378_v28, %v874_v8  ;;  %v6479_v48 = vpack.i.bf16 %v7510_v5, %v7999_v46 }
 0x150   :  { %1278 = vst.msk [vmem:[#allocation2 + $0x2b0] sm:$0xff] %vm1191_vm0, %v1149_v54  ;;  %v1005_v11 = vadd.f32 %v7378_v28, %v873_v45  ;;  %v7990_v17 = vpop.permute.xlu1 %6375 }
 0x151   :  { %v597_v26 = vpop.permute.xlu0 %596  ;;  %v1134_v34 = vmax.f32 %v1006_v50, 0.0  ;;  %1834 = vrot.lane.b32.xlu1 %v7992_v9, %s7119_s15 }
 0x152   :  { %v1133_v39 = vmax.f32 %v1005_v11, 0.0  ;;  %666 = vperm.xlu0 %6337, %v132_v31   ;;  %v890_v44 = vmul.f32 %v7368_v24, %v597_v26  ;;  %v149_v31 = vld [vmem:[%s10373_s0 + $0x3b0] sm:$0xff] }
 0x153   :  { %1263 = vst.msk [vmem:[#allocation2 + $0x238] sm:$0xff] %vm1191_vm0, %v1134_v34 }
 0x154   :  { %1262 = vst.msk [vmem:[#allocation2 + $0x230] sm:$0xff] %vm1191_vm0, %v1133_v39  ;;  %v1022_v12 = vadd.f32 %v7378_v28, %v890_v44  ;;  %v602_v54 = vpop.permute.xlu1 %601 }
 0x155   :  { %v6371_v8 = vpop.permute.xlu0 %6370  ;;  %v891_v45 = vmul.f32 %v7368_v24, %v602_v54  ;;  %6485 = vrot.lane.b32.xlu1 %v6484_v51, %s7120_s18  ;;  %v133_v51 = vld [vmem:[%s10373_s0 + $0x330] sm:$0xff] }
 0x156   :  { %6480 = vrot.lane.b32.xlu0 %v6479_v48, %s7118_s14  ;;  %v1150_v53 = vmax.f32 %v1022_v12, 0.0  ;;  %v6372_v11 = vunpack.i.l.bf16 %v6371_v8  ;;  %v1324_v48 = vld [vmem:[#allocation2 + $0x20] sm:$0xff]  ;;  %v6373_v12 = vunpack.i.h.bf16 %v6371_v8  ;;  %v150_v8 = vld [vmem:[%s10373_s0 + $0x3b8] sm:$0xff] }
 0x157   :  { %v1023_v50 = vadd.f32 %v7378_v28, %v891_v45  ;;  %v6377_v45 = vunpack.i.l.bf16 %v7990_v17 }
 0x158   :  { %1279 = vst.msk [vmem:[#allocation2 + $0x2b8] sm:$0xff] %vm1191_vm0, %v1150_v53  ;;  %v522_v5 = vpop.permute.xlu1 %521 }
 0x159   :  { %v8012_v26 = vpop.permute.xlu0 %1606  ;;  %v1151_v34 = vmax.f32 %v1023_v50, 0.0  ;;  %v875_v39 = vmul.f32 %v7368_v24, %v522_v5  ;;  %1836 = vrot.lane.b32.xlu1 %v8014_v63, %s7119_s15 }
 0x15a   :  { %10505 = vst [vmem:[#allocation18_spill] sm:$0xff] %v8012_v26  ;;  %751 = vperm.xlu0 %6337, %v149_v31   ;;  %v8022_v44 = vsel %vm1191_vm0, %v7837_v18, %v8012_v26  ;;  %v1618_v18 = vsel %vm1191_vm0, %v1324_v48, %v6372_v11  ;;  %v1325_v11 = vld [vmem:[#allocation2 + $0x28] sm:$0xff] }
 0x15b   :  { %5330 = vmatprep.mubr.msk.f32.mxu0 %vm1540_vm1, %v8022_v44  ;;  %1280 = vst.msk [vmem:[#allocation2 + $0x2c0] sm:$0xff] %vm1191_vm0, %v1151_v34  ;;  %v1007_v54 = vadd.f32 %v7378_v28, %v875_v39  ;;  %v1622_v16 = vsel %vm1540_vm1, %v1618_v18, %v6377_v45  ;;  %v6494_v34 = vpack.i.bf16 %v7578_v20, %v7558_v55  ;;  %v8050_v55 = vld [vmem:[#allocation2 + $0x228] sm:$0xff] }
 0x15c   :  { %v607_v53 = vpop.permute.xlu1 %606 }
 0x15d   :  { %v6381_v31 = vpop.permute.xlu0 %6380  ;;  %v1135_v50 = vmax.f32 %v1007_v54, 0.0  ;;  %v892_v5 = vmul.f32 %v7368_v24, %v607_v53  ;;  %676 = vperm.xlu1 %6338, %v134_v29   ;;  %v1619_v29 = vsel %vm1191_vm0, %v1325_v11, %v6373_v12 }
 0x15e   :  { %v6382_v21 = vunpack.i.l.bf16 %v6381_v31  ;;  %671 = vperm.xlu0 %6337, %v133_v51   ;;  %v6383_v48 = vunpack.i.h.bf16 %v6381_v31  ;;  %v6378_v51 = vunpack.i.h.bf16 %v7990_v17 }
 0x15f   :  { %1264 = vst.msk [vmem:[#allocation2 + $0x240] sm:$0xff] %vm1191_vm0, %v1135_v50  ;;  %v1024_v39 = vadd.f32 %v7378_v28, %v892_v5  ;;  %v8150_v41 = vld [vmem:[#allocation2 + $0x2b8] sm:$0xff] }
 0x160   :  { %v1626_v54 = vsel %vm1545_vm2, %v1622_v16, %v6382_v21  ;;  %v6386_v18 = vpop.permute.xlu1 %6385  ;;  %v1623_v16 = vsel %vm1540_vm1, %v1619_v29, %v6378_v51  ;;  %v8059_v21 = vld [vmem:[#allocation2 + $0x220] sm:$0xff] }
 0x161   :  { %v8048_v45 = vpop.permute.xlu0 %1608  ;;  %2531 = vmatmul.mubr.f32.gmra.mrb[8].mxu0 %v1626_v54  ;;  %v1152_v20 = vmax.f32 %v1024_v39, 0.0  ;;  %6495 = vrot.lane.b32.xlu1 %v6494_v34, %s7118_s14  ;;  %v1627_v17 = vsel %vm1545_vm2, %v1623_v16, %v6383_v48  ;;  %v6499_v12 = vpack.i.bf16 %v8050_v55, %v8059_v21  ;;  %v151_v34 = vld [vmem:[%s10373_s0 + $0x3c0] sm:$0xff]  ;;  %v6388_v54 = vunpack.i.h.bf16 %v6386_v18  ;;  %v1326_v16 = vld [vmem:[#allocation2 + $0x30] sm:$0xff] }
 0x162   :  { %10506 = vst [vmem:[#allocation19_spill] sm:$0xff] %v8048_v45  ;;  %756 = vperm.xlu0 %6337, %v150_v8   ;;  %v8056_v53 = vsel %vm1191_vm0, %v7829_v4, %v8048_v45  ;;  %v6387_v8 = vunpack.i.l.bf16 %v6386_v18 }
 0x163   :  { %1281 = vst.msk [vmem:[#allocation2 + $0x2c8] sm:$0xff] %vm1191_vm0, %v1152_v20  ;;  %5331 = vmatprep.mubr.msk.f32.mxu0 %vm1540_vm1, %v8056_v53 }
 0x164   :  { %v8067_v31 = vpop.permute.xlu1 %1610 }
 0x165   :  { %10507 = vst [vmem:[#allocation20_spill] sm:$0xff] %v8067_v31  ;;  %v527_v50 = vpop.permute.xlu0 %526  ;;  %2536 = vmatmul.mubr.f32.gmra.mrb[10].mxu0 %v1627_v17  ;;  %6500 = vrot.lane.b32.xlu1 %v6499_v12, %s7120_s18  ;;  %v8076_v5 = vsel %vm1191_vm0, %v7883_v30, %v8067_v31  ;;  %v8088_v17 = vld [vmem:[#allocation2 + $0x2c0] sm:$0xff] }
 0x166   :  { %v876_v4 = vmul.f32 %v7368_v24, %v527_v50  ;;  %6490 = vrot.lane.b32.xlu0 %v7844_v25, %s7119_s15  ;;  %5332 = vmatprep.mubr.msk.f32.mxu0 %vm1540_vm1, %v8076_v5  ;;  %v8084_v25 = vld [vmem:[#allocation2 + $0x2a0] sm:$0xff]  ;;  %v1620_v50 = vsel %vm1191_vm0, %v1326_v16, %v6387_v8 }
 0x168   :  { %v1008_v11 = vadd.f32 %v7378_v28, %v876_v4  ;;  %v6396_v39 = vpop.permute.xlu1 %6395 }
 0x169   :  { %v6391_v48 = vpop.permute.xlu0 %6390  ;;  %v6397_v51 = vunpack.i.l.bf16 %v6396_v39  ;;  %761 = vperm.xlu1 %6338, %v151_v34   ;;  %v6398_v43 = vunpack.i.h.bf16 %v6396_v39  ;;  %v135_v39 = vld [vmem:[%s10373_s0 + $0x340] sm:$0xff] }
 0x16a   :  { %v1136_v29 = vmax.f32 %v1008_v11, 0.0  ;;  %1902 = vrot.lane.b32.xlu0 %v8084_v25, %s7119_s15  ;;  %v6393_v30 = vunpack.i.h.bf16 %v6391_v48  ;;  %v6392_v20 = vunpack.i.l.bf16 %v6391_v48  ;;  %v8090_v12 = vld [vmem:[#allocation2 + $0x2c8] sm:$0xff]  ;;  %v1327_v48 = vld [vmem:[#allocation2 + $0x38] sm:$0xff] }
 0x16c   :  { %1265 = vst.msk [vmem:[#allocation2 + $0x248] sm:$0xff] %vm1191_vm0, %v1136_v29  ;;  %v8096_v4 = vpop.permute.xlu1 %1612  ;;  %v1624_v34 = vsel %vm1540_vm1, %v1620_v50, %v6392_v20  ;;  %v1621_v29 = vsel %vm1191_vm0, %v1327_v48, %v6388_v54  ;;  %v8120_v54 = vld [vmem:[#allocation2 + $0x2b0] sm:$0xff] }
 0x16d   :  { %10508 = vst [vmem:[#allocation21_spill] sm:$0xff] %v8096_v4  ;;  %v612_v11 = vpop.permute.xlu0 %611  ;;  %6505 = vrot.lane.b32.xlu1 %v7890_v23, %s7119_s15  ;;  %v1628_v8 = vsel %vm1545_vm2, %v1624_v34, %v6397_v51  ;;  %v8111_v16 = vsel %vm1191_vm0, %v7873_v61, %v8096_v4  ;;  %v1625_v20 = vsel %vm1540_vm1, %v1621_v29, %v6393_v30  ;;  %v8133_v29 = vld [vmem:[#allocation2 + $0x1b0] sm:$0xff] }
 0x16e   :  { %v893_v32 = vmul.f32 %v7368_v24, %v612_v11  ;;  %1904 = vrot.lane.b32.xlu0 %v8098_v60, %s7119_s15  ;;  %2541 = vmatmul.mubr.f32.gmra.mrb[12].mxu0 %v1628_v8  ;;  %v1629_v30 = vsel %vm1545_vm2, %v1625_v20, %v6398_v43  ;;  %v8139_v43 = vld [vmem:[#allocation2 + $0x230] sm:$0xff]  ;;  %v8141_v20 = vld [vmem:[#allocation2 + $0x238] sm:$0xff] }
 0x16f   :  { %5333 = vmatprep.mubr.msk.f32.mxu0 %vm1540_vm1, %v8111_v16 }
 0x170   :  { %v1025_v50 = vadd.f32 %v7378_v28, %v893_v32  ;;  %v537_v23 = vpop.permute.xlu1 %536  ;;  %v152_v32 = vld [vmem:[%s10373_s0 + $0x3c8] sm:$0xff] }
 0x171   :  { %v532_v51 = vpop.permute.xlu0 %531  ;;  %v878_v34 = vmul.f32 %v7368_v24, %v537_v23  ;;  %1906 = vrot.lane.b32.xlu1 %v8120_v54, %s7119_s15 }
 0x172   :  { %v1153_v11 = vmax.f32 %v1025_v50, 0.0  ;;  %v877_v61 = vmul.f32 %v7368_v24, %v532_v51  ;;  %681 = vperm.xlu0 %6337, %v135_v39   ;;  %2546 = vmatmul.mubr.f32.gmra.mrb[14].mxu0 %v1629_v30  ;;  %v6509_v39 = vpack.i.bf16 %v7619_v1, %v8133_v29  ;;  %v6514_v1 = vpack.i.bf16 %v8141_v20, %v8139_v43 }
 0x173   :  { %v1010_v48 = vadd.f32 %v7378_v28, %v878_v34  ;;  %v8196_v26 = vld [vmem:[#allocation2 + $0x248] sm:$0xff] }
 0x174   :  { %1282 = vst.msk [vmem:[#allocation2 + $0x2d0] sm:$0xff] %vm1191_vm0, %v1153_v11  ;;  %v1009_v8 = vadd.f32 %v7378_v28, %v877_v61  ;;  %v8137_v50 = vpop.permute.xlu1 %6405 }
 0x175   :  { %v617_v23 = vpop.permute.xlu0 %616  ;;  %v1138_v51 = vmax.f32 %v1010_v48, 0.0  ;;  %766 = vperm.xlu1 %6338, %v152_v32  }
 0x176   :  { %v1137_v30 = vmax.f32 %v1009_v8, 0.0  ;;  %6510 = vrot.lane.b32.xlu0 %v6509_v39, %s7118_s14  ;;  %v894_v11 = vmul.f32 %v7368_v24, %v617_v23  ;;  %v136_v8 = vld [vmem:[%s10373_s0 + $0x348] sm:$0xff]  ;;  %v137_v39 = vld [vmem:[%s10373_s0 + $0x350] sm:$0xff] }
 0x177   :  { %1267 = vst.msk [vmem:[#allocation2 + $0x258] sm:$0xff] %vm1191_vm0, %v1138_v51 }
 0x178   :  { %1266 = vst.msk [vmem:[#allocation2 + $0x250] sm:$0xff] %vm1191_vm0, %v1137_v30  ;;  %v1026_v34 = vadd.f32 %v7378_v28, %v894_v11  ;;  %v622_v61 = vpop.permute.xlu1 %621 }
 0x179   :  { %v6401_v18 = vpop.permute.xlu0 %6400  ;;  %v895_v48 = vmul.f32 %v7368_v24, %v622_v61  ;;  %1908 = vrot.lane.b32.xlu1 %v8150_v41, %s7119_s15 }
 0x17a   :  { %6515 = vrot.lane.b32.xlu0 %v6514_v1, %s7120_s18  ;;  %v1154_v32 = vmax.f32 %v1026_v34, 0.0  ;;  %v6402_v51 = vunpack.i.l.bf16 %v6401_v18 }
 0x17b   :  { %v1027_v23 = vadd.f32 %v7378_v28, %v895_v48  ;;  %v153_v48 = vld [vmem:[%s10373_s0 + $0x3d0] sm:$0xff] }
 0x17c   :  { %1283 = vst.msk [vmem:[#allocation2 + $0x2d8] sm:$0xff] %vm1191_vm0, %v1154_v32  ;;  %v542_v30 = vpop.permute.xlu1 %541  ;;  %v6403_v32 = vunpack.i.h.bf16 %v6401_v18  ;;  %v154_v18 = vld [vmem:[%s10373_s0 + $0x3d8] sm:$0xff] }
 0x17d   :  { %v8164_v11 = vpop.permute.xlu0 %1682  ;;  %v1155_v1 = vmax.f32 %v1027_v23, 0.0  ;;  %v879_v61 = vmul.f32 %v7368_v24, %v542_v30  ;;  %691 = vperm.xlu1 %6338, %v137_v39   ;;  %v6928_v23 = vld [vmem:[#allocation2 + $0x40] sm:$0xff] }
 0x17e   :  { %10509 = vst [vmem:[#allocation22_spill] sm:$0xff] %v8164_v11  ;;  %686 = vperm.xlu0 %6337, %v136_v8   ;;  %v1706_v34 = vsel %vm1191_vm0, %v7919_v56, %v8164_v11  ;;  %v1694_v30 = vsel %vm1191_vm0, %v6928_v23, %v6402_v51  ;;  %v6407_v8 = vunpack.i.l.bf16 %v8137_v50  ;;  %v6929_v23 = vld [vmem:[#allocation2 + $0x48] sm:$0xff] }
 0x17f   :  { %5334 = vmatprep.mubr.msk.f32.mxu0 %vm1540_vm1, %v1706_v34  ;;  %1284 = vst.msk [vmem:[#allocation2 + $0x2e0] sm:$0xff] %vm1191_vm0, %v1155_v1  ;;  %v1011_v62 = vadd.f32 %v7378_v28, %v879_v61 }
 0x180   :  { %v627_v39 = vpop.permute.xlu1 %626  ;;  %v1698_v1 = vsel %vm1540_vm1, %v1694_v30, %v6407_v8  ;;  %v6408_v30 = vunpack.i.h.bf16 %v8137_v50 }
 0x181   :  { %v6411_v4 = vpop.permute.xlu0 %6410  ;;  %v1139_v31 = vmax.f32 %v1011_v62, 0.0  ;;  %v896_v56 = vmul.f32 %v7368_v24, %v627_v39  ;;  %1962 = vrot.lane.b32.xlu1 %v8088_v17, %s7119_s15  ;;  %v1695_v39 = vsel %vm1191_vm0, %v6929_v23, %v6403_v32  ;;  %v10511_v32 = vpack.i.bf16 %v7611_v58, %v7609_v57  ;;  %v139_v23 = vld [vmem:[%s10373_s0 + $0x360] sm:$0xff] }
 0x182   :  { %v6412_v34 = vunpack.i.l.bf16 %v6411_v4  ;;  %771 = vperm.xlu0 %6337, %v153_v48   ;;  %v6413_v61 = vunpack.i.h.bf16 %v6411_v4  ;;  %v8189_v48 = vld [vmem:[#allocation2 + $0x2d0] sm:$0xff] }
 0x183   :  { %1268 = vst.msk [vmem:[#allocation2 + $0x260] sm:$0xff] %vm1191_vm0, %v1139_v31  ;;  %v1028_v51 = vadd.f32 %v7378_v28, %v896_v56  ;;  %v8191_v11 = vld [vmem:[#allocation2 + $0x2d8] sm:$0xff]  ;;  %v1699_v56 = vsel %vm1540_vm1, %v1695_v39, %v6408_v30  ;;  %v155_v31 = vld [vmem:[%s10373_s0 + $0x3e0] sm:$0xff] }
 0x184   :  { %v1702_v62 = vsel %vm1545_vm2, %v1698_v1, %v6412_v34  ;;  %v6416_v8 = vpop.permute.xlu1 %6415  ;;  %v8208_v34 = vld [vmem:[#allocation2 + $0x240] sm:$0xff]  ;;  %v138_v39 = vld [vmem:[%s10373_s0 + $0x358] sm:$0xff] }
 0x185   :  { %v8194_v45 = vpop.permute.xlu0 %1684  ;;  %2551 = vmatmul.mubr.f32.gmra.mrb[16].mxu0 %v1702_v62  ;;  %v1156_v4 = vmax.f32 %v1028_v51, 0.0  ;;  %776 = vperm.xlu1 %6338, %v154_v18   ;;  %v1703_v51 = vsel %vm1545_vm2, %v1699_v56, %v6413_v61  ;;  %v8217_v57 = vpack.i.bf16 %v8196_v26, %v8208_v34  ;;  %v6417_v30 = vunpack.i.l.bf16 %v6416_v8 }
 0x186   :  { %10510 = vst [vmem:[#allocation23_spill] sm:$0xff] %v8194_v45  ;;  %6520 = vrot.lane.b32.xlu0 %v10511_v32, %s7118_s14  ;;  %v1707_v50 = vsel %vm1191_vm0, %v7917_v49, %v8194_v45  ;;  %v8210_v1 = vld [vmem:[#allocation2 + $0x2e0] sm:$0xff]  ;;  %v6418_v56 = vunpack.i.h.bf16 %v6416_v8  ;;  %v6930_v45 = vld [vmem:[#allocation2 + $0x50] sm:$0xff]  ;;  %v6932_v8 = vld [vmem:[#allocation2 + $0x198] sm:$0xff] }
 0x187   :  { %1285 = vst.msk [vmem:[#allocation2 + $0x2e8] sm:$0xff] %vm1191_vm0, %v1156_v4  ;;  %5335 = vmatprep.mubr.msk.f32.mxu0 %vm1540_vm1, %v1707_v50  ;;  %v8221_v58 = vadd.f32 %v8210_v1, %v8088_v17 }
 0x188   :  { %v8223_v49 = vpop.permute.xlu1 %1686 }
 0x189   :  { %10512 = vst [vmem:[#allocation24_spill] sm:$0xff] %v8223_v49  ;;  %v547_v18 = vpop.permute.xlu0 %546  ;;  %2556 = vmatmul.mubr.f32.gmra.mrb[18].mxu0 %v1703_v51  ;;  %1964 = vrot.lane.b32.xlu1 %v8090_v12, %s7119_s15  ;;  %v1708_v61 = vsel %vm1191_vm0, %v7999_v46, %v8223_v49 }
 0x18a   :  { %v880_v62 = vmul.f32 %v7368_v24, %v547_v18  ;;  %6525 = vrot.lane.b32.xlu0 %v8217_v57, %s7120_s18  ;;  %5336 = vmatprep.mubr.msk.f32.mxu0 %vm1540_vm1, %v1708_v61 }
 0x18c   :  { %v1012_v4 = vadd.f32 %v7378_v28, %v880_v62  ;;  %v6426_v32 = vpop.permute.xlu1 %6425  ;;  %v1696_v62 = vsel %vm1191_vm0, %v6930_v45, %v6417_v30  ;;  %v6931_v30 = vld [vmem:[#allocation2 + $0x58] sm:$0xff] }
 0x18d   :  { %v6421_v50 = vpop.permute.xlu0 %6420  ;;  %v6427_v18 = vunpack.i.l.bf16 %v6426_v32  ;;  %701 = vperm.xlu1 %6338, %v139_v23   ;;  %v6428_v42 = vunpack.i.h.bf16 %v6426_v32  ;;  %v156_v32 = vld [vmem:[%s10373_s0 + $0x3e8] sm:$0xff] }
 0x18e   :  { %v1140_v51 = vmax.f32 %v1012_v4, 0.0  ;;  %696 = vperm.xlu0 %6337, %v138_v39   ;;  %v6423_v46 = vunpack.i.h.bf16 %v6421_v50  ;;  %v6422_v61 = vunpack.i.l.bf16 %v6421_v50  ;;  %v8244_v49 = vld [vmem:[#allocation2 + $0x2e8] sm:$0xff] }
 0x18f   :  { %v8252_v23 = vadd.f32 %v8244_v49, %v8090_v12 }
 0x190   :  { %1269 = vst.msk [vmem:[#allocation2 + $0x268] sm:$0xff] %vm1191_vm0, %v1140_v51  ;;  %v8254_v39 = vpop.permute.xlu1 %1688  ;;  %v1700_v50 = vsel %vm1540_vm1, %v1696_v62, %v6422_v61  ;;  %v1697_v51 = vsel %vm1191_vm0, %v6931_v30, %v6418_v56  ;;  %v8272_v56 = vld [vmem:[#allocation2 + $0x258] sm:$0xff]  ;;  %v10514_v30 = vpack.i.bf16 %v7655_v38, %v7653_v37 }
 0x191   :  { %10513 = vst [vmem:[#allocation25_spill] sm:$0xff] %v8254_v39  ;;  %v632_v4 = vpop.permute.xlu0 %631  ;;  %1966 = vrot.lane.b32.xlu1 %v8189_v48, %s7119_s15  ;;  %v1704_v45 = vsel %vm1545_vm2, %v1700_v50, %v6427_v18  ;;  %v1709_v52 = vsel %vm1191_vm0, %v6932_v8, %v8254_v39  ;;  %v1701_v61 = vsel %vm1540_vm1, %v1697_v51, %v6423_v46 }
 0x192   :  { %v897_v2 = vmul.f32 %v7368_v24, %v632_v4  ;;  %781 = vperm.xlu0 %6337, %v155_v31   ;;  %2561 = vmatmul.mubr.f32.gmra.mrb[20].mxu0 %v1704_v45  ;;  %v8270_v4 = vld [vmem:[#allocation2 + $0x250] sm:$0xff] }
 0x193   :  { %5337 = vmatprep.mubr.msk.f32.mxu0 %vm1540_vm1, %v1709_v52  ;;  %v8286_v51 = vpack.i.bf16 %v8272_v56, %v8270_v4 }
 0x194   :  { %v1029_v31 = vadd.f32 %v7378_v28, %v897_v2  ;;  %v557_v62 = vpop.permute.xlu1 %556  ;;  %v1705_v2 = vsel %vm1545_vm2, %v1701_v61, %v6428_v42  ;;  %v140_v42 = vld [vmem:[%s10373_s0 + $0x368] sm:$0xff] }
 0x195   :  { %v552_v18 = vpop.permute.xlu0 %551  ;;  %v882_v45 = vmul.f32 %v7368_v24, %v557_v62  ;;  %786 = vperm.xlu1 %6338, %v156_v32   ;;  %v141_v32 = vld [vmem:[%s10373_s0 + $0x370] sm:$0xff] }
 0x196   :  { %v1157_v50 = vmax.f32 %v1029_v31, 0.0  ;;  %v881_v8 = vmul.f32 %v7368_v24, %v552_v18  ;;  %6530 = vrot.lane.b32.xlu0 %v10514_v30, %s7118_s14  ;;  %2566 = vmatmul.mubr.f32.gmra.mrb[22].mxu0 %v1705_v2  ;;  %v157_v2 = vld [vmem:[%s10373_s0 + $0x3f0] sm:$0xff] }
 0x197   :  { %v1014_v52 = vadd.f32 %v7378_v28, %v882_v45  ;;  %v8330_v39 = vld [vmem:[#allocation2 + $0x268] sm:$0xff] }
 0x198   :  { %1286 = vst.msk [vmem:[#allocation2 + $0x2f0] sm:$0xff] %vm1191_vm0, %v1157_v50  ;;  %v1013_v46 = vadd.f32 %v7378_v28, %v881_v8  ;;  %v8288_v31 = vpop.permute.xlu1 %6435 }
 0x199   :  { %v637_v62 = vpop.permute.xlu0 %636  ;;  %v1142_v18 = vmax.f32 %v1014_v52, 0.0  ;;  %1968 = vrot.lane.b32.xlu1 %v8191_v11, %s7119_s15  ;;  %v6437_v59 = vunpack.i.l.bf16 %v8288_v31 }
 0x19a   :  { %v1141_v37 = vmax.f32 %v1013_v46, 0.0  ;;  %6535 = vrot.lane.b32.xlu0 %v8286_v51, %s7120_s18  ;;  %v898_v38 = vmul.f32 %v7368_v24, %v637_v62 }
 0x19b   :  { %1271 = vst.msk [vmem:[#allocation2 + $0x278] sm:$0xff] %vm1191_vm0, %v1142_v18 }
 0x19c   :  { %1270 = vst.msk [vmem:[#allocation2 + $0x270] sm:$0xff] %vm1191_vm0, %v1141_v37  ;;  %v1030_v61 = vadd.f32 %v7378_v28, %v898_v38  ;;  %v722_v50 = vpop.permute.xlu1 %721 }
 0x19d   :  { %v6431_v45 = vpop.permute.xlu0 %6430  ;;  %v915_v8 = vmul.f32 %v7368_v24, %v722_v50  ;;  %711 = vperm.xlu1 %6338, %v141_v32  }
 0x19e   :  { %706 = vperm.xlu0 %6337, %v140_v42   ;;  %v1158_v30 = vmax.f32 %v1030_v61, 0.0  ;;  %v6432_v62 = vunpack.i.l.bf16 %v6431_v45  ;;  %v6933_v61 = vld [vmem:[#allocation2 + $0x1a0] sm:$0xff] }
 0x19f   :  { %v8308_v52 = vld [vmem:[#allocation2 + $0x2f0] sm:$0xff]  ;;  %v1047_v46 = vadd.f32 %v7378_v28, %v915_v8  ;;  %v158_v8 = vld [vmem:[%s10373_s0 + $0x3f8] sm:$0xff] }
 0x1a0   :  { %v8313_v18 = vadd.f32 %v8308_v52, %v8189_v48  ;;  %1287 = vst.msk [vmem:[#allocation2 + $0x2f8] sm:$0xff] %vm1191_vm0, %v1158_v30  ;;  %v642_v37 = vpop.permute.xlu1 %641  ;;  %v6433_v30 = vunpack.i.h.bf16 %v6431_v45  ;;  %v8338_v45 = vld [vmem:[#allocation2 + $0x260] sm:$0xff] }
 0x1a1   :  { %v8316_v38 = vpop.permute.xlu0 %1758  ;;  %v1175_v42 = vmax.f32 %v1047_v46, 0.0  ;;  %v899_v32 = vmul.f32 %v7368_v24, %v642_v37  ;;  %2018 = vrot.lane.b32.xlu1 %v8210_v1, %s7119_s15  ;;  %v6934_v37 = vld [vmem:[#allocation2 + $0x60] sm:$0xff] }
 0x1a2   :  { %10515 = vst [vmem:[#allocation26_spill] sm:$0xff] %v8316_v38  ;;  %791 = vperm.xlu0 %6337, %v157_v2   ;;  %v1782_v50 = vsel %vm1191_vm0, %v6933_v61, %v8316_v38  ;;  %v1770_v2 = vsel %vm1191_vm0, %v6934_v37, %v6432_v62 }
 0x1a3   :  { %5338 = vmatprep.mubr.msk.f32.mxu0 %vm1540_vm1, %v1782_v50  ;;  %1304 = vst.msk [vmem:[#allocation2 + $0x380] sm:$0xff] %vm1191_vm0, %v1175_v42  ;;  %v1031_v46 = vadd.f32 %v7378_v28, %v899_v32  ;;  %v10516_v42 = vpack.i.bf16 %v7711_v14, %v7701_v15  ;;  %v1774_v62 = vsel %vm1540_vm1, %v1770_v2, %v6437_v59 }
 0x1a4   :  { %v727_v22 = vpop.permute.xlu1 %726  ;;  %v8343_v32 = vpack.i.bf16 %v8330_v39, %v8338_v45  ;;  %v1771_v15 = vsel %vm1191_vm0, %v6935_v27, %v6433_v30  ;;  %v142_v30 = vld [vmem:[%s10373_s0 + $0x378] sm:$0xff]  ;;  %v10519_v2 = vpack.i.bf16 %v7770_v33, %v7755_v13 }
 0x1a5   :  { %v6441_v61 = vpop.permute.xlu0 %6440  ;;  %v1159_v38 = vmax.f32 %v1031_v46, 0.0  ;;  %v916_v50 = vmul.f32 %v7368_v24, %v727_v22  ;;  %796 = vperm.xlu1 %6338, %v158_v8   ;;  %v6438_v8 = vunpack.i.h.bf16 %v8288_v31 }
 0x1a6   :  { %v6442_v35 = vunpack.i.l.bf16 %v6441_v61  ;;  %6540 = vrot.lane.b32.xlu0 %v10516_v42, %s7118_s14  ;;  %v6443_v22 = vunpack.i.h.bf16 %v6441_v61 }
 0x1a7   :  { %1288 = vst.msk [vmem:[#allocation2 + $0x300] sm:$0xff] %vm1191_vm0, %v1159_v38  ;;  %v1048_v46 = vadd.f32 %v7378_v28, %v916_v50  ;;  %v8349_v14 = vld [vmem:[#allocation2 + $0x2f8] sm:$0xff]  ;;  %v1775_v31 = vsel %vm1540_vm1, %v1771_v15, %v6438_v8 }
 0x1a8   :  { %v1778_v37 = vsel %vm1545_vm2, %v1774_v62, %v6442_v35  ;;  %v6446_v42 = vpop.permute.xlu1 %6445  ;;  %v8358_v38 = vadd.f32 %v8349_v14, %v8191_v11  ;;  %v6936_v35 = vld [vmem:[#allocation2 + $0x1a8] sm:$0xff]  ;;  %v1779_v50 = vsel %vm1545_vm2, %v1775_v31, %v6443_v22  ;;  %v8385_v31 = vld [vmem:[#allocation2 + $0x278] sm:$0xff] }
 0x1a9   :  { %v8352_v59 = vpop.permute.xlu0 %1760  ;;  %2571 = vmatmul.mubr.f32.gmra.mrb[24].mxu0 %v1778_v37  ;;  %v1176_v61 = vmax.f32 %v1048_v46, 0.0  ;;  %2020 = vrot.lane.b32.xlu1 %v8244_v49, %s7119_s15  ;;  %v6447_v8 = vunpack.i.l.bf16 %v6446_v42 }
 0x1aa   :  { %10517 = vst [vmem:[#allocation27_spill] sm:$0xff] %v8352_v59  ;;  %6545 = vrot.lane.b32.xlu0 %v8343_v32, %s7120_s18  ;;  %v1783_v27 = vsel %vm1191_vm0, %v6936_v35, %v8352_v59 }
 0x1ab   :  { %1305 = vst.msk [vmem:[#allocation2 + $0x388] sm:$0xff] %vm1191_vm0, %v1176_v61  ;;  %5339 = vmatprep.mubr.msk.f32.mxu0 %vm1540_vm1, %v1783_v27  ;;  %v8383_v27 = vld [vmem:[#allocation2 + $0x270] sm:$0xff] }
 0x1ac   :  { %v8373_v62 = vpop.permute.xlu1 %1762 }
 0x1ad   :  { %10518 = vst [vmem:[#allocation28_spill] sm:$0xff] %v8373_v62  ;;  %v647_v46 = vpop.permute.xlu0 %646  ;;  %2576 = vmatmul.mubr.f32.gmra.mrb[26].mxu0 %v1779_v50  ;;  %2022 = vrot.lane.b32.xlu1 %v8308_v52, %s7119_s15  ;;  %v1784_v15 = vsel %vm1191_vm0, %v8133_v29, %v8373_v62  ;;  %v6448_v50 = vunpack.i.h.bf16 %v6446_v42  ;;  %v6564_v42 = vpack.i.bf16 %v7975_v7, %v7947_v40  ;;  %v6939_v7 = vld [vmem:[#allocation2 + $0x1b8] sm:$0xff] }
 0x1ae   :  { %v900_v37 = vmul.f32 %v7368_v24, %v647_v46  ;;  %716 = vperm.xlu0 %6337, %v142_v30   ;;  %5340 = vmatprep.mubr.msk.f32.mxu0 %vm1540_vm1, %v1784_v15 }
 0x1af   :  { %v1773_v40 = vsel %vm1191_vm0, %v6938_v19, %v6448_v50  ;;  %v8420_v50 = vld [vmem:[#allocation2 + $0x300] sm:$0xff] }
 0x1b0   :  { %v1032_v61 = vadd.f32 %v7378_v28, %v900_v37  ;;  %v6456_v22 = vpop.permute.xlu1 %6455  ;;  %v8396_v37 = vpack.i.bf16 %v8385_v31, %v8383_v27 }
 0x1b1   :  { %v6451_v35 = vpop.permute.xlu0 %6450  ;;  %v6457_v46 = vunpack.i.l.bf16 %v6456_v22  ;;  %2024 = vrot.lane.b32.xlu1 %v8349_v14, %s7119_s15 }
 0x1b2   :  { %v1160_v30 = vmax.f32 %v1032_v61, 0.0  ;;  %6550 = vrot.lane.b32.xlu0 %v10519_v2, %s7118_s14  ;;  %v6453_v29 = vunpack.i.h.bf16 %v6451_v35  ;;  %v6452_v15 = vunpack.i.l.bf16 %v6451_v35  ;;  %v6937_v61 = vld [vmem:[#allocation2 + $0x70] sm:$0xff]  ;;  %v6458_v2 = vunpack.i.h.bf16 %v6456_v22 }
 0x1b3   :  { %v1772_v62 = vsel %vm1191_vm0, %v6937_v61, %v6447_v8 }
 0x1b4   :  { %1289 = vst.msk [vmem:[#allocation2 + $0x308] sm:$0xff] %vm1191_vm0, %v1160_v30  ;;  %v8401_v59 = vpop.permute.xlu1 %1764  ;;  %v1776_v33 = vsel %vm1540_vm1, %v1772_v62, %v6452_v15  ;;  %v1777_v62 = vsel %vm1540_vm1, %v1773_v40, %v6453_v29 }
 0x1b5   :  { %10520 = vst [vmem:[#allocation29_spill] sm:$0xff] %v8401_v59  ;;  %v732_v13 = vpop.permute.xlu0 %731  ;;  %6565 = vrot.lane.b32.xlu1 %v6564_v42, %s7118_s14  ;;  %v1780_v30 = vsel %vm1545_vm2, %v1776_v33, %v6457_v46  ;;  %v1785_v8 = vsel %vm1191_vm0, %v6939_v7, %v8401_v59  ;;  %v1781_v19 = vsel %vm1545_vm2, %v1777_v62, %v6458_v2 }
 0x1b6   :  { %v917_v35 = vmul.f32 %v7368_v24, %v732_v13  ;;  %6555 = vrot.lane.b32.xlu0 %v8396_v37, %s7120_s18  ;;  %2581 = vmatmul.mubr.f32.gmra.mrb[28].mxu0 %v1780_v30 }
 0x1b7   :  { %5341 = vmatprep.mubr.msk.f32.mxu0 %vm1540_vm1, %v1785_v8 }
 0x1b8   :  { %v1049_v22 = vadd.f32 %v7378_v28, %v917_v35  ;;  %v657_v15 = vpop.permute.xlu1 %656 }
 0x1b9   :  { %v652_v61 = vpop.permute.xlu0 %651  ;;  %v902_v42 = vmul.f32 %v7368_v24, %v657_v15 }
 0x1ba   :  { %v1177_v13 = vmax.f32 %v1049_v22, 0.0  ;;  %v901_v46 = vmul.f32 %v7368_v24, %v652_v61  ;;  %6560 = vrot.lane.b32.xlu0 %v8217_v57, %s7119_s15  ;;  %2586 = vmatmul.mubr.f32.gmra.mrb[30].mxu0 %v1781_v19  ;;  %v1432_v57 = vld [vmem:[#allocation2 + $0x380] sm:$0xff] }
 0x1bb   :  { %v8422_v29 = vld [vmem:[#allocation2 + $0x308] sm:$0xff]  ;;  %v1034_v33 = vadd.f32 %v7378_v28, %v902_v42 }
 0x1bc   :  { %1306 = vst.msk [vmem:[#allocation2 + $0x390] sm:$0xff] %vm1191_vm0, %v1177_v13  ;;  %v1033_v35 = vadd.f32 %v7378_v28, %v901_v46  ;;  %v6569_v30 = vpack.i.bf16 %v8422_v29, %v8420_v50  ;;  %v8429_v40 = vpop.permute.xlu1 %6465  ;;  %v1433_v13 = vld [vmem:[#allocation2 + $0x388] sm:$0xff] }
 0x1bd   :  { %v737_v7 = vpop.permute.xlu0 %736  ;;  %v1162_v8 = vmax.f32 %v1034_v33, 0.0 }
 0x1be   :  { %v1161_v2 = vmax.f32 %v1033_v35, 0.0  ;;  %2086 = vrot.lane.b32.xlu0 %v1432_v57, %s7119_s15  ;;  %6570 = vrot.lane.b32.xlu1 %v6569_v30, %s7120_s18  ;;  %v918_v62 = vmul.f32 %v7368_v24, %v737_v7  ;;  %v6579_v35 = vpack.i.bf16 %v8014_v63, %v7992_v9 }
 0x1bf   :  { %1291 = vst.msk [vmem:[#allocation2 + $0x318] sm:$0xff] %vm1191_vm0, %v1162_v8 }
 0x1c0   :  { %1290 = vst.msk [vmem:[#allocation2 + $0x310] sm:$0xff] %vm1191_vm0, %v1161_v2  ;;  %v1050_v22 = vadd.f32 %v7378_v28, %v918_v62  ;;  %v742_v15 = vpop.permute.xlu1 %741 }
 0x1c1   :  { %v8437_v61 = vpop.permute.xlu0 %6460  ;;  %v919_v42 = vmul.f32 %v7368_v24, %v742_v15 }
 0x1c2   :  { %10521 = vst [vmem:[#allocation30_spill] sm:$0xff] %v8437_v61  ;;  %2088 = vrot.lane.b32.xlu0 %v1433_v13, %s7119_s15  ;;  %6575 = vrot.lane.b32.xlu1 %v8286_v51, %s7119_s15  ;;  %v1178_v46 = vmax.f32 %v1050_v22, 0.0  ;;  %v10397_v33 = vunpack.i.l.bf16 %v8437_v61  ;;  %v6940_v13 = vld [vmem:[#allocation2 + $0x100] sm:$0xff]  ;;  %v10522_v10 = vunpack.i.h.bf16 %v8437_v61 }
 0x1c3   :  { %v1051_v19 = vadd.f32 %v7378_v28, %v919_v42  ;;  %v1434_v57 = vld [vmem:[#allocation2 + $0x390] sm:$0xff] }
 0x1c4   :  { %1307 = vst.msk [vmem:[#allocation2 + $0x398] sm:$0xff] %vm1191_vm0, %v1178_v46  ;;  %v662_v30 = vpop.permute.xlu1 %661  ;;  %v1842_v42 = vsel %vm1191_vm0, %v6940_v13, %v10397_v33  ;;  %v6467_v46 = vunpack.i.l.bf16 %v8429_v40  ;;  %v6941_v33 = vld [vmem:[#allocation2 + $0x108] sm:$0xff] }
 0x1c5   :  { %v1831_v7 = vpop.permute.xlu0 %1830  ;;  %v1179_v8 = vmax.f32 %v1051_v19, 0.0  ;;  %v903_v2 = vmul.f32 %v7368_v24, %v662_v30 }
 0x1c6   :  { %v8451_v62 = vsel %vm1191_vm0, %v8208_v34, %v1831_v7  ;;  %6580 = vrot.lane.b32.xlu0 %v6579_v35, %s7118_s14  ;;  %2090 = vrot.lane.b32.xlu1 %v1434_v57, %s7119_s15  ;;  %v8459_v63 = vld [vmem:[#allocation2 + $0x318] sm:$0xff] }
 0x1c7   :  { %5342 = vmatprep.mubr.msk.f32.mxu0 %vm1540_vm1, %v8451_v62  ;;  %v8457_v9 = vld [vmem:[#allocation2 + $0x310] sm:$0xff]  ;;  %1308 = vst.msk [vmem:[#allocation2 + $0x3a0] sm:$0xff] %vm1191_vm0, %v1179_v8  ;;  %v1035_v22 = vadd.f32 %v7378_v28, %v903_v2  ;;  %v1846_v8 = vsel %vm1540_vm1, %v1842_v42, %v6467_v46 }
 0x1c8   :  { %v6584_v15 = vpack.i.bf16 %v8459_v63, %v8457_v9  ;;  %v747_v19 = vpop.permute.xlu1 %746 }
 0x1c9   :  { %v6471_v35 = vpop.permute.xlu0 %6470  ;;  %v1163_v30 = vmax.f32 %v1035_v22, 0.0  ;;  %v920_v7 = vmul.f32 %v7368_v24, %v747_v19  ;;  %v1843_v22 = vsel %vm1191_vm0, %v6941_v33, %v10522_v10  ;;  %v6468_v19 = vunpack.i.h.bf16 %v8429_v40 }
 0x1ca   :  { %v6472_v57 = vunpack.i.l.bf16 %v6471_v35  ;;  %6585 = vrot.lane.b32.xlu0 %v6584_v15, %s7120_s18  ;;  %v6473_v51 = vunpack.i.h.bf16 %v6471_v35  ;;  %v6594_v10 = vpack.i.bf16 %v8098_v60, %v8084_v25  ;;  %v3614_v40 = vadd.f32 %v8059_v21, %v7954_v47 }
 0x1cb   :  { %1292 = vst.msk [vmem:[#allocation2 + $0x320] sm:$0xff] %vm1191_vm0, %v1163_v30  ;;  %v1052_v2 = vadd.f32 %v7378_v28, %v920_v7  ;;  %v1435_v59 = vld [vmem:[#allocation2 + $0x398] sm:$0xff] }
 0x1cc   :  { %v1850_v13 = vsel %vm1545_vm2, %v1846_v8, %v6472_v57  ;;  %2092 = vrot.lane.b32.xlu1 %v1435_v59, %s7119_s15  ;;  %v8481_v15 = vpop.permute.xlu1 %6475  ;;  %v1847_v59 = vsel %vm1540_vm1, %v1843_v22, %v6468_v19  ;;  %v3618_v7 = vadd.f32 %v3614_v40, %v8420_v50 }
 0x1cd   :  { %10523 = vst [vmem:[#allocation31_spill] sm:$0xff] %v8481_v15  ;;  %v1833_v42 = vpop.permute.xlu0 %1832  ;;  %2591 = vmatmul.mubr.f32.gmra.mrb[32].mxu0 %v1850_v13  ;;  %v1180_v46 = vmax.f32 %v1052_v2, 0.0  ;;  %v1851_v33 = vsel %vm1545_vm2, %v1847_v59, %v6473_v51  ;;  %v10403_v21 = vunpack.i.l.bf16 %v8481_v15  ;;  %v10400_v50 = vunpack.i.h.bf16 %v8481_v15 }
 0x1ce   :  { %v8485_v35 = vsel %vm1191_vm0, %v8196_v26, %v1833_v42  ;;  %6590 = vrot.lane.b32.xlu0 %v8343_v32, %s7119_s15  ;;  %v1436_v32 = vld [vmem:[#allocation2 + $0x3a0] sm:$0xff] }
 0x1cf   :  { %5343 = vmatprep.mubr.msk.f32.mxu0 %vm1540_vm1, %v8485_v35  ;;  %1309 = vst.msk [vmem:[#allocation2 + $0x3a8] sm:$0xff] %vm1191_vm0, %v1180_v46 }
 0x1d0   :  { %6595 = vrot.lane.b32.xlu1 %v6594_v10, %s7118_s14  ;;  %v1835_v26 = vpop.permute.xlu1 %1834  ;;  %v6942_v10 = vld [vmem:[#allocation2 + $0x110] sm:$0xff] }
 0x1d1   :  { %v667_v30 = vpop.permute.xlu0 %666  ;;  %2596 = vmatmul.mubr.f32.gmra.mrb[34].mxu0 %v1851_v33  ;;  %v8502_v60 = vsel %vm1191_vm0, %v8270_v4, %v1835_v26  ;;  %v1844_v59 = vsel %vm1191_vm0, %v6942_v10, %v10403_v21 }
 0x1d2   :  { %v904_v25 = vmul.f32 %v7368_v24, %v667_v30  ;;  %2158 = vrot.lane.b32.xlu0 %v1436_v32, %s7119_s15  ;;  %5344 = vmatprep.mubr.msk.f32.mxu0 %vm1540_vm1, %v8502_v60  ;;  %v1420_v47 = vld [vmem:[#allocation2 + $0x320] sm:$0xff]  ;;  %v6609_v30 = vpack.i.bf16 %v8150_v41, %v8120_v54  ;;  %v6943_v32 = vld [vmem:[#allocation2 + $0x118] sm:$0xff] }
 0x1d3   :  { %v8510_v57 = vadd.f32 %v3618_v7, %v1420_v47  ;;  %v1845_v7 = vsel %vm1191_vm0, %v6943_v32, %v10400_v50 }
 0x1d4   :  { %v1036_v51 = vadd.f32 %v7378_v28, %v904_v25  ;;  %v6486_v8 = vpop.permute.xlu1 %6485 }
 0x1d5   :  { %10524 = vst [vmem:[#allocation32_spill] sm:$0xff] %v8510_v57  ;;  %v6481_v2 = vpop.permute.xlu0 %6480  ;;  %v6487_v22 = vunpack.i.l.bf16 %v6486_v8  ;;  %v6488_v25 = vunpack.i.h.bf16 %v6486_v8 }
 0x1d6   :  { %v1164_v13 = vmax.f32 %v1036_v51, 0.0  ;;  %v6483_v19 = vunpack.i.h.bf16 %v6481_v2  ;;  %v6482_v42 = vunpack.i.l.bf16 %v6481_v2  ;;  %v1437_v46 = vld [vmem:[#allocation2 + $0x3a8] sm:$0xff] }
 0x1d7   :  { %2160 = vrot.lane.b32.xlu0 %v1437_v46, %s7119_s15  ;;  %v8530_v46 = vld [vmem:[#allocation2 + $0x208] sm:$0xff] }
 0x1d8   :  { %1293 = vst.msk [vmem:[#allocation2 + $0x328] sm:$0xff] %vm1191_vm0, %v1164_v13  ;;  %v1837_v40 = vpop.permute.xlu1 %1836  ;;  %v1848_v26 = vsel %vm1540_vm1, %v1844_v59, %v6482_v42  ;;  %v3615_v42 = vadd.f32 %v8530_v46, %v8050_v55  ;;  %v1849_v41 = vsel %vm1540_vm1, %v1845_v7, %v6483_v19 }
 0x1d9   :  { %v752_v33 = vpop.permute.xlu0 %751  ;;  %v8526_v51 = vsel %vm1191_vm0, %v8272_v56, %v1837_v40  ;;  %v1852_v13 = vsel %vm1545_vm2, %v1848_v26, %v6487_v22  ;;  %v1853_v55 = vsel %vm1545_vm2, %v1849_v41, %v6488_v25 }
 0x1da   :  { %v921_v2 = vmul.f32 %v7368_v24, %v752_v33  ;;  %2601 = vmatmul.mubr.f32.gmra.mrb[36].mxu0 %v1852_v13  ;;  %v3619_v56 = vadd.f32 %v3615_v42, %v8422_v29 }
 0x1db   :  { %5345 = vmatprep.mubr.msk.f32.mxu0 %vm1540_vm1, %v8526_v51  ;;  %6610 = vrot.lane.b32.xlu0 %v6609_v30, %s7118_s14 }
 0x1dc   :  { %v1053_v54 = vadd.f32 %v7378_v28, %v921_v2  ;;  %v677_v8 = vpop.permute.xlu1 %676 }
 0x1dd   :  { %v672_v10 = vpop.permute.xlu0 %671  ;;  %v906_v59 = vmul.f32 %v7368_v24, %v677_v8  ;;  %v8559_v8 = vld [vmem:[#allocation2 + $0x218] sm:$0xff] }
 0x1de   :  { %v1181_v22 = vmax.f32 %v1053_v54, 0.0  ;;  %v905_v40 = vmul.f32 %v7368_v24, %v672_v10  ;;  %2606 = vmatmul.mubr.f32.gmra.mrb[38].mxu0 %v1853_v55  ;;  %v3617_v10 = vadd.f32 %v8559_v8, %v8141_v20 }
 0x1df   :  { %v1421_v19 = vld [vmem:[#allocation2 + $0x328] sm:$0xff]  ;;  %v1038_v33 = vadd.f32 %v7378_v28, %v906_v59 }
 0x1e0   :  { %1310 = vst.msk [vmem:[#allocation2 + $0x3b0] sm:$0xff] %vm1191_vm0, %v1181_v22  ;;  %v1037_v26 = vadd.f32 %v7378_v28, %v905_v40  ;;  %v6599_v30 = vpack.i.bf16 %v1421_v19, %v1420_v47  ;;  %v8546_v32 = vadd.f32 %v3619_v56, %v1421_v19  ;;  %v6496_v29 = vpop.permute.xlu1 %6495  ;;  %v8563_v40 = vld [vmem:[#allocation2 + $0x210] sm:$0xff]  ;;  %v3621_v20 = vadd.f32 %v3617_v10, %v8459_v63 }
 0x1e1   :  { %v757_v7 = vpop.permute.xlu0 %756  ;;  %v1166_v2 = vmax.f32 %v1038_v33, 0.0  ;;  %v6497_v22 = vunpack.i.l.bf16 %v6496_v29  ;;  %v3616_v55 = vadd.f32 %v8563_v40, %v8139_v43  ;;  %v6947_v33 = vld [vmem:[#allocation2 + $0x120] sm:$0xff] }
 0x1e2   :  { %10525 = vst [vmem:[#allocation33_spill] sm:$0xff] %v8546_v32  ;;  %v1165_v13 = vmax.f32 %v1037_v26, 0.0  ;;  %6600 = vrot.lane.b32.xlu1 %v6599_v30, %s7120_s18  ;;  %v922_v42 = vmul.f32 %v7368_v24, %v757_v7  ;;  %v6948_v30 = vld [vmem:[#allocation2 + $0x128] sm:$0xff]  ;;  %v6498_v7 = vunpack.i.h.bf16 %v6496_v29 }
 0x1e3   :  { %1295 = vst.msk [vmem:[#allocation2 + $0x338] sm:$0xff] %vm1191_vm0, %v1166_v2 }
 0x1e4   :  { %1294 = vst.msk [vmem:[#allocation2 + $0x330] sm:$0xff] %vm1191_vm0, %v1165_v13  ;;  %v1054_v25 = vadd.f32 %v7378_v28, %v922_v42  ;;  %v6501_v41 = vpop.permute.xlu1 %6500 }
 0x1e5   :  { %v8553_v54 = vpop.permute.xlu0 %6490  ;;  %v6502_v19 = vunpack.i.l.bf16 %v6501_v41 }
 0x1e6   :  { %10526 = vst [vmem:[#allocation34_spill] sm:$0xff] %v8553_v54  ;;  %v10401_v47 = vunpack.i.h.bf16 %v8553_v54  ;;  %v10402_v56 = vunpack.i.l.bf16 %v8553_v54  ;;  %6605 = vrot.lane.b32.xlu1 %v8396_v37, %s7119_s15  ;;  %v1182_v59 = vmax.f32 %v1054_v25, 0.0  ;;  %v3620_v25 = vadd.f32 %v3616_v55, %v8457_v9  ;;  %v2831_v54 = vld [vmem:[#allocation3 + $0x420] sm:$0xff] }
 0x1e7   :  { %v1438_v42 = vld [vmem:[#allocation2 + $0x3b0] sm:$0xff] }
 0x1e8   :  { %v1914_v26 = vsel %vm1191_vm0, %v6947_v33, %v10402_v56  ;;  %v1915_v37 = vsel %vm1191_vm0, %v6948_v30, %v10401_v47  ;;  %1311 = vst.msk [vmem:[#allocation2 + $0x3b8] sm:$0xff] %vm1191_vm0, %v1182_v59  ;;  %v762_v2 = vpop.permute.xlu1 %761  ;;  %v6503_v30 = vunpack.i.h.bf16 %v6501_v41 }
 0x1e9   :  { %v1903_v13 = vpop.permute.xlu0 %1902  ;;  %v1918_v43 = vsel %vm1540_vm1, %v1914_v26, %v6497_v22  ;;  %v923_v50 = vmul.f32 %v7368_v24, %v762_v2  ;;  %v1919_v59 = vsel %vm1540_vm1, %v1915_v37, %v6498_v7 }
 0x1ea   :  { %v8580_v33 = vsel %vm1191_vm0, %v8338_v45, %v1903_v13  ;;  %2162 = vrot.lane.b32.xlu1 %v1438_v42, %s7119_s15  ;;  %v1922_v63 = vsel %vm1545_vm2, %v1918_v43, %v6502_v19  ;;  %v1423_v10 = vld [vmem:[#allocation2 + $0x338] sm:$0xff] }
 0x1eb   :  { %5346 = vmatprep.mubr.msk.f32.mxu0 %vm1540_vm1, %v8580_v33  ;;  %v1422_v29 = vld [vmem:[#allocation2 + $0x330] sm:$0xff]  ;;  %v1055_v22 = vadd.f32 %v7378_v28, %v923_v50  ;;  %v8590_v26 = vadd.f32 %v3621_v20, %v1423_v10  ;;  %v1923_v50 = vsel %vm1545_vm2, %v1919_v59, %v6503_v30 }
 0x1ec   :  { %2611 = vmatmul.mubr.f32.gmra.mrb[40].mxu0 %v1922_v63  ;;  %v6614_v9 = vpack.i.bf16 %v1423_v10, %v1422_v29  ;;  %v8588_v55 = vadd.f32 %v3620_v25, %v1422_v29  ;;  %v8592_v2 = vpop.permute.xlu1 %6505  ;;  %v10530_v25 = vpack.i.bf16 %v8090_v12, %v8088_v17 }
 0x1ed   :  { %10528 = vst [vmem:[#allocation36_spill] sm:$0xff] %v8590_v26  ;;  %10529 = vst [vmem:[#allocation37_spill] sm:$0xff] %v8592_v2  ;;  %v1905_v13 = vpop.permute.xlu0 %1904  ;;  %v1183_v19 = vmax.f32 %v1055_v22, 0.0  ;;  %v10404_v59 = vunpack.i.l.bf16 %v8592_v2 }
 0x1ee   :  { %10527 = vst [vmem:[#allocation35_spill] sm:$0xff] %v8588_v55  ;;  %v8596_v42 = vsel %vm1191_vm0, %v8330_v39, %v1905_v13  ;;  %6615 = vrot.lane.b32.xlu0 %v6614_v9, %s7120_s18 }
 0x1ef   :  { %5347 = vmatprep.mubr.msk.f32.mxu0 %vm1540_vm1, %v8596_v42  ;;  %1312 = vst.msk [vmem:[#allocation2 + $0x3c0] sm:$0xff] %vm1191_vm0, %v1183_v19  ;;  %v8603_v37 = vld [vmem:[#allocation2 + $0x3b8] sm:$0xff] }
 0x1f0   :  { %2616 = vmatmul.mubr.f32.gmra.mrb[42].mxu0 %v1923_v50  ;;  %2164 = vrot.lane.b32.xlu1 %v8603_v37, %s7119_s15  ;;  %v1907_v41 = vpop.permute.xlu1 %1906 }
 0x1f1   :  { %v682_v20 = vpop.permute.xlu0 %681  ;;  %v8609_v7 = vsel %vm1191_vm0, %v8383_v27, %v1907_v41 }
 0x1f2   :  { %v907_v43 = vmul.f32 %v7368_v24, %v682_v20  ;;  %6620 = vrot.lane.b32.xlu0 %v10530_v25, %s7118_s14  ;;  %5348 = vmatprep.mubr.msk.f32.mxu0 %vm1540_vm1, %v8609_v7  ;;  %v6949_v25 = vld [vmem:[#allocation2 + $0x130] sm:$0xff] }
 0x1f4   :  { %v1039_v63 = vadd.f32 %v7378_v28, %v907_v43  ;;  %v767_v29 = vpop.permute.xlu1 %766 }
 0x1f5   :  { %v6511_v10 = vpop.permute.xlu0 %6510  ;;  %v924_v9 = vmul.f32 %v7368_v24, %v767_v29 }
 0x1f6   :  { %v1167_v22 = vmax.f32 %v1039_v63, 0.0  ;;  %v6512_v30 = vunpack.i.l.bf16 %v6511_v10  ;;  %v8621_v13 = vld [vmem:[#allocation2 + $0x3c0] sm:$0xff]  ;;  %v1916_v63 = vsel %vm1191_vm0, %v6949_v25, %v10404_v59  ;;  %v6513_v29 = vunpack.i.h.bf16 %v6511_v10  ;;  %v6950_v10 = vld [vmem:[#allocation2 + $0x138] sm:$0xff] }
 0x1f7   :  { %v1056_v17 = vadd.f32 %v7378_v28, %v924_v9  ;;  %v8627_v12 = vadd.f32 %v8221_v58, %v8621_v13  ;;  %2218 = vrot.lane.b32.xlu1 %v8621_v13, %s7119_s15 }
 0x1f8   :  { %1296 = vst.msk [vmem:[#allocation2 + $0x340] sm:$0xff] %vm1191_vm0, %v1167_v22  ;;  %v1909_v19 = vpop.permute.xlu1 %1908  ;;  %v1920_v22 = vsel %vm1540_vm1, %v1916_v63, %v6512_v30  ;;  %v10531_v30 = vunpack.i.h.bf16 %v8592_v2 }
 0x1f9   :  { %v6516_v50 = vpop.permute.xlu0 %6515  ;;  %v1184_v20 = vmax.f32 %v1056_v17, 0.0  ;;  %v8640_v47 = vsel %vm1191_vm0, %v8385_v31, %v1909_v19 }
 0x1fa   :  { %v6517_v43 = vunpack.i.l.bf16 %v6516_v50  ;;  %v6518_v58 = vunpack.i.h.bf16 %v6516_v50  ;;  %v1917_v50 = vsel %vm1191_vm0, %v6950_v10, %v10531_v30 }
 0x1fb   :  { %1313 = vst.msk [vmem:[#allocation2 + $0x3c8] sm:$0xff] %vm1191_vm0, %v1184_v20  ;;  %v1921_v20 = vsel %vm1540_vm1, %v1917_v50, %v6513_v29 }
 0x1fc   :  { %v1924_v9 = vsel %vm1545_vm2, %v1920_v22, %v6517_v43  ;;  %v692_v56 = vpop.permute.xlu1 %691  ;;  %v1925_v25 = vsel %vm1545_vm2, %v1921_v20, %v6518_v58 }
 0x1fd   :  { %v687_v17 = vpop.permute.xlu0 %686  ;;  %2621 = vmatmul.mubr.f32.gmra.mrb[44].mxu0 %v1924_v9  ;;  %v909_v21 = vmul.f32 %v7368_v24, %v692_v56 }
 0x1fe   :  { %v908_v41 = vmul.f32 %v7368_v24, %v687_v17  ;;  %5349 = vmatprep.mubr.msk.f32.mxu0 %vm1540_vm1, %v8640_v47  ;;  %v6951_v17 = vld [vmem:[#allocation2 + $0x280] sm:$0xff] }
 0x1ff   :  { %v1041_v19 = vadd.f32 %v7378_v28, %v909_v21 }
 0x200   :  { %v1040_v43 = vadd.f32 %v7378_v28, %v908_v41  ;;  %v1963_v63 = vpop.permute.xlu1 %1962  ;;  %v8655_v55 = vpop.f32.mrb[0].mxu0 }
 0x201   :  { %v772_v56 = vpop.permute.xlu0 %771  ;;  %2626 = vmatmul.mubr.f32.gmra.mrb[46].mxu0 %v1925_v25  ;;  %v1169_v22 = vmax.f32 %v1041_v19, 0.0  ;;  %v1982_v59 = vsel %vm1191_vm0, %v6951_v17, %v1963_v63  ;;  %v2514_v10 = vpop.f32.mrb[1].mxu0 }
 0x202   :  { %v1168_v9 = vmax.f32 %v1040_v43, 0.0  ;;  %v925_v26 = vmul.f32 %v7368_v24, %v772_v56  ;;  %5350 = vmatprep.mubr.msk.f32.mxu0 %vm1540_vm1, %v1982_v59  ;;  %v8658_v21 = vld [vmem:[#allocation2 + $0x3c8] sm:$0xff]  ;;  %v8678_v10 = vld [vmem:[#allocation2 + $0x340] sm:$0xff] }
 0x203   :  { %1298 = vst.msk [vmem:[#allocation2 + $0x350] sm:$0xff] %vm1191_vm0, %v1169_v22  ;;  %v8667_v58 = vadd.f32 %v8252_v23, %v8658_v21  ;;  %2220 = vrot.lane.b32.xlu1 %v8658_v21, %s7119_s15 }
 0x204   :  { %1297 = vst.msk [vmem:[#allocation2 + $0x348] sm:$0xff] %vm1191_vm0, %v1168_v9  ;;  %v1057_v41 = vadd.f32 %v7378_v28, %v925_v26  ;;  %v777_v30 = vpop.permute.xlu1 %776  ;;  %v8672_v19 = vpop.f32.mrb[2].mxu0 }
 0x205   :  { %v6521_v59 = vpop.permute.xlu0 %6520  ;;  %v926_v20 = vmul.f32 %v7368_v24, %v777_v30  ;;  %v2519_v25 = vpop.f32.mrb[3].mxu0 }
 0x206   :  { %v1185_v50 = vmax.f32 %v1057_v41, 0.0  ;;  %v6522_v43 = vunpack.i.l.bf16 %v6521_v59  ;;  %v6523_v9 = vunpack.i.h.bf16 %v6521_v59 }
 0x207   :  { %v1058_v26 = vadd.f32 %v7378_v28, %v926_v20  ;;  %v6952_v20 = vld [vmem:[#allocation2 + $0x288] sm:$0xff] }
 0x208   :  { %1314 = vst.msk [vmem:[#allocation2 + $0x3d0] sm:$0xff] %vm1191_vm0, %v1185_v50  ;;  %v1965_v63 = vpop.permute.xlu1 %1964  ;;  %v1974_v17 = vsel %vm1540_vm1, %v7854_v36, %v6522_v43 }
 0x209   :  { %v6526_v56 = vpop.permute.xlu0 %6525  ;;  %v1186_v23 = vmax.f32 %v1058_v26, 0.0  ;;  %v1983_v26 = vsel %vm1191_vm0, %v6952_v20, %v1965_v63 }
 0x20a   :  { %v6527_v22 = vunpack.i.l.bf16 %v6526_v56  ;;  %v6528_v30 = vunpack.i.h.bf16 %v6526_v56 }
 0x20b   :  { %v8680_v41 = vld [vmem:[#allocation2 + $0x348] sm:$0xff]  ;;  %1315 = vst.msk [vmem:[#allocation2 + $0x3d8] sm:$0xff] %vm1191_vm0, %v1186_v23  ;;  %v1975_v23 = vsel %vm1540_vm1, %v7880_v6, %v6523_v9 }
 0x20c   :  { %v1978_v25 = vsel %vm1545_vm2, %v1974_v17, %v6527_v22  ;;  %v6624_v50 = vpack.i.bf16 %v8680_v41, %v8678_v10  ;;  %v702_v29 = vpop.permute.xlu1 %701  ;;  %v1979_v17 = vsel %vm1545_vm2, %v1975_v23, %v6528_v30 }
 0x20d   :  { %v697_v59 = vpop.permute.xlu0 %696  ;;  %2631 = vmatmul.mubr.f32.gmra.mrb[48].mxu0 %v1978_v25  ;;  %v911_v36 = vmul.f32 %v7368_v24, %v702_v29 }
 0x20e   :  { %v910_v43 = vmul.f32 %v7368_v24, %v697_v59  ;;  %6625 = vrot.lane.b32.xlu0 %v6624_v50, %s7120_s18  ;;  %5351 = vmatprep.mubr.msk.f32.mxu0 %vm1540_vm1, %v1983_v26  ;;  %v6953_v59 = vld [vmem:[#allocation2 + $0x290] sm:$0xff] }
 0x20f   :  { %v8691_v56 = vld [vmem:[#allocation2 + $0x3d0] sm:$0xff]  ;;  %v1043_v22 = vadd.f32 %v7378_v28, %v911_v36  ;;  %v10532_v36 = vpack.i.bf16 %v8191_v11, %v8189_v48 }
 0x210   :  { %v1042_v63 = vadd.f32 %v7378_v28, %v910_v43  ;;  %2222 = vrot.lane.b32.xlu1 %v8691_v56, %s7119_s15  ;;  %v8701_v29 = vadd.f32 %v8313_v18, %v8691_v56  ;;  %v1967_v25 = vpop.permute.xlu1 %1966 }
 0x211   :  { %v782_v50 = vpop.permute.xlu0 %781  ;;  %2636 = vmatmul.mubr.f32.gmra.mrb[50].mxu0 %v1979_v17  ;;  %v1171_v20 = vmax.f32 %v1043_v22, 0.0  ;;  %v1984_v6 = vsel %vm1191_vm0, %v6953_v59, %v1967_v25 }
 0x212   :  { %v1170_v26 = vmax.f32 %v1042_v63, 0.0  ;;  %v927_v9 = vmul.f32 %v7368_v24, %v782_v50  ;;  %6630 = vrot.lane.b32.xlu0 %v10532_v36, %s7118_s14  ;;  %5352 = vmatprep.mubr.msk.f32.mxu0 %vm1540_vm1, %v1984_v6  ;;  %v8711_v18 = vld [vmem:[#allocation2 + $0x3d8] sm:$0xff]  ;;  %v8731_v36 = vld [vmem:[#allocation2 + $0x350] sm:$0xff] }
 0x213   :  { %1300 = vst.msk [vmem:[#allocation2 + $0x360] sm:$0xff] %vm1191_vm0, %v1171_v20  ;;  %v8718_v43 = vadd.f32 %v8358_v38, %v8711_v18  ;;  %v3630_v38 = vadd.f32 %v8338_v45, %v8208_v34  ;;  %v6954_v45 = vld [vmem:[#allocation2 + $0x298] sm:$0xff] }
 0x214   :  { %1299 = vst.msk [vmem:[#allocation2 + $0x358] sm:$0xff] %vm1191_vm0, %v1170_v26  ;;  %v1059_v30 = vadd.f32 %v7378_v28, %v927_v9  ;;  %2224 = vrot.lane.b32.xlu1 %v8711_v18, %s7119_s15  ;;  %v787_v11 = vpop.permute.xlu1 %786 }
 0x215   :  { %v6531_v48 = vpop.permute.xlu0 %6530  ;;  %v928_v63 = vmul.f32 %v7368_v24, %v787_v11 }
 0x216   :  { %v1187_v22 = vmax.f32 %v1059_v30, 0.0  ;;  %v6532_v17 = vunpack.i.l.bf16 %v6531_v48  ;;  %v6533_v6 = vunpack.i.h.bf16 %v6531_v48 }
 0x217   :  { %v1060_v25 = vadd.f32 %v7378_v28, %v928_v63 }
 0x218   :  { %1316 = vst.msk [vmem:[#allocation2 + $0x3e0] sm:$0xff] %vm1191_vm0, %v1187_v22  ;;  %v1969_v50 = vpop.permute.xlu1 %1968  ;;  %v1976_v9 = vsel %vm1540_vm1, %v7930_v0, %v6532_v17  ;;  %v3634_v22 = vadd.f32 %v3630_v38, %v8678_v10 }
 0x219   :  { %v6536_v20 = vpop.permute.xlu0 %6535  ;;  %v1188_v26 = vmax.f32 %v1060_v25, 0.0  ;;  %v1985_v48 = vsel %vm1191_vm0, %v6954_v45, %v1969_v50  ;;  %v1977_v50 = vsel %vm1540_vm1, %v7969_v3, %v6533_v6  ;;  %v10535_v6 = vpack.i.bf16 %v8244_v49, %v8210_v1 }
 0x21a   :  { %v6537_v59 = vunpack.i.l.bf16 %v6536_v20  ;;  %v8735_v11 = vld [vmem:[#allocation2 + $0x360] sm:$0xff]  ;;  %v6538_v63 = vunpack.i.h.bf16 %v6536_v20 }
 0x21b   :  { %v8733_v30 = vld [vmem:[#allocation2 + $0x358] sm:$0xff]  ;;  %1317 = vst.msk [vmem:[#allocation2 + $0x3e8] sm:$0xff] %vm1191_vm0, %v1188_v26  ;;  %v8744_v25 = vadd.f32 %v3634_v22, %v8735_v11 }
 0x21c   :  { %v1980_v23 = vsel %vm1545_vm2, %v1976_v9, %v6537_v59  ;;  %v6634_v34 = vpack.i.bf16 %v8733_v30, %v8731_v36  ;;  %v712_v0 = vpop.permute.xlu1 %711 }
 0x21d   :  { %v707_v17 = vpop.permute.xlu0 %706  ;;  %2641 = vmatmul.mubr.f32.gmra.mrb[52].mxu0 %v1980_v23  ;;  %10533 = vst [vmem:[#allocation38_spill] sm:$0xff] %v8744_v25  ;;  %v913_v32 = vmul.f32 %v7368_v24, %v712_v0  ;;  %v8748_v26 = vpop.f32.mrb[4].mxu0 }
 0x21e   :  { %v912_v38 = vmul.f32 %v7368_v24, %v707_v17  ;;  %6635 = vrot.lane.b32.xlu0 %v6634_v34, %s7120_s18  ;;  %5353 = vmatprep.mubr.msk.f32.mxu0 %vm1540_vm1, %v1985_v48  ;;  %v2524_v20 = vpop.f32.mrb[5].mxu0  ;;  %v1981_v34 = vsel %vm1545_vm2, %v1977_v50, %v6538_v63 }
 0x21f   :  { %v8752_v59 = vld [vmem:[#allocation2 + $0x3e0] sm:$0xff]  ;;  %v1045_v23 = vadd.f32 %v7378_v28, %v913_v32 }
 0x220   :  { %v1044_v9 = vadd.f32 %v7378_v28, %v912_v38  ;;  %2274 = vrot.lane.b32.xlu1 %v8752_v59, %s7119_s15  ;;  %v8762_v22 = vadd.f32 %v8627_v12, %v8752_v59  ;;  %v2019_v45 = vpop.permute.xlu1 %2018  ;;  %v6955_v20 = vld [vmem:[#allocation2 + $0x2a0] sm:$0xff] }
 0x221   :  { %v792_v48 = vpop.permute.xlu0 %791  ;;  %2646 = vmatmul.mubr.f32.gmra.mrb[54].mxu0 %v1981_v34  ;;  %v1173_v0 = vmax.f32 %v1045_v23, 0.0  ;;  %v2038_v3 = vsel %vm1191_vm0, %v6955_v20, %v2019_v45  ;;  %v8766_v32 = vpop.f32.mrb[6].mxu0 }
 0x222   :  { %10534 = vst [vmem:[#allocation39_spill] sm:$0xff] %v8762_v22  ;;  %v1172_v17 = vmax.f32 %v1044_v9, 0.0  ;;  %6640 = vrot.lane.b32.xlu0 %v10535_v6, %s7118_s14  ;;  %v929_v12 = vmul.f32 %v7368_v24, %v792_v48  ;;  %v2529_v38 = vpop.f32.mrb[7].mxu0  ;;  %5354 = vmatprep.mubr.msk.f32.mxu0 %vm1540_vm1, %v2038_v3  ;;  %v8774_v63 = vld [vmem:[#allocation2 + $0x3e8] sm:$0xff] }
 0x223   :  { %1302 = vst.msk [vmem:[#allocation2 + $0x370] sm:$0xff] %vm1191_vm0, %v1173_v0  ;;  %v8780_v50 = vadd.f32 %v8667_v58, %v8774_v63  ;;  %v3632_v58 = vadd.f32 %v8383_v27, %v8270_v4  ;;  %v6956_v3 = vld [vmem:[#allocation2 + $0x248] sm:$0xff] }
 0x224   :  { %1301 = vst.msk [vmem:[#allocation2 + $0x368] sm:$0xff] %vm1191_vm0, %v1172_v17  ;;  %2276 = vrot.lane.b32.xlu1 %v8774_v63, %s7119_s15  ;;  %v1061_v1 = vadd.f32 %v7378_v28, %v929_v12  ;;  %v797_v49 = vpop.permute.xlu1 %796  ;;  %v3631_v6 = vadd.f32 %v6956_v3, %v8330_v39 }
 0x225   :  { %10536 = vst [vmem:[#allocation40_spill] sm:$0xff] %v8780_v50  ;;  %v6541_v9 = vpop.permute.xlu0 %6540  ;;  %v930_v34 = vmul.f32 %v7368_v24, %v797_v49  ;;  %v3636_v23 = vadd.f32 %v3632_v58, %v8731_v36 }
 0x226   :  { %v1189_v45 = vmax.f32 %v1061_v1, 0.0  ;;  %v6542_v48 = vunpack.i.l.bf16 %v6541_v9  ;;  %v6543_v50 = vunpack.i.h.bf16 %v6541_v9  ;;  %v3635_v4 = vadd.f32 %v3631_v6, %v8680_v41  ;;  %v6957_v9 = vld [vmem:[#allocation2 + $0x2a8] sm:$0xff] }
 0x227   :  { %v1062_v0 = vadd.f32 %v7378_v28, %v930_v34 }
 0x228   :  { %1318 = vst.msk [vmem:[#allocation2 + $0x3f0] sm:$0xff] %vm1191_vm0, %v1189_v45  ;;  %v2021_v17 = vpop.permute.xlu1 %2020  ;;  %v2030_v1 = vsel %vm1540_vm1, %v8022_v44, %v6542_v48 }
 0x229   :  { %v6546_v20 = vpop.permute.xlu0 %6545  ;;  %v1190_v38 = vmax.f32 %v1062_v0, 0.0  ;;  %v2039_v44 = vsel %vm1191_vm0, %v6957_v9, %v2021_v17 }
 0x22a   :  { %v6547_v12 = vunpack.i.l.bf16 %v6546_v20  ;;  %v8798_v34 = vld [vmem:[#allocation2 + $0x370] sm:$0xff]  ;;  %v6548_v27 = vunpack.i.h.bf16 %v6546_v20  ;;  %v2031_v20 = vsel %vm1540_vm1, %v8056_v53, %v6543_v50 }
 0x22b   :  { %v8796_v49 = vld [vmem:[#allocation2 + $0x368] sm:$0xff]  ;;  %1319 = vst.msk [vmem:[#allocation2 + $0x3f8] sm:$0xff] %vm1191_vm0, %v1190_v38  ;;  %v8806_v0 = vadd.f32 %v3636_v23, %v8798_v34 }
 0x22c   :  { %v2034_v45 = vsel %vm1545_vm2, %v2030_v1, %v6547_v12  ;;  %v6644_v39 = vpack.i.bf16 %v8796_v49, %v8735_v11  ;;  %v2023_v48 = vpop.permute.xlu1 %2022  ;;  %v8810_v3 = vadd.f32 %v3635_v4, %v8796_v49  ;;  %v2035_v17 = vsel %vm1545_vm2, %v2031_v20, %v6548_v27  ;;  %v6958_v12 = vld [vmem:[#allocation2 + $0x2b0] sm:$0xff]  ;;  %v6959_v20 = vld [vmem:[#allocation2 + $0x258] sm:$0xff] }
 0x22d   :  { %10537 = vst [vmem:[#allocation41_spill] sm:$0xff] %v8806_v0  ;;  %v717_v58 = vpop.permute.xlu0 %716  ;;  %2651 = vmatmul.mubr.f32.gmra.mrb[56].mxu0 %v2034_v45  ;;  %v2040_v1 = vsel %vm1191_vm0, %v6958_v12, %v2023_v48 }
 0x22e   :  { %10538 = vst [vmem:[#allocation42_spill] sm:$0xff] %v8810_v3  ;;  %v914_v6 = vmul.f32 %v7368_v24, %v717_v58  ;;  %6645 = vrot.lane.b32.xlu0 %v6644_v39, %s7120_s18  ;;  %5355 = vmatprep.mubr.msk.f32.mxu0 %vm1540_vm1, %v2039_v44 }
 0x22f   :  { %v8818_v38 = vld [vmem:[#allocation2 + $0x3f0] sm:$0xff] }
 0x230   :  { %v1046_v23 = vadd.f32 %v7378_v28, %v914_v6  ;;  %2278 = vrot.lane.b32.xlu1 %v8818_v38, %s7119_s15  ;;  %v8826_v24 = vadd.f32 %v8701_v29, %v8818_v38  ;;  %v2025_v4 = vpop.permute.xlu1 %2024  ;;  %v10540_v28 = vpack.i.bf16 %v8349_v14, %v8308_v52 }
 0x231   :  { %v6551_v45 = vpop.permute.xlu0 %6550  ;;  %2656 = vmatmul.mubr.f32.gmra.mrb[58].mxu0 %v2035_v17 }
 0x232   :  { %10539 = vst [vmem:[#allocation43_spill] sm:$0xff] %v8826_v24  ;;  %v1174_v53 = vmax.f32 %v1046_v23, 0.0  ;;  %6650 = vrot.lane.b32.xlu0 %v10540_v28, %s7118_s14  ;;  %5356 = vmatprep.mubr.msk.f32.mxu0 %vm1540_vm1, %v2040_v1  ;;  %v8833_v50 = vld [vmem:[#allocation2 + $0x3f8] sm:$0xff]  ;;  %v6552_v27 = vunpack.i.l.bf16 %v6551_v45  ;;  %v6553_v58 = vunpack.i.h.bf16 %v6551_v45  ;;  %v3633_v23 = vadd.f32 %v6959_v20, %v8385_v31 }
 0x233   :  { %v8838_v29 = vadd.f32 %v8718_v43, %v8833_v50  ;;  %v6960_v28 = vld [vmem:[#allocation2 + $0x2b8] sm:$0xff] }
 0x234   :  { %1303 = vst.msk [vmem:[#allocation2 + $0x378] sm:$0xff] %vm1191_vm0, %v1174_v53  ;;  %v8842_v9 = vpop.f32.mrb[8].mxu0  ;;  %2280 = vrot.lane.b32.xlu1 %v8833_v50, %s7119_s15  ;;  %v8846_v52 = vpop.permute.xlu1 %6565  ;;  %v2032_v43 = vsel %vm1540_vm1, %v8076_v5, %v6552_v27  ;;  %v3637_v45 = vadd.f32 %v3633_v23, %v8733_v30 }
 0x235   :  { %10541 = vst [vmem:[#allocation44_spill] sm:$0xff] %v8838_v29  ;;  %10542 = vst [vmem:[#allocation45_spill] sm:$0xff] %v8846_v52  ;;  %v6556_v14 = vpop.permute.xlu0 %6555  ;;  %v2534_v44 = vpop.f32.mrb[9].mxu0  ;;  %v10410_v31 = vunpack.i.l.bf16 %v8846_v52 }
 0x236   :  { %2262 = vrot.lane.b32.xlu0 %v8798_v34, %s7120_s18  ;;  %v6557_v48 = vunpack.i.l.bf16 %v6556_v14  ;;  %v6558_v17 = vunpack.i.h.bf16 %v6556_v14  ;;  %v2041_v44 = vsel %vm1191_vm0, %v6960_v28, %v2025_v4  ;;  %v2033_v4 = vsel %vm1540_vm1, %v8111_v16, %v6553_v58 }
 0x238   :  { %v8850_v6 = vpop.f32.mrb[10].mxu0  ;;  %v8855_v12 = vpop.permute.xlu1 %6570  ;;  %v2036_v53 = vsel %vm1545_vm2, %v2032_v43, %v6557_v48  ;;  %v2037_v20 = vsel %vm1545_vm2, %v2033_v4, %v6558_v17 }
 0x239   :  { %v6561_v1 = vpop.permute.xlu0 %6560  ;;  %v2539_v29 = vpop.f32.mrb[11].mxu0  ;;  %2661 = vmatmul.mubr.f32.gmra.mrb[60].mxu0 %v2036_v53  ;;  %v10420_v53 = vunpack.i.l.bf16 %v8855_v12 }
 0x23a   :  { %v6562_v39 = vunpack.i.l.bf16 %v6561_v1  ;;  %v6563_v24 = vunpack.i.h.bf16 %v6561_v1  ;;  %5357 = vmatprep.mubr.msk.f32.mxu0 %vm1540_vm1, %v2041_v44  ;;  %v6961_v29 = vld [vmem:[#allocation2 + $0x200] sm:$0xff] }
 0x23b   :  { %v8861_v5 = vld [vmem:[#allocation2 + $0x378] sm:$0xff] }
 0x23c   :  { %2264 = vrot.lane.b32.xlu0 %v8861_v5, %s7120_s18  ;;  %v8867_v27 = vadd.f32 %v3637_v45, %v8861_v5  ;;  %v2098_v14 = vsel %vm1191_vm0, %v6961_v29, %v6562_v39  ;;  %v6576_v48 = vpop.permute.xlu1 %6575  ;;  %v2099_v16 = vsel %vm1191_vm0, %v8530_v46, %v6563_v24  ;;  %v10407_v39 = vunpack.i.h.bf16 %v8846_v52 }
 0x23d   :  { %v2087_v43 = vpop.permute.xlu0 %2086  ;;  %2666 = vmatmul.mubr.f32.gmra.mrb[62].mxu0 %v2037_v20  ;;  %v2102_v1 = vsel %vm1540_vm1, %v2098_v14, %v10410_v31  ;;  %v10419_v45 = vunpack.i.h.bf16 %v8855_v12 }
 0x23e   :  { %10543 = vst [vmem:[#allocation46_spill] sm:$0xff] %v8867_v27  ;;  %v2110_v23 = vsel %vm1191_vm0, %v8678_v10, %v2087_v43  ;;  %v2106_v17 = vsel %vm1545_vm2, %v2102_v1, %v10420_v53  ;;  %v2103_v44 = vsel %vm1540_vm1, %v2099_v16, %v10407_v39  ;;  %v6578_v16 = vunpack.i.h.bf16 %v6576_v48  ;;  %v6967_v27 = vld [vmem:[#allocation2 + $0x388] sm:$0xff] }
 0x23f   :  { %5358 = vmatprep.mubr.msk.f32.mxu0 %vm1540_vm1, %v2110_v23  ;;  %v2107_v29 = vsel %vm1545_vm2, %v2103_v44, %v10419_v45 }
 0x240   :  { %v2091_v46 = vpop.permute.xlu1 %2090 }
 0x241   :  { %v2089_v58 = vpop.permute.xlu0 %2088  ;;  %v8888_v28 = vpop.f32.mrb[12].mxu0  ;;  %2671 = vmatmul.mubr.f32.gmra.mrb[64].mxu0 %v2106_v17  ;;  %v2112_v14 = vsel %vm1191_vm0, %v8731_v36, %v2091_v46 }
 0x242   :  { %v2111_v10 = vsel %vm1191_vm0, %v8680_v41, %v2089_v58  ;;  %v2544_v24 = vpop.f32.mrb[13].mxu0  ;;  %v6577_v41 = vunpack.i.l.bf16 %v6576_v48 }
 0x243   :  { %5359 = vmatprep.mubr.msk.f32.mxu0 %vm1540_vm1, %v2111_v10 }
 0x244   :  { %v2093_v58 = vpop.permute.xlu1 %2092  ;;  %v2100_v10 = vsel %vm1191_vm0, %v8563_v40, %v6577_v41  ;;  %v2101_v40 = vsel %vm1191_vm0, %v8559_v8, %v6578_v16  ;;  %v6962_v8 = vld [vmem:[#allocation2 + $0x220] sm:$0xff] }
 0x245   :  { %v8895_v4 = vpop.permute.xlu0 %6580  ;;  %v8902_v43 = vpop.f32.mrb[14].mxu0  ;;  %2676 = vmatmul.mubr.f32.gmra.mrb[66].mxu0 %v2107_v29  ;;  %v2113_v48 = vsel %vm1191_vm0, %v8733_v30, %v2093_v58 }
 0x246   :  { %10544 = vst [vmem:[#allocation47_spill] sm:$0xff] %v8895_v4  ;;  %v10406_v20 = vunpack.i.l.bf16 %v8895_v4  ;;  %v2549_v23 = vpop.f32.mrb[15].mxu0  ;;  %5360 = vmatprep.mubr.msk.f32.mxu0 %vm1540_vm1, %v2112_v14  ;;  %v10405_v44 = vunpack.i.h.bf16 %v8895_v4 }
 0x248   :  { %v2104_v36 = vsel %vm1540_vm1, %v2100_v10, %v10406_v20  ;;  %v2105_v14 = vsel %vm1540_vm1, %v2101_v40, %v10405_v44  ;;  %v8927_v23 = vpop.permute.xlu1 %6595 }
 0x249   :  { %v8906_v1 = vpop.permute.xlu0 %6585  ;;  %10545 = vst [vmem:[#allocation48_spill] sm:$0xff] %v8927_v23 }
 0x24a   :  { %v10418_v17 = vunpack.i.l.bf16 %v8906_v1  ;;  %v10415_v46 = vunpack.i.h.bf16 %v8906_v1 }
 0x24c   :  { %v2108_v24 = vsel %vm1545_vm2, %v2104_v36, %v10418_v17  ;;  %v2109_v10 = vsel %vm1545_vm2, %v2105_v14, %v10415_v46 }
 0x24d   :  { %v6591_v29 = vpop.permute.xlu0 %6590  ;;  %2681 = vmatmul.mubr.f32.gmra.mrb[68].mxu0 %v2108_v24  ;;  %v10408_v24 = vunpack.i.l.bf16 %v8927_v23 }
 0x24e   :  { %5361 = vmatprep.mubr.msk.f32.mxu0 %vm1540_vm1, %v2113_v48  ;;  %v6592_v41 = vunpack.i.l.bf16 %v6591_v29  ;;  %v6593_v58 = vunpack.i.h.bf16 %v6591_v29  ;;  %v6963_v29 = vld [vmem:[#allocation2 + $0x228] sm:$0xff] }
 0x250   :  { %v2170_v16 = vsel %vm1191_vm0, %v6962_v8, %v6592_v41  ;;  %v2171_v41 = vsel %vm1191_vm0, %v6963_v29, %v6593_v58 }
 0x251   :  { %v2159_v36 = vpop.permute.xlu0 %2158  ;;  %2686 = vmatmul.mubr.f32.gmra.mrb[70].mxu0 %v2109_v10  ;;  %v2174_v14 = vsel %vm1540_vm1, %v2170_v16, %v10408_v24 }
 0x252   :  { %v2182_v30 = vsel %vm1191_vm0, %v8735_v11, %v2159_v36  ;;  %v10409_v36 = vunpack.i.h.bf16 %v8927_v23 }
 0x253   :  { %5362 = vmatprep.mubr.msk.f32.mxu0 %vm1540_vm1, %v2182_v30 }
 0x254   :  { %v8937_v48 = vpop.permute.xlu1 %6600  ;;  %v2175_v16 = vsel %vm1540_vm1, %v2171_v41, %v10409_v36 }
 0x255   :  { %v10414_v40 = vunpack.i.l.bf16 %v8937_v48  ;;  %v2161_v44 = vpop.permute.xlu0 %2160  ;;  %v10411_v10 = vunpack.i.h.bf16 %v8937_v48 }
 0x256   :  { %v2183_v30 = vsel %vm1191_vm0, %v8796_v49, %v2161_v44 }
 0x257   :  { %v2178_v11 = vsel %vm1545_vm2, %v2174_v14, %v10414_v40  ;;  %v2179_v58 = vsel %vm1545_vm2, %v2175_v16, %v10411_v10  ;;  %v2799_v40 = vld [vmem:[#allocation3 + $0x320] sm:$0xff] }
 0x258   :  { %v6606_v8 = vpop.permute.xlu1 %6605  ;;  %v8951_v20 = vpop.f32.mrb[16].mxu0  ;;  %2691 = vmatmul.mubr.f32.gmra.mrb[72].mxu0 %v2178_v11 }
 0x259   :  { %v2554_v39 = vpop.f32.mrb[17].mxu0  ;;  %5363 = vmatprep.mubr.msk.f32.mxu0 %vm1540_vm1, %v2183_v30  ;;  %v6607_v14 = vunpack.i.l.bf16 %v6606_v8  ;;  %v8957_v24 = vpop.permute.xlu0 %6610  ;;  %v6608_v41 = vunpack.i.h.bf16 %v6606_v8  ;;  %v6964_v30 = vld [vmem:[#allocation2 + $0x230] sm:$0xff] }
 0x25a   :  { %10546 = vst [vmem:[#allocation49_spill] sm:$0xff] %v8957_v24  ;;  %v10412_v11 = vunpack.i.l.bf16 %v8957_v24  ;;  %v10416_v10 = vunpack.i.h.bf16 %v8957_v24 }
 0x25b   :  { %v2172_v36 = vsel %vm1191_vm0, %v6964_v30, %v6607_v14 }
 0x25c   :  { %v2163_v29 = vpop.permute.xlu1 %2162  ;;  %v8962_v49 = vpop.f32.mrb[18].mxu0  ;;  %2696 = vmatmul.mubr.f32.gmra.mrb[74].mxu0 %v2179_v58  ;;  %v2176_v58 = vsel %vm1540_vm1, %v2172_v36, %v10412_v11 }
 0x25d   :  { %v2184_v39 = vsel %vm1191_vm0, %v8798_v34, %v2163_v29  ;;  %v2559_v44 = vpop.f32.mrb[19].mxu0 }
 0x25e   :  { %5364 = vmatprep.mubr.msk.f32.mxu0 %vm1540_vm1, %v2184_v39  ;;  %v6965_v39 = vld [vmem:[#allocation2 + $0x238] sm:$0xff] }
 0x25f   :  { %v2173_v14 = vsel %vm1191_vm0, %v6965_v39, %v6608_v41  ;;  %v6966_v39 = vld [vmem:[#allocation2 + $0x380] sm:$0xff] }
 0x260   :  { %v8969_v31 = vpop.permute.xlu0 %6615  ;;  %v2177_v36 = vsel %vm1540_vm1, %v2173_v14, %v10416_v10  ;;  %v2800_v14 = vld [vmem:[#allocation3 + $0x328] sm:$0xff] }
 0x261   :  { %v10413_v16 = vunpack.i.l.bf16 %v8969_v31  ;;  %v10417_v34 = vunpack.i.h.bf16 %v8969_v31 }
 0x262   :  { %v2165_v29 = vpop.permute.xlu1 %2164 }
 0x263   :  { %v2180_v8 = vsel %vm1545_vm2, %v2176_v58, %v10413_v16  ;;  %v2185_v44 = vsel %vm1191_vm0, %v8861_v5, %v2165_v29  ;;  %v2181_v58 = vsel %vm1545_vm2, %v2177_v36, %v10417_v34 }
 0x264   :  { %2701 = vmatmul.mubr.f32.gmra.mrb[76].mxu0 %v2180_v8  ;;  %v2815_v8 = vld [vmem:[#allocation3 + $0x3a0] sm:$0xff]  ;;  %v8996_v10 = vpop.permute.xlu0 %6620 }
 0x265   :  { %5365 = vmatprep.mubr.msk.f32.mxu0 %vm1540_vm1, %v2185_v44  ;;  %v8984_v30 = vpop.f32.mrb[20].mxu0  ;;  %v2816_v44 = vld [vmem:[#allocation3 + $0x3a8] sm:$0xff]  ;;  %10547 = vst [vmem:[#allocation50_spill] sm:$0xff] %v8996_v10  ;;  %v10421_v34 = vunpack.i.l.bf16 %v8996_v10 }
 0x266   :  { %v2564_v11 = vpop.f32.mrb[21].mxu0  ;;  %v6056_v46 = vpack.c.bf16 %v2816_v44, %v2815_v8 }
 0x267   :  { %v6058_v11 = vpack.c.bf16 %v2800_v14, %v2799_v40  ;;  %v2802_v14 = vld [vmem:[#allocation3 + $0x338] sm:$0xff] }
 0x268   :  { %2706 = vmatmul.mubr.f32.gmra.mrb[78].mxu0 %v2181_v58  ;;  %6057 = vmatprep.subr.bf16.mxu1 %v6056_v46  ;;  %v2801_v46 = vld [vmem:[#allocation3 + $0x330] sm:$0xff] }
 0x269   :  { %v8992_v16 = vpop.f32.mrb[22].mxu0  ;;  %v2219_v41 = vpop.permute.xlu1 %2218  ;;  %6059 = vmatpush3.bf16.msra.mxu1 %v6058_v11  ;;  %v6062_v45 = vpack.c.bf16 %v2802_v14, %v2801_v46  ;;  %v2804_v46 = vld [vmem:[#allocation3 + $0x348] sm:$0xff]  ;;  %v10549_v14 = vunpack.i.h.bf16 %v8996_v10 }
 0x26a   :  { %v2238_v5 = vsel %vm1191_vm0, %v6966_v39, %v2219_v41  ;;  %v2569_v29 = vpop.f32.mrb[23].mxu0  ;;  %v2817_v39 = vld [vmem:[#allocation3 + $0x3b0] sm:$0xff] }
 0x26b   :  { %5366 = vmatprep.mubr.msk.f32.mxu0 %vm1540_vm1, %v2238_v5  ;;  %v2818_v5 = vld [vmem:[#allocation3 + $0x3b8] sm:$0xff] }
 0x26c   :  { %v6060_v40 = vpack.c.bf16 %v2818_v5, %v2817_v39  ;;  %v2819_v5 = vld [vmem:[#allocation3 + $0x3c0] sm:$0xff] }
 0x26e   :  { %6061 = vmatprep.subr.bf16.mxu1 %v6060_v40  ;;  %v2822_v40 = vld [vmem:[#allocation3 + $0x3d8] sm:$0xff] }
 0x26f   :  { %6063 = vmatpush3.bf16.msra.mxu1 %v6062_v45 }
 0x275   :  { %v2221_v29 = vpop.permute.xlu1 %2220 }
 0x276   :  { %v2239_v39 = vsel %vm1191_vm0, %v6967_v27, %v2221_v29  ;;  %v2821_v29 = vld [vmem:[#allocation3 + $0x3d0] sm:$0xff] }
 0x27c   :  { %v8998_v36 = vpop.f32.mrb[24].mxu0 }
 0x27d   :  { %v2574_v58 = vpop.f32.mrb[25].mxu0 }
 0x27e   :  { %v2230_v58 = vsel %vm1540_vm1, %v8451_v62, %v10421_v34  ;;  %v2803_v62 = vld [vmem:[#allocation3 + $0x340] sm:$0xff]  ;;  %v2231_v34 = vsel %vm1540_vm1, %v8485_v35, %v10549_v14 }
 0x27f   :  { %v2807_v14 = vld [vmem:[#allocation3 + $0x360] sm:$0xff] }
 0x280   :  { %v9001_v17 = vpop.permute.xlu0 %6625  ;;  %v9003_v41 = vpop.f32.mrb[26].mxu0 }
 0x281   :  { %10548 = vst [vmem:[#allocation51_spill] sm:$0xff] %v9001_v17  ;;  %v10422_v8 = vunpack.i.l.bf16 %v9001_v17  ;;  %v2579_v44 = vpop.f32.mrb[27].mxu0  ;;  %v10423_v53 = vunpack.i.h.bf16 %v9001_v17 }
 0x282   :  { %v2820_v44 = vld [vmem:[#allocation3 + $0x3c8] sm:$0xff]  ;;  %v2223_v11 = vpop.permute.xlu1 %2222 }
 0x283   :  { %v2234_v22 = vsel %vm1545_vm2, %v2230_v58, %v10422_v8  ;;  %v6064_v0 = vpack.c.bf16 %v2820_v44, %v2819_v5  ;;  %v6066_v58 = vpack.c.bf16 %v2804_v46, %v2803_v62  ;;  %v2235_v27 = vsel %vm1545_vm2, %v2231_v34, %v10423_v53  ;;  %v2805_v5 = vld [vmem:[#allocation3 + $0x350] sm:$0xff]  ;;  %v2806_v44 = vld [vmem:[#allocation3 + $0x358] sm:$0xff]  ;;  %v2824_v34 = vld [vmem:[#allocation3 + $0x3e8] sm:$0xff] }
 0x284   :  { %2711 = vmatmul.mubr.f32.gmra.mrb[80].mxu0 %v2234_v22  ;;  %v6968_v22 = vld [vmem:[#allocation2 + $0x390] sm:$0xff]  ;;  %v6070_v35 = vpack.c.bf16 %v2806_v44, %v2805_v5  ;;  %v9028_v62 = vpop.permute.xlu0 %6630  ;;  %v2826_v44 = vld [vmem:[#allocation3 + $0x3f8] sm:$0xff] }
 0x285   :  { %5367 = vmatprep.mubr.msk.f32.mxu0 %vm1540_vm1, %v2239_v39  ;;  %6065 = vmatprep.subr.bf16.mxu1 %v6064_v0  ;;  %v2240_v45 = vsel %vm1191_vm0, %v6968_v22, %v2223_v11  ;;  %v6068_v39 = vpack.c.bf16 %v2822_v40, %v2821_v29  ;;  %10550 = vst [vmem:[#allocation52_spill] sm:$0xff] %v9028_v62  ;;  %v2823_v0 = vld [vmem:[#allocation3 + $0x3e0] sm:$0xff]  ;;  %v2825_v5 = vld [vmem:[#allocation3 + $0x3f0] sm:$0xff] }
 0x286   :  { %6067 = vmatpush3.bf16.msra.mxu1 %v6066_v58  ;;  %v6072_v11 = vpack.c.bf16 %v2824_v34, %v2823_v0  ;;  %v2808_v58 = vld [vmem:[#allocation3 + $0x368] sm:$0xff]  ;;  %v2809_v53 = vld [vmem:[#allocation3 + $0x370] sm:$0xff]  ;;  %v2810_v0 = vld [vmem:[#allocation3 + $0x378] sm:$0xff] }
 0x287   :  { %6069 = vmatprep.subr.bf16.mxu1 %v6068_v39  ;;  %v2828_v34 = vld [vmem:[#allocation3 + $0x408] sm:$0xff] }
 0x288   :  { %2716 = vmatmul.mubr.f32.gmra.mrb[82].mxu0 %v2235_v27  ;;  %v10426_v27 = vunpack.i.l.bf16 %v9028_v62 }
 0x289   :  { %5368 = vmatprep.mubr.msk.f32.mxu0 %vm1540_vm1, %v2240_v45  ;;  %v9026_v8 = vpop.f32.mrb[28].mxu0  ;;  %v6074_v45 = vpack.c.bf16 %v2808_v58, %v2807_v14  ;;  %v6078_v58 = vpack.c.bf16 %v2810_v0, %v2809_v53  ;;  %v2812_v53 = vld [vmem:[#allocation3 + $0x388] sm:$0xff]  ;;  %v10552_v0 = vunpack.i.h.bf16 %v9028_v62 }
 0x28a   :  { %v2584_v46 = vpop.f32.mrb[29].mxu0  ;;  %6071 = vmatpush3.bf16.msra.mxu1 %v6070_v35  ;;  %v6076_v35 = vpack.c.bf16 %v2826_v44, %v2825_v5  ;;  %v2232_v14 = vsel %vm1540_vm1, %v8502_v60, %v10426_v27  ;;  %v2827_v44 = vld [vmem:[#allocation3 + $0x400] sm:$0xff] }
 0x28b   :  { %6073 = vmatprep.subr.bf16.mxu1 %v6072_v11  ;;  %v2225_v46 = vpop.permute.xlu1 %2224  ;;  %v6080_v10 = vpack.c.bf16 %v2828_v34, %v2827_v44  ;;  %v2811_v60 = vld [vmem:[#allocation3 + $0x380] sm:$0xff]  ;;  %v2233_v27 = vsel %vm1540_vm1, %v8526_v51, %v10552_v0  ;;  %v2829_v34 = vld [vmem:[#allocation3 + $0x410] sm:$0xff]  ;;  %v2814_v51 = vld [vmem:[#allocation3 + $0x398] sm:$0xff] }
 0x28d   :  { %v9031_v22 = vpop.f32.mrb[30].mxu0 }
 0x28e   :  { %v2589_v29 = vpop.f32.mrb[31].mxu0  ;;  %6075 = vmatpush3.bf16.msra.mxu1 %v6074_v45 }
 0x28f   :  { %6077 = vmatprep.subr.bf16.mxu1 %v6076_v35  ;;  %v6969_v29 = vld [vmem:[#allocation2 + $0x398] sm:$0xff]  ;;  %v10553_v35 = vld [vmem:[#allocation9_spill] sm:$0xff] }
 0x290   :  { %v9033_v40 = vpop.permute.xlu0 %6635  ;;  %v2241_v5 = vsel %vm1191_vm0, %v6969_v29, %v2225_v46 }
 0x291   :  { %10551 = vst [vmem:[#allocation53_spill] sm:$0xff] %v9033_v40  ;;  %v10427_v39 = vunpack.i.l.bf16 %v9033_v40  ;;  %v10428_v11 = vunpack.i.h.bf16 %v9033_v40 }
 0x292   :  { %6079 = vmatpush3.bf16.msra.mxu1 %v6078_v58  ;;  %v2275_v3 = vpop.permute.xlu1 %2274  ;;  %v2300_v58 = vsub.s32 6, %v10553_v35 }
 0x293   :  { %v2236_v45 = vsel %vm1545_vm2, %v2232_v14, %v10427_v39  ;;  %v6082_v14 = vpack.c.bf16 %v2812_v53, %v2811_v60  ;;  %v2237_v46 = vsel %vm1545_vm2, %v2233_v27, %v10428_v11  ;;  %6081 = vmatprep.subr.bf16.mxu1 %v6080_v10  ;;  %v2813_v39 = vld [vmem:[#allocation3 + $0x390] sm:$0xff]  ;;  %v6971_v10 = vld [vmem:[%s10375_s2] sm:$0xff] }
 0x294   :  { %2721 = vmatmul.mubr.f32.gmra.mrb[84].mxu0 %v2236_v45  ;;  %v6970_v45 = vld [vmem:[#allocation2 + $0x3a0] sm:$0xff]  ;;  %v6086_v60 = vpack.c.bf16 %v2814_v51, %v2813_v39  ;;  %v9057_v53 = vpop.permute.xlu0 %6640  ;;  %v9062_v27 = vrot.slane %v6971_v10, %v2300_v58 }
 0x295   :  { %5369 = vmatprep.mubr.msk.f32.mxu0 %vm1540_vm1, %v2241_v5  ;;  %v2294_v29 = vsel %vm1191_vm0, %v6970_v45, %v2275_v3  ;;  %v2830_v5 = vld [vmem:[#allocation3 + $0x418] sm:$0xff]  ;;  %10554 = vst [vmem:[#allocation54_spill] sm:$0xff] %v9057_v53  ;;  %v10429_v0 = vunpack.i.l.bf16 %v9057_v53 }
 0x296   :  { %6083 = vmatpush3.bf16.msra.mxu1 %v6082_v14  ;;  %v6084_v44 = vpack.c.bf16 %v2830_v5, %v2829_v34  ;;  %v9066_v3 = vadd.f32 %v8842_v9, %v9062_v27  ;;  %v2277_v14 = vpop.permute.xlu1 %2276 }
 0x297   :  { %v2286_v9 = vsel %vm1540_vm1, %v8580_v33, %v10429_v0 }
 0x298   :  { %2726 = vmatmul.mubr.f32.gmra.mrb[86].mxu0 %v2237_v46  ;;  %6085 = vmatprep.subr.bf16.mxu1 %v6084_v44  ;;  %v9083_v44 = vadd.f32 %v8850_v6, %v9062_v27  ;;  %v10557_v33 = vmax.f32 %v9066_v3, 0.0 }
 0x299   :  { %5370 = vmatprep.mubr.msk.f32.mxu0 %vm1540_vm1, %v2294_v29 }
 0x29a   :  { %6087 = vmatpush3.bf16.msra.mxu1 %v6086_v60 }
 0x2a0   :  { %v9069_v46 = vpop.permute.xlu0 %6645  ;;  %v2592_v39 = vpop.f32.mrb[32].mxu0 }
 0x2a1   :  { %10555 = vst [vmem:[#allocation55_spill] sm:$0xff] %v9069_v46  ;;  %v10432_v45 = vunpack.i.l.bf16 %v9069_v46  ;;  %v9073_v29 = vadd.f32 %v2592_v39, %v9062_v27  ;;  %v2594_v34 = vpop.f32.mrb[33].mxu0 }
 0x2a2   :  { %v2279_v10 = vpop.permute.xlu1 %2278  ;;  %v6972_v34 = vld [vmem:[#allocation2 + $0x3a8] sm:$0xff] }
 0x2a3   :  { %v10433_v60 = vmax.f32 %v9073_v29, 0.0  ;;  %v2290_v39 = vsel %vm1545_vm2, %v2286_v9, %v10432_v45  ;;  %v2295_v11 = vsel %vm1191_vm0, %v6972_v34, %v2277_v14  ;;  %v10558_v9 = vunpack.i.h.bf16 %v9057_v53 }
 0x2a4   :  { %v9091_v5 = vpop.permute.xlu0 %6650  ;;  %v2597_v58 = vpop.f32.mrb[34].mxu0  ;;  %2731 = vmatmul.mubr.f32.gmra.mrb[88].mxu0 %v2290_v39  ;;  %v10443_v39 = vmax.f32 %v9083_v44, 0.0 }
 0x2a5   :  { %10556 = vst [vmem:[#allocation56_spill] sm:$0xff] %v9091_v5  ;;  %v6654_v6 = vpack.i.bf16 %v10557_v33, %v10433_v60  ;;  %v10435_v0 = vunpack.i.l.bf16 %v9091_v5  ;;  %v9099_v51 = vadd.f32 %v2597_v58, %v9062_v27  ;;  %v2599_v62 = vpop.f32.mrb[35].mxu0  ;;  %5371 = vmatprep.mubr.msk.f32.mxu0 %vm1540_vm1, %v2295_v11  ;;  %v2287_v14 = vsel %vm1540_vm1, %v8596_v42, %v10558_v9  ;;  %v6973_v58 = vld [vmem:[#allocation2 + $0x3b0] sm:$0xff] }
 0x2a6   :  { %v10559_v33 = vunpack.i.h.bf16 %v9069_v46  ;;  %v2296_v62 = vsel %vm1191_vm0, %v6973_v58, %v2279_v10  ;;  %v10434_v9 = vunpack.i.h.bf16 %v9091_v5 }
 0x2a7   :  { %v10438_v34 = vmax.f32 %v9099_v51, 0.0  ;;  %6655 = vrot.lane.b32.xlu1 %v6654_v6, %s7118_s14  ;;  %v2288_v42 = vsel %vm1540_vm1, %v8609_v7, %v10435_v0  ;;  %v2281_v6 = vpop.permute.xlu1 %2280  ;;  %v9132_v7 = vadd.f32 %v8888_v28, %v9062_v27 }
 0x2a8   :  { %v2291_v45 = vsel %vm1545_vm2, %v2287_v14, %v10559_v33  ;;  %v9113_v60 = vpop.permute.xlu0 %2262  ;;  %v2297_v10 = vsel %vm1191_vm0, %v8603_v37, %v2281_v6  ;;  %v2289_v58 = vsel %vm1540_vm1, %v8640_v47, %v10434_v9 }
 0x2a9   :  { %10560 = vst [vmem:[#allocation57_spill] sm:$0xff] %v9113_v60  ;;  %2736 = vmatmul.mubr.f32.gmra.mrb[90].mxu0 %v2291_v45  ;;  %v6659_v11 = vpack.i.bf16 %v10443_v39, %v10438_v34  ;;  %v2292_v45 = vsel %vm1545_vm2, %v2288_v42, %v9113_v60  ;;  %v10441_v28 = vmax.f32 %v9132_v7, 0.0 }
 0x2aa   :  { %5372 = vmatprep.mubr.msk.f32.mxu0 %vm1540_vm1, %v2296_v62 }
 0x2ab   :  { %6660 = vrot.lane.b32.xlu0 %v6659_v11, %s7118_s14  ;;  %v9149_v11 = vadd.f32 %v8902_v43, %v9062_v27 }
 0x2ad   :  { %2741 = vmatmul.mubr.f32.gmra.mrb[92].mxu0 %v2292_v45  ;;  %v2602_v14 = vpop.f32.mrb[36].mxu0 }
 0x2ae   :  { %5373 = vmatprep.mubr.msk.f32.mxu0 %vm1540_vm1, %v2297_v10  ;;  %v9135_v33 = vpop.permute.xlu0 %2264  ;;  %v9142_v62 = vadd.f32 %v2602_v14, %v9062_v27  ;;  %v2604_v42 = vpop.f32.mrb[37].mxu0 }
 0x2af   :  { %10561 = vst [vmem:[#allocation58_spill] sm:$0xff] %v9135_v33  ;;  %v2293_v37 = vsel %vm1545_vm2, %v2289_v58, %v9135_v33  ;;  %v10440_v58 = vmax.f32 %v9149_v11, 0.0 }
 0x2b0   :  { %v10436_v6 = vmax.f32 %v9142_v62, 0.0 }
 0x2b1   :  { %2746 = vmatmul.mubr.f32.gmra.mrb[94].mxu0 %v2293_v37  ;;  %v2607_v45 = vpop.f32.mrb[38].mxu0  ;;  %v9169_v37 = vadd.f32 %v8951_v20, %v9062_v27 }
 0x2b2   :  { %v6664_v47 = vpack.i.bf16 %v10441_v28, %v10436_v6  ;;  %v9157_v10 = vadd.f32 %v2607_v45, %v9062_v27  ;;  %v2609_v14 = vpop.f32.mrb[39].mxu0 }
 0x2b3   :  { %v2759_v0 = vmax.f32 %v9169_v37, 0.0  ;;  %v9195_v37 = vadd.f32 %v8984_v30, %v9062_v27 }
 0x2b4   :  { %v10437_v42 = vmax.f32 %v9157_v10, 0.0  ;;  %6665 = vrot.lane.b32.xlu1 %v6664_v47, %s7118_s14  ;;  %v9177_v47 = vadd.f32 %v8962_v49, %v9062_v27 }
 0x2b6   :  { %v6669_v43 = vpack.i.bf16 %v10440_v58, %v10437_v42  ;;  %v10446_v58 = vmax.f32 %v9195_v37, 0.0 }
 0x2b8   :  { %6670 = vrot.lane.b32.xlu0 %v6669_v43, %s7118_s14 }
 0x2bf   :  { %v2612_v45 = vpop.f32.mrb[40].mxu0 }
 0x2c0   :  { %v9172_v14 = vadd.f32 %v2612_v45, %v9062_v27  ;;  %v2614_v9 = vpop.f32.mrb[41].mxu0  ;;  %v10444_v45 = vmax.f32 %v9177_v47, 0.0 }
 0x2c2   :  { %v10439_v6 = vmax.f32 %v9172_v14, 0.0 }
 0x2c3   :  { %v2617_v42 = vpop.f32.mrb[42].mxu0 }
 0x2c4   :  { %v6674_v43 = vpack.i.bf16 %v2759_v0, %v10439_v6  ;;  %v9183_v20 = vadd.f32 %v2617_v42, %v9062_v27  ;;  %v2619_v34 = vpop.f32.mrb[43].mxu0 }
 0x2c6   :  { %v10442_v9 = vmax.f32 %v9183_v20, 0.0  ;;  %6675 = vrot.lane.b32.xlu1 %v6674_v43, %s7118_s14  ;;  %v9203_v43 = vadd.f32 %v8992_v16, %v9062_v27 }
 0x2c8   :  { %v6679_v49 = vpack.i.bf16 %v10444_v45, %v10442_v9 }
 0x2ca   :  { %6680 = vrot.lane.b32.xlu0 %v6679_v49, %s7118_s14 }
 0x2d0   :  { %v2622_v42 = vpop.f32.mrb[44].mxu0 }
 0x2d1   :  { %v9198_v34 = vadd.f32 %v2622_v42, %v9062_v27  ;;  %v2624_v6 = vpop.f32.mrb[45].mxu0 }
 0x2d2   :  { %v10456_v6 = vmax.f32 %v9203_v43, 0.0 }
 0x2d3   :  { %v10445_v28 = vmax.f32 %v9198_v34, 0.0 }
 0x2d4   :  { %v2627_v9 = vpop.f32.mrb[46].mxu0 }
 0x2d5   :  { %v6684_v30 = vpack.i.bf16 %v10446_v58, %v10445_v28  ;;  %v9211_v49 = vadd.f32 %v2627_v9, %v9062_v27  ;;  %v2629_v42 = vpop.f32.mrb[47].mxu0 }
 0x2d7   :  { %v10455_v39 = vmax.f32 %v9211_v49, 0.0  ;;  %6685 = vrot.lane.b32.xlu1 %v6684_v30, %s7118_s14 }
 0x2d9   :  { %v6689_v16 = vpack.i.bf16 %v10456_v6, %v10455_v39 }
 0x2db   :  { %6690 = vrot.lane.b32.xlu0 %v6689_v16, %s7118_s14 }
 0x2e0   :  { %v9221_v45 = vpop.f32.mrb[48].mxu0 }
 0x2e1   :  { %v2634_v28 = vpop.f32.mrb[49].mxu0 }
 0x2e4   :  { %v9223_v58 = vpop.f32.mrb[50].mxu0 }
 0x2e5   :  { %v2639_v9 = vpop.f32.mrb[51].mxu0 }
 0x2e6   :  { %v2513_v9 = vadd.f32 %v8655_v55, %v9062_v27  ;;  %v2832_v55 = vld [vmem:[#allocation3 + $0x428] sm:$0xff] }
 0x2e8   :  { %v2751_v33 = vmax.f32 %v2513_v9, 0.0  ;;  %v6088_v9 = vpack.c.bf16 %v2832_v55, %v2831_v54  ;;  %v2523_v55 = vadd.f32 %v8748_v26, %v9062_v27 }
 0x2ea   :  { %6089 = vmatprep.subr.bf16.mxu1 %v6088_v9 }
 0x2f0   :  { %v9225_v42 = vpop.f32.mrb[52].mxu0 }
 0x2f1   :  { %v2644_v5 = vpop.f32.mrb[53].mxu0 }
 0x2f4   :  { %v9227_v53 = vpop.f32.mrb[54].mxu0 }
 0x2f5   :  { %v2649_v25 = vpop.f32.mrb[55].mxu0 }
 0x300   :  { %v9229_v30 = vpop.f32.mrb[56].mxu0 }
 0x301   :  { %v2654_v24 = vpop.f32.mrb[57].mxu0 }
 0x304   :  { %v9231_v23 = vpop.f32.mrb[58].mxu0 }
 0x305   :  { %v2659_v39 = vpop.f32.mrb[59].mxu0 }
 0x306   :  { %v2518_v39 = vadd.f32 %v8672_v19, %v9062_v27 }
 0x308   :  { %v2752_v15 = vmax.f32 %v2518_v39, 0.0  ;;  %v2835_v39 = vld [vmem:[#allocation3 + $0x440] sm:$0xff] }
 0x30c   :  { %v9233_v6 = vpop.f32.mrb[60].mxu0 }
 0x30d   :  { %v2664_v16 = vpop.f32.mrb[61].mxu0 }
 0x310   :  { %v9235_v57 = vpop.f32.mrb[62].mxu0 }
 0x311   :  { %v2669_v28 = vpop.f32.mrb[63].mxu0 }
 0x314   :  { %v2672_v4 = vpop.f32.mrb[64].mxu0 }
 0x315   :  { %v2673_v5 = vadd.f32 %v2672_v4, %v9062_v27  ;;  %v2674_v52 = vpop.f32.mrb[65].mxu0 }
 0x317   :  { %v2783_v25 = vmax.f32 %v2673_v5, 0.0 }
 0x318   :  { %v2677_v60 = vpop.f32.mrb[66].mxu0 }
 0x319   :  { %v6656_v24 = vpop.permute.xlu1 %6655  ;;  %v2678_v2 = vadd.f32 %v2677_v60, %v9062_v27  ;;  %v2679_v16 = vpop.f32.mrb[67].mxu0  ;;  %2971 = vrot.lane.b32.xlu1 %v2783_v25, %s7118_s14  ;;  %v2834_v25 = vld [vmem:[#allocation3 + $0x438] sm:$0xff] }
 0x31a   :  { %v6658_v28 = vunpack.i.h.bf16 %v6656_v24  ;;  %v6657_v46 = vunpack.i.l.bf16 %v6656_v24  ;;  %v2833_v16 = vld [vmem:[#allocation3 + $0x430] sm:$0xff] }
 0x31b   :  { %v2784_v40 = vmax.f32 %v2678_v2, 0.0  ;;  %v6092_v24 = vpack.c.bf16 %v2834_v25, %v2833_v16  ;;  %v10562_v2 = vmax.f32 %v9177_v47, 0.0  ;;  %v2753_v16 = vmax.f32 %v2523_v55, 0.0 }
 0x31c   :  { %v2899_v4 = vsel %vm1540_vm1, %v2759_v0, %v6657_v46  ;;  %v2895_v52 = vsel %vm1540_vm1, %v2751_v33, %v6658_v28  ;;  %v2836_v28 = vld [vmem:[#allocation3 + $0x448] sm:$0xff] }
 0x31d   :  { %v6661_v5 = vpop.permute.xlu0 %6660  ;;  %3119 = vmatprep.mubr.f32.mxu1 %v2899_v4  ;;  %2973 = vrot.lane.b32.xlu0 %v2784_v40, %s7118_s14  ;;  %v6096_v47 = vpack.c.bf16 %v2836_v28, %v2835_v39  ;;  %v2839_v39 = vld [vmem:[#allocation3 + $0x460] sm:$0xff]  ;;  %v2840_v28 = vld [vmem:[#allocation3 + $0x468] sm:$0xff] }
 0x31e   :  { %v6663_v19 = vunpack.i.h.bf16 %v6661_v5  ;;  %v6662_v60 = vunpack.i.l.bf16 %v6661_v5  ;;  %3120 = vmatmul.mubr.f32.vlgmr.msra.gmra.mrb[0].mxu1 %v2895_v52 }
 0x31f   :  { %6091 = vmatpush3.bf16.msra.mxu1 %v6088_v9 }
 0x320   :  { %v2682_v17 = vpop.f32.mrb[68].mxu0  ;;  %v2900_v0 = vsel %vm1540_vm1, %v10562_v2, %v6662_v60  ;;  %v2896_v46 = vsel %vm1540_vm1, %v2752_v15, %v6663_v19  ;;  %6093 = vmatprep.subr.bf16.mxu1 %v6092_v24  ;;  %v2528_v15 = vadd.f32 %v8766_v32, %v9062_v27  ;;  %v2837_v19 = vld [vmem:[#allocation3 + $0x450] sm:$0xff]  ;;  %v2838_v60 = vld [vmem:[#allocation3 + $0x458] sm:$0xff] }
 0x321   :  { %v2683_v54 = vadd.f32 %v2682_v17, %v9062_v27  ;;  %v2684_v33 = vpop.f32.mrb[69].mxu0  ;;  %3124 = vmatprep.mubr.f32.mxu1 %v2900_v0  ;;  %v6100_v26 = vpack.c.bf16 %v2838_v60, %v2837_v19  ;;  %v10563_v0 = vmax.f32 %v9195_v37, 0.0 }
 0x322   :  { %3125 = vmatmul.mubr.f32.gmra.mrb[2].mxu1 %v2896_v46 }
 0x323   :  { %v2785_v40 = vmax.f32 %v2683_v54, 0.0  ;;  %6095 = vmatpush3.bf16.msra.mxu1 %v6092_v24  ;;  %v2633_v24 = vadd.f32 %v9221_v45, %v9062_v27  ;;  %v2754_v54 = vmax.f32 %v2528_v15, 0.0 }
 0x324   :  { %v2687_v4 = vpop.f32.mrb[70].mxu0  ;;  %6097 = vmatprep.subr.bf16.mxu1 %v6096_v47 }
 0x325   :  { %v2688_v52 = vadd.f32 %v2687_v4, %v9062_v27  ;;  %v2689_v5 = vpop.f32.mrb[71].mxu0  ;;  %2975 = vrot.lane.b32.xlu1 %v2785_v40, %s7118_s14  ;;  %v9268_v37 = vmax.f32 %v2633_v24, 0.0 }
 0x326   :  { %v6666_v9 = vpop.permute.xlu1 %6665  ;;  %v2638_v5 = vadd.f32 %v9223_v58, %v9062_v27 }
 0x327   :  { %v2786_v17 = vmax.f32 %v2688_v52, 0.0  ;;  %v6668_v25 = vunpack.i.h.bf16 %v6666_v9  ;;  %v6667_v2 = vunpack.i.l.bf16 %v6666_v9  ;;  %6099 = vmatpush3.bf16.msra.mxu1 %v6096_v47  ;;  %v6104_v52 = vpack.c.bf16 %v2840_v28, %v2839_v39 }
 0x328   :  { %6101 = vmatprep.subr.bf16.mxu1 %v6100_v26  ;;  %v2643_v39 = vadd.f32 %v9225_v42, %v9062_v27  ;;  %v2578_v42 = vadd.f32 %v9003_v41, %v9062_v27 }
 0x329   :  { %2977 = vrot.lane.b32.xlu0 %v2786_v17, %s7118_s14  ;;  %v2901_v46 = vsel %vm1540_vm1, %v10563_v0, %v6667_v2  ;;  %v2897_v32 = vsel %vm1540_vm1, %v2753_v16, %v6668_v25  ;;  %v10564_v17 = vmax.f32 %v9203_v43, 0.0  ;;  %v2841_v16 = vld [vmem:[#allocation3 + $0x470] sm:$0xff]  ;;  %v2842_v25 = vld [vmem:[#allocation3 + $0x478] sm:$0xff]  ;;  %v9283_v43 = vmax.f32 %v2638_v5, 0.0 }
 0x32a   :  { %v6671_v33 = vpop.permute.xlu0 %6670  ;;  %3129 = vmatprep.mubr.f32.mxu1 %v2901_v46  ;;  %v6108_v24 = vpack.c.bf16 %v2842_v25, %v2841_v16  ;;  %v2843_v46 = vld [vmem:[#allocation3 + $0x480] sm:$0xff]  ;;  %v9306_v16 = vmax.f32 %v2643_v39, 0.0  ;;  %v2653_v25 = vadd.f32 %v9229_v30, %v9062_v27  ;;  %v2764_v39 = vmax.f32 %v2578_v42, 0.0 }
 0x32b   :  { %v2692_v40 = vpop.f32.mrb[72].mxu0  ;;  %v6673_v55 = vunpack.i.h.bf16 %v6671_v33  ;;  %v6672_v4 = vunpack.i.l.bf16 %v6671_v33  ;;  %3130 = vmatmul.mubr.f32.gmra.mrb[4].mxu1 %v2897_v32  ;;  %v2844_v32 = vld [vmem:[#allocation3 + $0x488] sm:$0xff] }
 0x32c   :  { %v9266_v47 = vadd.f32 %v2692_v40, %v9062_v27  ;;  %v2694_v45 = vpop.f32.mrb[73].mxu0  ;;  %6103 = vmatpush3.bf16.msra.mxu1 %v6100_v26  ;;  %v6112_v33 = vpack.c.bf16 %v2844_v32, %v2843_v46  ;;  %v2573_v40 = vadd.f32 %v8998_v36, %v9062_v27 }
 0x32d   :  { %v2902_v9 = vsel %vm1540_vm1, %v10564_v17, %v6672_v4  ;;  %v2898_v19 = vsel %vm1540_vm1, %v2754_v54, %v6673_v55  ;;  %6105 = vmatprep.subr.bf16.mxu1 %v6104_v52  ;;  %v2845_v55 = vld [vmem:[#allocation3 + $0x490] sm:$0xff]  ;;  %v2846_v4 = vld [vmem:[#allocation3 + $0x498] sm:$0xff]  ;;  %v2658_v45 = vadd.f32 %v9231_v23, %v9062_v27  ;;  %v2648_v23 = vadd.f32 %v9227_v53, %v9062_v27 }
 0x32e   :  { %v2787_v15 = vmax.f32 %v9266_v47, 0.0  ;;  %3134 = vmatprep.mubr.f32.mxu1 %v2902_v9  ;;  %v6116_v36 = vpack.c.bf16 %v2846_v4, %v2845_v55  ;;  %v2763_v9 = vmax.f32 %v2573_v40, 0.0  ;;  %v2668_v53 = vadd.f32 %v9235_v57, %v9062_v27 }
 0x32f   :  { %v2697_v60 = vpop.f32.mrb[74].mxu0  ;;  %3135 = vmatmul.mubr.f32.gmra.mrb[6].mxu1 %v2898_v19  ;;  %v9319_v32 = vmax.f32 %v2658_v45, 0.0  ;;  %v9333_v55 = vmax.f32 %v2648_v23, 0.0  ;;  %v9335_v57 = vmax.f32 %v2653_v25, 0.0  ;;  %v2663_v4 = vadd.f32 %v9233_v6, %v9062_v27 }
 0x330   :  { %v6694_v2 = vpack.i.bf16 %v9268_v37, %v2787_v15  ;;  %v9281_v26 = vadd.f32 %v2697_v60, %v9062_v27  ;;  %v2699_v58 = vpop.f32.mrb[75].mxu0  ;;  %6107 = vmatpush3.bf16.msra.mxu1 %v6104_v52  ;;  %v9349_v23 = vmax.f32 %v2668_v53, 0.0  ;;  %v2583_v25 = vadd.f32 %v9026_v8, %v9062_v27 }
 0x331   :  { %6109 = vmatprep.subr.bf16.mxu1 %v6108_v24 }
 0x332   :  { %v2788_v0 = vmax.f32 %v9281_v26, 0.0  ;;  %6695 = vrot.lane.b32.xlu1 %v6694_v2, %s7118_s14 }
 0x334   :  { %v6699_v54 = vpack.i.bf16 %v9283_v43, %v2788_v0  ;;  %6111 = vmatpush3.bf16.msra.mxu1 %v6108_v24  ;;  %v10565_v24 = vmax.f32 %v9066_v3, 0.0 }
 0x335   :  { %6113 = vmatprep.subr.bf16.mxu1 %v6112_v33 }
 0x336   :  { %6700 = vrot.lane.b32.xlu0 %v6699_v54, %s7118_s14 }
 0x337   :  { %v2702_v28 = vpop.f32.mrb[76].mxu0 }
 0x338   :  { %v9298_v52 = vadd.f32 %v2702_v28, %v9062_v27  ;;  %v2704_v5 = vpop.f32.mrb[77].mxu0  ;;  %v9300_v17 = vpop.permute.xlu1 %6675  ;;  %6115 = vmatpush3.bf16.msra.mxu1 %v6112_v33 }
 0x339   :  { %v6678_v19 = vunpack.i.h.bf16 %v9300_v17  ;;  %v6677_v60 = vunpack.i.l.bf16 %v9300_v17  ;;  %6117 = vmatprep.subr.bf16.mxu1 %v6116_v36 }
 0x33a   :  { %v2789_v2 = vmax.f32 %v9298_v52, 0.0 }
 0x33b   :  { %v2707_v58 = vpop.f32.mrb[78].mxu0  ;;  %v2959_v41 = vsel %vm1540_vm1, %v2763_v9, %v6677_v60  ;;  %v2955_v46 = vsel %vm1540_vm1, %v10565_v24, %v6678_v19  ;;  %v10566_v9 = vmax.f32 %v9083_v44, 0.0  ;;  %v6714_v19 = vpack.i.bf16 %v9319_v32, %v9335_v57 }
 0x33c   :  { %v6704_v30 = vpack.i.bf16 %v9306_v16, %v2789_v2  ;;  %v9327_v54 = vadd.f32 %v2707_v58, %v9062_v27  ;;  %v2709_v33 = vpop.f32.mrb[79].mxu0  ;;  %v9329_v40 = vpop.permute.xlu0 %6680  ;;  %3139 = vmatprep.mubr.f32.mxu1 %v2959_v41  ;;  %6119 = vmatpush3.bf16.msra.mxu1 %v6116_v36  ;;  %v9354_v36 = vmax.f32 %v2663_v4, 0.0  ;;  %v2765_v41 = vmax.f32 %v2583_v25, 0.0 }
 0x33d   :  { %v6683_v3 = vunpack.i.h.bf16 %v9329_v40  ;;  %v6682_v28 = vunpack.i.l.bf16 %v9329_v40  ;;  %3140 = vmatmul.mubr.f32.gmra.mrb[8].mxu1 %v2955_v46  ;;  %v2588_v24 = vadd.f32 %v9031_v22, %v9062_v27  ;;  %v10567_v33 = vmax.f32 %v9132_v7, 0.0 }
 0x33e   :  { %v2790_v45 = vmax.f32 %v9327_v54, 0.0  ;;  %6705 = vrot.lane.b32.xlu1 %v6704_v30, %s7118_s14  ;;  %v6719_v44 = vpack.i.bf16 %v9349_v23, %v9354_v36 }
 0x33f   :  { %v2960_v5 = vsel %vm1540_vm1, %v2764_v39, %v6682_v28  ;;  %v2956_v42 = vsel %vm1540_vm1, %v10566_v9, %v6683_v3  ;;  %v2766_v3 = vmax.f32 %v2588_v24, 0.0  ;;  %v10568_v9 = vmax.f32 %v9149_v11, 0.0 }
 0x340   :  { %v6709_v6 = vpack.i.bf16 %v9333_v55, %v2790_v45  ;;  %3144 = vmatprep.mubr.f32.mxu1 %v2960_v5 }
 0x341   :  { %3145 = vmatmul.mubr.f32.gmra.mrb[10].mxu1 %v2956_v42 }
 0x342   :  { %6710 = vrot.lane.b32.xlu0 %v6709_v6, %s7118_s14  ;;  %6715 = vrot.lane.b32.xlu1 %v6714_v19, %s7118_s14 }
 0x346   :  { %6720 = vrot.lane.b32.xlu0 %v6719_v44, %s7118_s14 }
 0x349   :  { %v9363_v58 = vpop.permute.xlu1 %6685 }
 0x34a   :  { %v6688_v46 = vunpack.i.h.bf16 %v9363_v58  ;;  %v6687_v53 = vunpack.i.l.bf16 %v9363_v58 }
 0x34c   :  { %v2961_v30 = vsel %vm1540_vm1, %v2765_v41, %v6687_v53  ;;  %v2957_v8 = vsel %vm1540_vm1, %v10567_v33, %v6688_v46 }
 0x34d   :  { %v9375_v39 = vpop.permute.xlu0 %6690  ;;  %3149 = vmatprep.mubr.f32.mxu1 %v2961_v30 }
 0x34e   :  { %v6693_v4 = vunpack.i.h.bf16 %v9375_v39  ;;  %v6692_v22 = vunpack.i.l.bf16 %v9375_v39  ;;  %3150 = vmatmul.mubr.f32.gmra.mrb[12].mxu1 %v2957_v8  ;;  %v10574_v39 = vmax.f32 %v9183_v20, 0.0 }
 0x350   :  { %v2962_v5 = vsel %vm1540_vm1, %v2766_v3, %v6692_v22  ;;  %v2958_v42 = vsel %vm1540_vm1, %v10568_v9, %v6693_v4 }
 0x351   :  { %3154 = vmatprep.mubr.f32.mxu1 %v2962_v5 }
 0x352   :  { %3155 = vmatmul.mubr.f32.gmra.mrb[14].mxu1 %v2958_v42 }
 0x357   :  { %v2712_v7 = vpop.f32.mrb[80].mxu0 }
 0x358   :  { %v2714_v19 = vpop.f32.mrb[81].mxu0  ;;  %v2713_v6 = vadd.f32 %v2712_v7, %v9062_v27 }
 0x35a   :  { %v9387_v24 = vmax.f32 %v2713_v6, 0.0 }
 0x35b   :  { %v2717_v44 = vpop.f32.mrb[82].mxu0 }
 0x35c   :  { %v2718_v25 = vadd.f32 %v2717_v44, %v9062_v27  ;;  %v2719_v41 = vpop.f32.mrb[83].mxu0 }
 0x35e   :  { %v9389_v46 = vmax.f32 %v2718_v25, 0.0 }
 0x360   :  { %v6724_v30 = vpack.i.bf16 %v9389_v46, %v9387_v24 }
 0x362   :  { %6725 = vrot.lane.b32.xlu1 %v6724_v30, %s7118_s14 }
 0x367   :  { %v2722_v11 = vpop.f32.mrb[84].mxu0 }
 0x368   :  { %v2724_v33 = vpop.f32.mrb[85].mxu0  ;;  %v2723_v8 = vadd.f32 %v2722_v11, %v9062_v27 }
 0x36a   :  { %v9396_v9 = vmax.f32 %v2723_v8, 0.0 }
 0x36b   :  { %v2727_v3 = vpop.f32.mrb[86].mxu0 }
 0x36c   :  { %v2728_v4 = vadd.f32 %v2727_v3, %v9062_v27  ;;  %v2729_v5 = vpop.f32.mrb[87].mxu0 }
 0x36e   :  { %v9398_v42 = vmax.f32 %v2728_v4, 0.0 }
 0x370   :  { %v6729_v7 = vpack.i.bf16 %v9398_v42, %v9396_v9 }
 0x372   :  { %6730 = vrot.lane.b32.xlu0 %v6729_v7, %s7118_s14 }
 0x377   :  { %v2732_v19 = vpop.f32.mrb[88].mxu0 }
 0x378   :  { %v2734_v6 = vpop.f32.mrb[89].mxu0  ;;  %v9404_v44 = vadd.f32 %v2732_v19, %v9062_v27 }
 0x37a   :  { %v10475_v11 = vmax.f32 %v9404_v44, 0.0 }
 0x37c   :  { %v2737_v25 = vpop.f32.mrb[90].mxu0 }
 0x37d   :  { %v9407_v41 = vadd.f32 %v2737_v25, %v9062_v27  ;;  %v2739_v30 = vpop.f32.mrb[91].mxu0 }
 0x37f   :  { %v10478_v33 = vmax.f32 %v9407_v41, 0.0 }
 0x380   :  { %v2742_v8 = vpop.f32.mrb[92].mxu0 }
 0x381   :  { %v6734_v3 = vpack.i.bf16 %v10478_v33, %v10475_v11  ;;  %v2744_v4 = vpop.f32.mrb[93].mxu0  ;;  %v9416_v5 = vadd.f32 %v2742_v8, %v9062_v27 }
 0x383   :  { %6735 = vrot.lane.b32.xlu1 %v6734_v3, %s7118_s14  ;;  %v10477_v25 = vmax.f32 %v9416_v5, 0.0 }
 0x384   :  { %v2747_v7 = vpop.f32.mrb[94].mxu0 }
 0x385   :  { %v9420_v19 = vadd.f32 %v2747_v7, %v9062_v27  ;;  %v2749_v6 = vpop.f32.mrb[95].mxu0  ;;  %v10569_v27 = vmax.f32 %v9073_v29, 0.0  ;;  %v10571_v29 = vmax.f32 %v9142_v62, 0.0 }
 0x387   :  { %v10476_v30 = vmax.f32 %v9420_v19, 0.0  ;;  %v2999_v4 = vsel %vm1540_vm1, %v10569_v27, %v6677_v60  ;;  %v3001_v60 = vsel %vm1540_vm1, %v10571_v29, %v6687_v53  ;;  %v10573_v53 = vmax.f32 %v9172_v14, 0.0 }
 0x389   :  { %v6739_v11 = vpack.i.bf16 %v10476_v30, %v10477_v25  ;;  %v3398_v25 = vld [vmem:[#allocation3 + $0x548] sm:$0xff] }
 0x38b   :  { %6740 = vrot.lane.b32.xlu0 %v6739_v11, %s7118_s14  ;;  %v2972_v8 = vpop.permute.xlu1 %2971  ;;  %v10570_v11 = vmax.f32 %v9099_v51, 0.0  ;;  %v10572_v51 = vmax.f32 %v9157_v10, 0.0 }
 0x38c   :  { %v3003_v3 = vsel %vm1540_vm1, %v9268_v37, %v2972_v8 }
 0x38d   :  { %3159 = vmatprep.mubr.f32.mxu1 %v3003_v3  ;;  %v3000_v30 = vsel %vm1540_vm1, %v10570_v11, %v6682_v28  ;;  %v3002_v28 = vsel %vm1540_vm1, %v10572_v51, %v6692_v22 }
 0x38e   :  { %3160 = vmatmul.mubr.f32.gmra.mrb[16].mxu1 %v2999_v4 }
 0x38f   :  { %v2974_v7 = vpop.permute.xlu0 %2973 }
 0x390   :  { %v3004_v6 = vsel %vm1540_vm1, %v9283_v43, %v2974_v7 }
 0x391   :  { %3164 = vmatprep.mubr.f32.mxu1 %v3004_v6 }
 0x392   :  { %3165 = vmatmul.mubr.f32.gmra.mrb[18].mxu1 %v3000_v30 }
 0x397   :  { %v2976_v8 = vpop.permute.xlu1 %2975 }
 0x398   :  { %v3005_v17 = vsel %vm1540_vm1, %v9306_v16, %v2976_v8 }
 0x399   :  { %3169 = vmatprep.mubr.f32.mxu1 %v3005_v17 }
 0x39a   :  { %3170 = vmatmul.mubr.f32.gmra.mrb[20].mxu1 %v3001_v60  ;;  %v10575_v60 = vmax.f32 %v9198_v34, 0.0 }
 0x39b   :  { %v2978_v3 = vpop.permute.xlu0 %2977 }
 0x39c   :  { %v3006_v40 = vsel %vm1540_vm1, %v9333_v55, %v2978_v3 }
 0x39d   :  { %3174 = vmatprep.mubr.f32.mxu1 %v3006_v40 }
 0x39e   :  { %3175 = vmatmul.mubr.f32.gmra.mrb[22].mxu1 %v3002_v28 }
 0x3a4   :  { %v6696_v30 = vpop.permute.xlu1 %6695 }
 0x3a5   :  { %v6698_v27 = vunpack.i.h.bf16 %v6696_v30  ;;  %v6697_v58 = vunpack.i.l.bf16 %v6696_v30  ;;  %v10576_v30 = vmax.f32 %v9211_v49, 0.0 }
 0x3a7   :  { %v3043_v62 = vsel %vm1540_vm1, %v9335_v57, %v6697_v58  ;;  %v2903_v4 = vsel %vm1540_vm1, %v10573_v53, %v6698_v27 }
 0x3a8   :  { %v6701_v7 = vpop.permute.xlu0 %6700  ;;  %3179 = vmatprep.mubr.f32.mxu1 %v3043_v62 }
 0x3a9   :  { %v6703_v6 = vunpack.i.h.bf16 %v6701_v7  ;;  %v6702_v11 = vunpack.i.l.bf16 %v6701_v7  ;;  %3180 = vmatmul.mubr.f32.gmra.mrb[24].mxu1 %v2903_v4 }
 0x3ab   :  { %v3044_v10 = vsel %vm1540_vm1, %v9319_v32, %v6702_v11  ;;  %v2904_v22 = vsel %vm1540_vm1, %v10574_v39, %v6703_v6 }
 0x3ac   :  { %3184 = vmatprep.mubr.f32.mxu1 %v3044_v10 }
 0x3ad   :  { %3185 = vmatmul.mubr.f32.gmra.mrb[26].mxu1 %v2904_v22 }
 0x3b0   :  { %v6706_v8 = vpop.permute.xlu1 %6705 }
 0x3b1   :  { %v6708_v17 = vunpack.i.h.bf16 %v6706_v8  ;;  %v6707_v29 = vunpack.i.l.bf16 %v6706_v8 }
 0x3b3   :  { %v3045_v14 = vsel %vm1540_vm1, %v9354_v36, %v6707_v29  ;;  %v2905_v3 = vsel %vm1540_vm1, %v10575_v60, %v6708_v17 }
 0x3b4   :  { %v6711_v40 = vpop.permute.xlu0 %6710  ;;  %3189 = vmatprep.mubr.f32.mxu1 %v3045_v14  ;;  %v6716_v58 = vpop.permute.xlu1 %6715 }
 0x3b5   :  { %v6713_v51 = vunpack.i.h.bf16 %v6711_v40  ;;  %v6712_v28 = vunpack.i.l.bf16 %v6711_v40  ;;  %3190 = vmatmul.mubr.f32.gmra.mrb[28].mxu1 %v2905_v3  ;;  %v6717_v62 = vunpack.i.l.bf16 %v6716_v58  ;;  %v6718_v53 = vunpack.i.h.bf16 %v6716_v58 }
 0x3b7   :  { %v3046_v20 = vsel %vm1540_vm1, %v9349_v23, %v6712_v28  ;;  %v2906_v27 = vsel %vm1540_vm1, %v10576_v30, %v6713_v51  ;;  %v2963_v6 = vsel %vm1540_vm1, %v9268_v37, %v6717_v62  ;;  %v2964_v49 = vsel %vm1540_vm1, %v9283_v43, %v6718_v53 }
 0x3b8   :  { %3194 = vmatprep.mubr.f32.mxu1 %v3046_v20  ;;  %v6721_v34 = vpop.permute.xlu0 %6720 }
 0x3b9   :  { %3195 = vmatmul.mubr.f32.gmra.mrb[30].mxu1 %v2906_v27  ;;  %v6722_v7 = vunpack.i.l.bf16 %v6721_v34  ;;  %v6723_v11 = vunpack.i.h.bf16 %v6721_v34 }
 0x3ba   :  { %5778 = vmatprep.mubr.f32.mxu1 %v2903_v4 }
 0x3bb   :  { %v2965_v10 = vsel %vm1540_vm1, %v9306_v16, %v6722_v7  ;;  %v2966_v4 = vsel %vm1540_vm1, %v9333_v55, %v6723_v11 }
 0x3bd   :  { %5779 = vmatmul.mubr.f32.vlgmr.msra.gmra.mrb[32].mxu1 %v2904_v22 }
 0x3be   :  { %5781 = vmatprep.mubr.f32.mxu1 %v2905_v3 }
 0x3c1   :  { %5782 = vmatmul.mubr.f32.gmra.mrb[34].mxu1 %v2906_v27 }
 0x3c2   :  { %5784 = vmatprep.mubr.f32.mxu1 %v2963_v6 }
 0x3c5   :  { %5785 = vmatmul.mubr.f32.gmra.mrb[36].mxu1 %v2964_v49 }
 0x3c6   :  { %5787 = vmatprep.mubr.f32.mxu1 %v2965_v10 }
 0x3c9   :  { %5788 = vmatmul.mubr.f32.gmra.mrb[38].mxu1 %v2966_v4 }
 0x3d4   :  { %v6726_v39 = vpop.permute.xlu1 %6725 }
 0x3d5   :  { %v6728_v22 = vunpack.i.h.bf16 %v6726_v39  ;;  %v6727_v8 = vunpack.i.l.bf16 %v6726_v39 }
 0x3d7   :  { %v3007_v17 = vsel %vm1540_vm1, %v2787_v15, %v6727_v8  ;;  %v3008_v29 = vsel %vm1540_vm1, %v2788_v0, %v6728_v22 }
 0x3d8   :  { %5790 = vmatprep.mubr.f32.mxu1 %v3007_v17 }
 0x3d9   :  { %5791 = vmatmul.mubr.f32.gmra.mrb[40].mxu1 %v3008_v29 }
 0x3e4   :  { %v6731_v14 = vpop.permute.xlu0 %6730 }
 0x3e5   :  { %v6733_v60 = vunpack.i.h.bf16 %v6731_v14  ;;  %v6732_v3 = vunpack.i.l.bf16 %v6731_v14 }
 0x3e7   :  { %v3009_v40 = vsel %vm1540_vm1, %v2789_v2, %v6732_v3  ;;  %v3010_v51 = vsel %vm1540_vm1, %v2790_v45, %v6733_v60  ;;  %v4184_v60 = vld [vmem:[#allocation3] sm:$0xff]  ;;  %v4185_v3 = vld [vmem:[#allocation3 + $0x8] sm:$0xff] }
 0x3e8   :  { %5793 = vmatprep.mubr.f32.mxu1 %v3009_v40  ;;  %v6176_v40 = vpack.c.bf16 %v4185_v3, %v4184_v60 }
 0x3e9   :  { %5794 = vmatmul.mubr.f32.gmra.mrb[42].mxu1 %v3010_v51 }
 0x3ea   :  { %6177 = vmatprep.subr.bf16.mxu0 %v6176_v40 }
 0x3eb   :  { %6179 = vmatpush3.bf16.msra.mxu0 %v6176_v40 }
 0x3f1   :  { %v5450_v47 = vpop.f32.mrb[0].mxu1 }
 0x3f2   :  { %v5451_v15 = vpop.f32.mrb[1].mxu1 }
 0x3f3   :  { %v9497_v26 = vadd.f32 %v5451_v15, %v5450_v47 }
 0x3f5   :  { %v6736_v0 = vpop.permute.xlu1 %6735  ;;  %v5453_v30 = vpop.f32.mrb[2].mxu1 }
 0x3f6   :  { %v6738_v28 = vunpack.i.h.bf16 %v6736_v0  ;;  %v6737_v20 = vunpack.i.l.bf16 %v6736_v0  ;;  %v5454_v27 = vpop.f32.mrb[3].mxu1 }
 0x3f7   :  { %v9499_v58 = vadd.f32 %v5454_v27, %v5453_v30  ;;  %v4186_v30 = vld [vmem:[#allocation3 + $0x10] sm:$0xff]  ;;  %v4187_v27 = vld [vmem:[#allocation3 + $0x18] sm:$0xff] }
 0x3f8   :  { %v3047_v52 = vsel %vm1540_vm1, %v9387_v24, %v6737_v20  ;;  %v3048_v2 = vsel %vm1540_vm1, %v9389_v46, %v6738_v28 }
 0x3f9   :  { %5796 = vmatprep.mubr.f32.mxu1 %v3047_v52  ;;  %v6180_v52 = vpack.c.bf16 %v4187_v27, %v4186_v30 }
 0x3fa   :  { %5797 = vmatmul.mubr.f32.gmra.mrb[44].mxu1 %v3048_v2  ;;  %v4188_v2 = vld [vmem:[#allocation3 + $0x20] sm:$0xff] }
 0x3fb   :  { %6181 = vmatprep.subr.bf16.mxu0 %v6180_v52 }
 0x3fc   :  { %6183 = vmatpush3.bf16.msra.mxu0 %v6180_v52 }
 0x3fd   :  { %v6741_v54 = vpop.permute.xlu0 %6740 }
 0x3fe   :  { %v6743_v45 = vunpack.i.h.bf16 %v6741_v54  ;;  %v6742_v62 = vunpack.i.l.bf16 %v6741_v54  ;;  %v5456_v34 = vpop.f32.mrb[4].mxu1  ;;  %v4189_v54 = vld [vmem:[#allocation3 + $0x28] sm:$0xff] }
 0x3ff   :  { %v5457_v6 = vpop.f32.mrb[5].mxu1 }
 0x400   :  { %v3049_v53 = vsel %vm1540_vm1, %v9396_v9, %v6742_v62  ;;  %v3050_v7 = vsel %vm1540_vm1, %v9398_v42, %v6743_v45  ;;  %v9509_v11 = vadd.f32 %v5457_v6, %v5456_v34  ;;  %v6184_v45 = vpack.c.bf16 %v4189_v54, %v4188_v2  ;;  %v4190_v62 = vld [vmem:[#allocation3 + $0x30] sm:$0xff]  ;;  %v4191_v34 = vld [vmem:[#allocation3 + $0x38] sm:$0xff] }
 0x401   :  { %5799 = vmatprep.mubr.f32.mxu1 %v3049_v53  ;;  %v6188_v53 = vpack.c.bf16 %v4191_v34, %v4190_v62  ;;  %v4194_v62 = vld [vmem:[#allocation3 + $0x50] sm:$0xff]  ;;  %v4195_v34 = vld [vmem:[#allocation3 + $0x58] sm:$0xff] }
 0x402   :  { %5800 = vmatmul.mubr.f32.gmra.mrb[46].mxu1 %v3050_v7  ;;  %v5459_v49 = vpop.f32.mrb[6].mxu1  ;;  %6185 = vmatprep.subr.bf16.mxu0 %v6184_v45 }
 0x403   :  { %v5460_v10 = vpop.f32.mrb[7].mxu1  ;;  %6187 = vmatpush3.bf16.msra.mxu0 %v6184_v45 }
 0x404   :  { %v9511_v4 = vadd.f32 %v5460_v10, %v5459_v49  ;;  %6189 = vmatprep.subr.bf16.mxu0 %v6188_v53 }
 0x407   :  { %6191 = vmatpush3.bf16.msra.mxu0 %v6188_v53  ;;  %v4196_v53 = vld [vmem:[#allocation3 + $0x60] sm:$0xff] }
 0x410   :  { %v5462_v39 = vpop.f32.mrb[8].mxu1 }
 0x411   :  { %v5463_v22 = vpop.f32.mrb[9].mxu1 }
 0x412   :  { %v9513_v8 = vadd.f32 %v5463_v22, %v5462_v39 }
 0x414   :  { %v5465_v17 = vpop.f32.mrb[10].mxu1 }
 0x415   :  { %v5466_v29 = vpop.f32.mrb[11].mxu1 }
 0x416   :  { %v9515_v14 = vadd.f32 %v5466_v29, %v5465_v17 }
 0x421   :  { %v5468_v51 = vpop.f32.mrb[12].mxu1 }
 0x422   :  { %v5469_v47 = vpop.f32.mrb[13].mxu1 }
 0x423   :  { %v9517_v15 = vadd.f32 %v5469_v47, %v5468_v51  ;;  %v4192_v51 = vld [vmem:[#allocation3 + $0x40] sm:$0xff]  ;;  %v4193_v47 = vld [vmem:[#allocation3 + $0x48] sm:$0xff] }
 0x425   :  { %v5471_v0 = vpop.f32.mrb[14].mxu1 }
 0x426   :  { %v5472_v28 = vpop.f32.mrb[15].mxu1 }
 0x427   :  { %v9519_v20 = vadd.f32 %v5472_v28, %v5471_v0  ;;  %v6192_v28 = vpack.c.bf16 %v4193_v47, %v4192_v51  ;;  %v3395_v51 = vld [vmem:[#allocation3 + $0x530] sm:$0xff] }
 0x429   :  { %6193 = vmatprep.subr.bf16.mxu0 %v6192_v28 }
 0x42a   :  { %6195 = vmatpush3.bf16.msra.mxu0 %v6192_v28  ;;  %v3396_v28 = vld [vmem:[#allocation3 + $0x538] sm:$0xff] }
 0x461   :  { %v5474_v7 = vpop.f32.mrb[16].mxu1 }
 0x462   :  { %v5475_v6 = vpop.f32.mrb[17].mxu1 }
 0x463   :  { %v9521_v49 = vadd.f32 %v5475_v6, %v5474_v7  ;;  %v6196_v7 = vpack.c.bf16 %v4195_v34, %v4194_v62  ;;  %v4197_v6 = vld [vmem:[#allocation3 + $0x68] sm:$0xff] }
 0x465   :  { %v5477_v10 = vpop.f32.mrb[18].mxu1  ;;  %6197 = vmatprep.subr.bf16.mxu0 %v6196_v7 }
 0x466   :  { %v5478_v39 = vpop.f32.mrb[19].mxu1  ;;  %6199 = vmatpush3.bf16.msra.mxu0 %v6196_v7  ;;  %v4198_v7 = vld [vmem:[#allocation3 + $0x70] sm:$0xff] }
 0x467   :  { %v9523_v22 = vadd.f32 %v5478_v39, %v5477_v10  ;;  %v3393_v10 = vld [vmem:[#allocation3 + $0x520] sm:$0xff]  ;;  %v3394_v39 = vld [vmem:[#allocation3 + $0x528] sm:$0xff] }
 0x46d   :  { %v5480_v17 = vpop.f32.mrb[20].mxu1 }
 0x46e   :  { %v5481_v29 = vpop.f32.mrb[21].mxu1 }
 0x46f   :  { %v9525_v60 = vadd.f32 %v5481_v29, %v5480_v17  ;;  %v6200_v17 = vpack.c.bf16 %v4197_v6, %v4196_v53  ;;  %v6120_v29 = vpack.c.bf16 %v3394_v39, %v3393_v10  ;;  %v3053_v53 = vsub.s32 7, %v10553_v35  ;;  %v3381_v10 = vld [vmem:[#allocation3 + $0x4c0] sm:$0xff]  ;;  %v3382_v39 = vld [vmem:[#allocation3 + $0x4c8] sm:$0xff] }
 0x471   :  { %v5483_v3 = vpop.f32.mrb[22].mxu1  ;;  %6121 = vmatprep.subr.bf16.mxu1 %v6120_v29  ;;  %6201 = vmatprep.subr.bf16.mxu0 %v6200_v17  ;;  %v4199_v29 = vld [vmem:[#allocation3 + $0x78] sm:$0xff] }
 0x472   :  { %v5484_v40 = vpop.f32.mrb[23].mxu1  ;;  %6203 = vmatpush3.bf16.msra.mxu0 %v6200_v17 }
 0x473   :  { %v9527_v0 = vadd.f32 %v5484_v40, %v5483_v3  ;;  %v3377_v3 = vld [vmem:[#allocation3 + $0x4a0] sm:$0xff]  ;;  %v3378_v40 = vld [vmem:[#allocation3 + $0x4a8] sm:$0xff] }
 0x474   :  { %v6122_v47 = vpack.c.bf16 %v3378_v40, %v3377_v3  ;;  %v3399_v3 = vld [vmem:[#allocation3 + $0x550] sm:$0xff]  ;;  %v3400_v40 = vld [vmem:[#allocation3 + $0x558] sm:$0xff] }
 0x476   :  { %6123 = vmatpush3.bf16.msra.mxu1 %v6122_v47 }
 0x47c   :  { %v5486_v30 = vpop.f32.mrb[24].mxu1 }
 0x47d   :  { %v5487_v27 = vpop.f32.mrb[25].mxu1 }
 0x47e   :  { %v9529_v52 = vadd.f32 %v5487_v27, %v5486_v30  ;;  %v3379_v30 = vld [vmem:[#allocation3 + $0x4b0] sm:$0xff]  ;;  %v3380_v27 = vld [vmem:[#allocation3 + $0x4b8] sm:$0xff] }
 0x47f   :  { %v6126_v62 = vpack.c.bf16 %v3380_v27, %v3379_v30  ;;  %v6974_v30 = vld [vmem:[%s10375_s2] sm:$0xff] }
 0x480   :  { %v5489_v2 = vpop.f32.mrb[26].mxu1  ;;  %v9539_v27 = vrot.slane %v6974_v30, %v3053_v53 }
 0x481   :  { %v5490_v54 = vpop.f32.mrb[27].mxu1 }
 0x482   :  { %v9531_v45 = vadd.f32 %v5490_v54, %v5489_v2  ;;  %v6124_v2 = vpack.c.bf16 %v3396_v28, %v3395_v51  ;;  %v3397_v54 = vld [vmem:[#allocation3 + $0x540] sm:$0xff]  ;;  %v6130_v51 = vpack.c.bf16 %v3382_v39, %v3381_v10  ;;  %v6204_v28 = vpack.c.bf16 %v4199_v29, %v4198_v7  ;;  %v3386_v7 = vld [vmem:[#allocation3 + $0x4e8] sm:$0xff] }
 0x483   :  { %v6128_v6 = vpack.c.bf16 %v3398_v25, %v3397_v54  ;;  %v6132_v25 = vpack.c.bf16 %v3400_v40, %v3399_v3  ;;  %v3384_v54 = vld [vmem:[#allocation3 + $0x4d8] sm:$0xff]  ;;  %v10577_v39 = vmov 0.0|0.0   ;;  %v3385_v40 = vld [vmem:[#allocation3 + $0x4e0] sm:$0xff] }
 0x484   :  { %6125 = vmatprep.subr.bf16.mxu1 %v6124_v2  ;;  %v3383_v2 = vld [vmem:[#allocation3 + $0x4d0] sm:$0xff]  ;;  %6205 = vmatprep.subr.bf16.mxu0 %v6204_v28 }
 0x485   :  { %6127 = vmatpush3.bf16.msra.mxu1 %v6126_v62  ;;  %6207 = vmatpush3.bf16.msra.mxu0 %v6204_v28  ;;  %v3127_v62 = vadd.f32 %v9499_v58, %v9539_v27  ;;  %v6134_v10 = vpack.c.bf16 %v3384_v54, %v3383_v2  ;;  %v3404_v28 = vld [vmem:[#allocation3 + $0x578] sm:$0xff]  ;;  %v3137_v58 = vadd.f32 %v9511_v4, %v9539_v27  ;;  %v3387_v54 = vld [vmem:[#allocation3 + $0x4f0] sm:$0xff] }
 0x486   :  { %6129 = vmatprep.subr.bf16.mxu1 %v6128_v6  ;;  %6272 = vmatprep.subr.bf16.mxu0 %v10577_v39  ;;  %v3122_v6 = vadd.f32 %v9497_v26, %v9539_v27  ;;  %v3132_v26 = vadd.f32 %v9509_v11, %v9539_v27  ;;  %v3406_v39 = vld [vmem:[#allocation3 + $0x588] sm:$0xff]  ;;  %v3147_v4 = vadd.f32 %v9515_v14, %v9539_v27 }
 0x487   :  { %v3142_v11 = vadd.f32 %v9513_v8, %v9539_v27  ;;  %v3152_v14 = vadd.f32 %v9517_v15, %v9539_v27  ;;  %v3177_v15 = vadd.f32 %v9527_v0, %v9539_v27 }
 0x488   :  { %v5492_v34 = vpop.f32.mrb[28].mxu1 }
 0x489   :  { %v5493_v33 = vpop.f32.mrb[29].mxu1  ;;  %6131 = vmatpush3.bf16.msra.mxu1 %v6130_v51  ;;  %v6138_v51 = vpack.c.bf16 %v3386_v7, %v3385_v40  ;;  %v3389_v7 = vld [vmem:[#allocation3 + $0x500] sm:$0xff] }
 0x48a   :  { %v9534_v61 = vadd.f32 %v5493_v33, %v5492_v34  ;;  %v3401_v33 = vld [vmem:[#allocation3 + $0x560] sm:$0xff]  ;;  %v3402_v34 = vld [vmem:[#allocation3 + $0x568] sm:$0xff]  ;;  %6133 = vmatprep.subr.bf16.mxu1 %v6132_v25 }
 0x48b   :  { %v6136_v3 = vpack.c.bf16 %v3402_v34, %v3401_v33  ;;  %v3388_v33 = vld [vmem:[#allocation3 + $0x4f8] sm:$0xff] }
 0x48c   :  { %v5495_v47 = vpop.f32.mrb[30].mxu1 }
 0x48d   :  { %v5496_v35 = vpop.f32.mrb[31].mxu1  ;;  %6135 = vmatpush3.bf16.msra.mxu1 %v6134_v10  ;;  %v6142_v10 = vpack.c.bf16 %v3388_v33, %v3387_v54  ;;  %v3162_v33 = vadd.f32 %v9521_v49, %v9539_v27 }
 0x48e   :  { %v9541_v17 = vadd.f32 %v5496_v35, %v5495_v47  ;;  %v3403_v47 = vld [vmem:[#allocation3 + $0x570] sm:$0xff]  ;;  %6137 = vmatprep.subr.bf16.mxu1 %v6136_v3 }
 0x48f   :  { %v6140_v25 = vpack.c.bf16 %v3404_v28, %v3403_v47 }
 0x490   :  { %v5780_v53 = vpop.f32.mrb[32].mxu1 }
 0x491   :  { %v9548_v29 = vadd.f32 %v5780_v53, %v3127_v62  ;;  %v3266_v35 = vpop.f32.mrb[33].mxu1  ;;  %v3405_v53 = vld [vmem:[#allocation3 + $0x580] sm:$0xff]  ;;  %6139 = vmatpush3.bf16.msra.mxu1 %v6138_v51 }
 0x492   :  { %v9550_v30 = vadd.f32 %v3266_v35, %v3122_v6  ;;  %6141 = vmatprep.subr.bf16.mxu1 %v6140_v25  ;;  %v6144_v3 = vpack.c.bf16 %v3406_v39, %v3405_v53  ;;  %v3390_v35 = vld [vmem:[#allocation3 + $0x508] sm:$0xff]  ;;  %v3167_v39 = vadd.f32 %v9523_v22, %v9539_v27 }
 0x494   :  { %v5783_v2 = vpop.f32.mrb[34].mxu1 }
 0x495   :  { %v9556_v34 = vadd.f32 %v5783_v2, %v3137_v58  ;;  %v3276_v62 = vpop.f32.mrb[35].mxu1  ;;  %v3157_v2 = vadd.f32 %v9519_v20, %v9539_v27  ;;  %6143 = vmatpush3.bf16.msra.mxu1 %v6142_v10 }
 0x496   :  { %v9558_v6 = vadd.f32 %v3276_v62, %v3132_v26  ;;  %v6146_v26 = vpack.c.bf16 %v3390_v35, %v3389_v7  ;;  %6145 = vmatprep.subr.bf16.mxu1 %v6144_v3  ;;  %v3407_v7 = vld [vmem:[#allocation3 + $0x590] sm:$0xff]  ;;  %v3408_v35 = vld [vmem:[#allocation3 + $0x598] sm:$0xff] }
 0x497   :  { %v6148_v49 = vpack.c.bf16 %v3408_v35, %v3407_v7  ;;  %v10580_v7 = vmax.f32 %v9404_v44, 0.0 }
 0x498   :  { %v5786_v40 = vpop.f32.mrb[36].mxu1 }
 0x499   :  { %v3292_v47 = vadd.f32 %v5786_v40, %v3147_v4  ;;  %v3286_v28 = vpop.f32.mrb[37].mxu1  ;;  %6147 = vmatpush3.bf16.msra.mxu1 %v6146_v26  ;;  %v3172_v40 = vadd.f32 %v9525_v60, %v9539_v27  ;;  %v3182_v60 = vadd.f32 %v9529_v52, %v9539_v27 }
 0x49a   :  { %v3287_v58 = vadd.f32 %v3286_v28, %v3142_v11  ;;  %v3391_v28 = vld [vmem:[#allocation3 + $0x510] sm:$0xff]  ;;  %6149 = vmatprep.subr.bf16.mxu1 %v6148_v49  ;;  %v3547_v49 = vld [vmem:[#allocation3 + $0x208] sm:$0xff] }
 0x49c   :  { %v5789_v62 = vpop.f32.mrb[38].mxu1 }
 0x49d   :  { %v9568_v51 = vadd.f32 %v5789_v62, %v3157_v2  ;;  %v3296_v8 = vpop.f32.mrb[39].mxu1  ;;  %v3392_v2 = vld [vmem:[#allocation3 + $0x518] sm:$0xff]  ;;  %v3187_v62 = vadd.f32 %v9531_v45, %v9539_v27 }
 0x49e   :  { %v3297_v25 = vadd.f32 %v3296_v8, %v3152_v14  ;;  %v6150_v26 = vpack.c.bf16 %v3392_v2, %v3391_v28  ;;  %v3350_v14 = vmax.f32 %v3292_v47, 0.0  ;;  %v3197_v47 = vadd.f32 %v9541_v17, %v9539_v27  ;;  %v9611_v17 = vld [vmem:[#allocation2 + $0x118] sm:$0xff] }
 0x4a0   :  { %6151 = vmatpush3.bf16.msra.mxu1 %v6150_v26  ;;  %v3351_v28 = vmax.f32 %v3297_v25, 0.0  ;;  %v9613_v25 = vld [vmem:[#allocation2 + $0x110] sm:$0xff] }
 0x4ac   :  { %v5792_v54 = vpop.f32.mrb[40].mxu1 }
 0x4ad   :  { %v9574_v20 = vadd.f32 %v5792_v54, %v3167_v39  ;;  %v3306_v53 = vpop.f32.mrb[41].mxu1  ;;  %v3349_v54 = vmax.f32 %v3287_v58, 0.0  ;;  %v3546_v58 = vld [vmem:[#allocation3 + $0x200] sm:$0xff] }
 0x4ae   :  { %v9576_v4 = vadd.f32 %v3306_v53, %v3162_v33  ;;  %v9606_v26 = vpack.c.bf16 %v3547_v49, %v3546_v58 }
 0x4af   :  { %v3365_v45 = vadd.f32 %v3349_v54, %v9335_v57 }
 0x4b0   :  { %6153 = vmatprep.subr.bf16.mxu1 %v9606_v26 }
 0x4bc   :  { %v5795_v10 = vpop.f32.mrb[42].mxu1 }
 0x4bd   :  { %v9582_v11 = vadd.f32 %v5795_v10, %v3177_v15  ;;  %v3316_v3 = vpop.f32.mrb[43].mxu1  ;;  %v3366_v10 = vadd.f32 %v3350_v14, %v9319_v32  ;;  %v3352_v14 = vmax.f32 %v9568_v51, 0.0  ;;  %v6980_v51 = vld [vmem:[#allocation2 + $0x200] sm:$0xff] }
 0x4be   :  { %v9584_v22 = vadd.f32 %v3316_v3, %v3172_v40  ;;  %v10578_v40 = vmax.f32 %v9407_v41, 0.0  ;;  %v3192_v41 = vadd.f32 %v9534_v61, %v9539_v27  ;;  %v9619_v61 = vld [vmem:[#allocation2 + $0x100] sm:$0xff] }
 0x4cd   :  { %v5798_v0 = vpop.f32.mrb[44].mxu1 }
 0x4ce   :  { %v3332_v8 = vadd.f32 %v5798_v0, %v3187_v62  ;;  %v3326_v39 = vpop.f32.mrb[45].mxu1  ;;  %v6764_v0 = vpack.i.bf16 %v9611_v17, %v9613_v25 }
 0x4cf   :  { %v3327_v33 = vadd.f32 %v3326_v39, %v3182_v60  ;;  %v9617_v60 = vld [vmem:[#allocation2 + $0x108] sm:$0xff] }
 0x4d0   :  { %v3358_v53 = vmax.f32 %v3332_v8, 0.0  ;;  %v6754_v27 = vpack.i.bf16 %v9617_v60, %v9619_v61  ;;  %v3367_v8 = vadd.f32 %v3351_v28, %v9354_v36  ;;  %v9642_v28 = vld [vmem:[#allocation2 + $0x128] sm:$0xff] }
 0x4d1   :  { %v3357_v15 = vmax.f32 %v3327_v33, 0.0  ;;  %v10582_v33 = vmax.f32 %v9416_v5, 0.0  ;;  %v6981_v5 = vld [vmem:[#allocation2 + $0x218] sm:$0xff] }
 0x4d2   :  { %v9593_v3 = vadd.f32 %v3358_v53, %v10578_v40 }
 0x4d3   :  { %v9598_v35 = vadd.f32 %v3357_v15, %v10580_v7  ;;  %v3368_v15 = vadd.f32 %v3352_v14, %v9349_v23  ;;  %v6983_v23 = vld [vmem:[#allocation2 + $0x228] sm:$0xff]  ;;  %v6991_v14 = vld [vmem:[#allocation2 + $0x250] sm:$0xff] }
 0x4d4   :  { %10579 = vst [vmem:[#allocation59_spill] sm:$0xff] %v9593_v3  ;;  %v6744_v52 = vpack.i.bf16 %v3366_v10, %v9593_v3  ;;  %v6979_v10 = vld [vmem:[#allocation2 + $0x208] sm:$0xff] }
 0x4d5   :  { %10581 = vst [vmem:[#allocation60_spill] sm:$0xff] %v9598_v35  ;;  %v6749_v32 = vpack.i.bf16 %v3365_v45, %v9598_v35  ;;  %v5801_v2 = vpop.f32.mrb[46].mxu1  ;;  %v6759_v40 = vpack.i.bf16 %v6979_v10, %v3367_v8  ;;  %v10584_v45 = vmax.f32 %v9420_v19, 0.0  ;;  %v6984_v19 = vld [vmem:[#allocation2 + $0x220] sm:$0xff]  ;;  %v6992_v8 = vld [vmem:[#allocation2 + $0x258] sm:$0xff]  ;;  %v6995_v10 = vld [vmem:[#allocation2 + $0x270] sm:$0xff] }
 0x4d6   :  { %v3342_v57 = vadd.f32 %v5801_v2, %v3197_v47  ;;  %v3336_v44 = vpop.f32.mrb[47].mxu1  ;;  %6745 = vrot.lane.b32.xlu0 %v6744_v52, %s7118_s14  ;;  %v6779_v52 = vpack.i.bf16 %v6981_v5, %v3368_v15  ;;  %v6982_v47 = vld [vmem:[#allocation2 + $0x210] sm:$0xff]  ;;  %v6789_v49 = vpack.i.bf16 %v6983_v23, %v6984_v19  ;;  %v9668_v23 = vld [vmem:[#allocation2 + $0x380] sm:$0xff]  ;;  %v9670_v19 = vld [vmem:[#allocation2 + $0x388] sm:$0xff] }
 0x4d7   :  { %v3337_v62 = vadd.f32 %v3336_v44, %v3192_v41  ;;  %6750 = vrot.lane.b32.xlu1 %v6749_v32, %s7118_s14  ;;  %v9644_v32 = vld [vmem:[#allocation2 + $0x120] sm:$0xff]  ;;  %v6987_v41 = vld [vmem:[#allocation2 + $0x230] sm:$0xff]  ;;  %10588 = vst [vmem:[#allocation65_spill] sm:$0xff] %v9668_v23  ;;  %10589 = vst [vmem:[#allocation66_spill] sm:$0xff] %v9670_v19 }
 0x4d8   :  { %v3360_v39 = vmax.f32 %v3342_v57, 0.0  ;;  %v6784_v2 = vpack.i.bf16 %v9642_v28, %v9644_v32  ;;  %v6988_v57 = vld [vmem:[#allocation2 + $0x238] sm:$0xff]  ;;  %v9748_v3 = vld [vmem:[#allocation2 + $0x28] sm:$0xff] }
 0x4d9   :  { %v3359_v54 = vmax.f32 %v3337_v62, 0.0  ;;  %v6799_v44 = vpack.i.bf16 %v6988_v57, %v6987_v41  ;;  %v9650_v62 = vld [vmem:[#allocation2 + $0x138] sm:$0xff] }
 0x4da   :  { %6765 = vrot.lane.b32.xlu0 %v6764_v0, %s7119_s15  ;;  %v9634_v7 = vadd.f32 %v3360_v39, %v10584_v45  ;;  %v9652_v0 = vld [vmem:[#allocation2 + $0x130] sm:$0xff]  ;;  %v6809_v39 = vpack.i.bf16 %v6992_v8, %v6991_v14  ;;  %v9678_v41 = vld [vmem:[#allocation2 + $0x3b8] sm:$0xff]  ;;  %v10594_v8 = vpack.i.bf16 %v8711_v18, %v8691_v56  ;;  %v7009_v18 = vld [vmem:[#allocation2 + $0x180] sm:$0xff] }
 0x4db   :  { %v9628_v53 = vadd.f32 %v3359_v54, %v10582_v33  ;;  %6755 = vrot.lane.b32.xlu1 %v6754_v27, %s7119_s15  ;;  %v6794_v27 = vpack.i.bf16 %v9650_v62, %v9652_v0  ;;  %v6993_v54 = vld [vmem:[#allocation2 + $0x248] sm:$0xff]  ;;  %v6994_v33 = vld [vmem:[#allocation2 + $0x240] sm:$0xff]  ;;  %10591 = vst [vmem:[#allocation68_spill] sm:$0xff] %v9678_v41 }
 0x4dc   :  { %10585 = vst [vmem:[#allocation62_spill] sm:$0xff] %v9634_v7  ;;  %v6769_v58 = vpack.i.bf16 %v6982_v47, %v9634_v7  ;;  %v6804_v15 = vpack.i.bf16 %v6993_v54, %v6994_v33  ;;  %v9664_v47 = vld [vmem:[#allocation2 + $0x398] sm:$0xff]  ;;  %v10596_v54 = vpack.i.bf16 %v8833_v50, %v8818_v38  ;;  %v10597_v33 = vpack.i.bf16 %v8774_v63, %v8752_v59  ;;  %v9714_v38 = vld [vmem:[#allocation2] sm:$0xff] }
 0x4dd   :  { %10583 = vst [vmem:[#allocation61_spill] sm:$0xff] %v9628_v53  ;;  %v6774_v36 = vpack.i.bf16 %v6980_v51, %v9628_v53  ;;  %v6997_v51 = vld [vmem:[#allocation2 + $0x268] sm:$0xff]  ;;  %10587 = vst [vmem:[#allocation64_spill] sm:$0xff] %v9664_v47  ;;  %v9716_v50 = vld [vmem:[#allocation2 + $0x20] sm:$0xff]  ;;  %v3354_v63 = vmax.f32 %v9574_v20, 0.0 }
 0x4de   :  { %v3550_v59 = vadd.f32 %v9716_v50, %v9714_v38  ;;  %v7019_v53 = vld [vmem:[#allocation2 + $0x8] sm:$0xff] }
 0x4df   :  { %6775 = vrot.lane.b32.xlu0 %v6774_v36, %s7118_s14  ;;  %6760 = vrot.lane.b32.xlu1 %v6759_v40, %s7118_s14  ;;  %v6996_v40 = vld [vmem:[#allocation2 + $0x278] sm:$0xff]  ;;  %v6998_v36 = vld [vmem:[#allocation2 + $0x260] sm:$0xff]  ;;  %v3551_v35 = vadd.f32 %v9748_v3, %v7019_v53 }
 0x4e0   :  { %v6819_v45 = vpack.i.bf16 %v6996_v40, %v6995_v10  ;;  %v6814_v5 = vpack.i.bf16 %v6997_v51, %v6998_v36  ;;  %v9708_v10 = vld [vmem:[#allocation2 + $0xa0] sm:$0xff]  ;;  %v3353_v40 = vmax.f32 %v9576_v4, 0.0 }
 0x4e1   :  { %v9723_v51 = vld [vmem:[#allocation2 + $0x40] sm:$0xff] }
 0x4e2   :  { %v9725_v36 = vld [vmem:[#allocation2 + $0x60] sm:$0xff] }
 0x4e3   :  { %6780 = vrot.lane.b32.xlu0 %v6779_v52, %s7118_s14  ;;  %6770 = vrot.lane.b32.xlu1 %v6769_v58, %s7118_s14  ;;  %v9662_v52 = vld [vmem:[#allocation2 + $0x390] sm:$0xff]  ;;  %v7014_v4 = vld [vmem:[#allocation2 + $0x1a0] sm:$0xff] }
 0x4e4   :  { %10586 = vst [vmem:[#allocation63_spill] sm:$0xff] %v9662_v52  ;;  %v6829_v58 = vpack.i.bf16 %v9664_v47, %v9662_v52  ;;  %v9753_v47 = vld [vmem:[#allocation2 + $0x30] sm:$0xff] }
 0x4e7   :  { %6790 = vrot.lane.b32.xlu0 %v6789_v49, %s7118_s14  ;;  %6785 = vrot.lane.b32.xlu1 %v6784_v2, %s7119_s15  ;;  %v6824_v49 = vpack.i.bf16 %v9670_v19, %v9668_v23  ;;  %v9676_v2 = vld [vmem:[#allocation2 + $0x3b0] sm:$0xff]  ;;  %v3355_v19 = vmax.f32 %v9584_v22, 0.0 }
 0x4e8   :  { %10590 = vst [vmem:[#allocation67_spill] sm:$0xff] %v9676_v2  ;;  %v6839_v57 = vpack.i.bf16 %v9678_v41, %v9676_v2  ;;  %v9751_v41 = vld [vmem:[#allocation2 + $0x10] sm:$0xff] }
 0x4e9   :  { %v9780_v22 = vld [vmem:[#allocation2 + $0x50] sm:$0xff] }
 0x4eb   :  { %6800 = vrot.lane.b32.xlu0 %v6799_v44, %s7118_s14  ;;  %6795 = vrot.lane.b32.xlu1 %v6794_v27, %s7119_s15  ;;  %v9682_v44 = vld [vmem:[#allocation2 + $0x3a0] sm:$0xff]  ;;  %v9684_v27 = vld [vmem:[#allocation2 + $0x3a8] sm:$0xff] }
 0x4ec   :  { %10592 = vst [vmem:[#allocation69_spill] sm:$0xff] %v9682_v44  ;;  %10593 = vst [vmem:[#allocation70_spill] sm:$0xff] %v9684_v27  ;;  %v6834_v14 = vpack.i.bf16 %v9684_v27, %v9682_v44  ;;  %v3347_v44 = vmax.f32 %v9558_v6, 0.0 }
 0x4ef   :  { %6810 = vrot.lane.b32.xlu0 %v6809_v39, %s7118_s14  ;;  %6805 = vrot.lane.b32.xlu1 %v6804_v15, %s7118_s14  ;;  %v10595_v39 = vpack.i.bf16 %v8658_v21, %v8621_v13  ;;  %v9706_v15 = vld [vmem:[#allocation2 + $0x80] sm:$0xff]  ;;  %v3345_v21 = vmax.f32 %v9550_v30, 0.0  ;;  %v9729_v30 = vadd.f32 %v9725_v36, %v9723_v51 }
 0x4f0   :  { %v3582_v56 = vadd.f32 %v9708_v10, %v9706_v15 }
 0x4f2   :  { %v3586_v13 = vadd.f32 %v7009_v18, %v3582_v56  ;;  %v3549_v56 = vld [vmem:[#allocation3 + $0x218] sm:$0xff]  ;;  %v3369_v18 = vadd.f32 %v3353_v40, %v9387_v24  ;;  %v3554_v24 = vadd.f32 %v9619_v61, %v3550_v59  ;;  %v3370_v40 = vadd.f32 %v3354_v63, %v9389_v46  ;;  %v9769_v61 = vld [vmem:[#allocation2 + $0x68] sm:$0xff]  ;;  %v7026_v63 = vld [vmem:[#allocation2 + $0x190] sm:$0xff] }
 0x4f3   :  { %6820 = vrot.lane.b32.xlu0 %v6819_v45, %s7118_s14  ;;  %6815 = vrot.lane.b32.xlu1 %v6814_v5, %s7118_s14 }
 0x4f4   :  { %v9731_v5 = vadd.f32 %v7014_v4, %v3586_v13 }
 0x4f7   :  { %6830 = vrot.lane.b32.xlu0 %v6829_v58, %s7120_s18  ;;  %6825 = vrot.lane.b32.xlu1 %v6824_v49, %s7120_s18  ;;  %v9733_v58 = vld [vmem:[#allocation2 + $0x88] sm:$0xff] }
 0x4f8   :  { %v9735_v49 = vld [vmem:[#allocation2 + $0xa8] sm:$0xff] }
 0x4f9   :  { %10598 = vst [vmem:[#allocation71_spill] sm:$0xff] %v9735_v49  ;;  %v3583_v20 = vadd.f32 %v9735_v49, %v9733_v58 }
 0x4fb   :  { %6840 = vrot.lane.b32.xlu0 %v6839_v57, %s7120_s18  ;;  %6835 = vrot.lane.b32.xlu1 %v6834_v14, %s7120_s18  ;;  %v9739_v57 = vld [vmem:[#allocation2 + $0x90] sm:$0xff] }
 0x4fc   :  { %v9741_v14 = vld [vmem:[#allocation2 + $0xb0] sm:$0xff] }
 0x4fd   :  { %10599 = vst [vmem:[#allocation72_spill] sm:$0xff] %v9741_v14 }
 0x4ff   :  { %6850 = vrot.lane.b32.xlu0 %v10594_v8, %s7120_s18  ;;  %6845 = vrot.lane.b32.xlu1 %v10595_v39, %s7120_s18  ;;  %v3584_v8 = vadd.f32 %v9741_v14, %v9739_v57  ;;  %v3361_v39 = vadd.f32 %v3345_v21, %v9268_v37  ;;  %v3552_v37 = vadd.f32 %v9753_v47, %v9751_v41  ;;  %v3346_v21 = vmax.f32 %v9548_v29, 0.0  ;;  %v9767_v29 = vld [vmem:[#allocation2 + $0x48] sm:$0xff] }
 0x500   :  { %v9773_v46 = vadd.f32 %v9769_v61, %v9767_v29 }
 0x503   :  { %6860 = vrot.lane.b32.xlu0 %v10596_v54, %s7120_s18  ;;  %6855 = vrot.lane.b32.xlu1 %v10597_v33, %s7120_s18  ;;  %v3548_v33 = vld [vmem:[#allocation3 + $0x210] sm:$0xff] }
 0x504   :  { %v6156_v52 = vpack.c.bf16 %v3549_v56, %v3548_v33  ;;  %v3362_v56 = vadd.f32 %v3346_v21, %v9283_v43  ;;  %v3363_v43 = vadd.f32 %v3347_v44, %v9306_v16 }
 0x548   :  { %v9721_v45 = vpop.permute.xlu0 %6745 }
 0x549   :  { %v6751_v54 = vpop.permute.xlu1 %6750  ;;  %v6747_v13 = vunpack.i.l.bf16 %v9721_v45  ;;  %v6748_v23 = vunpack.i.h.bf16 %v9721_v45  ;;  %v9782_v45 = vld [vmem:[#allocation2 + $0x70] sm:$0xff] }
 0x54a   :  { %v6753_v4 = vunpack.i.h.bf16 %v6751_v54  ;;  %v6752_v7 = vunpack.i.l.bf16 %v6751_v54  ;;  %v9786_v33 = vadd.f32 %v9782_v45, %v9780_v22 }
 0x54b   :  { %v3446_v6 = vsel %vm1540_vm1, %v3370_v40, %v6747_v13  ;;  %v9792_v13 = vld [vmem:[#allocation2 + $0x38] sm:$0xff] }
 0x54c   :  { %v9760_v2 = vpop.permute.xlu0 %6765  ;;  %v3445_v54 = vsel %vm1540_vm1, %v3369_v18, %v6752_v7  ;;  %v3441_v27 = vsel %vm1540_vm1, %v3361_v39, %v6753_v4  ;;  %v7025_v7 = vld [vmem:[#allocation2 + $0x188] sm:$0xff]  ;;  %v9777_v39 = vadd.f32 %v7026_v63, %v3584_v8  ;;  %v7029_v8 = vld [vmem:[#allocation2 + $0x18] sm:$0xff] }
 0x54d   :  { %v6756_v14 = vpop.permute.xlu1 %6755  ;;  %3517 = vmatprep.mubr.f32.mxu1 %v3445_v54  ;;  %v9775_v59 = vadd.f32 %v7025_v7, %v3583_v20  ;;  %v3558_v20 = vadd.f32 %v9644_v32, %v3554_v24  ;;  %v3553_v40 = vadd.f32 %v9792_v13, %v7029_v8  ;;  %v3348_v54 = vmax.f32 %v9556_v34, 0.0 }
 0x54e   :  { %3518 = vmatmul.mubr.f32.vlgmr.msra.gmra.mrb[48].mxu1 %v3441_v27  ;;  %v6758_v18 = vunpack.i.h.bf16 %v6756_v14  ;;  %v6757_v4 = vunpack.i.l.bf16 %v6756_v14  ;;  %v3555_v27 = vadd.f32 %v9617_v60, %v3551_v35  ;;  %v3556_v7 = vadd.f32 %v9613_v25, %v3552_v37 }
 0x54f   :  { %3522 = vmatprep.mubr.f32.mxu1 %v3446_v6  ;;  %6155 = vmatpush3.bf16.msra.mxu1 %v9606_v26  ;;  %v3356_v14 = vmax.f32 %v9582_v11, 0.0  ;;  %v3371_v26 = vadd.f32 %v3355_v19, %v9396_v9  ;;  %v3442_v35 = vsel %vm1540_vm1, %v3362_v56, %v6748_v23  ;;  %v6768_v34 = vunpack.i.h.bf16 %v9760_v2 }
 0x550   :  { %6157 = vmatprep.subr.bf16.mxu1 %v6156_v52  ;;  %v6767_v49 = vunpack.i.l.bf16 %v9760_v2  ;;  %v4225_v25 = vsel %vm1191_vm0, %v7019_v53, %v6758_v18  ;;  %v4224_v16 = vsel %vm1191_vm0, %v9714_v38, %v6757_v4  ;;  %v3364_v44 = vadd.f32 %v3348_v54, %v9333_v55 }
 0x551   :  { %v6776_v21 = vpop.permute.xlu0 %6775  ;;  %v6761_v32 = vpop.permute.xlu1 %6760  ;;  %v3372_v37 = vadd.f32 %v3356_v14, %v9398_v42  ;;  %v10600_v53 = vunpack.i.l.bf16 %v8855_v12  ;;  %v3559_v55 = vadd.f32 %v9642_v28, %v3555_v27  ;;  %v4227_v54 = vsel %vm1191_vm0, %v7029_v8, %v6768_v34 }
 0x552   :  { %v6778_v60 = vunpack.i.h.bf16 %v6776_v21  ;;  %v6777_v24 = vunpack.i.l.bf16 %v6776_v21  ;;  %v6763_v63 = vunpack.i.h.bf16 %v6761_v32  ;;  %v6762_v6 = vunpack.i.l.bf16 %v6761_v32  ;;  %3523 = vmatmul.mubr.f32.gmra.mrb[50].mxu1 %v3442_v35 }
 0x553   :  { %6159 = vmatpush3.bf16.msra.mxu1 %v6156_v52  ;;  %v10601_v52 = vunpack.i.h.bf16 %v8855_v12  ;;  %v4226_v42 = vsel %vm1191_vm0, %v9751_v41, %v6767_v49  ;;  %v3557_v14 = vadd.f32 %v9611_v17, %v3553_v40  ;;  %v10602_v28 = vunpack.i.l.bf16 %v8906_v1 }
 0x554   :  { %v4229_v9 = vsel %vm1540_vm1, %v4225_v25, %v6763_v63  ;;  %v3447_v11 = vsel %vm1540_vm1, %v3371_v26, %v6777_v24  ;;  %v3443_v23 = vsel %vm1540_vm1, %v3363_v43, %v6762_v6  ;;  %v4228_v19 = vsel %vm1540_vm1, %v4224_v16, %v6778_v60  ;;  %v7031_v16 = vld [vmem:[#allocation2 + $0x140] sm:$0xff] }
 0x555   :  { %v6781_v56 = vpop.permute.xlu0 %6780  ;;  %v6771_v2 = vpop.permute.xlu1 %6770  ;;  %3527 = vmatprep.mubr.f32.mxu1 %v3447_v11  ;;  %v4232_v38 = vsel %vm1545_vm2, %v4228_v19, %v10600_v53  ;;  %v4233_v18 = vsel %vm1545_vm2, %v4229_v9, %v10601_v52  ;;  %v3562_v41 = vmul.f32 0.25, %v3558_v20  ;;  %v10603_v49 = vunpack.i.h.bf16 %v8906_v1  ;;  %v7032_v11 = vld [vmem:[#allocation2 + $0x148] sm:$0xff]  ;;  %v7033_v1 = vld [vmem:[#allocation2 + $0x150] sm:$0xff] }
 0x556   :  { %v6783_v4 = vunpack.i.h.bf16 %v6781_v56  ;;  %v6782_v26 = vunpack.i.l.bf16 %v6781_v56  ;;  %v6773_v43 = vunpack.i.h.bf16 %v6771_v2  ;;  %v6772_v21 = vunpack.i.l.bf16 %v6771_v2  ;;  %3528 = vmatmul.mubr.f32.gmra.mrb[52].mxu1 %v3443_v23  ;;  %5912 = vmatprep.mubr.f32.mxu0 %v4232_v38 }
 0x557   :  { %5913 = vmatmul.mubr.f32.vlgmr.msra.gmra.mrb[96].mxu0 %v4233_v18  ;;  %v3560_v8 = vadd.f32 %v9652_v0, %v3556_v7  ;;  %v3570_v9 = vadd.f32 %v7031_v16, %v9729_v30  ;;  %v3571_v20 = vadd.f32 %v7032_v11, %v9773_v46  ;;  %v3572_v23 = vadd.f32 %v7033_v1, %v9786_v33  ;;  %v7034_v46 = vld [vmem:[#allocation2 + $0x160] sm:$0xff] }
 0x558   :  { %v3448_v12 = vsel %vm1540_vm1, %v3372_v37, %v6772_v21  ;;  %v3444_v32 = vsel %vm1540_vm1, %v3364_v44, %v6782_v26  ;;  %v4230_v35 = vsel %vm1540_vm1, %v4226_v42, %v6773_v43  ;;  %v4231_v60 = vsel %vm1540_vm1, %v4227_v54, %v6783_v4  ;;  %v7035_v43 = vld [vmem:[#allocation2 + $0x168] sm:$0xff]  ;;  %v9853_v42 = vld [vmem:[#allocation2 + $0x78] sm:$0xff] }
 0x559   :  { %v6791_v24 = vpop.permute.xlu0 %6790  ;;  %v6786_v63 = vpop.permute.xlu1 %6785  ;;  %3532 = vmatprep.mubr.f32.mxu1 %v3448_v12  ;;  %v4234_v27 = vsel %vm1545_vm2, %v4230_v35, %v10602_v28  ;;  %v4235_v17 = vsel %vm1545_vm2, %v4231_v60, %v10603_v49  ;;  %v3563_v19 = vmul.f32 0.25, %v3559_v55  ;;  %v3561_v44 = vadd.f32 %v9650_v62, %v3557_v14  ;;  %v7036_v55 = vld [vmem:[#allocation2 + $0x58] sm:$0xff]  ;;  %v7038_v35 = vld [vmem:[#allocation2 + $0x170] sm:$0xff] }
 0x55a   :  { %v6793_v40 = vunpack.i.h.bf16 %v6791_v24  ;;  %v6792_v6 = vunpack.i.l.bf16 %v6791_v24  ;;  %v6788_v34 = vunpack.i.h.bf16 %v6786_v63  ;;  %v6787_v25 = vunpack.i.l.bf16 %v6786_v63  ;;  %3533 = vmatmul.mubr.f32.gmra.mrb[54].mxu1 %v3444_v32  ;;  %5915 = vmatprep.mubr.f32.mxu0 %v4234_v27  ;;  %v9862_v24 = vld [vmem:[#allocation2 + $0xb8] sm:$0xff] }
 0x55b   :  { %5810 = vmatprep.mubr.msk.f32.mxu1 %vm1191_vm0, %v3562_v41  ;;  %5916 = vmatmul.mubr.f32.gmra.mrb[98].mxu0 %v4235_v17  ;;  %v3564_v2 = vmul.f32 0.25, %v3560_v8  ;;  %v3574_v38 = vadd.f32 %v7034_v46, %v3570_v9  ;;  %v3575_v21 = vadd.f32 %v7035_v43, %v3571_v20  ;;  %v3569_v54 = vadd.f32 %v9853_v42, %v7036_v55  ;;  %v10608_v20 = vld [vmem:[#allocation30_spill] sm:$0xff] }
 0x55c   :  { %v4260_v0 = vsel %vm1191_vm0, %v9716_v50, %v6787_v25  ;;  %v4261_v7 = vsel %vm1191_vm0, %v9748_v3, %v6788_v34  ;;  %v10604_v3 = vunpack.i.l.bf16 %v8937_v48  ;;  %v10605_v50 = vunpack.i.h.bf16 %v8937_v48  ;;  %v9860_v48 = vld [vmem:[#allocation2 + $0x98] sm:$0xff] }
 0x55d   :  { %v6801_v37 = vpop.permute.xlu0 %6800  ;;  %v6796_v56 = vpop.permute.xlu1 %6795  ;;  %v4264_v30 = vsel %vm1540_vm1, %v4260_v0, %v6792_v6  ;;  %v4265_v53 = vsel %vm1540_vm1, %v4261_v7, %v6793_v40  ;;  %v3565_v14 = vmul.f32 0.25, %v3561_v44  ;;  %v3576_v60 = vadd.f32 %v7038_v35, %v3572_v23  ;;  %v7041_v40 = vld [vmem:[#allocation2 + $0x158] sm:$0xff] }
 0x55e   :  { %v6803_v52 = vunpack.i.h.bf16 %v6801_v37  ;;  %v6802_v33 = vunpack.i.l.bf16 %v6801_v37  ;;  %v6798_v18 = vunpack.i.h.bf16 %v6796_v56  ;;  %v6797_v4 = vunpack.i.l.bf16 %v6796_v56  ;;  %5811 = vmatmul.mubr.msk.f32.vlgmr.msra.gmra.mrb[56].mxu1 %vm1191_vm0, %v3563_v19  ;;  %v7042_v37 = vld [vmem:[#allocation2 + $0x178] sm:$0xff] }
 0x55f   :  { %5813 = vmatprep.mubr.msk.f32.mxu1 %vm1191_vm0, %v3564_v2  ;;  %v4268_v62 = vsel %vm1545_vm2, %v4264_v30, %v10604_v3  ;;  %v4269_v26 = vsel %vm1545_vm2, %v4265_v53, %v10605_v50  ;;  %v3585_v63 = vadd.f32 %v9862_v24, %v9860_v48  ;;  %v3578_v41 = vmul.f32 0.25, %v3574_v38  ;;  %v10611_v30 = vld [vmem:[#allocation51_spill] sm:$0xff] }
 0x560   :  { %5918 = vmatprep.mubr.f32.mxu0 %v4268_v62  ;;  %v4262_v12 = vsel %vm1191_vm0, %v9753_v47, %v6797_v4  ;;  %v4263_v32 = vsel %vm1191_vm0, %v9792_v13, %v6798_v18  ;;  %v3573_v6 = vadd.f32 %v7041_v40, %v3569_v54  ;;  %v10606_v34 = vunpack.i.l.bf16 %v8969_v31  ;;  %v10613_v38 = vld [vmem:[#allocation31_spill] sm:$0xff]  ;;  %v7043_v4 = vld [vmem:[#allocation2 + $0x1a8] sm:$0xff] }
 0x561   :  { %5919 = vmatmul.mubr.f32.gmra.mrb[100].mxu0 %v4269_v26  ;;  %v6811_v28 = vpop.permute.xlu0 %6810  ;;  %v6806_v27 = vpop.permute.xlu1 %6805  ;;  %v4266_v49 = vsel %vm1540_vm1, %v4262_v12, %v6802_v33  ;;  %v4267_v47 = vsel %vm1540_vm1, %v4263_v32, %v6803_v52  ;;  %v10607_v16 = vunpack.i.h.bf16 %v8969_v31  ;;  %v3579_v11 = vmul.f32 0.25, %v3575_v21  ;;  %v7044_v62 = vld [vmem:[#allocation2 + $0x1b0] sm:$0xff]  ;;  %v7045_v21 = vld [vmem:[#allocation2 + $0x198] sm:$0xff] }
 0x562   :  { %v6812_v17 = vunpack.i.l.bf16 %v6811_v28  ;;  %v6808_v8 = vunpack.i.h.bf16 %v6806_v27  ;;  %v6807_v13 = vunpack.i.l.bf16 %v6806_v27  ;;  %5814 = vmatmul.mubr.msk.f32.gmra.mrb[58].mxu1 %vm1191_vm0, %v3565_v14  ;;  %v4270_v25 = vsel %vm1545_vm2, %v4266_v49, %v10606_v34 }
 0x563   :  { %5816 = vmatprep.mubr.msk.f32.mxu1 %vm1191_vm0, %v3578_v41  ;;  %v4271_v9 = vsel %vm1545_vm2, %v4267_v47, %v10607_v16  ;;  %v10609_v1 = vunpack.i.l.bf16 %v10608_v20  ;;  %5921 = vmatprep.mubr.f32.mxu0 %v4270_v25  ;;  %v3580_v0 = vmul.f32 0.25, %v3576_v60  ;;  %v10610_v7 = vunpack.i.h.bf16 %v10608_v20  ;;  %v10617_v60 = vld [vmem:[#allocation53_spill] sm:$0xff]  ;;  %v10623_v16 = vld [vmem:[#allocation55_spill] sm:$0xff] }
 0x564   :  { %v3577_v56 = vadd.f32 %v7042_v37, %v3573_v6  ;;  %v6813_v31 = vunpack.i.h.bf16 %v6811_v28  ;;  %v10612_v53 = vunpack.i.l.bf16 %v10611_v30  ;;  %v10614_v52 = vunpack.i.l.bf16 %v10613_v38 }
 0x565   :  { %v4284_v23 = vsel %vm1191_vm0, %v9723_v51, %v10609_v1  ;;  %v4285_v44 = vsel %vm1191_vm0, %v9767_v29, %v10610_v7  ;;  %5922 = vmatmul.mubr.f32.gmra.mrb[102].mxu0 %v4271_v9  ;;  %v6816_v2 = vpop.permute.xlu1 %6815  ;;  %v3591_v3 = vadd.f32 %v7043_v4, %v9775_v59  ;;  %v3592_v50 = vadd.f32 %v7044_v62, %v9777_v39  ;;  %v6821_v26 = vpop.permute.xlu0 %6820  ;;  %v10625_v1 = vld [vmem:[#allocation37_spill] sm:$0xff]  ;;  %v10633_v4 = vld [vmem:[#allocation58_spill] sm:$0xff] }
 0x566   :  { %v4288_v19 = vsel %vm1540_vm1, %v4284_v23, %v6807_v13  ;;  %v4289_v51 = vsel %vm1540_vm1, %v4285_v44, %v6808_v8  ;;  %v4286_v33 = vsel %vm1191_vm0, %v9780_v22, %v10614_v52  ;;  %v6817_v18 = vunpack.i.l.bf16 %v6816_v2  ;;  %5817 = vmatmul.mubr.msk.f32.gmra.mrb[60].mxu1 %vm1191_vm0, %v3579_v11  ;;  %v10631_v52 = vld [vmem:[#allocation14_spill] sm:$0xff]  ;;  %v10634_v62 = vld [vmem:[#allocation45_spill] sm:$0xff] }
 0x567   :  { %v4292_v46 = vsel %vm1545_vm2, %v4288_v19, %v10612_v53  ;;  %v4290_v29 = vsel %vm1540_vm1, %v4286_v33, %v6812_v17  ;;  %5819 = vmatprep.mubr.msk.f32.mxu1 %vm1191_vm0, %v3580_v0  ;;  %v3594_v43 = vmul.f32 0.25, %v9731_v5  ;;  %v3589_v54 = vadd.f32 %v7045_v21, %v3585_v63  ;;  %v10619_v5 = vld [vmem:[#allocation34_spill] sm:$0xff]  ;;  %v7046_v17 = vld [vmem:[#allocation2 + $0x1b8] sm:$0xff]  ;;  %v10630_v53 = vld [vmem:[#allocation57_spill] sm:$0xff] }
 0x568   :  { %5924 = vmatprep.mubr.f32.mxu0 %v4292_v46  ;;  %v10615_v22 = vunpack.i.h.bf16 %v10611_v30  ;;  %v3581_v12 = vmul.f32 0.25, %v3577_v56  ;;  %v10616_v32 = vunpack.i.h.bf16 %v10613_v38  ;;  %v6818_v59 = vunpack.i.h.bf16 %v6816_v2  ;;  %v10629_v2 = vld [vmem:[#allocation10_spill] sm:$0xff] }
 0x569   :  { %v10618_v39 = vunpack.i.l.bf16 %v10617_v60  ;;  %v10620_v41 = vunpack.i.l.bf16 %v10619_v5  ;;  %v6822_v49 = vunpack.i.l.bf16 %v6821_v26  ;;  %v3593_v8 = vadd.f32 %v7046_v17, %v3589_v54  ;;  %v6826_v0 = vpop.permute.xlu1 %6825  ;;  %v6831_v38 = vpop.permute.xlu0 %6830  ;;  %v10644_v17 = vld [vmem:[#allocation17_spill] sm:$0xff] }
 0x56a   :  { %v4293_v14 = vsel %vm1545_vm2, %v4289_v51, %v10615_v22  ;;  %v4287_v35 = vsel %vm1191_vm0, %v7036_v55, %v10616_v32  ;;  %5820 = vmatmul.mubr.msk.f32.gmra.mrb[62].mxu1 %vm1191_vm0, %v3581_v12  ;;  %v3595_v55 = vmul.f32 0.25, %v3591_v3  ;;  %v10621_v13 = vunpack.i.h.bf16 %v10617_v60  ;;  %v10638_v32 = vld [vmem:[#allocation16_spill] sm:$0xff] }
 0x56b   :  { %5925 = vmatmul.mubr.f32.gmra.mrb[104].mxu0 %v4293_v14  ;;  %v4294_v28 = vsel %vm1545_vm2, %v4290_v29, %v10618_v39  ;;  %v4291_v27 = vsel %vm1540_vm1, %v4287_v35, %v6813_v31  ;;  %v4308_v63 = vsel %vm1191_vm0, %v9725_v36, %v10620_v41  ;;  %5822 = vmatprep.mubr.msk.f32.mxu1 %vm1191_vm0, %v3594_v43  ;;  %v3596_v6 = vmul.f32 0.25, %v3592_v50  ;;  %v10636_v43 = vld [vmem:[#allocation12_spill] sm:$0xff]  ;;  %v10637_v14 = vld [vmem:[#allocation15_spill] sm:$0xff]  ;;  %v10640_v39 = vld [vmem:[#allocation13_spill] sm:$0xff] }
 0x56c   :  { %5927 = vmatprep.mubr.f32.mxu0 %v4294_v28  ;;  %v4312_v47 = vsel %vm1540_vm1, %v4308_v63, %v6817_v18  ;;  %v4295_v40 = vsel %vm1545_vm2, %v4291_v27, %v10621_v13  ;;  %v10622_v34 = vunpack.i.h.bf16 %v10619_v5  ;;  %v6823_v25 = vunpack.i.h.bf16 %v6821_v26 }
 0x56d   :  { %v10624_v9 = vunpack.i.l.bf16 %v10623_v16  ;;  %v10626_v23 = vunpack.i.l.bf16 %v10625_v1  ;;  %v3597_v37 = vmul.f32 0.25, %v3593_v8  ;;  %v10628_v56 = vunpack.i.h.bf16 %v10625_v1  ;;  %v6836_v12 = vpop.permute.xlu1 %6835  ;;  %v6841_v13 = vpop.permute.xlu0 %6840 }
 0x56e   :  { %v4309_v36 = vsel %vm1191_vm0, %v9769_v61, %v10622_v34  ;;  %5823 = vmatmul.mubr.msk.f32.gmra.mrb[64].mxu1 %vm1191_vm0, %v3595_v55  ;;  %v10627_v61 = vunpack.i.h.bf16 %v10623_v16  ;;  %v6827_v30 = vunpack.i.l.bf16 %v6826_v0  ;;  %v4332_v33 = vsel %vm1191_vm0, %v9706_v15, %v10631_v52 }
 0x56f   :  { %5928 = vmatmul.mubr.f32.gmra.mrb[106].mxu0 %v4295_v40  ;;  %v4316_v11 = vsel %vm1545_vm2, %v4312_v47, %v10624_v9  ;;  %v4313_v20 = vsel %vm1540_vm1, %v4309_v36, %v6818_v59  ;;  %v4310_v19 = vsel %vm1191_vm0, %v9782_v45, %v10626_v23  ;;  %5825 = vmatprep.mubr.msk.f32.mxu1 %vm1191_vm0, %v3596_v6  ;;  %v3610_v45 = vmul.f32 0.25, %v10629_v2  ;;  %v10645_v40 = vld [vmem:[#allocation18_spill] sm:$0xff]  ;;  %v10647_v9 = vld [vmem:[#allocation48_spill] sm:$0xff] }
 0x570   :  { %5930 = vmatprep.mubr.f32.mxu0 %v4316_v11  ;;  %v4314_v7 = vsel %vm1540_vm1, %v4310_v19, %v6822_v49  ;;  %v4317_v44 = vsel %vm1545_vm2, %v4313_v20, %v10627_v61  ;;  %v4311_v31 = vsel %vm1191_vm0, %v9853_v42, %v10628_v56  ;;  %v10632_v42 = vld [vmem:[#allocation11_spill] sm:$0xff]  ;;  %v6828_v29 = vunpack.i.h.bf16 %v6826_v0  ;;  %v10649_v20 = vld [vmem:[#allocation33_spill] sm:$0xff]  ;;  %v10653_v56 = vld [vmem:[#allocation20_spill] sm:$0xff] }
 0x571   :  { %v4318_v46 = vsel %vm1545_vm2, %v4314_v7, %v10630_v53  ;;  %v4315_v51 = vsel %vm1540_vm1, %v4311_v31, %v6823_v25  ;;  %v3611_v18 = vmul.f32 0.25, %v10632_v42  ;;  %v10635_v50 = vunpack.i.l.bf16 %v10634_v62  ;;  %v10651_v7 = vld [vmem:[#allocation19_spill] sm:$0xff]  ;;  %v10654_v31 = vld [vmem:[#allocation72_spill] sm:$0xff] }
 0x572   :  { %5826 = vmatmul.mubr.msk.f32.gmra.mrb[66].mxu1 %vm1191_vm0, %v3597_v37  ;;  %v4319_v3 = vsel %vm1545_vm2, %v4315_v51, %v10633_v4  ;;  %v3612_v21 = vmul.f32 0.25, %v10636_v43  ;;  %v6832_v54 = vunpack.i.l.bf16 %v6831_v38  ;;  %v4333_v15 = vsel %vm1191_vm0, %v9733_v58, %v10637_v14  ;;  %v10641_v58 = vld [vmem:[#allocation47_spill] sm:$0xff]  ;;  %v6846_v37 = vpop.permute.xlu1 %6845 }
 0x573   :  { %5931 = vmatmul.mubr.f32.gmra.mrb[108].mxu0 %v4317_v44  ;;  %5828 = vmatprep.mubr.msk.f32.mxu1 %vm1191_vm0, %v3610_v45  ;;  %v4336_v26 = vsel %vm1540_vm1, %v4332_v33, %v10635_v50  ;;  %v4334_v35 = vsel %vm1191_vm0, %v9739_v57, %v10638_v32  ;;  %v10639_v59 = vunpack.i.h.bf16 %v10634_v62  ;;  %v3613_v28 = vmul.f32 0.25, %v10640_v39  ;;  %v10643_v57 = vld [vmem:[#allocation32_spill] sm:$0xff]  ;;  %v10652_v61 = vld [vmem:[#allocation71_spill] sm:$0xff]  ;;  %v7047_v45 = vld [vmem:[#allocation2 + $0x280] sm:$0xff] }
 0x574   :  { %5933 = vmatprep.mubr.f32.mxu0 %v4318_v46  ;;  %v4340_v22 = vsel %vm1545_vm2, %v4336_v26, %v6827_v30  ;;  %v6833_v27 = vunpack.i.h.bf16 %v6831_v38  ;;  %v10642_v41 = vunpack.i.l.bf16 %v10641_v58  ;;  %v6837_v49 = vunpack.i.l.bf16 %v6836_v12  ;;  %v7048_v30 = vld [vmem:[#allocation2 + $0x2a0] sm:$0xff]  ;;  %v7050_v62 = vld [vmem:[#allocation2 + $0x2a8] sm:$0xff] }
 0x575   :  { %v4337_v60 = vsel %vm1540_vm1, %v4333_v15, %v10639_v59  ;;  %v3626_v55 = vmul.f32 0.25, %v10643_v57  ;;  %v4335_v8 = vsel %vm1191_vm0, %v9860_v48, %v10644_v17  ;;  %v4356_v6 = vsel %vm1191_vm0, %v9708_v10, %v10645_v40  ;;  %v10650_v10 = vld [vmem:[#allocation35_spill] sm:$0xff]  ;;  %v10656_v33 = vld [vmem:[#allocation49_spill] sm:$0xff]  ;;  %v10667_v17 = vld [vmem:[#allocation42_spill] sm:$0xff] }
 0x576   :  { %5829 = vmatmul.mubr.msk.f32.gmra.mrb[68].mxu1 %vm1191_vm0, %v3611_v18  ;;  %v4341_v5 = vsel %vm1545_vm2, %v4337_v60, %v6828_v29  ;;  %v4338_v63 = vsel %vm1540_vm1, %v4334_v35, %v10642_v41  ;;  %v10646_v34 = vunpack.i.h.bf16 %v10641_v58  ;;  %v6838_v25 = vunpack.i.h.bf16 %v6836_v12  ;;  %v10658_v29 = vld [vmem:[#allocation36_spill] sm:$0xff]  ;;  %v7051_v15 = vld [vmem:[#allocation2 + $0x290] sm:$0xff]  ;;  %v6851_v35 = vpop.permute.xlu0 %6850  ;;  %v7053_v59 = vld [vmem:[#allocation2 + $0xc0] sm:$0xff] }
 0x577   :  { %5934 = vmatmul.mubr.f32.gmra.mrb[110].mxu0 %v4319_v3  ;;  %5831 = vmatprep.mubr.msk.f32.mxu1 %vm1191_vm0, %v3612_v21  ;;  %v4342_v47 = vsel %vm1545_vm2, %v4338_v63, %v6832_v54  ;;  %v10648_v11 = vunpack.i.l.bf16 %v10647_v9  ;;  %v3627_v1 = vmul.f32 0.25, %v10649_v20  ;;  %v6842_v23 = vunpack.i.l.bf16 %v6841_v13  ;;  %v7049_v3 = vld [vmem:[#allocation2 + $0x288] sm:$0xff]  ;;  %v7052_v12 = vld [vmem:[#allocation2 + $0x2b0] sm:$0xff] }
 0x578   :  { %5936 = vmatprep.mubr.f32.mxu0 %v4340_v22  ;;  %v4339_v36 = vsel %vm1540_vm1, %v4335_v8, %v10646_v34  ;;  %v3628_v0 = vmul.f32 0.25, %v10650_v10  ;;  %v4357_v44 = vsel %vm1191_vm0, %v10652_v61, %v10651_v7  ;;  %v4358_v2 = vsel %vm1191_vm0, %v10654_v31, %v10653_v56  ;;  %v10659_v21 = vld [vmem:[#allocation38_spill] sm:$0xff]  ;;  %v10660_v22 = vld [vmem:[#allocation21_spill] sm:$0xff]  ;;  %v10670_v20 = vld [vmem:[#allocation23_spill] sm:$0xff] }
 0x579   :  { %v4343_v16 = vsel %vm1545_vm2, %v4339_v36, %v6833_v27  ;;  %v4360_v48 = vsel %vm1540_vm1, %v4356_v6, %v10648_v11  ;;  %v3646_v53 = vadd.f32 %v7048_v30, %v7047_v45  ;;  %v10655_v46 = vunpack.i.h.bf16 %v10647_v9  ;;  %v10661_v60 = vld [vmem:[#allocation22_spill] sm:$0xff]  ;;  %v10669_v6 = vld [vmem:[#allocation41_spill] sm:$0xff]  ;;  %v7055_v9 = vld [vmem:[#allocation2 + $0x2b8] sm:$0xff] }
 0x57a   :  { %5832 = vmatmul.mubr.msk.f32.gmra.mrb[70].mxu1 %vm1191_vm0, %v3613_v28  ;;  %v4364_v19 = vsel %vm1545_vm2, %v4360_v48, %v6837_v49  ;;  %v6843_v38 = vunpack.i.h.bf16 %v6841_v13  ;;  %v10657_v42 = vunpack.i.l.bf16 %v10656_v33  ;;  %v3629_v4 = vmul.f32 0.25, %v10658_v29  ;;  %v10662_v28 = vld [vmem:[#allocation65_spill] sm:$0xff]  ;;  %v7056_v48 = vld [vmem:[#allocation2 + $0xc8] sm:$0xff]  ;;  %v10671_v10 = vld [vmem:[#allocation24_spill] sm:$0xff] }
 0x57b   :  { %5937 = vmatmul.mubr.f32.gmra.mrb[112].mxu0 %v4341_v5  ;;  %5834 = vmatprep.mubr.msk.f32.mxu1 %vm1191_vm0, %v3626_v55  ;;  %v4361_v51 = vsel %vm1540_vm1, %v4357_v44, %v10655_v46  ;;  %v3647_v50 = vadd.f32 %v7050_v62, %v7049_v3  ;;  %v6847_v26 = vunpack.i.l.bf16 %v6846_v37  ;;  %v3642_v54 = vmul.f32 0.25, %v10659_v21  ;;  %v10663_v5 = vld [vmem:[#allocation66_spill] sm:$0xff]  ;;  %v10668_v13 = vld [vmem:[#allocation69_spill] sm:$0xff]  ;;  %v10672_v7 = vld [vmem:[#allocation63_spill] sm:$0xff] }
 0x57c   :  { %5939 = vmatprep.mubr.f32.mxu0 %v4342_v47  ;;  %v4365_v52 = vsel %vm1545_vm2, %v4361_v51, %v6838_v25  ;;  %v4362_v18 = vsel %vm1540_vm1, %v4358_v2, %v10657_v42  ;;  %v4359_v14 = vsel %vm1191_vm0, %v9862_v24, %v10660_v22  ;;  %v3648_v32 = vadd.f32 %v7052_v12, %v7051_v15  ;;  %v10665_v47 = vld [vmem:[#allocation50_spill] sm:$0xff]  ;;  %v10676_v46 = vld [vmem:[#allocation52_spill] sm:$0xff]  ;;  %v10679_v3 = vld [vmem:[#allocation25_spill] sm:$0xff] }
 0x57d   :  { %v4366_v43 = vsel %vm1545_vm2, %v4362_v18, %v6842_v23  ;;  %v4380_v39 = vsel %vm1191_vm0, %v7053_v59, %v10661_v60  ;;  %v3650_v27 = vadd.f32 %v10662_v28, %v3646_v53  ;;  %v3651_v58 = vadd.f32 %v10663_v5, %v3647_v50  ;;  %v6856_v23 = vpop.permute.xlu1 %6855  ;;  %v10673_v44 = vld [vmem:[#allocation70_spill] sm:$0xff]  ;;  %v10680_v50 = vld [vmem:[#allocation64_spill] sm:$0xff]  ;;  %v7059_v21 = vld [vmem:[#allocation2 + $0xe0] sm:$0xff] }
 0x57e   :  { %5835 = vmatmul.mubr.msk.f32.gmra.mrb[72].mxu1 %vm1191_vm0, %v3627_v1  ;;  %v10664_v41 = vunpack.i.h.bf16 %v10656_v33  ;;  %v6848_v63 = vunpack.i.h.bf16 %v6846_v37  ;;  %v10666_v57 = vunpack.i.l.bf16 %v10665_v47  ;;  %v3643_v8 = vmul.f32 0.25, %v10667_v17  ;;  %v10675_v2 = vld [vmem:[#allocation46_spill] sm:$0xff] }
 0x57f   :  { %5940 = vmatmul.mubr.f32.gmra.mrb[114].mxu0 %v4343_v16  ;;  %5837 = vmatprep.mubr.msk.f32.mxu1 %vm1191_vm0, %v3628_v0  ;;  %v3654_v40 = vadd.f32 %v10668_v13, %v3650_v27  ;;  %v3644_v34 = vmul.f32 0.25, %v10669_v6  ;;  %v6852_v36 = vunpack.i.l.bf16 %v6851_v35  ;;  %v7054_v16 = vld [vmem:[#allocation2 + $0x298] sm:$0xff]  ;;  %v4381_v1 = vsel %vm1191_vm0, %v7056_v48, %v10670_v20  ;;  %v10692_v20 = vld [vmem:[#allocation29_spill] sm:$0xff] }
 0x580   :  { %5942 = vmatprep.mubr.f32.mxu0 %v4364_v19  ;;  %v4363_v24 = vsel %vm1540_vm1, %v4359_v14, %v10664_v41  ;;  %v4384_v55 = vsel %vm1540_vm1, %v4380_v39, %v10666_v57  ;;  %v3649_v11 = vadd.f32 %v7055_v9, %v7054_v16  ;;  %v7057_v19 = vld [vmem:[#allocation2 + $0xd0] sm:$0xff]  ;;  %v3652_v61 = vadd.f32 %v10672_v7, %v3648_v32  ;;  %v10683_v32 = vld [vmem:[#allocation68_spill] sm:$0xff]  ;;  %v10684_v39 = vld [vmem:[#allocation54_spill] sm:$0xff] }
 0x581   :  { %v4367_v49 = vsel %vm1545_vm2, %v4363_v24, %v6843_v38  ;;  %v4388_v25 = vsel %vm1545_vm2, %v4384_v55, %v6847_v26  ;;  %v4382_v0 = vsel %vm1191_vm0, %v7057_v19, %v10671_v10  ;;  %v3655_v37 = vadd.f32 %v10673_v44, %v3651_v58  ;;  %v7060_v24 = vld [vmem:[#allocation2 + $0xe8] sm:$0xff]  ;;  %v10687_v57 = vld [vmem:[#allocation28_spill] sm:$0xff]  ;;  %v10691_v16 = vld [vmem:[#allocation39_spill] sm:$0xff] }
 0x582   :  { %5838 = vmatmul.mubr.msk.f32.gmra.mrb[74].mxu1 %vm1191_vm0, %v3629_v4  ;;  %v10674_v56 = vunpack.i.h.bf16 %v10665_v47  ;;  %v3645_v45 = vmul.f32 0.25, %v10675_v2  ;;  %v6853_v30 = vunpack.i.h.bf16 %v6851_v35  ;;  %v10677_v51 = vunpack.i.l.bf16 %v10676_v46  ;;  %v7058_v4 = vld [vmem:[#allocation2 + $0xd8] sm:$0xff]  ;;  %v7061_v47 = vld [vmem:[#allocation2 + $0xf0] sm:$0xff]  ;;  %v4036_v2 = vld [vmem:[#allocation3 + $0x228] sm:$0xff] }
 0x583   :  { %5943 = vmatmul.mubr.f32.gmra.mrb[116].mxu0 %v4365_v52  ;;  %5840 = vmatprep.mubr.msk.f32.mxu1 %vm1191_vm0, %v3642_v54  ;;  %v10678_v52 = vld [vmem:[#allocation67_spill] sm:$0xff]  ;;  %v6857_v42 = vunpack.i.l.bf16 %v6856_v23  ;;  %v3658_v29 = vmul.f32 0.25, %v3654_v40  ;;  %v4383_v62 = vsel %vm1191_vm0, %v7058_v4, %v10679_v3  ;;  %v3653_v26 = vadd.f32 %v10680_v50, %v3649_v11  ;;  %v10681_v54 = vld [vmem:[#allocation26_spill] sm:$0xff]  ;;  %v10689_v6 = vld [vmem:[#allocation56_spill] sm:$0xff] }
 0x584   :  { %5945 = vmatprep.mubr.f32.mxu0 %v4366_v43  ;;  %v4385_v31 = vsel %vm1540_vm1, %v4381_v1, %v10674_v56  ;;  %v4386_v38 = vsel %vm1540_vm1, %v4382_v0, %v10677_v51  ;;  %v3656_v33 = vadd.f32 %v10678_v52, %v3652_v61  ;;  %v6861_v43 = vpop.permute.xlu0 %6860  ;;  %v4404_v22 = vsel %vm1191_vm0, %v7059_v21, %v10681_v54  ;;  %v7062_v48 = vld [vmem:[#allocation2 + $0xf8] sm:$0xff]  ;;  %v10695_v61 = vld [vmem:[#allocation43_spill] sm:$0xff]  ;;  %v4039_v51 = vld [vmem:[#allocation3 + $0x240] sm:$0xff] }
 0x585   :  { %v4389_v53 = vsel %vm1545_vm2, %v4385_v31, %v6848_v63  ;;  %v4390_v18 = vsel %vm1545_vm2, %v4386_v38, %v6852_v36  ;;  %v10682_v14 = vunpack.i.h.bf16 %v10676_v46  ;;  %v3659_v12 = vmul.f32 0.25, %v3655_v37  ;;  %v10686_v63 = vld [vmem:[#allocation27_spill] sm:$0xff]  ;;  %v10694_v10 = vld [vmem:[#allocation40_spill] sm:$0xff]  ;;  %v4035_v31 = vld [vmem:[#allocation3 + $0x220] sm:$0xff] }
 0x586   :  { %5841 = vmatmul.mubr.msk.f32.gmra.mrb[76].mxu1 %vm1191_vm0, %v3643_v8  ;;  %v3657_v35 = vadd.f32 %v10683_v32, %v3653_v26  ;;  %v6858_v59 = vunpack.i.h.bf16 %v6856_v23  ;;  %v10685_v28 = vunpack.i.l.bf16 %v10684_v39  ;;  %v6862_v5 = vunpack.i.l.bf16 %v6861_v43  ;;  %v10696_v37 = vld [vmem:[#allocation44_spill] sm:$0xff]  ;;  %v4040_v38 = vld [vmem:[#allocation3 + $0x248] sm:$0xff] }
 0x587   :  { %5946 = vmatmul.mubr.f32.gmra.mrb[118].mxu0 %v4367_v49  ;;  %5843 = vmatprep.mubr.msk.f32.mxu1 %vm1191_vm0, %v3644_v34  ;;  %v4387_v15 = vsel %vm1540_vm1, %v4383_v62, %v10682_v14  ;;  %v3660_v41 = vmul.f32 0.25, %v3656_v33  ;;  %v4405_v49 = vsel %vm1191_vm0, %v7060_v24, %v10686_v63  ;;  %v4406_v55 = vsel %vm1191_vm0, %v7061_v47, %v10687_v57  ;;  %v4041_v33 = vld [vmem:[#allocation3 + $0x250] sm:$0xff]  ;;  %v4694_v4 = vld [vmem:[#allocation3 + $0x108] sm:$0xff] }
 0x588   :  { %5948 = vmatprep.mubr.f32.mxu0 %v4388_v25  ;;  %v4391_v60 = vsel %vm1545_vm2, %v4387_v15, %v6853_v30  ;;  %v4408_v27 = vsel %vm1540_vm1, %v4404_v22, %v10685_v28  ;;  %v10688_v17 = vunpack.i.h.bf16 %v10684_v39  ;;  %v6863_v13 = vunpack.i.h.bf16 %v6861_v43  ;;  %v4037_v30 = vld [vmem:[#allocation3 + $0x230] sm:$0xff]  ;;  %v10697_v43 = vld [vmem:[#allocation9_spill] sm:$0xff] }
 0x589   :  { %v4412_v58 = vsel %vm1545_vm2, %v4408_v27, %v6857_v42  ;;  %v10690_v34 = vunpack.i.l.bf16 %v10689_v6  ;;  %v3661_v25 = vmul.f32 0.25, %v3657_v35  ;;  %v3674_v9 = vmul.f32 0.25, %v10691_v16  ;;  %v4042_v42 = vld [vmem:[#allocation3 + $0x258] sm:$0xff]  ;;  %v7063_v15 = vld [vmem:[%s10375_s2] sm:$0xff] }
 0x58a   :  { %5844 = vmatmul.mubr.msk.f32.gmra.mrb[78].mxu1 %vm1191_vm0, %v3645_v45  ;;  %v4409_v8 = vsel %vm1540_vm1, %v4405_v49, %v10688_v17  ;;  %v4407_v1 = vsel %vm1191_vm0, %v7062_v48, %v10692_v20  ;;  %v10693_v23 = vunpack.i.h.bf16 %v10689_v6  ;;  %v3675_v0 = vmul.f32 0.25, %v10694_v10 }
 0x58b   :  { %5949 = vmatmul.mubr.f32.gmra.mrb[120].mxu0 %v4389_v53  ;;  %5846 = vmatprep.mubr.msk.f32.mxu1 %vm1191_vm0, %v3658_v29  ;;  %v4413_v40 = vsel %vm1545_vm2, %v4409_v8, %v6858_v59  ;;  %v4410_v36 = vsel %vm1540_vm1, %v4406_v55, %v10690_v34  ;;  %v3676_v44 = vmul.f32 0.25, %v10695_v61  ;;  %v3677_v56 = vmul.f32 0.25, %v10696_v37  ;;  %v4038_v53 = vld [vmem:[#allocation3 + $0x238] sm:$0xff]  ;;  %v4693_v29 = vld [vmem:[#allocation3 + $0x100] sm:$0xff] }
 0x58c   :  { %5951 = vmatprep.mubr.f32.mxu0 %v4390_v18  ;;  %v4414_v11 = vsel %vm1545_vm2, %v4410_v36, %v6862_v5  ;;  %v4411_v19 = vsel %vm1540_vm1, %v4407_v1, %v10693_v23  ;;  %v6160_v45 = vpack.c.bf16 %v4036_v2, %v4035_v31  ;;  %v6164_v46 = vpack.c.bf16 %v4038_v53, %v4037_v30 }
 0x58d   :  { %v4415_v7 = vsel %vm1545_vm2, %v4411_v19, %v6863_v13  ;;  %v6168_v52 = vpack.c.bf16 %v4040_v38, %v4039_v51  ;;  %v6172_v18 = vpack.c.bf16 %v4042_v42, %v4041_v33  ;;  %v6208_v3 = vpack.c.bf16 %v4694_v4, %v4693_v29 }
 0x58e   :  { %5847 = vmatmul.mubr.msk.f32.gmra.mrb[80].mxu1 %vm1191_vm0, %v3659_v12  ;;  %6161 = vmatprep.subr.bf16.mxu1 %v6160_v45  ;;  %v4418_v21 = vsub.s32 2, %v10697_v43  ;;  %v3680_v47 = vsub.s32 4, %v10697_v43 }
 0x58f   :  { %5952 = vmatmul.mubr.f32.gmra.mrb[122].mxu0 %v4391_v60  ;;  %5849 = vmatprep.mubr.msk.f32.mxu1 %vm1191_vm0, %v3660_v41 }
 0x590   :  { %5954 = vmatprep.mubr.f32.mxu0 %v4412_v58  ;;  %6163 = vmatpush3.bf16.msra.mxu1 %v6160_v45  ;;  %v10105_v12 = vrot.slane %v7063_v15, %v4418_v21  ;;  %v10124_v8 = vrot.slane %v7063_v15, %v3680_v47 }
 0x591   :  { %6165 = vmatprep.subr.bf16.mxu1 %v6164_v46 }
 0x592   :  { %5850 = vmatmul.mubr.msk.f32.gmra.mrb[82].mxu1 %vm1191_vm0, %v3661_v25 }
 0x593   :  { %5955 = vmatmul.mubr.f32.gmra.mrb[124].mxu0 %v4413_v40  ;;  %5852 = vmatprep.mubr.msk.f32.mxu1 %vm1191_vm0, %v3674_v9 }
 0x594   :  { %5957 = vmatprep.mubr.f32.mxu0 %v4414_v11  ;;  %6167 = vmatpush3.bf16.msra.mxu1 %v6164_v46 }
 0x595   :  { %6169 = vmatprep.subr.bf16.mxu1 %v6168_v52 }
 0x596   :  { %5853 = vmatmul.mubr.msk.f32.gmra.mrb[84].mxu1 %vm1191_vm0, %v3675_v0 }
 0x597   :  { %5958 = vmatmul.mubr.f32.gmra.mrb[126].mxu0 %v4415_v7  ;;  %5855 = vmatprep.mubr.msk.f32.mxu1 %vm1191_vm0, %v3676_v44 }
 0x598   :  { %6171 = vmatpush3.bf16.msra.mxu1 %v6168_v52 }
 0x599   :  { %6173 = vmatprep.subr.bf16.mxu1 %v6172_v18 }
 0x59a   :  { %5856 = vmatmul.mubr.msk.f32.gmra.mrb[86].mxu1 %vm1191_vm0, %v3677_v56 }
 0x59c   :  { %6175 = vmatpush3.bf16.msra.mxu1 %v6172_v18 }
 0x59d   :  { %6209 = vmatprep.subr.bf16.mxu1 %v6208_v3 }
 0x621   :  { %v5562_v62 = vpop.f32.mrb[48].mxu1 }
 0x622   :  { %v5563_v50 = vpop.f32.mrb[49].mxu1 }
 0x623   :  { %v10095_v26 = vadd.f32 %v5563_v50, %v5562_v62 }
 0x625   :  { %v5565_v54 = vpop.f32.mrb[50].mxu1 }
 0x626   :  { %v5566_v22 = vpop.f32.mrb[51].mxu1 }
 0x627   :  { %v10098_v14 = vadd.f32 %v5566_v22, %v5565_v54 }
 0x629   :  { %v5568_v32 = vpop.f32.mrb[52].mxu1 }
 0x62a   :  { %v5569_v35 = vpop.f32.mrb[53].mxu1  ;;  %v5914_v59 = vpop.f32.mrb[96].mxu0 }
 0x62b   :  { %v10107_v60 = vadd.f32 %v5569_v35, %v5568_v32  ;;  %v10110_v39 = vadd.f32 %v5914_v59, %v10105_v12  ;;  %v4486_v28 = vpop.f32.mrb[97].mxu0 }
 0x62c   :  { %v10113_v27 = vadd.f32 %v4486_v28, %v10105_v12 }
 0x62d   :  { %v5571_v5 = vpop.f32.mrb[54].mxu1 }
 0x62e   :  { %v5572_v58 = vpop.f32.mrb[55].mxu1  ;;  %v5917_v41 = vpop.f32.mrb[98].mxu0 }
 0x62f   :  { %v10115_v24 = vadd.f32 %v5572_v58, %v5571_v5  ;;  %v10118_v63 = vadd.f32 %v5917_v41, %v10105_v12  ;;  %v4496_v49 = vpop.f32.mrb[99].mxu0 }
 0x630   :  { %v10122_v57 = vadd.f32 %v4496_v49, %v10105_v12 }
 0x631   :  { %v5812_v55 = vpop.f32.mrb[56].mxu1 }
 0x632   :  { %v3844_v17 = vpop.f32.mrb[57].mxu1  ;;  %v3850_v36 = vadd.f32 %v5812_v55, %v10124_v8 }
 0x633   :  { %v3845_v9 = vadd.f32 %v3844_v17, %v10124_v8 }
 0x634   :  { %v5920_v13 = vpop.f32.mrb[100].mxu0  ;;  %v4004_v19 = vmax.f32 %v3850_v36, 0.0 }
 0x635   :  { %v10126_v40 = vpop.f32.mrb[101].mxu0  ;;  %v5815_v6 = vpop.f32.mrb[58].mxu1  ;;  %v4512_v25 = vadd.f32 %v5920_v13, %v10105_v12  ;;  %v4003_v56 = vmax.f32 %v3845_v9, 0.0 }
 0x636   :  { %v3854_v34 = vpop.f32.mrb[59].mxu1  ;;  %v3860_v7 = vadd.f32 %v5815_v6, %v10124_v8 }
 0x637   :  { %v4650_v0 = vmax.f32 %v4512_v25, 0.0  ;;  %v3855_v31 = vadd.f32 %v3854_v34, %v10124_v8 }
 0x638   :  { %v10130_v16 = vpop.f32.mrb[102].mxu0  ;;  %v4006_v4 = vmax.f32 %v3860_v7, 0.0 }
 0x639   :  { %v4516_v11 = vpop.f32.mrb[103].mxu0  ;;  %v5818_v48 = vpop.f32.mrb[60].mxu1  ;;  %v4005_v54 = vmax.f32 %v3855_v31, 0.0 }
 0x63a   :  { %v4517_v20 = vadd.f32 %v4516_v11, %v10105_v12  ;;  %v3870_v1 = vadd.f32 %v5818_v48, %v10124_v8  ;;  %v3864_v23 = vpop.f32.mrb[61].mxu1 }
 0x63b   :  { %v3865_v10 = vadd.f32 %v3864_v23, %v10124_v8 }
 0x63c   :  { %v4651_v61 = vmax.f32 %v4517_v20, 0.0  ;;  %v4008_v44 = vmax.f32 %v3870_v1, 0.0 }
 0x63d   :  { %v4007_v2 = vmax.f32 %v3865_v10, 0.0  ;;  %v5821_v53 = vpop.f32.mrb[62].mxu1 }
 0x63e   :  { %v5926_v37 = vpop.f32.mrb[104].mxu0  ;;  %v10139_v46 = vpack.i.bf16 %v4651_v61, %v4650_v0  ;;  %v4044_v51 = vadd.f32 %v4008_v44, %v4004_v19  ;;  %v3880_v52 = vadd.f32 %v5821_v53, %v10124_v8  ;;  %v3874_v33 = vpop.f32.mrb[63].mxu1 }
 0x63f   :  { %v4532_v45 = vadd.f32 %v5926_v37, %v10105_v12  ;;  %v4526_v30 = vpop.f32.mrb[105].mxu0  ;;  %v4043_v42 = vadd.f32 %v4007_v2, %v4003_v56  ;;  %v3875_v29 = vadd.f32 %v3874_v33, %v10124_v8  ;;  %v4507_v37 = vadd.f32 %v10126_v40, %v10105_v12 }
 0x640   :  { %v4527_v38 = vadd.f32 %v4526_v30, %v10105_v12  ;;  %v4010_v62 = vmax.f32 %v3880_v52, 0.0 }
 0x641   :  { %v4654_v18 = vmax.f32 %v4532_v45, 0.0  ;;  %v4009_v22 = vmax.f32 %v3875_v29, 0.0  ;;  %v5824_v35 = vpop.f32.mrb[64].mxu1  ;;  %v4649_v40 = vmax.f32 %v4507_v37, 0.0 }
 0x642   :  { %v4653_v3 = vmax.f32 %v4527_v38, 0.0  ;;  %v5929_v50 = vpop.f32.mrb[106].mxu0  ;;  %v4046_v28 = vadd.f32 %v4010_v62, %v4006_v4  ;;  %v3890_v58 = vadd.f32 %v5824_v35, %v10124_v8  ;;  %v3884_v41 = vpop.f32.mrb[65].mxu1 }
 0x643   :  { %v4542_v15 = vadd.f32 %v5929_v50, %v10105_v12  ;;  %v4536_v32 = vpop.f32.mrb[107].mxu0  ;;  %v4045_v49 = vadd.f32 %v4009_v22, %v4005_v54  ;;  %v3885_v55 = vadd.f32 %v3884_v41, %v10124_v8 }
 0x644   :  { %v6864_v59 = vpack.i.bf16 %v4654_v18, %v4653_v3  ;;  %v4537_v5 = vadd.f32 %v4536_v32, %v10105_v12  ;;  %v4012_v13 = vmax.f32 %v3890_v58, 0.0 }
 0x645   :  { %v4656_v47 = vmax.f32 %v4542_v15, 0.0  ;;  %v4011_v34 = vmax.f32 %v3885_v55, 0.0  ;;  %v5827_v9 = vpop.f32.mrb[66].mxu1 }
 0x646   :  { %v4655_v17 = vmax.f32 %v4537_v5, 0.0  ;;  %v5932_v6 = vpop.f32.mrb[108].mxu0  ;;  %6865 = vrot.lane.b32.xlu1 %v6864_v59, %s7120_s18  ;;  %v4048_v48 = vadd.f32 %v4044_v51, %v4012_v13  ;;  %v3900_v1 = vadd.f32 %v5827_v9, %v10124_v8  ;;  %v3894_v23 = vpop.f32.mrb[67].mxu1 }
 0x647   :  { %v4552_v36 = vadd.f32 %v5932_v6, %v10105_v12  ;;  %v4546_v25 = vpop.f32.mrb[109].mxu0  ;;  %v4047_v19 = vadd.f32 %v4043_v42, %v4011_v34  ;;  %v3895_v0 = vadd.f32 %v3894_v23, %v10124_v8 }
 0x648   :  { %v10150_v11 = vpack.i.bf16 %v4656_v47, %v4655_v17  ;;  %v4547_v20 = vadd.f32 %v4546_v25, %v10105_v12  ;;  %v4014_v61 = vmax.f32 %v3900_v1, 0.0 }
 0x649   :  { %v4658_v10 = vmax.f32 %v4552_v36, 0.0  ;;  %v4013_v56 = vmax.f32 %v3895_v0, 0.0  ;;  %v5830_v45 = vpop.f32.mrb[68].mxu1 }
 0x64a   :  { %v4657_v7 = vmax.f32 %v4547_v20, 0.0  ;;  %v5935_v44 = vpop.f32.mrb[110].mxu0  ;;  %v4050_v53 = vadd.f32 %v4046_v28, %v4014_v61  ;;  %v3910_v38 = vadd.f32 %v5830_v45, %v10124_v8  ;;  %v3904_v52 = vpop.f32.mrb[69].mxu1 }
 0x64b   :  { %v4562_v31 = vadd.f32 %v5935_v44, %v10105_v12  ;;  %v4556_v2 = vpop.f32.mrb[111].mxu0  ;;  %v4049_v33 = vadd.f32 %v4045_v49, %v4013_v56  ;;  %v3905_v18 = vadd.f32 %v3904_v52, %v10124_v8 }
 0x64c   :  { %v6869_v30 = vpack.i.bf16 %v4658_v10, %v4657_v7  ;;  %v4557_v51 = vadd.f32 %v4556_v2, %v10105_v12  ;;  %v4016_v4 = vmax.f32 %v3910_v38, 0.0 }
 0x64d   :  { %v4660_v42 = vmax.f32 %v4562_v31, 0.0  ;;  %v4015_v62 = vmax.f32 %v3905_v18, 0.0  ;;  %v5833_v22 = vpop.f32.mrb[70].mxu1 }
 0x64e   :  { %v4659_v29 = vmax.f32 %v4557_v51, 0.0  ;;  %v5938_v3 = vpop.f32.mrb[112].mxu0  ;;  %6870 = vrot.lane.b32.xlu0 %v6869_v30, %s7121_s19  ;;  %v4052_v32 = vadd.f32 %v4048_v48, %v4016_v4  ;;  %v3920_v59 = vadd.f32 %v5833_v22, %v10124_v8  ;;  %v3914_v28 = vpop.f32.mrb[71].mxu1 }
 0x64f   :  { %v4572_v50 = vadd.f32 %v5938_v3, %v10105_v12  ;;  %v4566_v54 = vpop.f32.mrb[113].mxu0  ;;  %v4051_v5 = vadd.f32 %v4047_v19, %v4015_v62  ;;  %v3915_v41 = vadd.f32 %v3914_v28, %v10124_v8 }
 0x650   :  { %v10163_v15 = vpack.i.bf16 %v4660_v42, %v4659_v29  ;;  %v4567_v35 = vadd.f32 %v4566_v54, %v10105_v12  ;;  %v4018_v47 = vmax.f32 %v3920_v59, 0.0 }
 0x651   :  { %v4662_v58 = vmax.f32 %v4572_v50, 0.0  ;;  %v4017_v17 = vmax.f32 %v3915_v41, 0.0  ;;  %v5836_v34 = vpop.f32.mrb[72].mxu1 }
 0x652   :  { %v4661_v49 = vmax.f32 %v4567_v35, 0.0  ;;  %v5941_v55 = vpop.f32.mrb[114].mxu0  ;;  %4729 = vrot.lane.b32.xlu0 %v4649_v40, %s7122_s20  ;;  %v4054_v25 = vadd.f32 %v4050_v53, %v4018_v47  ;;  %v3930_v48 = vadd.f32 %v5836_v34, %v10124_v8  ;;  %v3924_v20 = vpop.f32.mrb[73].mxu1 }
 0x653   :  { %v4582_v13 = vadd.f32 %v5941_v55, %v10105_v12  ;;  %v4576_v6 = vpop.f32.mrb[115].mxu0  ;;  %v4053_v1 = vadd.f32 %v4049_v33, %v4017_v17  ;;  %v3925_v19 = vadd.f32 %v3924_v20, %v10124_v8 }
 0x654   :  { %v6874_v36 = vpack.i.bf16 %v4662_v58, %v4661_v49  ;;  %v4577_v9 = vadd.f32 %v4576_v6, %v10105_v12  ;;  %v4020_v0 = vmax.f32 %v3930_v48, 0.0 }
 0x655   :  { %v4664_v23 = vmax.f32 %v4582_v13, 0.0  ;;  %v4019_v61 = vmax.f32 %v3925_v19, 0.0  ;;  %v5839_v37 = vpop.f32.mrb[74].mxu1 }
 0x656   :  { %v4663_v10 = vmax.f32 %v4577_v9, 0.0  ;;  %v5944_v7 = vpop.f32.mrb[116].mxu0  ;;  %6875 = vrot.lane.b32.xlu1 %v6874_v36, %s7118_s14  ;;  %6880 = vrot.lane.b32.xlu0 %v10139_v46, %s7122_s20  ;;  %v4056_v31 = vadd.f32 %v4052_v32, %v4020_v0  ;;  %v3940_v45 = vadd.f32 %v5839_v37, %v10124_v8  ;;  %v3934_v30 = vpop.f32.mrb[75].mxu1 }
 0x657   :  { %v4586_v44 = vpop.f32.mrb[117].mxu0  ;;  %v4055_v53 = vadd.f32 %v4051_v5, %v4019_v61  ;;  %v3935_v51 = vadd.f32 %v3934_v30, %v10124_v8  ;;  %v4592_v38 = vadd.f32 %v5944_v7, %v10105_v12  ;;  %v10197_v7 = vld [vmem:[%s10375_s2 + $0x8] sm:$0xff] }
 0x658   :  { %v6899_v56 = vpack.i.bf16 %v4664_v23, %v4663_v10  ;;  %v4587_v2 = vadd.f32 %v4586_v44, %v10105_v12  ;;  %v4022_v33 = vmax.f32 %v3940_v45, 0.0 }
 0x659   :  { %v4021_v46 = vmax.f32 %v3935_v51, 0.0  ;;  %v5842_v4 = vpop.f32.mrb[76].mxu1  ;;  %v4666_v32 = vmax.f32 %v4592_v38, 0.0  ;;  %v10698_v38 = vsub.s32 0, %v10697_v43 }
 0x65a   :  { %v4665_v52 = vmax.f32 %v4587_v2, 0.0  ;;  %v5947_v42 = vpop.f32.mrb[118].mxu0  ;;  %6890 = vrot.lane.b32.xlu0 %v10150_v11, %s7120_s18  ;;  %v4058_v3 = vadd.f32 %v4054_v25, %v4022_v33  ;;  %v3950_v62 = vadd.f32 %v5842_v4, %v10124_v8  ;;  %v3944_v50 = vpop.f32.mrb[77].mxu1 }
 0x65b   :  { %v4602_v18 = vadd.f32 %v5947_v42, %v10105_v12  ;;  %v4596_v29 = vpop.f32.mrb[119].mxu0  ;;  %v4057_v54 = vadd.f32 %v4053_v1, %v4021_v46  ;;  %v3945_v22 = vadd.f32 %v3944_v50, %v10124_v8  ;;  %v4522_v1 = vadd.f32 %v10130_v16, %v10105_v12 }
 0x65c   :  { %v4597_v40 = vadd.f32 %v4596_v29, %v10105_v12  ;;  %4793 = vrot.lane.b32.xlu1 %v4665_v52, %s7123_s21  ;;  %v4024_v59 = vmax.f32 %v3950_v62, 0.0  ;;  %v3452_v52 = vrot.slane %v10197_v7, %v10698_v38  ;;  %v10700_v38 = vld [vmem:[#allocation59_spill] sm:$0xff] }
 0x65d   :  { %v4668_v28 = vmax.f32 %v4602_v18, 0.0  ;;  %v4023_v5 = vmax.f32 %v3945_v22, 0.0  ;;  %v5845_v49 = vpop.f32.mrb[78].mxu1  ;;  %v4652_v33 = vmax.f32 %v4522_v1, 0.0 }
 0x65e   :  { %v4667_v35 = vmax.f32 %v4597_v40, 0.0  ;;  %v5950_v11 = vpop.f32.mrb[120].mxu0  ;;  %6900 = vrot.lane.b32.xlu0 %v6899_v56, %s7118_s14  ;;  %v4060_v55 = vadd.f32 %v4056_v31, %v4024_v59  ;;  %v3960_v13 = vadd.f32 %v5845_v49, %v10124_v8  ;;  %v3954_v6 = vpop.f32.mrb[79].mxu1  ;;  %v3530_v1 = vadd.f32 %v10107_v60, %v3452_v52 }
 0x65f   :  { %v4612_v58 = vadd.f32 %v5950_v11, %v10105_v12  ;;  %v4606_v41 = vpop.f32.mrb[121].mxu0  ;;  %v4059_v34 = vadd.f32 %v4055_v53, %v4023_v5  ;;  %v3955_v25 = vadd.f32 %v3954_v6, %v10124_v8  ;;  %v3520_v11 = vadd.f32 %v10095_v26, %v3452_v52 }
 0x660   :  { %v6884_v47 = vpack.i.bf16 %v4667_v35, %v4666_v32  ;;  %v4607_v17 = vadd.f32 %v4606_v41, %v10105_v12  ;;  %v4026_v48 = vmax.f32 %v3960_v13, 0.0 }
 0x661   :  { %v4670_v36 = vmax.f32 %v4612_v58, 0.0  ;;  %v4025_v23 = vmax.f32 %v3955_v25, 0.0  ;;  %v5848_v0 = vpop.f32.mrb[80].mxu1 }
 0x662   :  { %v4669_v9 = vmax.f32 %v4607_v17, 0.0  ;;  %v5953_v20 = vpop.f32.mrb[122].mxu0  ;;  %6885 = vrot.lane.b32.xlu1 %v6884_v47, %s7123_s21  ;;  %4799 = vrot.lane.b32.xlu0 %v4668_v28, %s7123_s21  ;;  %v4062_v44 = vadd.f32 %v4058_v3, %v4026_v48  ;;  %v3970_v56 = vadd.f32 %v5848_v0, %v10124_v8  ;;  %v3964_v31 = vpop.f32.mrb[81].mxu1  ;;  %v3525_v28 = vadd.f32 %v10098_v14, %v3452_v52 }
 0x663   :  { %v4622_v19 = vadd.f32 %v5953_v20, %v10105_v12  ;;  %v4616_v10 = vpop.f32.mrb[123].mxu0  ;;  %v4061_v2 = vadd.f32 %v4057_v54, %v4025_v23  ;;  %v3965_v16 = vadd.f32 %v3964_v31, %v10124_v8  ;;  %v3535_v23 = vadd.f32 %v10115_v24, %v3452_v52  ;;  %v4695_v24 = vld [vmem:[#allocation3 + $0x110] sm:$0xff] }
 0x664   :  { %v6904_v61 = vpack.i.bf16 %v4670_v36, %v4669_v9  ;;  %v4617_v37 = vadd.f32 %v4616_v10, %v10105_v12  ;;  %v4028_v53 = vmax.f32 %v3970_v56, 0.0  ;;  %v3538_v9 = vmax.f32 %v3520_v11, 0.0 }
 0x665   :  { %v4672_v45 = vmax.f32 %v4622_v19, 0.0  ;;  %v4027_v42 = vmax.f32 %v3965_v16, 0.0  ;;  %v5851_v29 = vpop.f32.mrb[82].mxu1  ;;  %v3539_v48 = vmax.f32 %v3525_v28, 0.0  ;;  %v4681_v28 = vld [vmem:[#allocation3 + $0xa0] sm:$0xff] }
 0x666   :  { %v4671_v30 = vmax.f32 %v4617_v37, 0.0  ;;  %v5956_v51 = vpop.f32.mrb[124].mxu0  ;;  %6895 = vrot.lane.b32.xlu1 %v10163_v15, %s7121_s19  ;;  %v4064_v3 = vadd.f32 %v4060_v55, %v4028_v53  ;;  %v3980_v62 = vadd.f32 %v5851_v29, %v10124_v8  ;;  %v3974_v50 = vpop.f32.mrb[83].mxu1  ;;  %v4678_v37 = vld [vmem:[#allocation3 + $0x88] sm:$0xff]  ;;  %v10699_v53 = vld [vmem:[#allocation60_spill] sm:$0xff] }
 0x667   :  { %v4632_v46 = vadd.f32 %v5956_v51, %v10105_v12  ;;  %v4626_v18 = vpop.f32.mrb[125].mxu0  ;;  %v4063_v54 = vadd.f32 %v4059_v34, %v4027_v42  ;;  %v3975_v15 = vadd.f32 %v3974_v50, %v10124_v8  ;;  %v3542_v51 = vadd.f32 %v3538_v9, %v10699_v53  ;;  %v4685_v9 = vld [vmem:[#allocation3 + $0xc0] sm:$0xff]  ;;  %v4708_v53 = vld [vmem:[#allocation3 + $0x178] sm:$0xff] }
 0x668   :  { %v6914_v4 = vpack.i.bf16 %v4672_v45, %v4671_v30  ;;  %v4627_v40 = vadd.f32 %v4626_v18, %v10105_v12  ;;  %v4030_v35 = vmax.f32 %v3980_v62, 0.0  ;;  %v3543_v52 = vadd.f32 %v3539_v48, %v10700_v38  ;;  %v4698_v62 = vld [vmem:[#allocation3 + $0x128] sm:$0xff] }
 0x669   :  { %v4674_v22 = vmax.f32 %v4632_v46, 0.0  ;;  %v4029_v5 = vmax.f32 %v3975_v15, 0.0  ;;  %v5854_v49 = vpop.f32.mrb[84].mxu1  ;;  %v3541_v42 = vmax.f32 %v3535_v23, 0.0  ;;  %v10702_v15 = vld [vmem:[#allocation62_spill] sm:$0xff] }
 0x66a   :  { %v4673_v32 = vmax.f32 %v4627_v40, 0.0  ;;  %v5959_v59 = vpop.f32.mrb[126].mxu0  ;;  %4735 = vrot.lane.b32.xlu1 %v4652_v33, %s7122_s20  ;;  %v4066_v55 = vadd.f32 %v4062_v44, %v4030_v35  ;;  %v10217_v13 = vadd.f32 %v5854_v49, %v10124_v8  ;;  %v3984_v6 = vpop.f32.mrb[85].mxu1  ;;  %v4677_v44 = vld [vmem:[#allocation3 + $0x80] sm:$0xff]  ;;  %v3540_v33 = vmax.f32 %v3530_v1, 0.0  ;;  %v4686_v48 = vld [vmem:[#allocation3 + $0xc8] sm:$0xff] }
 0x66b   :  { %v4642_v58 = vadd.f32 %v5959_v59, %v10105_v12  ;;  %v4636_v41 = vpop.f32.mrb[127].mxu0  ;;  %v4065_v34 = vadd.f32 %v4061_v2, %v4029_v5  ;;  %v10220_v25 = vadd.f32 %v3984_v6, %v10124_v8  ;;  %v4696_v2 = vld [vmem:[#allocation3 + $0x118] sm:$0xff]  ;;  %v6210_v30 = vpack.c.bf16 %v4678_v37, %v4677_v44  ;;  %v4697_v40 = vld [vmem:[#allocation3 + $0x120] sm:$0xff]  ;;  %v4682_v5 = vld [vmem:[#allocation3 + $0xa8] sm:$0xff] }
 0x66c   :  { %v6909_v47 = vpack.i.bf16 %v4674_v22, %v4673_v32  ;;  %v4637_v17 = vadd.f32 %v4636_v41, %v10105_v12  ;;  %v4032_v14 = vmax.f32 %v10217_v13, 0.0  ;;  %v6212_v29 = vpack.c.bf16 %v4696_v2, %v4695_v24  ;;  %v4700_v41 = vld [vmem:[#allocation3 + $0x138] sm:$0xff]  ;;  %v4701_v6 = vld [vmem:[#allocation3 + $0x140] sm:$0xff] }
 0x66d   :  { %v4676_v36 = vmax.f32 %v4642_v58, 0.0  ;;  %v4031_v12 = vmax.f32 %v10220_v25, 0.0  ;;  %v5857_v20 = vpop.f32.mrb[86].mxu1  ;;  %v3545_v32 = vadd.f32 %v3541_v42, %v10702_v15  ;;  %v6216_v11 = vpack.c.bf16 %v4698_v62, %v4697_v40  ;;  %v4699_v58 = vld [vmem:[#allocation3 + $0x130] sm:$0xff]  ;;  %v4704_v1 = vld [vmem:[#allocation3 + $0x158] sm:$0xff]  ;;  %v4705_v37 = vld [vmem:[#allocation3 + $0x160] sm:$0xff] }
 0x66e   :  { %v4675_v26 = vmax.f32 %v4637_v17, 0.0  ;;  %6905 = vrot.lane.b32.xlu1 %v6904_v61, %s7119_s15  ;;  %6910 = vrot.lane.b32.xlu0 %v6909_v47, %s7124_s25  ;;  %v10228_v10 = vadd.f32 %v5857_v20, %v10124_v8  ;;  %v3994_v0 = vpop.f32.mrb[87].mxu1  ;;  %v4068_v61 = vadd.f32 %v4064_v3, %v4032_v14  ;;  %v4680_v3 = vld [vmem:[#allocation3 + $0x98] sm:$0xff]  ;;  %v6218_v49 = vpack.c.bf16 %v4682_v5, %v4681_v28  ;;  %v4703_v20 = vld [vmem:[#allocation3 + $0x150] sm:$0xff]  ;;  %v4689_v2 = vld [vmem:[#allocation3 + $0xe0] sm:$0xff] }
 0x66f   :  { %v4067_v56 = vadd.f32 %v4063_v54, %v4031_v12  ;;  %v10235_v31 = vadd.f32 %v3994_v0, %v10124_v8  ;;  %v10701_v54 = vld [vmem:[#allocation61_spill] sm:$0xff]  ;;  %v6220_v47 = vpack.c.bf16 %v4700_v41, %v4699_v58  ;;  %v4684_v17 = vld [vmem:[#allocation3 + $0xb8] sm:$0xff]  ;;  %v6226_v23 = vpack.c.bf16 %v4686_v48, %v4685_v9  ;;  %v4687_v0 = vld [vmem:[#allocation3 + $0xd0] sm:$0xff] }
 0x670   :  { %v6919_v19 = vpack.i.bf16 %v4676_v36, %v4675_v26  ;;  %v4034_v60 = vmax.f32 %v10228_v10, 0.0  ;;  %v4072_v46 = vmul.f32 0.125, %v4068_v61  ;;  %v3544_v22 = vadd.f32 %v3540_v33, %v10701_v54  ;;  %v4688_v44 = vld [vmem:[#allocation3 + $0xd8] sm:$0xff]  ;;  %v4706_v61 = vld [vmem:[#allocation3 + $0x168] sm:$0xff]  ;;  %v4709_v42 = vld [vmem:[#allocation3 + $0x180] sm:$0xff] }
 0x671   :  { %v4071_v45 = vmul.f32 0.125, %v4067_v56  ;;  %v4033_v16 = vmax.f32 %v10235_v31, 0.0  ;;  %v6230_v56 = vpack.c.bf16 %v4688_v44, %v4687_v0  ;;  %v6232_v24 = vpack.c.bf16 %v4706_v61, %v4705_v37  ;;  %v4692_v33 = vld [vmem:[#allocation3 + $0xf8] sm:$0xff]  ;;  %v4715_v48 = vld [vmem:[#allocation3 + $0x1b0] sm:$0xff] }
 0x672   :  { %6915 = vrot.lane.b32.xlu1 %v6914_v4, %s7119_s15  ;;  %6920 = vrot.lane.b32.xlu0 %v6919_v19, %s7124_s25  ;;  %v4070_v8 = vadd.f32 %v4066_v55, %v4034_v60  ;;  %v4679_v4 = vld [vmem:[#allocation3 + $0x90] sm:$0xff]  ;;  %v6228_v19 = vpack.c.bf16 %v4704_v1, %v4703_v20  ;;  %v4716_v20 = vld [vmem:[#allocation3 + $0x1b8] sm:$0xff]  ;;  %v10704_v10 = vsub.s32 1, %v10697_v43 }
 0x673   :  { %v4069_v18 = vadd.f32 %v4065_v34, %v4033_v16  ;;  %5874 = vmatprep.mubr.msk.f32.mxu1 %vm1540_vm1, %v4071_v45  ;;  %v6214_v35 = vpack.c.bf16 %v4680_v3, %v4679_v4  ;;  %v4683_v55 = vld [vmem:[#allocation3 + $0xb0] sm:$0xff]  ;;  %v4702_v34 = vld [vmem:[#allocation3 + $0x148] sm:$0xff] }
 0x674   :  { %5875 = vmatmul.mubr.msk.f32.vlgmr.msra.gmra.mrb[88].mxu1 %vm1540_vm1, %v4072_v46  ;;  %v4074_v59 = vmul.f32 0.125, %v4070_v8  ;;  %v6222_v36 = vpack.c.bf16 %v4684_v17, %v4683_v55  ;;  %v6224_v26 = vpack.c.bf16 %v4702_v34, %v4701_v6  ;;  %v4690_v45 = vld [vmem:[#allocation3 + $0xe8] sm:$0xff]  ;;  %v5069_v0 = vld [vmem:[#allocation3 + $0x5b0] sm:$0xff] }
 0x675   :  { %v4073_v50 = vmul.f32 0.125, %v4069_v18  ;;  %6211 = vmatpush3.bf16.msra.mxu1 %v6210_v30  ;;  %v4707_v30 = vld [vmem:[#allocation3 + $0x170] sm:$0xff]  ;;  %v4710_v46 = vld [vmem:[#allocation3 + $0x188] sm:$0xff] }
 0x676   :  { %5053 = vrot.lane.b32.xlu0 %v3543_v52, %s7118_s14  ;;  %5051 = vrot.lane.b32.xlu1 %v3542_v51, %s7118_s14  ;;  %v6234_v51 = vpack.c.bf16 %v4690_v45, %v4689_v2  ;;  %v6236_v38 = vpack.c.bf16 %v4708_v53, %v4707_v30  ;;  %v4691_v52 = vld [vmem:[#allocation3 + $0xf0] sm:$0xff]  ;;  %v6240_v18 = vpack.c.bf16 %v4710_v46, %v4709_v42  ;;  %v4714_v55 = vld [vmem:[#allocation3 + $0x1a8] sm:$0xff]  ;;  %v10703_v46 = vmov 0.0|0.0  }
 0x677   :  { %5877 = vmatprep.mubr.msk.f32.mxu1 %vm1540_vm1, %v4073_v50  ;;  %6213 = vmatprep.subr.bf16.mxu1 %v6212_v29  ;;  %v6238_v8 = vpack.c.bf16 %v4692_v33, %v4691_v52  ;;  %v6252_v30 = vpack.c.bf16 %v4716_v20, %v4715_v48  ;;  %v4717_v33 = vld [vmem:[#allocation3 + $0x1c0] sm:$0xff]  ;;  %v4718_v42 = vld [vmem:[#allocation3 + $0x1c8] sm:$0xff] }
 0x678   :  { %5878 = vmatmul.mubr.msk.f32.gmra.mrb[90].mxu1 %vm1540_vm1, %v4074_v59  ;;  %v4721_v20 = vld [vmem:[#allocation3 + $0x1e0] sm:$0xff] }
 0x679   :  { %6215 = vmatpush3.bf16.msra.mxu1 %v6214_v35  ;;  %v4712_v35 = vld [vmem:[#allocation3 + $0x198] sm:$0xff] }
 0x67a   :  { %5057 = vrot.lane.b32.xlu0 %v3545_v32, %s7118_s14  ;;  %5055 = vrot.lane.b32.xlu1 %v3544_v22, %s7118_s14  ;;  %v4645_v22 = vmax.f32 %v10113_v27, 0.0  ;;  %v4711_v32 = vld [vmem:[#allocation3 + $0x190] sm:$0xff]  ;;  %v4713_v27 = vld [vmem:[#allocation3 + $0x1a0] sm:$0xff] }
 0x67b   :  { %6217 = vmatprep.subr.bf16.mxu1 %v6216_v11  ;;  %v6244_v41 = vpack.c.bf16 %v4712_v35, %v4711_v32  ;;  %v6248_v9 = vpack.c.bf16 %v4714_v55, %v4713_v27  ;;  %v6256_v35 = vpack.c.bf16 %v4718_v42, %v4717_v33 }
 0x67d   :  { %6219 = vmatpush3.bf16.msra.mxu1 %v6218_v49 }
 0x67e   :  { %6221 = vmatprep.subr.bf16.mxu1 %v6220_v47 }
 0x681   :  { %6223 = vmatpush3.bf16.msra.mxu1 %v6222_v36  ;;  %v4646_v36 = vmax.f32 %v10110_v39, 0.0 }
 0x682   :  { %6225 = vmatprep.subr.bf16.mxu1 %v6224_v26 }
 0x685   :  { %6227 = vmatpush3.bf16.msra.mxu1 %v6226_v23  ;;  %v5067_v23 = vld [vmem:[#allocation3 + $0x5a0] sm:$0xff] }
 0x686   :  { %6229 = vmatprep.subr.bf16.mxu1 %v6228_v19  ;;  %v5068_v19 = vld [vmem:[#allocation3 + $0x5a8] sm:$0xff] }
 0x689   :  { %6231 = vmatpush3.bf16.msra.mxu1 %v6230_v56  ;;  %v6273_v56 = vpack.c.bf16 %v5068_v19, %v5067_v23  ;;  %v4722_v23 = vld [vmem:[#allocation3 + $0x1e8] sm:$0xff] }
 0x68a   :  { %6233 = vmatprep.subr.bf16.mxu1 %v6232_v24  ;;  %v5070_v24 = vld [vmem:[#allocation3 + $0x5b8] sm:$0xff] }
 0x68b   :  { %6274 = vmatpush1.bf16.msra.mxu0 %v6273_v56  ;;  %v6276_v53 = vpack.c.bf16 %v5070_v24, %v5069_v0  ;;  %v5076_v56 = vld [vmem:[#allocation3 + $0x5e8] sm:$0xff] }
 0x68c   :  { %6275 = vmatprep.subr.bf16.mxu0 %v10703_v46 }
 0x68d   :  { %6235 = vmatpush3.bf16.msra.mxu1 %v6234_v51 }
 0x68e   :  { %6237 = vmatprep.subr.bf16.mxu1 %v6236_v38 }
 0x68f   :  { %6277 = vmatpush1.bf16.msra.mxu0 %v6276_v53  ;;  %v4724_v53 = vld [vmem:[#allocation3 + $0x1f8] sm:$0xff] }
 0x690   :  { %6278 = vmatprep.subr.bf16.mxu0 %v10703_v46 }
 0x691   :  { %6239 = vmatpush3.bf16.msra.mxu1 %v6238_v8 }
 0x692   :  { %6241 = vmatprep.subr.bf16.mxu1 %v6240_v18 }
 0x6b8   :  { %v6866_v4 = vpop.permute.xlu1 %6865 }
 0x6b9   :  { %v6867_v15 = vunpack.i.l.bf16 %v6866_v4  ;;  %v6868_v26 = vunpack.i.h.bf16 %v6866_v4 }
 0x6c0   :  { %v6871_v29 = vpop.permute.xlu0 %6870 }
 0x6c1   :  { %v6872_v62 = vunpack.i.l.bf16 %v6871_v29  ;;  %v6873_v17 = vunpack.i.h.bf16 %v6871_v29 }
 0x6c3   :  { %v4847_v11 = vsel %vm4846_vm4, %v6867_v15, %v6872_v62  ;;  %v4848_v37 = vsel %vm4846_vm4, %v6868_v26, %v6873_v17  ;;  %v4647_v62 = vmax.f32 %v10122_v57, 0.0  ;;  %v4719_v57 = vld [vmem:[#allocation3 + $0x1d0] sm:$0xff] }
 0x6c4   :  { %v4730_v3 = vpop.permute.xlu0 %4729  ;;  %v5073_v17 = vld [vmem:[#allocation3 + $0x5d0] sm:$0xff] }
 0x6c5   :  { %v4838_v59 = vsel %vm4837_vm3, %v4645_v22, %v4730_v3  ;;  %v5071_v3 = vld [vmem:[#allocation3 + $0x5c0] sm:$0xff] }
 0x6c6   :  { %v4842_v49 = vsel %vm1545_vm2, %v4838_v59, %v6867_v15 }
 0x6c8   :  { %v6876_v40 = vpop.permute.xlu1 %6875  ;;  %v10256_v54 = vpop.permute.xlu0 %6880 }
 0x6c9   :  { %v6877_v50 = vunpack.i.l.bf16 %v6876_v40  ;;  %v6882_v6 = vunpack.i.l.bf16 %v10256_v54  ;;  %v6878_v34 = vunpack.i.h.bf16 %v6876_v40  ;;  %v6883_v51 = vunpack.i.h.bf16 %v10256_v54  ;;  %v5072_v40 = vld [vmem:[#allocation3 + $0x5c8] sm:$0xff] }
 0x6cb   :  { %v4851_v5 = vsel %vm1540_vm1, %v4847_v11, %v6877_v50  ;;  %v4839_v61 = vsel %vm4837_vm3, %v4646_v36, %v6882_v6  ;;  %v4852_v39 = vsel %vm1540_vm1, %v4848_v37, %v6878_v34  ;;  %v4840_v55 = vsel %vm4837_vm3, %v4647_v62, %v6883_v51  ;;  %v5074_v6 = vld [vmem:[#allocation3 + $0x5d8] sm:$0xff] }
 0x6cc   :  { %v10267_v47 = vpop.permute.xlu0 %6890  ;;  %v4843_v52 = vsel %vm1545_vm2, %v4839_v61, %v6868_v26  ;;  %v6282_v19 = vpack.c.bf16 %v5074_v6, %v5073_v17  ;;  %v5075_v61 = vld [vmem:[#allocation3 + $0x5e0] sm:$0xff]  ;;  %v5088_v6 = vld [vmem:[#allocation3 + $0x648] sm:$0xff] }
 0x6cd   :  { %v6893_v8 = vunpack.i.h.bf16 %v10267_v47  ;;  %v6285_v51 = vpack.c.bf16 %v5076_v56, %v5075_v61  ;;  %v5199_v56 = vld [vmem:[#allocation3 + $0x678] sm:$0xff] }
 0x6ce   :  { %v10261_v28 = vpop.permute.xlu1 %4793 }
 0x6cf   :  { %v4856_v58 = vsel %vm4855_vm5, %v4851_v5, %v10261_v28 }
 0x6d0   :  { %4937 = vmatprep.mubr.f32.mxu1 %v4856_v58  ;;  %v6901_v2 = vpop.permute.xlu0 %6900 }
 0x6d1   :  { %4938 = vmatmul.mubr.f32.vlgmr.msra.gmra.mrb[92].mxu1 %v4842_v49  ;;  %v6903_v50 = vunpack.i.h.bf16 %v6901_v2  ;;  %v6902_v54 = vunpack.i.l.bf16 %v6901_v2  ;;  %v6279_v49 = vpack.c.bf16 %v5072_v40, %v5071_v3 }
 0x6d2   :  { %6243 = vmatpush3.bf16.msra.mxu1 %v6240_v18  ;;  %v6892_v18 = vunpack.i.l.bf16 %v10267_v47  ;;  %v4648_v47 = vmax.f32 %v10118_v63, 0.0 }
 0x6d3   :  { %6245 = vmatprep.subr.bf16.mxu1 %v6244_v41  ;;  %6280 = vmatpush1.bf16.msra.mxu0 %v6279_v49 }
 0x6d4   :  { %v10271_v1 = vpop.permute.xlu1 %6885  ;;  %v10289_v59 = vpop.permute.xlu0 %4799  ;;  %v4844_v34 = vsel %vm1545_vm2, %v4840_v55, %v6892_v18  ;;  %6281 = vmatprep.subr.bf16.mxu0 %v10703_v46  ;;  %v5087_v55 = vld [vmem:[#allocation3 + $0x640] sm:$0xff] }
 0x6d5   :  { %v6887_v44 = vunpack.i.l.bf16 %v10271_v1  ;;  %v6888_v22 = vunpack.i.h.bf16 %v10271_v1  ;;  %v5080_v1 = vld [vmem:[#allocation3 + $0x608] sm:$0xff] }
 0x6d6   :  { %6247 = vmatpush3.bf16.msra.mxu1 %v6244_v41  ;;  %v4720_v41 = vld [vmem:[#allocation3 + $0x1d8] sm:$0xff] }
 0x6d7   :  { %v4857_v45 = vsel %vm4855_vm5, %v4852_v39, %v6887_v44  ;;  %6249 = vmatprep.subr.bf16.mxu1 %v6248_v9  ;;  %v6260_v63 = vpack.c.bf16 %v4720_v41, %v4719_v57  ;;  %v6264_v39 = vpack.c.bf16 %v4722_v23, %v4721_v20  ;;  %6283 = vmatpush1.bf16.msra.mxu0 %v6282_v19  ;;  %v5084_v41 = vld [vmem:[#allocation3 + $0x628] sm:$0xff]  ;;  %v5196_v19 = vld [vmem:[#allocation3 + $0x660] sm:$0xff] }
 0x6d8   :  { %v6896_v38 = vpop.permute.xlu1 %6895  ;;  %4942 = vmatprep.mubr.f32.mxu1 %v4857_v45  ;;  %6284 = vmatprep.subr.bf16.mxu0 %v10703_v46 }
 0x6d9   :  { %v6898_v29 = vunpack.i.h.bf16 %v6896_v38  ;;  %v6897_v4 = vunpack.i.l.bf16 %v6896_v38  ;;  %4943 = vmatmul.mubr.f32.gmra.mrb[94].mxu1 %v4843_v52 }
 0x6da   :  { %6251 = vmatpush3.bf16.msra.mxu1 %v6248_v9 }
 0x6db   :  { %6253 = vmatprep.subr.bf16.mxu1 %v6252_v30  ;;  %v4849_v15 = vsel %vm4846_vm4, %v6892_v18, %v6897_v4  ;;  %v4850_v32 = vsel %vm4846_vm4, %v6893_v8, %v6898_v29  ;;  %6286 = vmatpush1.bf16.msra.mxu0 %v6285_v51 }
 0x6dc   :  { %v4736_v11 = vpop.permute.xlu1 %4735  ;;  %v4853_v5 = vsel %vm1540_vm1, %v4849_v15, %v6902_v54  ;;  %v4854_v58 = vsel %vm1540_vm1, %v4850_v32, %v6903_v50  ;;  %6287 = vmatprep.subr.bf16.mxu0 %v10703_v46  ;;  %v5078_v32 = vld [vmem:[#allocation3 + $0x5f8] sm:$0xff] }
 0x6dd   :  { %v4858_v27 = vsel %vm4855_vm5, %v4853_v5, %v6888_v22  ;;  %v4841_v36 = vsel %vm4837_vm3, %v4648_v47, %v4736_v11  ;;  %v4859_v26 = vsel %vm4855_vm5, %v4854_v58, %v10289_v59  ;;  %v5081_v5 = vld [vmem:[#allocation3 + $0x610] sm:$0xff]  ;;  %v5082_v58 = vld [vmem:[#allocation3 + $0x618] sm:$0xff] }
 0x6de   :  { %6255 = vmatpush3.bf16.msra.mxu1 %v6252_v30  ;;  %4947 = vmatprep.mubr.f32.mxu1 %v4858_v27  ;;  %v4845_v24 = vsel %vm1545_vm2, %v4841_v36, %v6893_v8  ;;  %v4723_v30 = vld [vmem:[#allocation3 + $0x1f0] sm:$0xff]  ;;  %v6294_v57 = vpack.c.bf16 %v5082_v58, %v5081_v5  ;;  %v5086_v27 = vld [vmem:[#allocation3 + $0x638] sm:$0xff] }
 0x6df   :  { %4948 = vmatmul.mubr.f32.gmra.mrb[96].mxu1 %v4844_v34  ;;  %6257 = vmatprep.subr.bf16.mxu1 %v6256_v35  ;;  %v6268_v52 = vpack.c.bf16 %v4724_v53, %v4723_v30  ;;  %v5085_v47 = vld [vmem:[#allocation3 + $0x630] sm:$0xff]  ;;  %v6303_v34 = vpack.c.bf16 %v5088_v6, %v5087_v55 }
 0x6e0   :  { %v6906_v9 = vpop.permute.xlu1 %6905  ;;  %v6911_v48 = vpop.permute.xlu0 %6910  ;;  %4952 = vmatprep.mubr.f32.mxu1 %v4859_v26  ;;  %v6300_v17 = vpack.c.bf16 %v5086_v27, %v5085_v47  ;;  %v5089_v36 = vld [vmem:[#allocation3 + $0x650] sm:$0xff]  ;;  %v5090_v26 = vld [vmem:[#allocation3 + $0x658] sm:$0xff] }
 0x6e1   :  { %v6907_v0 = vunpack.i.l.bf16 %v6906_v9  ;;  %v6912_v37 = vunpack.i.l.bf16 %v6911_v48  ;;  %v6908_v33 = vunpack.i.h.bf16 %v6906_v9  ;;  %v6913_v8 = vunpack.i.h.bf16 %v6911_v48 }
 0x6e2   :  { %6259 = vmatpush3.bf16.msra.mxu1 %v6256_v35  ;;  %v5079_v35 = vld [vmem:[#allocation3 + $0x600] sm:$0xff] }
 0x6e3   :  { %4953 = vmatmul.mubr.f32.gmra.mrb[98].mxu1 %v4845_v24  ;;  %6261 = vmatprep.subr.bf16.mxu1 %v6260_v63  ;;  %v4860_v2 = vsel %vm1191_vm0, %v10261_v28, %v6907_v0  ;;  %v4861_v18 = vsel %vm1191_vm0, %v6887_v44, %v6908_v33  ;;  %v5077_v44 = vld [vmem:[#allocation3 + $0x5f0] sm:$0xff]  ;;  %v5197_v0 = vld [vmem:[#allocation3 + $0x668] sm:$0xff]  ;;  %v4077_v33 = vsub.s32 5, %v10697_v43 }
 0x6e4   :  { %v4865_v45 = vsel %vm4864_vm6, %v4860_v2, %v6912_v37  ;;  %v6916_v38 = vpop.permute.xlu1 %6915  ;;  %v6921_v28 = vpop.permute.xlu0 %6920  ;;  %v4866_v62 = vsel %vm4864_vm6, %v4861_v18, %v6913_v8  ;;  %v6288_v11 = vpack.c.bf16 %v5078_v32, %v5077_v44  ;;  %v5198_v37 = vld [vmem:[#allocation3 + $0x670] sm:$0xff]  ;;  %v6308_v61 = vpack.c.bf16 %v5197_v0, %v5196_v19  ;;  %v7064_v18 = vld [vmem:[%s10375_s2] sm:$0xff]  ;;  %v5201_v0 = vld [vmem:[#allocation3 + $0x688] sm:$0xff]  ;;  %s7125_s2 = smov [#allocation6]  }
 0x6e5   :  { %5992 = vmatprep.mubr.f32.mxu1 %v4865_v45  ;;  %v6917_v42 = vunpack.i.l.bf16 %v6916_v38  ;;  %v6918_v29 = vunpack.i.h.bf16 %v6916_v38  ;;  %v6922_v4 = vunpack.i.l.bf16 %v6921_v28  ;;  %v6923_v40 = vunpack.i.h.bf16 %v6921_v28  ;;  %s5314_s26 = sshll.u32 %s7125_s2, 4  ;;  %s5315_s26 = int_to_ptr.vmem [resolvable:$true] %s5314_s26 }
 0x6e6   :  { %6263 = vmatpush3.bf16.msra.mxu1 %v6260_v63  ;;  %6289 = vmatpush1.bf16.msra.mxu0 %v6288_v11  ;;  %v6306_v63 = vpack.c.bf16 %v5090_v26, %v5089_v36  ;;  %v6312_v24 = vpack.c.bf16 %v5199_v56, %v5198_v37  ;;  %v5203_v56 = vld [vmem:[#allocation3 + $0x698] sm:$0xff]  ;;  %s7087_s27 = scalar_lea.vmem %s5315_s26, 512  ;;  %p7092_p9 = scmp.lt.s32.totalorder %s5315_s26, %s5315_s26 }
 0x6e7   :  { %6265 = vmatprep.subr.bf16.mxu1 %v6264_v39  ;;  %v4862_v3 = vsel %vm1191_vm0, %v6888_v22, %v6917_v42  ;;  %v4863_v54 = vsel %vm1191_vm0, %v10289_v59, %v6918_v29  ;;  %v6291_v22 = vpack.c.bf16 %v5080_v1, %v5079_v35  ;;  %6290 = vmatprep.subr.bf16.mxu0 %v10703_v46  ;;  %v5083_v59 = vld [vmem:[#allocation3 + $0x620] sm:$0xff]  ;;  %p7088_p8 = scmp.ne.s32.totalorder %s5315_s26, %s7087_s27  ;;  %p7093_p10 = scmp.lt.s32.totalorder %s7087_s27, %s7087_s27 }
 0x6e8   :  { %v4867_v50 = vsel %vm4864_vm6, %v4862_v3, %v6922_v4  ;;  %v4868_v15 = vsel %vm4864_vm6, %v4863_v54, %v6923_v40  ;;  %v6297_v49 = vpack.c.bf16 %v5084_v41, %v5083_v59  ;;  %v4078_v29 = vrot.slane %v7064_v18, %v4077_v33 }
 0x6e9   :  { %v4871_v4 = vsub.s32 3, %v10697_v43  ;;  %p7094_p11 = por %p7093_p10, %p7092_p9 }
 0x6ea   :  { %6267 = vmatpush3.bf16.msra.mxu1 %v6264_v39  ;;  %6292 = vmatpush1.bf16.msra.mxu0 %v6291_v22 }
 0x6eb   :  { %6269 = vmatprep.subr.bf16.mxu1 %v6268_v52  ;;  %6293 = vmatprep.subr.bf16.mxu0 %v10703_v46  ;;  %v4872_v40 = vrot.slane %v7064_v18, %v4871_v4  ;;  %p7095_p12 = pnand %p7094_p11, %p7088_p8 }
 0x6ee   :  { %6271 = vmatpush3.bf16.msra.mxu1 %v6268_v52  ;;  %6295 = vmatpush1.bf16.msra.mxu0 %v6294_v57 }
 0x6ef   :  { %6296 = vmatprep.subr.bf16.mxu0 %v10703_v46  ;;  %6309 = vmatprep.subr.bf16.mxu1 %v6308_v61 }
 0x6f1   :  { %5993 = vmatmul.mubr.f32.vlgmr.msra.gmra.mrb[100].mxu1 %v4866_v62 }
 0x6f2   :  { %5995 = vmatprep.mubr.f32.mxu1 %v4867_v50  ;;  %6298 = vmatpush1.bf16.msra.mxu0 %v6297_v49  ;;  %v5052_v49 = vpop.permute.xlu1 %5051 }
 0x6f3   :  { %6299 = vmatprep.subr.bf16.mxu0 %v10703_v46  ;;  %6311 = vmatpush3.bf16.msra.mxu1 %v6308_v61  ;;  %v5202_v61 = vld [vmem:[#allocation3 + $0x690] sm:$0xff] }
 0x6f4   :  { %6313 = vmatprep.subr.bf16.mxu1 %v6312_v24 }
 0x6f5   :  { %5996 = vmatmul.mubr.f32.gmra.mrb[102].mxu1 %v4868_v15 }
 0x6f6   :  { %6301 = vmatpush1.bf16.msra.mxu0 %v6300_v17 }
 0x6f7   :  { %6302 = vmatprep.subr.bf16.mxu0 %v10703_v46  ;;  %6315 = vmatpush3.bf16.msra.mxu1 %v6312_v24  ;;  %v6320_v24 = vpack.c.bf16 %v5203_v56, %v5202_v61 }
 0x6fa   :  { %6304 = vmatpush1.bf16.msra.mxu0 %v6303_v34 }
 0x6fb   :  { %6305 = vmatprep.subr.bf16.mxu0 %v10703_v46 }
 0x6fe   :  { %6307 = vmatpush1.bf16.msra.mxu0 %v6306_v63 }
 0x747   :  { %v5876_v9 = vpop.f32.mrb[88].mxu1 }
 0x748   :  { %v4157_v48 = vpop.f32.mrb[89].mxu1  ;;  %v4163_v62 = vadd.f32 %v5876_v9, %v4078_v29  ;;  %v5056_v9 = vpop.permute.xlu1 %5055 }
 0x749   :  { %v4158_v3 = vadd.f32 %v4157_v48, %v4078_v29 }
 0x74a   :  { %v4177_v32 = vmax.f32 %v4163_v62, 0.0 }
 0x74b   :  { %v5879_v20 = vpop.f32.mrb[90].mxu1  ;;  %v4176_v50 = vmax.f32 %v4158_v3, 0.0  ;;  %v5207_v3 = vrot.slane %v10197_v7, %v4418_v21 }
 0x74c   :  { %v4167_v23 = vpop.f32.mrb[91].mxu1  ;;  %v4181_v47 = vadd.f32 %v4177_v32, %v4032_v14  ;;  %v4173_v27 = vadd.f32 %v5879_v20, %v4078_v29 }
 0x74d   :  { %v4180_v1 = vadd.f32 %v4176_v50, %v4031_v12  ;;  %v4168_v22 = vadd.f32 %v4167_v23, %v4078_v29  ;;  %v5054_v12 = vpop.permute.xlu0 %5053 }
 0x74e   :  { %v4179_v26 = vmax.f32 %v4173_v27, 0.0  ;;  %v5064_v14 = vsel %vm1540_vm1, %v4181_v47, %v5054_v12 }
 0x74f   :  { %v4178_v6 = vmax.f32 %v4168_v22, 0.0  ;;  %v5063_v25 = vsel %vm1540_vm1, %v4180_v1, %v5052_v49 }
 0x750   :  { %v4183_v48 = vadd.f32 %v4179_v26, %v4034_v60  ;;  %v5094_v60 = vrot.slane %v10197_v7, %v10704_v10 }
 0x751   :  { %v4182_v63 = vadd.f32 %v4178_v6, %v4033_v16  ;;  %v5058_v19 = vpop.permute.xlu0 %5057  ;;  %v5200_v16 = vld [vmem:[#allocation3 + $0x680] sm:$0xff] }
 0x752   :  { %v5066_v31 = vsel %vm1540_vm1, %v4183_v48, %v5058_v19  ;;  %v6316_v37 = vpack.c.bf16 %v5201_v0, %v5200_v16 }
 0x753   :  { %v5065_v23 = vsel %vm1540_vm1, %v4182_v63, %v5056_v9 }
 0x754   :  { %6317 = vmatprep.subr.bf16.mxu1 %v6316_v37 }
 0x755   :  { %6319 = vmatpush3.bf16.msra.mxu1 %v6316_v37 }
 0x756   :  { %6321 = vmatprep.subr.bf16.mxu1 %v6320_v24 }
 0x759   :  { %6323 = vmatpush3.bf16.msra.mxu1 %v6320_v24 }
 0x7a4   :  { %v5702_v2 = vpop.f32.mrb[92].mxu1 }
 0x7a5   :  { %v5703_v46 = vpop.f32.mrb[93].mxu1 }
 0x7a6   :  { %v5704_v39 = vadd.f32 %v5703_v46, %v5702_v2 }
 0x7a8   :  { %v4940_v44 = vadd.f32 %v5704_v39, %v4872_v40 }
 0x7ac   :  { %v5705_v45 = vpop.f32.mrb[94].mxu1 }
 0x7ad   :  { %v5706_v30 = vpop.f32.mrb[95].mxu1 }
 0x7ae   :  { %v5707_v53 = vadd.f32 %v5706_v30, %v5705_v45 }
 0x7b0   :  { %v4945_v54 = vadd.f32 %v5707_v53, %v4872_v40 }
 0x7b2   :  { %v5708_v51 = vpop.f32.mrb[96].mxu1 }
 0x7b3   :  { %v5709_v38 = vpop.f32.mrb[97].mxu1 }
 0x7b4   :  { %v5710_v52 = vadd.f32 %v5709_v38, %v5708_v51 }
 0x7b6   :  { %v5711_v42 = vpop.f32.mrb[98].mxu1  ;;  %v4950_v41 = vadd.f32 %v5710_v52, %v4872_v40 }
 0x7b7   :  { %v5712_v28 = vpop.f32.mrb[99].mxu1 }
 0x7b8   :  { %v5713_v8 = vadd.f32 %v5712_v28, %v5711_v42 }
 0x7ba   :  { %v4955_v58 = vadd.f32 %v5713_v8, %v4872_v40 }
 0x7c4   :  { %v5994_v15 = vpop.f32.mrb[100].mxu1 }
 0x7c5   :  { %v5030_v35 = vadd.f32 %v5994_v15, %v4945_v54  ;;  %v5024_v11 = vpop.f32.mrb[101].mxu1 }
 0x7c6   :  { %v5025_v5 = vadd.f32 %v5024_v11, %v4940_v44 }
 0x7c7   :  { %v5044_v34 = vmax.f32 %v5030_v35, 0.0 }
 0x7c8   :  { %v5043_v57 = vmax.f32 %v5025_v5, 0.0  ;;  %v5997_v59 = vpop.f32.mrb[102].mxu1 }
 0x7c9   :  { %v5040_v55 = vadd.f32 %v5997_v59, %v4955_v58  ;;  %v5034_v17 = vpop.f32.mrb[103].mxu1 }
 0x7ca   :  { %v5035_v36 = vadd.f32 %v5034_v17, %v4950_v41  ;;  %5410 = vmatprep.mubr.msk.f32.mxu0 %vm1540_vm1, %v5043_v57 }
 0x7cb   :  { %5172 = vmatmul.mubr.f32.vlgmr.msra.gmra.mrb[128].mxu0 %v5063_v25  ;;  %v5046_v20 = vmax.f32 %v5040_v55, 0.0 }
 0x7cc   :  { %5411 = vmatprep.mubr.msk.f32.mxu0 %vm1540_vm1, %v5044_v34  ;;  %v5045_v13 = vmax.f32 %v5035_v36, 0.0 }
 0x7cf   :  { %5177 = vmatmul.mubr.f32.gmra.mrb[130].mxu0 %v5064_v14 }
 0x7d0   :  { %5412 = vmatprep.mubr.msk.f32.mxu0 %vm1540_vm1, %v5045_v13 }
 0x7d3   :  { %5182 = vmatmul.mubr.f32.gmra.mrb[132].mxu0 %v5065_v23 }
 0x7d4   :  { %5413 = vmatprep.mubr.msk.f32.mxu0 %vm1540_vm1, %v5046_v20 }
 0x7d7   :  { %5187 = vmatmul.mubr.f32.gmra.mrb[134].mxu0 %v5066_v31 }
 0x89e   :  { %v5173_v2 = vpop.f32.mrb[128].mxu0 }
 0x89f   :  { %v5174_v46 = vadd.f32 %v5173_v2, %v5094_v60  ;;  %v5175_v39 = vpop.f32.mrb[129].mxu0 }
 0x8a1   :  { %v5192_v45 = vmax.f32 %v5174_v46, 0.0 }
 0x8a2   :  { %v5178_v30 = vpop.f32.mrb[130].mxu0 }
 0x8a3   :  { %v5179_v53 = vadd.f32 %v5178_v30, %v5094_v60  ;;  %v5180_v51 = vpop.f32.mrb[131].mxu0  ;;  %6014 = vmatprep.mubr.msk.f32.mxu1 %vm1540_vm1, %v5192_v45 }
 0x8a5   :  { %v5193_v38 = vmax.f32 %v5179_v53, 0.0 }
 0x8a6   :  { %v5183_v52 = vpop.f32.mrb[132].mxu0 }
 0x8a7   :  { %v5184_v33 = vadd.f32 %v5183_v52, %v5094_v60  ;;  %v5185_v42 = vpop.f32.mrb[133].mxu0  ;;  %6015 = vmatmul.mubr.msk.f32.vlgmr.msra.gmra.mrb[104].mxu1 %vm1540_vm1, %v5193_v38 }
 0x8a9   :  { %v5194_v28 = vmax.f32 %v5184_v33, 0.0 }
 0x8aa   :  { %v5188_v8 = vpop.f32.mrb[134].mxu0 }
 0x8ab   :  { %v5189_v18 = vadd.f32 %v5188_v8, %v5094_v60  ;;  %v5190_v29 = vpop.f32.mrb[135].mxu0  ;;  %6017 = vmatprep.mubr.msk.f32.mxu1 %vm1540_vm1, %v5194_v28 }
 0x8ad   :  { %v5195_v4 = vmax.f32 %v5189_v18, 0.0 }
 0x8af   :  { %6018 = vmatmul.mubr.msk.f32.gmra.mrb[106].mxu1 %vm1540_vm1, %v5195_v4 }
 0x97a   :  { %v6016_v40 = vpop.f32.mrb[104].mxu1 }
 0x97b   :  { %v5292_v62 = vadd.f32 %v6016_v40, %v5207_v3  ;;  %v5286_v50 = vpop.f32.mrb[105].mxu1 }
 0x97c   :  { %v5287_v54 = vadd.f32 %v5286_v50, %v5207_v3 }
 0x97d   :  { %5306 = vst [vmem:[#allocation6 + $0x8] sm:$0xff] %v5292_v62 }
 0x97e   :  { %5305 = vst [vmem:[#allocation6] sm:$0xff] %v5287_v54 }
 0x982   :  { %v6019_v15 = vpop.f32.mrb[106].mxu1 }
 0x983   :  { %v5302_v44 = vadd.f32 %v6019_v15, %v5207_v3  ;;  %v5296_v32 = vpop.f32.mrb[107].mxu1 }
 0x984   :  { %v5297_v35 = vadd.f32 %v5296_v32, %v5207_v3 }
 0x985   :  { %5308 = vst [vmem:[#allocation6 + $0x18] sm:$0xff] %v5302_v44 }
 0x986   :  { %5307 = vst [vmem:[#allocation6 + $0x10] sm:$0xff] %v5297_v35 }
 0x987   :  { %7098 = shalt.err (!%p7095_p12)
}
 0x988   :  { %s7099_s30 = scalar_lea.hbm %s10376_s3, 512 }
 0x989   :  { %p7100_p13 = scmp.ne.s32.totalorder %s10376_s3, %s7099_s30  ;;  %p7103_p0 = scmp.lt.u32.totalorder %s7099_s30, %s10376_s3 }
 0x98b   :  { %p7105_p1 = pnand %p7103_p0, %p7100_p13 }
 0x98d   :  { %7108 = shalt.err (!%p7105_p1)
}
 0x98e   :  { %5320 = dma.vmem_to_hbm [thread:$0]  %s5315_s26, 512, %s10376_s3, [#allocation5], %s7114_s22, %s7114_s22, %s7115_s23  }
 0x98f   :  { %7111 = dma.done.wait [#allocation5], 512  }
 0x990   :  { %7112 = vsyncadd [#allocation5], 4294966784 }
 0x991   :  { %5324 = vsyncpa [#allocation4], 1 }
 0x992   :  { %5325 = vsyncpa [#allocation5], 1 }

</bundles_post_ra>
